<compile_context>
chip_gen: v5e
topology: v5e:2x2
jax: 0.10.0
libtpu: 0.0.40
codegen_flags: <defaults>
</compile_context>

<pallas_src>
import jax
import jax.numpy as jnp
import numpy as np
from jax.experimental import pallas as pl
from jax.experimental.pallas import tpu as pltpu


def _round_up(x, m):
    return ((x + m - 1) // m) * m


# Chunks up to this length are fully unrolled at trace time; longer chunks use
# an unroll-by-2 fori_loop.
_UNROLL_MAX_TC = 8


def _lstm_decoder_kernel(
    tf_ref,     # SMEM  (Tp,)             int32 teacher-forcing mask (scalar prefetch)
    tgt_ref,    # VMEM  (Tc, Bc, D)       f32 target chunk (time-major, batch-padded)
    h0_ref,     # VMEM  (Bc, Hp)          f32 initial hidden state
    c0_ref,     # VMEM  (Bc, Hp)          f32 initial cell state
    w_ref,      # VMEM  (Dxp+Hp, 4*Hp)    fused [W_ih^T ; W_hh^T]   (weights dtype)
    b_ref,      # VMEM  (1, 4*Hp)         b_ih + b_hh (f32)
    wout_ref,   # VMEM  (Hp, Op)          W_out^T                   (weights dtype)
    bout_ref,   # VMEM  (1, Op)           b_out (f32)
    out_ref,    # VMEM  (Tc, Bc, Op)      f32 decoder outputs for this chunk
    xh_ref,     # VMEM scratch (Bc, Dxp+Hp) weights-dtype fused [x ; h], carried over time
    c_ref,      # VMEM scratch (Bc, Hp)   f32 cell state, carried over time
):
    Tc, Bc, D = tgt_ref.shape
    Hp = c_ref.shape[-1]
    Dxp = xh_ref.shape[-1] - Hp
    wdtype = xh_ref.dtype
    t_chunk = pl.program_id(1)

    # Start of a time sweep for this batch chunk: (re)initialize carried state.
    @pl.when(t_chunk == 0)
    def _init():
        c_ref[...] = c0_ref[...]
        xh_ref[...] = jnp.zeros_like(xh_ref)
        xh_ref[:, 0:D] = tgt_ref[0].astype(wdtype)       # x_0 = tgt[0]
        xh_ref[:, Dxp:] = h0_ref[...].astype(wdtype)     # h_0

    # Loop-invariant bias broadcasts hoisted out of the serial time loop
    # (JAX does not CSE broadcast_in_dim; inside the loop it would re-emit T times).
    b_b = jnp.broadcast_to(b_ref[...], (Bc, b_ref.shape[-1]))
    bout_b = jnp.broadcast_to(bout_ref[...], (Bc, bout_ref.shape[-1]))

    def _sigmoid(x):
        # sigmoid(x) = 0.5*tanh(0.5*x) + 0.5 : one EUP push instead of exp + recip.
        return 0.5 * jnp.tanh(0.5 * x) + 0.5

    def step(t, carry):
        # One fused gate matmul per step: [x_t, h_t] @ [W_ih^T ; W_hh^T] (f32 acc).
        gates = jnp.dot(xh_ref[...], w_ref[...],
                        preferred_element_type=jnp.float32) + b_b
        # PyTorch nn.LSTM gate order (i, f, g, o); Hp-aligned (lane-dense) slices.
        i_g = _sigmoid(gates[:, 0 * Hp:1 * Hp])
        f_g = _sigmoid(gates[:, 1 * Hp:2 * Hp])
        g_g = jnp.tanh(gates[:, 2 * Hp:3 * Hp])
        o_g = _sigmoid(gates[:, 3 * Hp:4 * Hp])
        c_new = f_g * c_ref[...] + i_g * g_g
        h_new = o_g * jnp.tanh(c_new)
        c_ref[...] = c_new
        h_w = h_new.astype(wdtype)            # cast once, reused for both dots
        # DecoderStep.out: Linear(hidden_dim -> output_dim); lane-dense store.
        y = jnp.dot(h_w, wout_ref[...], preferred_element_type=jnp.float32) + bout_b
        out_ref[t] = y
        # Next decoder input: teacher force -> current gold frame tgt[t]
        # (as in the reference loop), otherwise the prediction y.
        teacher = tf_ref[t_chunk * Tc + t] > 0
        x_next = jnp.where(teacher, tgt_ref[t], y[:, 0:D])
        xh_ref[:, 0:D] = x_next.astype(wdtype)
        xh_ref[:, Dxp:] = h_w
        return carry

    if Tc <= _UNROLL_MAX_TC:
        # Short chunks: full trace-time unroll (straight-line code, best LLO
        # scheduling, no loop-carried control overhead).
        for t in range(Tc):
            step(t, 0)
    else:
        # Longer chunks: unroll-by-2 loop so one step's out-store / tgt-load /
        # xh packing can co-issue with the next step's MXU work, while keeping
        # vreg pressure bounded.
        def step2(k, carry):
            carry = step(2 * k, carry)
            return step(2 * k + 1, carry)
        jax.lax.fori_loop(0, Tc // 2, step2, 0)
        if Tc % 2:
            step(Tc - 1, 0)


def _pack_params(params, D, Dout, H, Dxp, Hp, Op, weights_dtype):
    """Pad to lane-dense sizes and fuse [W_ih^T ; W_hh^T] into one matmul weight."""
    w_ih_t = params["w_ih"].T.astype(jnp.float32)   # (D, 4H)
    w_hh_t = params["w_hh"].T.astype(jnp.float32)   # (H, 4H)
    bias = (params["b_ih"] + params["b_hh"]).astype(jnp.float32)  # (4H,)

    w_fused = jnp.zeros((Dxp + Hp, 4 * Hp), jnp.float32)
    b_fused = jnp.zeros((1, 4 * Hp), jnp.float32)
    for g in range(4):  # gate order (i, f, g, o); each gate padded to Hp lanes
        w_fused = w_fused.at[:D, g * Hp:g * Hp + H].set(w_ih_t[:, g * H:(g + 1) * H])
        w_fused = w_fused.at[Dxp:Dxp + H, g * Hp:g * Hp + H].set(w_hh_t[:, g * H:(g + 1) * H])
        b_fused = b_fused.at[0, g * Hp:g * Hp + H].set(bias[g * H:(g + 1) * H])

    wout = jnp.zeros((Hp, Op), jnp.float32).at[:H, :Dout].set(
        params["w_out"].T.astype(jnp.float32))
    bout = jnp.zeros((1, Op), jnp.float32).at[0, :Dout].set(
        params["b_out"].astype(jnp.float32))
    # bf16 weights halve weight VMEM/DMA bytes and hit the native MXU rate; the
    # dots request f32 accumulation, and the cell state / gates / y stay f32.
    return (w_fused.astype(weights_dtype), b_fused,
            wout.astype(weights_dtype), bout)


def lstm_decoder_forward(tgt_btd, params, teacher_force_mask, hidden=None,
                         cell=None, weights_dtype=jnp.bfloat16,
                         time_chunk=32, batch_chunk=None):
    """tgt_btd: (B, T, D) float32.  Returns (B, T, Dout) float32."""
    B, T, D = tgt_btd.shape
    H = params["w_hh"].shape[1]
    Dout = params["w_out"].shape[0]
    # The reference module feeds the Linear output back as the LSTM input, so:
    assert Dout == D, "LSTMDecoder forward requires output_dim == input_dim"
    assert teacher_force_mask.shape[0] >= T

    Hp = _round_up(H, 128)      # hidden dim, lane-padded (VMEM-only)
    Dxp = _round_up(D, 128)     # x-section of fused gate matmul (VMEM-only)
    Op = _round_up(Dout, 128)   # lane-dense output stores

    # Batch: pad to a sublane multiple; for larger batches split into chunks on
    # a leading "parallel" grid axis so v7x's two TensorCores decode disjoint
    # batch rows concurrently (no effect on v5e/v6e, which have one TC).
    Bp = _round_up(max(B, 8), 8)
    if batch_chunk is None:
        batch_chunk = Bp if Bp < 16 else _round_up((Bp + 1) // 2, 8)
    Bc = max(8, min(_round_up(batch_chunk, 8), Bp))
    Bp = _round_up(Bp, Bc)
    NB = Bp // Bc

    # Time: chunked grid -> VMEM stays O(Tc) and tgt prefetch / out writeback
    # overlap the recurrence; x/h/c are carried across chunks in VMEM scratch.
    Tc = int(max(1, min(time_chunk, T)))
    Tp = _round_up(T, Tc)
    NT = Tp // Tc

    # tgt stays at its natural lane width D in HBM (no 128-lane padding): only
    # batch (sublane) and time (chunk multiple) padding, so HBM traffic ~= data.
    tgt_p = jnp.zeros((Tp, Bp, D), jnp.float32)
    tgt_p = tgt_p.at[:T, :B, :].set(
        jnp.transpose(tgt_btd.astype(jnp.float32), (1, 0, 2)))

    h0 = jnp.zeros((Bp, Hp), jnp.float32)
    c0 = jnp.zeros((Bp, Hp), jnp.float32)
    if hidden is not None:
        h0 = h0.at[:B, :H].set(hidden.astype(jnp.float32))
    if cell is not None:
        c0 = c0.at[:B, :H].set(cell.astype(jnp.float32))

    w_fused, b_fused, wout, bout = _pack_params(params, D, Dout, H, Dxp, Hp, Op,
                                                weights_dtype)
    tf_p = jnp.zeros((Tp,), jnp.int32).at[:T].set(
        teacher_force_mask.astype(jnp.int32)[:T])

    # VMEM budget from the actual chunk working set (tgt/out double-buffered,
    # weights single-buffered, plus carried scratch), with headroom, capped at
    # the physical capacity of this TPU generation (128 MiB v5e/v6e, 64 MiB v7x).
    wbytes = np.dtype(weights_dtype).itemsize
    per_step = (2 * Tc * Bc * D * 4              # tgt chunk (double buffered)
                + 2 * Tc * Bc * Op * 4           # out chunk (double buffered)
                + (Dxp + Hp) * 4 * Hp * wbytes   # fused gate weights
                + Hp * Op * wbytes               # output weights
                + (4 * Hp + Op) * 4              # biases
                + 2 * Bc * Hp * 4                # h0 / c0 blocks
                + Bc * (Dxp + Hp) * wbytes       # xh scratch
                + Bc * Hp * 4)                   # cell-state scratch
    try:
        cap = int(getattr(pltpu.get_tpu_info(), "vmem_capacity_bytes", 64 << 20))
    except Exception:
        cap = 64 << 20
    vmem_limit = int(min(cap - (8 << 20),
                         max(2 * per_step + (4 << 20), 16 << 20)))

    operands = (tf_p, tgt_p, h0, c0, w_fused, b_fused, wout, bout)

    def _spec(shape, imap, mode):
        if mode is None:
            return pl.BlockSpec(shape, imap)
        return pl.BlockSpec(shape, imap, pipeline_mode=mode)

    def _call(single_buffer_invariants):
        # Grid-invariant operands (weights/biases) and the per-batch-chunk
        # initial state gain nothing from double buffering; single-buffer them.
        mode = pl.Buffered(1) if single_buffer_invariants else None
        grid_spec = pltpu.PrefetchScalarGridSpec(
            num_scalar_prefetch=1,
            grid=(NB, NT),
            in_specs=[
                pl.BlockSpec((Tc, Bc, D), lambda b, t, tf: (t, b, 0)),     # tgt chunk
                _spec((Bc, Hp), lambda b, t, tf: (b, 0), mode),            # h0
                _spec((Bc, Hp), lambda b, t, tf: (b, 0), mode),            # c0
                _spec((Dxp + Hp, 4 * Hp), lambda b, t, tf: (0, 0), mode),  # [W_ih^T;W_hh^T]
                _spec((1, 4 * Hp), lambda b, t, tf: (0, 0), mode),         # b_ih + b_hh
                _spec((Hp, Op), lambda b, t, tf: (0, 0), mode),            # W_out^T
                _spec((1, Op), lambda b, t, tf: (0, 0), mode),             # b_out
            ],
            out_specs=pl.BlockSpec((Tc, Bc, Op), lambda b, t, tf: (t, b, 0)),
            scratch_shapes=[
                pltpu.VMEM((Bc, Dxp + Hp), weights_dtype),   # fused [x ; h] carry
                pltpu.VMEM((Bc, Hp), jnp.float32),           # cell-state carry
            ],
        )
        return pl.pallas_call(
            _lstm_decoder_kernel,
            out_shape=jax.ShapeDtypeStruct((Tp, Bp, Op), jnp.float32),
            grid_spec=grid_spec,
            compiler_params=pltpu.CompilerParams(
                dimension_semantics=("parallel", "arbitrary"),
                vmem_limit_bytes=vmem_limit),
        )(*operands)

    try:
        out_tbd = _call(True)
    except Exception:
        # pl.Buffered(1) is a pure VMEM-footprint optimization; fall back to the
        # default (double-buffered) specs if this JAX/Mosaic build rejects it.
        out_tbd = _call(False)

    # TODO(synk): consumers that accept time-major, lane-padded output could use
    # out_tbd directly and skip this slice + transpose pass over HBM.
    return jnp.transpose(out_tbd[:T, :B, :Dout], (1, 0, 2))  # (B, T, Dout)


def init_params(key, input_dim, output_dim, hidden_dim):
    """Deterministic parameter init mirroring PyTorch nn.LSTM / nn.Linear shapes."""
    D, Dout, H = input_dim, output_dim, hidden_dim
    ks = jax.random.split(key, 6)
    bound = 1.0 / np.sqrt(H)
    return {
        "w_ih": jax.random.uniform(ks[0], (4 * H, D), jnp.float32, -bound, bound),
        "w_hh": jax.random.uniform(ks[1], (4 * H, H), jnp.float32, -bound, bound),
        "b_ih": jax.random.uniform(ks[2], (4 * H,), jnp.float32, -bound, bound),
        "b_hh": jax.random.uniform(ks[3], (4 * H,), jnp.float32, -bound, bound),
        "w_out": jax.random.uniform(ks[4], (Dout, H), jnp.float32, -bound, bound),
        "b_out": jax.random.uniform(ks[5], (Dout,), jnp.float32, -bound, bound),
    }
    # TODO(synk): conv1/conv2/dropout layers exist in __init__ but are unused in
    # forward (conv path is commented out), so no parameters are created here.


def reference_forward(tgt_btd, params, tf_mask, hidden=None, cell=None,
                      weights_dtype=jnp.float32):
    """Pure-JAX reference of the same forward.  `weights_dtype=jnp.bfloat16`
    mirrors the kernel's bf16-weights / f32-accumulation MXU path."""
    tgt = jnp.transpose(tgt_btd.astype(jnp.float32), (1, 0, 2))
    T, B, D = tgt.shape
    H = params["w_hh"].shape[1]
    w_ih_t = params["w_ih"].T.astype(weights_dtype)
    w_hh_t = params["w_hh"].T.astype(weights_dtype)
    b = (params["b_ih"] + params["b_hh"])[None, :].astype(jnp.float32)
    w_out_t = params["w_out"].T.astype(weights_dtype)
    b_out = params["b_out"][None, :].astype(jnp.float32)

    h = jnp.zeros((B, H), jnp.float32) if hidden is None else hidden.astype(jnp.float32)
    c = jnp.zeros((B, H), jnp.float32) if cell is None else cell.astype(jnp.float32)
    x = tgt[0]
    outs = []
    for t in range(T):
        gates = (jnp.dot(x.astype(weights_dtype), w_ih_t, preferred_element_type=jnp.float32)
                 + jnp.dot(h.astype(weights_dtype), w_hh_t, preferred_element_type=jnp.float32)
                 + b)
        i = jax.nn.sigmoid(gates[:, :H])
        f = jax.nn.sigmoid(gates[:, H:2 * H])
        g = jnp.tanh(gates[:, 2 * H:3 * H])
        o = jax.nn.sigmoid(gates[:, 3 * H:])
        c = f * c + i * g
        h = o * jnp.tanh(c)
        y = jnp.dot(h.astype(weights_dtype), w_out_t,
                    preferred_element_type=jnp.float32) + b_out
        outs.append(y)
        x = jnp.where(tf_mask[t] > 0, tgt[t], y)
    return jnp.transpose(jnp.stack(outs, 0), (1, 0, 2))


if __name__ == "__main__":
    key = jax.random.PRNGKey(0)
    k_tgt, k_par, k_tf = jax.random.split(key, 3)

    B, T, D, H = 2, 8, 16, 32          # batch, seq_len, input_dim=output_dim, hidden_dim
    tgt = jax.random.normal(k_tgt, (B, T, D), jnp.float32)
    params = init_params(k_par, input_dim=D, output_dim=D, hidden_dim=H)

    # The PyTorch module draws teacher-forcing decisions with python random();
    # here we precompute a deterministic per-step mask (p = teacher_forcing_ratio).
    teacher_forcing_ratio = 0.5
    tf_mask = jax.random.bernoulli(k_tf, teacher_forcing_ratio, (T,)).astype(jnp.int32)

    # (a) bf16-weight fast path, chunked time grid (NT=2) -> exercises the
    #     VMEM-carried xh / c state across grid steps.
    out = jax.block_until_ready(
        lstm_decoder_forward(tgt, params, tf_mask, time_chunk=4))
    ref_bf16 = reference_forward(tgt, params, tf_mask, weights_dtype=jnp.bfloat16)
    np.testing.assert_allclose(np.asarray(out), np.asarray(ref_bf16),
                               rtol=2e-3, atol=2e-3)
    assert out.shape == (B, T, D)

    # (b) exact-semantics path: f32 weights, single time chunk.
    out_f32 = jax.block_until_ready(
        lstm_decoder_forward(tgt, params, tf_mask,
                             weights_dtype=jnp.float32, time_chunk=32))
    ref_f32 = reference_forward(tgt, params, tf_mask, weights_dtype=jnp.float32)
    np.testing.assert_allclose(np.asarray(out_f32), np.asarray(ref_f32),
                               rtol=2e-3, atol=2e-3)

    # (c) longer sequence, T not divisible by the chunk -> exercises the
    #     unroll-by-2 fori_loop path and the time-padding logic.
    T2 = 22
    tgt2 = jax.random.normal(jax.random.PRNGKey(1), (B, T2, D), jnp.float32)
    tf2 = jax.random.bernoulli(jax.random.PRNGKey(2), 0.5, (T2,)).astype(jnp.int32)
    out2 = jax.block_until_ready(
        lstm_decoder_forward(tgt2, params, tf2,
                             weights_dtype=jnp.float32, time_chunk=12))
    ref2 = reference_forward(tgt2, params, tf2, weights_dtype=jnp.float32)
    np.testing.assert_allclose(np.asarray(out2), np.asarray(ref2),
                               rtol=2e-3, atol=2e-3)
    assert out2.shape == (B, T2, D)

    # (d) larger batch -> exercises the leading "parallel" batch-chunk axis
    #     (NB=2) with padded batch rows.
    B2 = 10
    tgt3 = jax.random.normal(jax.random.PRNGKey(3), (B2, T, D), jnp.float32)
    out3 = jax.block_until_ready(
        lstm_decoder_forward(tgt3, params, tf_mask, time_chunk=4))
    ref3 = reference_forward(tgt3, params, tf_mask, weights_dtype=jnp.bfloat16)
    np.testing.assert_allclose(np.asarray(out3), np.asarray(ref3),
                               rtol=2e-3, atol=2e-3)
    assert out3.shape == (B2, T, D)

    print("KERNEL_OK")
</pallas_src>

<mosaic_0001>
module attributes {stable_mosaic.version = 11 : i64} {
  func.func @_lstm_decoder_kernel(%arg0: i32, %arg1: i32, %arg2: memref<8xi32, #tpu.memory_space<smem>>, %arg3: memref<4x8x16xf32, #tpu.memory_space<vmem>>, %arg4: memref<8x128xf32, #tpu.memory_space<vmem>>, %arg5: memref<8x128xf32, #tpu.memory_space<vmem>>, %arg6: memref<256x512xbf16, #tpu.memory_space<vmem>>, %arg7: memref<1x512xf32, #tpu.memory_space<vmem>>, %arg8: memref<128x128xbf16, #tpu.memory_space<vmem>>, %arg9: memref<1x128xf32, #tpu.memory_space<vmem>>, %arg10: memref<4x8x128xf32, #tpu.memory_space<vmem>>, %arg11: memref<8x256xbf16, #tpu.memory_space<vmem>>, %arg12: memref<8x128xf32, #tpu.memory_space<vmem>>) attributes {dimension_semantics = [#tpu.dimension_semantics<parallel>, #tpu.dimension_semantics<arbitrary>], iteration_bounds = array<i64: 1, 2>, scalar_prefetch = 1 : i64, scratch_operands = 2 : i64, tpu.core_type = #tpu.core_type<tc>, window_params = [{transform_indices = @transform_0, window_bounds = array<i64: 4, 8, 16>}, {pipeline_mode = #tpu.pipeline_mode<synchronous>, transform_indices = @transform_1, window_bounds = array<i64: 8, 128>}, {pipeline_mode = #tpu.pipeline_mode<synchronous>, transform_indices = @transform_2, window_bounds = array<i64: 8, 128>}, {pipeline_mode = #tpu.pipeline_mode<synchronous>, transform_indices = @transform_3, window_bounds = array<i64: 256, 512>}, {pipeline_mode = #tpu.pipeline_mode<synchronous>, transform_indices = @transform_4, window_bounds = array<i64: 1, 512>}, {pipeline_mode = #tpu.pipeline_mode<synchronous>, transform_indices = @transform_5, window_bounds = array<i64: 128, 128>}, {pipeline_mode = #tpu.pipeline_mode<synchronous>, transform_indices = @transform_6, window_bounds = array<i64: 1, 128>}, {transform_indices = @transform_7, window_bounds = array<i64: 4, 8, 128>}]} {
    %c0_i32 = arith.constant 0 : i32
    %0 = arith.cmpi eq, %arg1, %c0_i32 : i32
    %1 = arith.extui %0 : i1 to i32
    %c0_i32_0 = arith.constant 0 : i32
    %2 = arith.cmpi ne, %1, %c0_i32_0 : i32
    scf.if %2 {
      %c0_131 = arith.constant 0 : index
      %c0_132 = arith.constant 0 : index
      %233 = vector.load %arg5[%c0_131, %c0_132] : memref<8x128xf32, #tpu.memory_space<vmem>>, vector<8x128xf32>
      %c0_133 = arith.constant 0 : index
      %c0_134 = arith.constant 0 : index
      %234 = vector.load %arg12[%c0_133, %c0_134] : memref<8x128xf32, #tpu.memory_space<vmem>>, vector<8x128xf32>
      tpu.vector_store %arg12[%c0_133, %c0_134], %233 {strides = array<i32>} : memref<8x128xf32, #tpu.memory_space<vmem>>, vector<8x128xf32>,
      %cst_135 = arith.constant 0.000000e+00 : bf16
      %235 = vector.broadcast %cst_135 : bf16 to vector<8x256xbf16>
      %c0_136 = arith.constant 0 : index
      %c0_137 = arith.constant 0 : index
      %236 = vector.load %arg11[%c0_136, %c0_137] : memref<8x256xbf16, #tpu.memory_space<vmem>>, vector<8x256xbf16>
      tpu.vector_store %arg11[%c0_136, %c0_137], %235 {strides = array<i32>} : memref<8x256xbf16, #tpu.memory_space<vmem>>, vector<8x256xbf16>,
      %c0_138 = arith.constant 0 : index
      %c0_139 = arith.constant 0 : index
      %c0_140 = arith.constant 0 : index
      %237 = vector.load %arg3[%c0_138, %c0_139, %c0_140] : memref<4x8x16xf32, #tpu.memory_space<vmem>>, vector<1x8x16xf32>
      %238 = vector.shape_cast %237 : vector<1x8x16xf32> to vector<8x16xf32>
      %239 = arith.truncf %238 : vector<8x16xf32> to vector<8x16xbf16>
      %c0_141 = arith.constant 0 : index
      %c0_142 = arith.constant 0 : index
      %240 = vector.load %arg11[%c0_141, %c0_142] : memref<8x256xbf16, #tpu.memory_space<vmem>>, vector<8x16xbf16>
      tpu.vector_store %arg11[%c0_141, %c0_142], %239 {strides = array<i32>} : memref<8x256xbf16, #tpu.memory_space<vmem>>, vector<8x16xbf16>,
      %c0_143 = arith.constant 0 : index
      %c0_144 = arith.constant 0 : index
      %241 = vector.load %arg4[%c0_143, %c0_144] : memref<8x128xf32, #tpu.memory_space<vmem>>, vector<8x128xf32>
      %242 = arith.truncf %241 : vector<8x128xf32> to vector<8x128xbf16>
      %c0_145 = arith.constant 0 : index
      %c128_146 = arith.constant 128 : index
      %243 = vector.load %arg11[%c0_145, %c128_146] : memref<8x256xbf16, #tpu.memory_space<vmem>>, vector<8x128xbf16>
      tpu.vector_store %arg11[%c0_145, %c128_146], %242 {strides = array<i32>} : memref<8x256xbf16, #tpu.memory_space<vmem>>, vector<8x128xbf16>,
    } else {
    }
    %c0 = arith.constant 0 : index
    %c0_1 = arith.constant 0 : index
    %3 = vector.load %arg7[%c0, %c0_1] : memref<1x512xf32, #tpu.memory_space<vmem>>, vector<1x512xf32>
    %4 = vector.shape_cast %3 : vector<1x512xf32> to vector<1x512xf32>
    %5 = vector.broadcast %4 : vector<1x512xf32> to vector<8x512xf32>
    %c0_2 = arith.constant 0 : index
    %c0_3 = arith.constant 0 : index
    %6 = vector.load %arg9[%c0_2, %c0_3] : memref<1x128xf32, #tpu.memory_space<vmem>>, vector<1x128xf32>
    %7 = vector.shape_cast %6 : vector<1x128xf32> to vector<1x128xf32>
    %8 = vector.broadcast %7 : vector<1x128xf32> to vector<8x128xf32>
    %c0_4 = arith.constant 0 : index
    %c0_5 = arith.constant 0 : index
    %9 = vector.load %arg11[%c0_4, %c0_5] : memref<8x256xbf16, #tpu.memory_space<vmem>>, vector<8x256xbf16>
    %c0_6 = arith.constant 0 : index
    %c0_7 = arith.constant 0 : index
    %10 = vector.load %arg6[%c0_6, %c0_7] : memref<256x512xbf16, #tpu.memory_space<vmem>>, vector<256x512xbf16>
    %cst = arith.constant dense<0.000000e+00> : vector<8x512xf32>
    %11 = tpu.matmul %9, %10, %cst {dimension_numbers = #tpu.dot_dimension_numbers<[1], [0], [0], [1], [0, 0, 1, 1], [], []>} : vector<8x256xbf16>, vector<256x512xbf16>, vector<8x512xf32> -> vector<8x512xf32>
    %12 = arith.addf %11, %5 : vector<8x512xf32>
    %13 = vector.extract_strided_slice %12 {offsets = [0, 0], sizes = [8, 128], strides = [1, 1]} : vector<8x512xf32> to vector<8x128xf32>
    %cst_8 = arith.constant 5.000000e-01 : f32
    %14 = vector.broadcast %cst_8 : f32 to vector<8x128xf32>
    %15 = arith.mulf %14, %13 : vector<8x128xf32>
    %16 = math.tanh %15 : vector<8x128xf32>
    %cst_9 = arith.constant 5.000000e-01 : f32
    %17 = vector.broadcast %cst_9 : f32 to vector<8x128xf32>
    %18 = arith.mulf %17, %16 : vector<8x128xf32>
    %cst_10 = arith.constant 5.000000e-01 : f32
    %19 = vector.broadcast %cst_10 : f32 to vector<8x128xf32>
    %20 = arith.addf %18, %19 : vector<8x128xf32>
    %21 = vector.extract_strided_slice %12 {offsets = [0, 128], sizes = [8, 128], strides = [1, 1]} : vector<8x512xf32> to vector<8x128xf32>
    %cst_11 = arith.constant 5.000000e-01 : f32
    %22 = vector.broadcast %cst_11 : f32 to vector<8x128xf32>
    %23 = arith.mulf %22, %21 : vector<8x128xf32>
    %24 = math.tanh %23 : vector<8x128xf32>
    %cst_12 = arith.constant 5.000000e-01 : f32
    %25 = vector.broadcast %cst_12 : f32 to vector<8x128xf32>
    %26 = arith.mulf %25, %24 : vector<8x128xf32>
    %cst_13 = arith.constant 5.000000e-01 : f32
    %27 = vector.broadcast %cst_13 : f32 to vector<8x128xf32>
    %28 = arith.addf %26, %27 : vector<8x128xf32>
    %29 = vector.extract_strided_slice %12 {offsets = [0, 256], sizes = [8, 128], strides = [1, 1]} : vector<8x512xf32> to vector<8x128xf32>
    %30 = math.tanh %29 : vector<8x128xf32>
    %31 = vector.extract_strided_slice %12 {offsets = [0, 384], sizes = [8, 128], strides = [1, 1]} : vector<8x512xf32> to vector<8x128xf32>
    %cst_14 = arith.constant 5.000000e-01 : f32
    %32 = vector.broadcast %cst_14 : f32 to vector<8x128xf32>
    %33 = arith.mulf %32, %31 : vector<8x128xf32>
    %34 = math.tanh %33 : vector<8x128xf32>
    %cst_15 = arith.constant 5.000000e-01 : f32
    %35 = vector.broadcast %cst_15 : f32 to vector<8x128xf32>
    %36 = arith.mulf %35, %34 : vector<8x128xf32>
    %cst_16 = arith.constant 5.000000e-01 : f32
    %37 = vector.broadcast %cst_16 : f32 to vector<8x128xf32>
    %38 = arith.addf %36, %37 : vector<8x128xf32>
    %c0_17 = arith.constant 0 : index
    %c0_18 = arith.constant 0 : index
    %39 = vector.load %arg12[%c0_17, %c0_18] : memref<8x128xf32, #tpu.memory_space<vmem>>, vector<8x128xf32>
    %40 = arith.mulf %28, %39 : vector<8x128xf32>
    %41 = arith.mulf %20, %30 : vector<8x128xf32>
    %42 = arith.addf %40, %41 : vector<8x128xf32>
    %43 = math.tanh %42 : vector<8x128xf32>
    %44 = arith.mulf %38, %43 : vector<8x128xf32>
    %c0_19 = arith.constant 0 : index
    %c0_20 = arith.constant 0 : index
    %45 = vector.load %arg12[%c0_19, %c0_20] : memref<8x128xf32, #tpu.memory_space<vmem>>, vector<8x128xf32>
    tpu.vector_store %arg12[%c0_19, %c0_20], %42 {strides = array<i32>} : memref<8x128xf32, #tpu.memory_space<vmem>>, vector<8x128xf32>,
    %46 = arith.truncf %44 : vector<8x128xf32> to vector<8x128xbf16>
    %c0_21 = arith.constant 0 : index
    %c0_22 = arith.constant 0 : index
    %47 = vector.load %arg8[%c0_21, %c0_22] : memref<128x128xbf16, #tpu.memory_space<vmem>>, vector<128x128xbf16>
    %cst_23 = arith.constant dense<0.000000e+00> : vector<8x128xf32>
    %48 = tpu.matmul %46, %47, %cst_23 {dimension_numbers = #tpu.dot_dimension_numbers<[1], [0], [0], [1], [0, 0, 1, 1], [], []>} : vector<8x128xbf16>, vector<128x128xbf16>, vector<8x128xf32> -> vector<8x128xf32>
    %49 = arith.addf %48, %8 : vector<8x128xf32>
    %c0_24 = arith.constant 0 : index
    %c0_25 = arith.constant 0 : index
    %c0_26 = arith.constant 0 : index
    %50 = vector.load %arg10[%c0_24, %c0_25, %c0_26] : memref<4x8x128xf32, #tpu.memory_space<vmem>>, vector<1x8x128xf32>
    %51 = vector.shape_cast %50 : vector<1x8x128xf32> to vector<8x128xf32>
    %52 = vector.shape_cast %49 : vector<8x128xf32> to vector<1x8x128xf32>
    tpu.vector_store %arg10[%c0_24, %c0_25, %c0_26], %52 {strides = array<i32>} : memref<4x8x128xf32, #tpu.memory_space<vmem>>, vector<1x8x128xf32>,
    %c4_i32 = arith.constant 4 : i32
    %53 = arith.muli %arg1, %c4_i32 : i32
    %c0_i32_27 = arith.constant 0 : i32
    %54 = arith.addi %53, %c0_i32_27 : i32
    %55 = arith.index_cast %54 : i32 to index
    %56 = memref.load %arg2[%55] : memref<8xi32, #tpu.memory_space<smem>>
    %c0_i32_28 = arith.constant 0 : i32
    %57 = arith.cmpi sgt, %56, %c0_i32_28 : i32
    %c0_29 = arith.constant 0 : index
    %c0_30 = arith.constant 0 : index
    %c0_31 = arith.constant 0 : index
    %58 = vector.load %arg3[%c0_29, %c0_30, %c0_31] : memref<4x8x16xf32, #tpu.memory_space<vmem>>, vector<1x8x16xf32>
    %59 = vector.shape_cast %58 : vector<1x8x16xf32> to vector<8x16xf32>
    %60 = vector.extract_strided_slice %49 {offsets = [0, 0], sizes = [8, 16], strides = [1, 1]} : vector<8x128xf32> to vector<8x16xf32>
    %61 = arith.select %57, %59, %60 : vector<8x16xf32>
    %62 = arith.truncf %61 : vector<8x16xf32> to vector<8x16xbf16>
    %c0_32 = arith.constant 0 : index
    %c0_33 = arith.constant 0 : index
    %63 = vector.load %arg11[%c0_32, %c0_33] : memref<8x256xbf16, #tpu.memory_space<vmem>>, vector<8x16xbf16>
    tpu.vector_store %arg11[%c0_32, %c0_33], %62 {strides = array<i32>} : memref<8x256xbf16, #tpu.memory_space<vmem>>, vector<8x16xbf16>,
    %c0_34 = arith.constant 0 : index
    %c128 = arith.constant 128 : index
    %64 = vector.load %arg11[%c0_34, %c128] : memref<8x256xbf16, #tpu.memory_space<vmem>>, vector<8x128xbf16>
    tpu.vector_store %arg11[%c0_34, %c128], %46 {strides = array<i32>} : memref<8x256xbf16, #tpu.memory_space<vmem>>, vector<8x128xbf16>,
    %c0_35 = arith.constant 0 : index
    %c0_36 = arith.constant 0 : index
    %65 = vector.load %arg11[%c0_35, %c0_36] : memref<8x256xbf16, #tpu.memory_space<vmem>>, vector<8x256xbf16>
    %c0_37 = arith.constant 0 : index
    %c0_38 = arith.constant 0 : index
    %66 = vector.load %arg6[%c0_37, %c0_38] : memref<256x512xbf16, #tpu.memory_space<vmem>>, vector<256x512xbf16>
    %cst_39 = arith.constant dense<0.000000e+00> : vector<8x512xf32>
    %67 = tpu.matmul %65, %66, %cst_39 {dimension_numbers = #tpu.dot_dimension_numbers<[1], [0], [0], [1], [0, 0, 1, 1], [], []>} : vector<8x256xbf16>, vector<256x512xbf16>, vector<8x512xf32> -> vector<8x512xf32>
    %68 = arith.addf %67, %5 : vector<8x512xf32>
    %69 = vector.extract_strided_slice %68 {offsets = [0, 0], sizes = [8, 128], strides = [1, 1]} : vector<8x512xf32> to vector<8x128xf32>
    %cst_40 = arith.constant 5.000000e-01 : f32
    %70 = vector.broadcast %cst_40 : f32 to vector<8x128xf32>
    %71 = arith.mulf %70, %69 : vector<8x128xf32>
    %72 = math.tanh %71 : vector<8x128xf32>
    %cst_41 = arith.constant 5.000000e-01 : f32
    %73 = vector.broadcast %cst_41 : f32 to vector<8x128xf32>
    %74 = arith.mulf %73, %72 : vector<8x128xf32>
    %cst_42 = arith.constant 5.000000e-01 : f32
    %75 = vector.broadcast %cst_42 : f32 to vector<8x128xf32>
    %76 = arith.addf %74, %75 : vector<8x128xf32>
    %77 = vector.extract_strided_slice %68 {offsets = [0, 128], sizes = [8, 128], strides = [1, 1]} : vector<8x512xf32> to vector<8x128xf32>
    %cst_43 = arith.constant 5.000000e-01 : f32
    %78 = vector.broadcast %cst_43 : f32 to vector<8x128xf32>
    %79 = arith.mulf %78, %77 : vector<8x128xf32>
    %80 = math.tanh %79 : vector<8x128xf32>
    %cst_44 = arith.constant 5.000000e-01 : f32
    %81 = vector.broadcast %cst_44 : f32 to vector<8x128xf32>
    %82 = arith.mulf %81, %80 : vector<8x128xf32>
    %cst_45 = arith.constant 5.000000e-01 : f32
    %83 = vector.broadcast %cst_45 : f32 to vector<8x128xf32>
    %84 = arith.addf %82, %83 : vector<8x128xf32>
    %85 = vector.extract_strided_slice %68 {offsets = [0, 256], sizes = [8, 128], strides = [1, 1]} : vector<8x512xf32> to vector<8x128xf32>
    %86 = math.tanh %85 : vector<8x128xf32>
    %87 = vector.extract_strided_slice %68 {offsets = [0, 384], sizes = [8, 128], strides = [1, 1]} : vector<8x512xf32> to vector<8x128xf32>
    %cst_46 = arith.constant 5.000000e-01 : f32
    %88 = vector.broadcast %cst_46 : f32 to vector<8x128xf32>
    %89 = arith.mulf %88, %87 : vector<8x128xf32>
    %90 = math.tanh %89 : vector<8x128xf32>
    %cst_47 = arith.constant 5.000000e-01 : f32
    %91 = vector.broadcast %cst_47 : f32 to vector<8x128xf32>
    %92 = arith.mulf %91, %90 : vector<8x128xf32>
    %cst_48 = arith.constant 5.000000e-01 : f32
    %93 = vector.broadcast %cst_48 : f32 to vector<8x128xf32>
    %94 = arith.addf %92, %93 : vector<8x128xf32>
    %c0_49 = arith.constant 0 : index
    %c0_50 = arith.constant 0 : index
    %95 = vector.load %arg12[%c0_49, %c0_50] : memref<8x128xf32, #tpu.memory_space<vmem>>, vector<8x128xf32>
    %96 = arith.mulf %84, %95 : vector<8x128xf32>
    %97 = arith.mulf %76, %86 : vector<8x128xf32>
    %98 = arith.addf %96, %97 : vector<8x128xf32>
    %99 = math.tanh %98 : vector<8x128xf32>
    %100 = arith.mulf %94, %99 : vector<8x128xf32>
    %c0_51 = arith.constant 0 : index
    %c0_52 = arith.constant 0 : index
    %101 = vector.load %arg12[%c0_51, %c0_52] : memref<8x128xf32, #tpu.memory_space<vmem>>, vector<8x128xf32>
    tpu.vector_store %arg12[%c0_51, %c0_52], %98 {strides = array<i32>} : memref<8x128xf32, #tpu.memory_space<vmem>>, vector<8x128xf32>,
    %102 = arith.truncf %100 : vector<8x128xf32> to vector<8x128xbf16>
    %c0_53 = arith.constant 0 : index
    %c0_54 = arith.constant 0 : index
    %103 = vector.load %arg8[%c0_53, %c0_54] : memref<128x128xbf16, #tpu.memory_space<vmem>>, vector<128x128xbf16>
    %cst_55 = arith.constant dense<0.000000e+00> : vector<8x128xf32>
    %104 = tpu.matmul %102, %103, %cst_55 {dimension_numbers = #tpu.dot_dimension_numbers<[1], [0], [0], [1], [0, 0, 1, 1], [], []>} : vector<8x128xbf16>, vector<128x128xbf16>, vector<8x128xf32> -> vector<8x128xf32>
    %105 = arith.addf %104, %8 : vector<8x128xf32>
    %c1 = arith.constant 1 : index
    %c0_56 = arith.constant 0 : index
    %c0_57 = arith.constant 0 : index
    %106 = vector.load %arg10[%c1, %c0_56, %c0_57] : memref<4x8x128xf32, #tpu.memory_space<vmem>>, vector<1x8x128xf32>
    %107 = vector.shape_cast %106 : vector<1x8x128xf32> to vector<8x128xf32>
    %108 = vector.shape_cast %105 : vector<8x128xf32> to vector<1x8x128xf32>
    tpu.vector_store %arg10[%c1, %c0_56, %c0_57], %108 {strides = array<i32>} : memref<4x8x128xf32, #tpu.memory_space<vmem>>, vector<1x8x128xf32>,
    %c4_i32_58 = arith.constant 4 : i32
    %109 = arith.muli %arg1, %c4_i32_58 : i32
    %c1_i32 = arith.constant 1 : i32
    %110 = arith.addi %109, %c1_i32 : i32
    %111 = arith.index_cast %110 : i32 to index
    %112 = memref.load %arg2[%111] : memref<8xi32, #tpu.memory_space<smem>>
    %c0_i32_59 = arith.constant 0 : i32
    %113 = arith.cmpi sgt, %112, %c0_i32_59 : i32
    %c1_60 = arith.constant 1 : index
    %c0_61 = arith.constant 0 : index
    %c0_62 = arith.constant 0 : index
    %114 = vector.load %arg3[%c1_60, %c0_61, %c0_62] : memref<4x8x16xf32, #tpu.memory_space<vmem>>, vector<1x8x16xf32>
    %115 = vector.shape_cast %114 : vector<1x8x16xf32> to vector<8x16xf32>
    %116 = vector.extract_strided_slice %105 {offsets = [0, 0], sizes = [8, 16], strides = [1, 1]} : vector<8x128xf32> to vector<8x16xf32>
    %117 = arith.select %113, %115, %116 : vector<8x16xf32>
    %118 = arith.truncf %117 : vector<8x16xf32> to vector<8x16xbf16>
    %c0_63 = arith.constant 0 : index
    %c0_64 = arith.constant 0 : index
    %119 = vector.load %arg11[%c0_63, %c0_64] : memref<8x256xbf16, #tpu.memory_space<vmem>>, vector<8x16xbf16>
    tpu.vector_store %arg11[%c0_63, %c0_64], %118 {strides = array<i32>} : memref<8x256xbf16, #tpu.memory_space<vmem>>, vector<8x16xbf16>,
    %c0_65 = arith.constant 0 : index
    %c128_66 = arith.constant 128 : index
    %120 = vector.load %arg11[%c0_65, %c128_66] : memref<8x256xbf16, #tpu.memory_space<vmem>>, vector<8x128xbf16>
    tpu.vector_store %arg11[%c0_65, %c128_66], %102 {strides = array<i32>} : memref<8x256xbf16, #tpu.memory_space<vmem>>, vector<8x128xbf16>,
    %c0_67 = arith.constant 0 : index
    %c0_68 = arith.constant 0 : index
    %121 = vector.load %arg11[%c0_67, %c0_68] : memref<8x256xbf16, #tpu.memory_space<vmem>>, vector<8x256xbf16>
    %c0_69 = arith.constant 0 : index
    %c0_70 = arith.constant 0 : index
    %122 = vector.load %arg6[%c0_69, %c0_70] : memref<256x512xbf16, #tpu.memory_space<vmem>>, vector<256x512xbf16>
    %cst_71 = arith.constant dense<0.000000e+00> : vector<8x512xf32>
    %123 = tpu.matmul %121, %122, %cst_71 {dimension_numbers = #tpu.dot_dimension_numbers<[1], [0], [0], [1], [0, 0, 1, 1], [], []>} : vector<8x256xbf16>, vector<256x512xbf16>, vector<8x512xf32> -> vector<8x512xf32>
    %124 = arith.addf %123, %5 : vector<8x512xf32>
    %125 = vector.extract_strided_slice %124 {offsets = [0, 0], sizes = [8, 128], strides = [1, 1]} : vector<8x512xf32> to vector<8x128xf32>
    %cst_72 = arith.constant 5.000000e-01 : f32
    %126 = vector.broadcast %cst_72 : f32 to vector<8x128xf32>
    %127 = arith.mulf %126, %125 : vector<8x128xf32>
    %128 = math.tanh %127 : vector<8x128xf32>
    %cst_73 = arith.constant 5.000000e-01 : f32
    %129 = vector.broadcast %cst_73 : f32 to vector<8x128xf32>
    %130 = arith.mulf %129, %128 : vector<8x128xf32>
    %cst_74 = arith.constant 5.000000e-01 : f32
    %131 = vector.broadcast %cst_74 : f32 to vector<8x128xf32>
    %132 = arith.addf %130, %131 : vector<8x128xf32>
    %133 = vector.extract_strided_slice %124 {offsets = [0, 128], sizes = [8, 128], strides = [1, 1]} : vector<8x512xf32> to vector<8x128xf32>
    %cst_75 = arith.constant 5.000000e-01 : f32
    %134 = vector.broadcast %cst_75 : f32 to vector<8x128xf32>
    %135 = arith.mulf %134, %133 : vector<8x128xf32>
    %136 = math.tanh %135 : vector<8x128xf32>
    %cst_76 = arith.constant 5.000000e-01 : f32
    %137 = vector.broadcast %cst_76 : f32 to vector<8x128xf32>
    %138 = arith.mulf %137, %136 : vector<8x128xf32>
    %cst_77 = arith.constant 5.000000e-01 : f32
    %139 = vector.broadcast %cst_77 : f32 to vector<8x128xf32>
    %140 = arith.addf %138, %139 : vector<8x128xf32>
    %141 = vector.extract_strided_slice %124 {offsets = [0, 256], sizes = [8, 128], strides = [1, 1]} : vector<8x512xf32> to vector<8x128xf32>
    %142 = math.tanh %141 : vector<8x128xf32>
    %143 = vector.extract_strided_slice %124 {offsets = [0, 384], sizes = [8, 128], strides = [1, 1]} : vector<8x512xf32> to vector<8x128xf32>
    %cst_78 = arith.constant 5.000000e-01 : f32
    %144 = vector.broadcast %cst_78 : f32 to vector<8x128xf32>
    %145 = arith.mulf %144, %143 : vector<8x128xf32>
    %146 = math.tanh %145 : vector<8x128xf32>
    %cst_79 = arith.constant 5.000000e-01 : f32
    %147 = vector.broadcast %cst_79 : f32 to vector<8x128xf32>
    %148 = arith.mulf %147, %146 : vector<8x128xf32>
    %cst_80 = arith.constant 5.000000e-01 : f32
    %149 = vector.broadcast %cst_80 : f32 to vector<8x128xf32>
    %150 = arith.addf %148, %149 : vector<8x128xf32>
    %c0_81 = arith.constant 0 : index
    %c0_82 = arith.constant 0 : index
    %151 = vector.load %arg12[%c0_81, %c0_82] : memref<8x128xf32, #tpu.memory_space<vmem>>, vector<8x128xf32>
    %152 = arith.mulf %140, %151 : vector<8x128xf32>
    %153 = arith.mulf %132, %142 : vector<8x128xf32>
    %154 = arith.addf %152, %153 : vector<8x128xf32>
    %155 = math.tanh %154 : vector<8x128xf32>
    %156 = arith.mulf %150, %155 : vector<8x128xf32>
    %c0_83 = arith.constant 0 : index
    %c0_84 = arith.constant 0 : index
    %157 = vector.load %arg12[%c0_83, %c0_84] : memref<8x128xf32, #tpu.memory_space<vmem>>, vector<8x128xf32>
    tpu.vector_store %arg12[%c0_83, %c0_84], %154 {strides = array<i32>} : memref<8x128xf32, #tpu.memory_space<vmem>>, vector<8x128xf32>,
    %158 = arith.truncf %156 : vector<8x128xf32> to vector<8x128xbf16>
    %c0_85 = arith.constant 0 : index
    %c0_86 = arith.constant 0 : index
    %159 = vector.load %arg8[%c0_85, %c0_86] : memref<128x128xbf16, #tpu.memory_space<vmem>>, vector<128x128xbf16>
    %cst_87 = arith.constant dense<0.000000e+00> : vector<8x128xf32>
    %160 = tpu.matmul %158, %159, %cst_87 {dimension_numbers = #tpu.dot_dimension_numbers<[1], [0], [0], [1], [0, 0, 1, 1], [], []>} : vector<8x128xbf16>, vector<128x128xbf16>, vector<8x128xf32> -> vector<8x128xf32>
    %161 = arith.addf %160, %8 : vector<8x128xf32>
    %c2 = arith.constant 2 : index
    %c0_88 = arith.constant 0 : index
    %c0_89 = arith.constant 0 : index
    %162 = vector.load %arg10[%c2, %c0_88, %c0_89] : memref<4x8x128xf32, #tpu.memory_space<vmem>>, vector<1x8x128xf32>
    %163 = vector.shape_cast %162 : vector<1x8x128xf32> to vector<8x128xf32>
    %164 = vector.shape_cast %161 : vector<8x128xf32> to vector<1x8x128xf32>
    tpu.vector_store %arg10[%c2, %c0_88, %c0_89], %164 {strides = array<i32>} : memref<4x8x128xf32, #tpu.memory_space<vmem>>, vector<1x8x128xf32>,
    %c4_i32_90 = arith.constant 4 : i32
    %165 = arith.muli %arg1, %c4_i32_90 : i32
    %c2_i32 = arith.constant 2 : i32
    %166 = arith.addi %165, %c2_i32 : i32
    %167 = arith.index_cast %166 : i32 to index
    %168 = memref.load %arg2[%167] : memref<8xi32, #tpu.memory_space<smem>>
    %c0_i32_91 = arith.constant 0 : i32
    %169 = arith.cmpi sgt, %168, %c0_i32_91 : i32
    %c2_92 = arith.constant 2 : index
    %c0_93 = arith.constant 0 : index
    %c0_94 = arith.constant 0 : index
    %170 = vector.load %arg3[%c2_92, %c0_93, %c0_94] : memref<4x8x16xf32, #tpu.memory_space<vmem>>, vector<1x8x16xf32>
    %171 = vector.shape_cast %170 : vector<1x8x16xf32> to vector<8x16xf32>
    %172 = vector.extract_strided_slice %161 {offsets = [0, 0], sizes = [8, 16], strides = [1, 1]} : vector<8x128xf32> to vector<8x16xf32>
    %173 = arith.select %169, %171, %172 : vector<8x16xf32>
    %174 = arith.truncf %173 : vector<8x16xf32> to vector<8x16xbf16>
    %c0_95 = arith.constant 0 : index
    %c0_96 = arith.constant 0 : index
    %175 = vector.load %arg11[%c0_95, %c0_96] : memref<8x256xbf16, #tpu.memory_space<vmem>>, vector<8x16xbf16>
    tpu.vector_store %arg11[%c0_95, %c0_96], %174 {strides = array<i32>} : memref<8x256xbf16, #tpu.memory_space<vmem>>, vector<8x16xbf16>,
    %c0_97 = arith.constant 0 : index
    %c128_98 = arith.constant 128 : index
    %176 = vector.load %arg11[%c0_97, %c128_98] : memref<8x256xbf16, #tpu.memory_space<vmem>>, vector<8x128xbf16>
    tpu.vector_store %arg11[%c0_97, %c128_98], %158 {strides = array<i32>} : memref<8x256xbf16, #tpu.memory_space<vmem>>, vector<8x128xbf16>,
    %c0_99 = arith.constant 0 : index
    %c0_100 = arith.constant 0 : index
    %177 = vector.load %arg11[%c0_99, %c0_100] : memref<8x256xbf16, #tpu.memory_space<vmem>>, vector<8x256xbf16>
    %c0_101 = arith.constant 0 : index
    %c0_102 = arith.constant 0 : index
    %178 = vector.load %arg6[%c0_101, %c0_102] : memref<256x512xbf16, #tpu.memory_space<vmem>>, vector<256x512xbf16>
    %cst_103 = arith.constant dense<0.000000e+00> : vector<8x512xf32>
    %179 = tpu.matmul %177, %178, %cst_103 {dimension_numbers = #tpu.dot_dimension_numbers<[1], [0], [0], [1], [0, 0, 1, 1], [], []>} : vector<8x256xbf16>, vector<256x512xbf16>, vector<8x512xf32> -> vector<8x512xf32>
    %180 = arith.addf %179, %5 : vector<8x512xf32>
    %181 = vector.extract_strided_slice %180 {offsets = [0, 0], sizes = [8, 128], strides = [1, 1]} : vector<8x512xf32> to vector<8x128xf32>
    %cst_104 = arith.constant 5.000000e-01 : f32
    %182 = vector.broadcast %cst_104 : f32 to vector<8x128xf32>
    %183 = arith.mulf %182, %181 : vector<8x128xf32>
    %184 = math.tanh %183 : vector<8x128xf32>
    %cst_105 = arith.constant 5.000000e-01 : f32
    %185 = vector.broadcast %cst_105 : f32 to vector<8x128xf32>
    %186 = arith.mulf %185, %184 : vector<8x128xf32>
    %cst_106 = arith.constant 5.000000e-01 : f32
    %187 = vector.broadcast %cst_106 : f32 to vector<8x128xf32>
    %188 = arith.addf %186, %187 : vector<8x128xf32>
    %189 = vector.extract_strided_slice %180 {offsets = [0, 128], sizes = [8, 128], strides = [1, 1]} : vector<8x512xf32> to vector<8x128xf32>
    %cst_107 = arith.constant 5.000000e-01 : f32
    %190 = vector.broadcast %cst_107 : f32 to vector<8x128xf32>
    %191 = arith.mulf %190, %189 : vector<8x128xf32>
    %192 = math.tanh %191 : vector<8x128xf32>
    %cst_108 = arith.constant 5.000000e-01 : f32
    %193 = vector.broadcast %cst_108 : f32 to vector<8x128xf32>
    %194 = arith.mulf %193, %192 : vector<8x128xf32>
    %cst_109 = arith.constant 5.000000e-01 : f32
    %195 = vector.broadcast %cst_109 : f32 to vector<8x128xf32>
    %196 = arith.addf %194, %195 : vector<8x128xf32>
    %197 = vector.extract_strided_slice %180 {offsets = [0, 256], sizes = [8, 128], strides = [1, 1]} : vector<8x512xf32> to vector<8x128xf32>
    %198 = math.tanh %197 : vector<8x128xf32>
    %199 = vector.extract_strided_slice %180 {offsets = [0, 384], sizes = [8, 128], strides = [1, 1]} : vector<8x512xf32> to vector<8x128xf32>
    %cst_110 = arith.constant 5.000000e-01 : f32
    %200 = vector.broadcast %cst_110 : f32 to vector<8x128xf32>
    %201 = arith.mulf %200, %199 : vector<8x128xf32>
    %202 = math.tanh %201 : vector<8x128xf32>
    %cst_111 = arith.constant 5.000000e-01 : f32
    %203 = vector.broadcast %cst_111 : f32 to vector<8x128xf32>
    %204 = arith.mulf %203, %202 : vector<8x128xf32>
    %cst_112 = arith.constant 5.000000e-01 : f32
    %205 = vector.broadcast %cst_112 : f32 to vector<8x128xf32>
    %206 = arith.addf %204, %205 : vector<8x128xf32>
    %c0_113 = arith.constant 0 : index
    %c0_114 = arith.constant 0 : index
    %207 = vector.load %arg12[%c0_113, %c0_114] : memref<8x128xf32, #tpu.memory_space<vmem>>, vector<8x128xf32>
    %208 = arith.mulf %196, %207 : vector<8x128xf32>
    %209 = arith.mulf %188, %198 : vector<8x128xf32>
    %210 = arith.addf %208, %209 : vector<8x128xf32>
    %211 = math.tanh %210 : vector<8x128xf32>
    %212 = arith.mulf %206, %211 : vector<8x128xf32>
    %c0_115 = arith.constant 0 : index
    %c0_116 = arith.constant 0 : index
    %213 = vector.load %arg12[%c0_115, %c0_116] : memref<8x128xf32, #tpu.memory_space<vmem>>, vector<8x128xf32>
    tpu.vector_store %arg12[%c0_115, %c0_116], %210 {strides = array<i32>} : memref<8x128xf32, #tpu.memory_space<vmem>>, vector<8x128xf32>,
    %214 = arith.truncf %212 : vector<8x128xf32> to vector<8x128xbf16>
    %c0_117 = arith.constant 0 : index
    %c0_118 = arith.constant 0 : index
    %215 = vector.load %arg8[%c0_117, %c0_118] : memref<128x128xbf16, #tpu.memory_space<vmem>>, vector<128x128xbf16>
    %cst_119 = arith.constant dense<0.000000e+00> : vector<8x128xf32>
    %216 = tpu.matmul %214, %215, %cst_119 {dimension_numbers = #tpu.dot_dimension_numbers<[1], [0], [0], [1], [0, 0, 1, 1], [], []>} : vector<8x128xbf16>, vector<128x128xbf16>, vector<8x128xf32> -> vector<8x128xf32>
    %217 = arith.addf %216, %8 : vector<8x128xf32>
    %c3 = arith.constant 3 : index
    %c0_120 = arith.constant 0 : index
    %c0_121 = arith.constant 0 : index
    %218 = vector.load %arg10[%c3, %c0_120, %c0_121] : memref<4x8x128xf32, #tpu.memory_space<vmem>>, vector<1x8x128xf32>
    %219 = vector.shape_cast %218 : vector<1x8x128xf32> to vector<8x128xf32>
    %220 = vector.shape_cast %217 : vector<8x128xf32> to vector<1x8x128xf32>
    tpu.vector_store %arg10[%c3, %c0_120, %c0_121], %220 {strides = array<i32>} : memref<4x8x128xf32, #tpu.memory_space<vmem>>, vector<1x8x128xf32>,
    %c4_i32_122 = arith.constant 4 : i32
    %221 = arith.muli %arg1, %c4_i32_122 : i32
    %c3_i32 = arith.constant 3 : i32
    %222 = arith.addi %221, %c3_i32 : i32
    %223 = arith.index_cast %222 : i32 to index
    %224 = memref.load %arg2[%223] : memref<8xi32, #tpu.memory_space<smem>>
    %c0_i32_123 = arith.constant 0 : i32
    %225 = arith.cmpi sgt, %224, %c0_i32_123 : i32
    %c3_124 = arith.constant 3 : index
    %c0_125 = arith.constant 0 : index
    %c0_126 = arith.constant 0 : index
    %226 = vector.load %arg3[%c3_124, %c0_125, %c0_126] : memref<4x8x16xf32, #tpu.memory_space<vmem>>, vector<1x8x16xf32>
    %227 = vector.shape_cast %226 : vector<1x8x16xf32> to vector<8x16xf32>
    %228 = vector.extract_strided_slice %217 {offsets = [0, 0], sizes = [8, 16], strides = [1, 1]} : vector<8x128xf32> to vector<8x16xf32>
    %229 = arith.select %225, %227, %228 : vector<8x16xf32>
    %230 = arith.truncf %229 : vector<8x16xf32> to vector<8x16xbf16>
    %c0_127 = arith.constant 0 : index
    %c0_128 = arith.constant 0 : index
    %231 = vector.load %arg11[%c0_127, %c0_128] : memref<8x256xbf16, #tpu.memory_space<vmem>>, vector<8x16xbf16>
    tpu.vector_store %arg11[%c0_127, %c0_128], %230 {strides = array<i32>} : memref<8x256xbf16, #tpu.memory_space<vmem>>, vector<8x16xbf16>,
    %c0_129 = arith.constant 0 : index
    %c128_130 = arith.constant 128 : index
    %232 = vector.load %arg11[%c0_129, %c128_130] : memref<8x256xbf16, #tpu.memory_space<vmem>>, vector<8x128xbf16>
    tpu.vector_store %arg11[%c0_129, %c128_130], %214 {strides = array<i32>} : memref<8x256xbf16, #tpu.memory_space<vmem>>, vector<8x128xbf16>,
    return
  }
  func.func @transform_0(%arg0: i32, %arg1: i32, %arg2: memref<8xi32, #tpu.memory_space<smem>>) -> (i32, i32, i32) {
    %c0_i32 = arith.constant 0 : i32
    %c0_i32_0 = arith.constant 0 : i32
    return %arg1, %arg0, %c0_i32 : i32, i32, i32
  }
  func.func @transform_1(%arg0: i32, %arg1: i32, %arg2: memref<8xi32, #tpu.memory_space<smem>>) -> (i32, i32) {
    %c0_i32 = arith.constant 0 : i32
    %c0_i32_0 = arith.constant 0 : i32
    return %arg0, %c0_i32 : i32, i32
  }
  func.func @transform_2(%arg0: i32, %arg1: i32, %arg2: memref<8xi32, #tpu.memory_space<smem>>) -> (i32, i32) {
    %c0_i32 = arith.constant 0 : i32
    %c0_i32_0 = arith.constant 0 : i32
    return %arg0, %c0_i32 : i32, i32
  }
  func.func @transform_3(%arg0: i32, %arg1: i32, %arg2: memref<8xi32, #tpu.memory_space<smem>>) -> (i32, i32) {
    %c0_i32 = arith.constant 0 : i32
    %c0_i32_0 = arith.constant 0 : i32
    %c0_i32_1 = arith.constant 0 : i32
    return %c0_i32, %c0_i32_0 : i32, i32
  }
  func.func @transform_4(%arg0: i32, %arg1: i32, %arg2: memref<8xi32, #tpu.memory_space<smem>>) -> (i32, i32) {
    %c0_i32 = arith.constant 0 : i32
    %c0_i32_0 = arith.constant 0 : i32
    %c0_i32_1 = arith.constant 0 : i32
    return %c0_i32, %c0_i32_0 : i32, i32
  }
  func.func @transform_5(%arg0: i32, %arg1: i32, %arg2: memref<8xi32, #tpu.memory_space<smem>>) -> (i32, i32) {
    %c0_i32 = arith.constant 0 : i32
    %c0_i32_0 = arith.constant 0 : i32
    %c0_i32_1 = arith.constant 0 : i32
    return %c0_i32, %c0_i32_0 : i32, i32
  }
  func.func @transform_6(%arg0: i32, %arg1: i32, %arg2: memref<8xi32, #tpu.memory_space<smem>>) -> (i32, i32) {
    %c0_i32 = arith.constant 0 : i32
    %c0_i32_0 = arith.constant 0 : i32
    %c0_i32_1 = arith.constant 0 : i32
    return %c0_i32, %c0_i32_0 : i32, i32
  }
  func.func @transform_7(%arg0: i32, %arg1: i32, %arg2: memref<8xi32, #tpu.memory_space<smem>>) -> (i32, i32, i32) {
    %c0_i32 = arith.constant 0 : i32
    %c0_i32_0 = arith.constant 0 : i32
    return %arg1, %arg0, %c0_i32 : i32, i32, i32
  }
}

module attributes {stable_mosaic.version = 11 : i64} {
  func.func @_lstm_decoder_kernel(%arg0: i32, %arg1: i32, %arg2: memref<8xi32, #tpu.memory_space<smem>>, %arg3: memref<4x8x16xf32, #tpu.memory_space<vmem>>, %arg4: memref<8x128xf32, #tpu.memory_space<vmem>>, %arg5: memref<8x128xf32, #tpu.memory_space<vmem>>, %arg6: memref<256x512xbf16, #tpu.memory_space<vmem>>, %arg7: memref<1x512xf32, #tpu.memory_space<vmem>>, %arg8: memref<128x128xbf16, #tpu.memory_space<vmem>>, %arg9: memref<1x128xf32, #tpu.memory_space<vmem>>, %arg10: memref<4x8x128xf32, #tpu.memory_space<vmem>>, %arg11: memref<8x256xbf16, #tpu.memory_space<vmem>>, %arg12: memref<8x128xf32, #tpu.memory_space<vmem>>) attributes {dimension_semantics = [#tpu.dimension_semantics<parallel>, #tpu.dimension_semantics<arbitrary>], iteration_bounds = array<i64: 1, 2>, scalar_prefetch = 1 : i64, scratch_operands = 2 : i64, tpu.core_type = #tpu.core_type<tc>, window_params = [{transform_indices = @transform_0, window_bounds = array<i64: 4, 8, 16>}, {transform_indices = @transform_1, window_bounds = array<i64: 8, 128>}, {transform_indices = @transform_2, window_bounds = array<i64: 8, 128>}, {pipeline_mode = #tpu.pipeline_mode<synchronous>, transform_indices = @transform_3, window_bounds = array<i64: 256, 512>}, {pipeline_mode = #tpu.pipeline_mode<synchronous>, transform_indices = @transform_4, window_bounds = array<i64: 1, 512>}, {pipeline_mode = #tpu.pipeline_mode<synchronous>, transform_indices = @transform_5, window_bounds = array<i64: 128, 128>}, {pipeline_mode = #tpu.pipeline_mode<synchronous>, transform_indices = @transform_6, window_bounds = array<i64: 1, 128>}, {transform_indices = @transform_7, window_bounds = array<i64: 4, 8, 128>}]} {
    %c0_i32 = arith.constant 0 : i32
    %0 = arith.cmpi eq, %arg1, %c0_i32 : i32
    %1 = arith.extui %0 : i1 to i32
    %c0_i32_0 = arith.constant 0 : i32
    %2 = arith.cmpi ne, %1, %c0_i32_0 : i32
    scf.if %2 {
      %c0_131 = arith.constant 0 : index
      %c0_132 = arith.constant 0 : index
      %233 = vector.load %arg5[%c0_131, %c0_132] : memref<8x128xf32, #tpu.memory_space<vmem>>, vector<8x128xf32>
      %c0_133 = arith.constant 0 : index
      %c0_134 = arith.constant 0 : index
      %234 = vector.load %arg12[%c0_133, %c0_134] : memref<8x128xf32, #tpu.memory_space<vmem>>, vector<8x128xf32>
      tpu.vector_store %arg12[%c0_133, %c0_134], %233 {strides = array<i32>} : memref<8x128xf32, #tpu.memory_space<vmem>>, vector<8x128xf32>,
      %cst_135 = arith.constant 0.000000e+00 : bf16
      %235 = vector.broadcast %cst_135 : bf16 to vector<8x256xbf16>
      %c0_136 = arith.constant 0 : index
      %c0_137 = arith.constant 0 : index
      %236 = vector.load %arg11[%c0_136, %c0_137] : memref<8x256xbf16, #tpu.memory_space<vmem>>, vector<8x256xbf16>
      tpu.vector_store %arg11[%c0_136, %c0_137], %235 {strides = array<i32>} : memref<8x256xbf16, #tpu.memory_space<vmem>>, vector<8x256xbf16>,
      %c0_138 = arith.constant 0 : index
      %c0_139 = arith.constant 0 : index
      %c0_140 = arith.constant 0 : index
      %237 = vector.load %arg3[%c0_138, %c0_139, %c0_140] : memref<4x8x16xf32, #tpu.memory_space<vmem>>, vector<1x8x16xf32>
      %238 = vector.shape_cast %237 : vector<1x8x16xf32> to vector<8x16xf32>
      %239 = arith.truncf %238 : vector<8x16xf32> to vector<8x16xbf16>
      %c0_141 = arith.constant 0 : index
      %c0_142 = arith.constant 0 : index
      %240 = vector.load %arg11[%c0_141, %c0_142] : memref<8x256xbf16, #tpu.memory_space<vmem>>, vector<8x16xbf16>
      tpu.vector_store %arg11[%c0_141, %c0_142], %239 {strides = array<i32>} : memref<8x256xbf16, #tpu.memory_space<vmem>>, vector<8x16xbf16>,
      %c0_143 = arith.constant 0 : index
      %c0_144 = arith.constant 0 : index
      %241 = vector.load %arg4[%c0_143, %c0_144] : memref<8x128xf32, #tpu.memory_space<vmem>>, vector<8x128xf32>
      %242 = arith.truncf %241 : vector<8x128xf32> to vector<8x128xbf16>
      %c0_145 = arith.constant 0 : index
      %c128_146 = arith.constant 128 : index
      %243 = vector.load %arg11[%c0_145, %c128_146] : memref<8x256xbf16, #tpu.memory_space<vmem>>, vector<8x128xbf16>
      tpu.vector_store %arg11[%c0_145, %c128_146], %242 {strides = array<i32>} : memref<8x256xbf16, #tpu.memory_space<vmem>>, vector<8x128xbf16>,
    } else {
    }
    %c0 = arith.constant 0 : index
    %c0_1 = arith.constant 0 : index
    %3 = vector.load %arg7[%c0, %c0_1] : memref<1x512xf32, #tpu.memory_space<vmem>>, vector<1x512xf32>
    %4 = vector.shape_cast %3 : vector<1x512xf32> to vector<1x512xf32>
    %5 = vector.broadcast %4 : vector<1x512xf32> to vector<8x512xf32>
    %c0_2 = arith.constant 0 : index
    %c0_3 = arith.constant 0 : index
    %6 = vector.load %arg9[%c0_2, %c0_3] : memref<1x128xf32, #tpu.memory_space<vmem>>, vector<1x128xf32>
    %7 = vector.shape_cast %6 : vector<1x128xf32> to vector<1x128xf32>
    %8 = vector.broadcast %7 : vector<1x128xf32> to vector<8x128xf32>
    %c0_4 = arith.constant 0 : index
    %c0_5 = arith.constant 0 : index
    %9 = vector.load %arg11[%c0_4, %c0_5] : memref<8x256xbf16, #tpu.memory_space<vmem>>, vector<8x256xbf16>
    %c0_6 = arith.constant 0 : index
    %c0_7 = arith.constant 0 : index
    %10 = vector.load %arg6[%c0_6, %c0_7] : memref<256x512xbf16, #tpu.memory_space<vmem>>, vector<256x512xbf16>
    %cst = arith.constant dense<0.000000e+00> : vector<8x512xf32>
    %11 = tpu.matmul %9, %10, %cst {dimension_numbers = #tpu.dot_dimension_numbers<[1], [0], [0], [1], [0, 0, 1, 1], [], []>} : vector<8x256xbf16>, vector<256x512xbf16>, vector<8x512xf32> -> vector<8x512xf32>
    %12 = arith.addf %11, %5 : vector<8x512xf32>
    %13 = vector.extract_strided_slice %12 {offsets = [0, 0], sizes = [8, 128], strides = [1, 1]} : vector<8x512xf32> to vector<8x128xf32>
    %cst_8 = arith.constant 5.000000e-01 : f32
    %14 = vector.broadcast %cst_8 : f32 to vector<8x128xf32>
    %15 = arith.mulf %14, %13 : vector<8x128xf32>
    %16 = math.tanh %15 : vector<8x128xf32>
    %cst_9 = arith.constant 5.000000e-01 : f32
    %17 = vector.broadcast %cst_9 : f32 to vector<8x128xf32>
    %18 = arith.mulf %17, %16 : vector<8x128xf32>
    %cst_10 = arith.constant 5.000000e-01 : f32
    %19 = vector.broadcast %cst_10 : f32 to vector<8x128xf32>
    %20 = arith.addf %18, %19 : vector<8x128xf32>
    %21 = vector.extract_strided_slice %12 {offsets = [0, 128], sizes = [8, 128], strides = [1, 1]} : vector<8x512xf32> to vector<8x128xf32>
    %cst_11 = arith.constant 5.000000e-01 : f32
    %22 = vector.broadcast %cst_11 : f32 to vector<8x128xf32>
    %23 = arith.mulf %22, %21 : vector<8x128xf32>
    %24 = math.tanh %23 : vector<8x128xf32>
    %cst_12 = arith.constant 5.000000e-01 : f32
    %25 = vector.broadcast %cst_12 : f32 to vector<8x128xf32>
    %26 = arith.mulf %25, %24 : vector<8x128xf32>
    %cst_13 = arith.constant 5.000000e-01 : f32
    %27 = vector.broadcast %cst_13 : f32 to vector<8x128xf32>
    %28 = arith.addf %26, %27 : vector<8x128xf32>
    %29 = vector.extract_strided_slice %12 {offsets = [0, 256], sizes = [8, 128], strides = [1, 1]} : vector<8x512xf32> to vector<8x128xf32>
    %30 = math.tanh %29 : vector<8x128xf32>
    %31 = vector.extract_strided_slice %12 {offsets = [0, 384], sizes = [8, 128], strides = [1, 1]} : vector<8x512xf32> to vector<8x128xf32>
    %cst_14 = arith.constant 5.000000e-01 : f32
    %32 = vector.broadcast %cst_14 : f32 to vector<8x128xf32>
    %33 = arith.mulf %32, %31 : vector<8x128xf32>
    %34 = math.tanh %33 : vector<8x128xf32>
    %cst_15 = arith.constant 5.000000e-01 : f32
    %35 = vector.broadcast %cst_15 : f32 to vector<8x128xf32>
    %36 = arith.mulf %35, %34 : vector<8x128xf32>
    %cst_16 = arith.constant 5.000000e-01 : f32
    %37 = vector.broadcast %cst_16 : f32 to vector<8x128xf32>
    %38 = arith.addf %36, %37 : vector<8x128xf32>
    %c0_17 = arith.constant 0 : index
    %c0_18 = arith.constant 0 : index
    %39 = vector.load %arg12[%c0_17, %c0_18] : memref<8x128xf32, #tpu.memory_space<vmem>>, vector<8x128xf32>
    %40 = arith.mulf %28, %39 : vector<8x128xf32>
    %41 = arith.mulf %20, %30 : vector<8x128xf32>
    %42 = arith.addf %40, %41 : vector<8x128xf32>
    %43 = math.tanh %42 : vector<8x128xf32>
    %44 = arith.mulf %38, %43 : vector<8x128xf32>
    %c0_19 = arith.constant 0 : index
    %c0_20 = arith.constant 0 : index
    %45 = vector.load %arg12[%c0_19, %c0_20] : memref<8x128xf32, #tpu.memory_space<vmem>>, vector<8x128xf32>
    tpu.vector_store %arg12[%c0_19, %c0_20], %42 {strides = array<i32>} : memref<8x128xf32, #tpu.memory_space<vmem>>, vector<8x128xf32>,
    %46 = arith.truncf %44 : vector<8x128xf32> to vector<8x128xbf16>
    %c0_21 = arith.constant 0 : index
    %c0_22 = arith.constant 0 : index
    %47 = vector.load %arg8[%c0_21, %c0_22] : memref<128x128xbf16, #tpu.memory_space<vmem>>, vector<128x128xbf16>
    %cst_23 = arith.constant dense<0.000000e+00> : vector<8x128xf32>
    %48 = tpu.matmul %46, %47, %cst_23 {dimension_numbers = #tpu.dot_dimension_numbers<[1], [0], [0], [1], [0, 0, 1, 1], [], []>} : vector<8x128xbf16>, vector<128x128xbf16>, vector<8x128xf32> -> vector<8x128xf32>
    %49 = arith.addf %48, %8 : vector<8x128xf32>
    %c0_24 = arith.constant 0 : index
    %c0_25 = arith.constant 0 : index
    %c0_26 = arith.constant 0 : index
    %50 = vector.load %arg10[%c0_24, %c0_25, %c0_26] : memref<4x8x128xf32, #tpu.memory_space<vmem>>, vector<1x8x128xf32>
    %51 = vector.shape_cast %50 : vector<1x8x128xf32> to vector<8x128xf32>
    %52 = vector.shape_cast %49 : vector<8x128xf32> to vector<1x8x128xf32>
    tpu.vector_store %arg10[%c0_24, %c0_25, %c0_26], %52 {strides = array<i32>} : memref<4x8x128xf32, #tpu.memory_space<vmem>>, vector<1x8x128xf32>,
    %c4_i32 = arith.constant 4 : i32
    %53 = arith.muli %arg1, %c4_i32 : i32
    %c0_i32_27 = arith.constant 0 : i32
    %54 = arith.addi %53, %c0_i32_27 : i32
    %55 = arith.index_cast %54 : i32 to index
    %56 = memref.load %arg2[%55] : memref<8xi32, #tpu.memory_space<smem>>
    %c0_i32_28 = arith.constant 0 : i32
    %57 = arith.cmpi sgt, %56, %c0_i32_28 : i32
    %c0_29 = arith.constant 0 : index
    %c0_30 = arith.constant 0 : index
    %c0_31 = arith.constant 0 : index
    %58 = vector.load %arg3[%c0_29, %c0_30, %c0_31] : memref<4x8x16xf32, #tpu.memory_space<vmem>>, vector<1x8x16xf32>
    %59 = vector.shape_cast %58 : vector<1x8x16xf32> to vector<8x16xf32>
    %60 = vector.extract_strided_slice %49 {offsets = [0, 0], sizes = [8, 16], strides = [1, 1]} : vector<8x128xf32> to vector<8x16xf32>
    %61 = arith.select %57, %59, %60 : vector<8x16xf32>
    %62 = arith.truncf %61 : vector<8x16xf32> to vector<8x16xbf16>
    %c0_32 = arith.constant 0 : index
    %c0_33 = arith.constant 0 : index
    %63 = vector.load %arg11[%c0_32, %c0_33] : memref<8x256xbf16, #tpu.memory_space<vmem>>, vector<8x16xbf16>
    tpu.vector_store %arg11[%c0_32, %c0_33], %62 {strides = array<i32>} : memref<8x256xbf16, #tpu.memory_space<vmem>>, vector<8x16xbf16>,
    %c0_34 = arith.constant 0 : index
    %c128 = arith.constant 128 : index
    %64 = vector.load %arg11[%c0_34, %c128] : memref<8x256xbf16, #tpu.memory_space<vmem>>, vector<8x128xbf16>
    tpu.vector_store %arg11[%c0_34, %c128], %46 {strides = array<i32>} : memref<8x256xbf16, #tpu.memory_space<vmem>>, vector<8x128xbf16>,
    %c0_35 = arith.constant 0 : index
    %c0_36 = arith.constant 0 : index
    %65 = vector.load %arg11[%c0_35, %c0_36] : memref<8x256xbf16, #tpu.memory_space<vmem>>, vector<8x256xbf16>
    %c0_37 = arith.constant 0 : index
    %c0_38 = arith.constant 0 : index
    %66 = vector.load %arg6[%c0_37, %c0_38] : memref<256x512xbf16, #tpu.memory_space<vmem>>, vector<256x512xbf16>
    %cst_39 = arith.constant dense<0.000000e+00> : vector<8x512xf32>
    %67 = tpu.matmul %65, %66, %cst_39 {dimension_numbers = #tpu.dot_dimension_numbers<[1], [0], [0], [1], [0, 0, 1, 1], [], []>} : vector<8x256xbf16>, vector<256x512xbf16>, vector<8x512xf32> -> vector<8x512xf32>
    %68 = arith.addf %67, %5 : vector<8x512xf32>
    %69 = vector.extract_strided_slice %68 {offsets = [0, 0], sizes = [8, 128], strides = [1, 1]} : vector<8x512xf32> to vector<8x128xf32>
    %cst_40 = arith.constant 5.000000e-01 : f32
    %70 = vector.broadcast %cst_40 : f32 to vector<8x128xf32>
    %71 = arith.mulf %70, %69 : vector<8x128xf32>
    %72 = math.tanh %71 : vector<8x128xf32>
    %cst_41 = arith.constant 5.000000e-01 : f32
    %73 = vector.broadcast %cst_41 : f32 to vector<8x128xf32>
    %74 = arith.mulf %73, %72 : vector<8x128xf32>
    %cst_42 = arith.constant 5.000000e-01 : f32
    %75 = vector.broadcast %cst_42 : f32 to vector<8x128xf32>
    %76 = arith.addf %74, %75 : vector<8x128xf32>
    %77 = vector.extract_strided_slice %68 {offsets = [0, 128], sizes = [8, 128], strides = [1, 1]} : vector<8x512xf32> to vector<8x128xf32>
    %cst_43 = arith.constant 5.000000e-01 : f32
    %78 = vector.broadcast %cst_43 : f32 to vector<8x128xf32>
    %79 = arith.mulf %78, %77 : vector<8x128xf32>
    %80 = math.tanh %79 : vector<8x128xf32>
    %cst_44 = arith.constant 5.000000e-01 : f32
    %81 = vector.broadcast %cst_44 : f32 to vector<8x128xf32>
    %82 = arith.mulf %81, %80 : vector<8x128xf32>
    %cst_45 = arith.constant 5.000000e-01 : f32
    %83 = vector.broadcast %cst_45 : f32 to vector<8x128xf32>
    %84 = arith.addf %82, %83 : vector<8x128xf32>
    %85 = vector.extract_strided_slice %68 {offsets = [0, 256], sizes = [8, 128], strides = [1, 1]} : vector<8x512xf32> to vector<8x128xf32>
    %86 = math.tanh %85 : vector<8x128xf32>
    %87 = vector.extract_strided_slice %68 {offsets = [0, 384], sizes = [8, 128], strides = [1, 1]} : vector<8x512xf32> to vector<8x128xf32>
    %cst_46 = arith.constant 5.000000e-01 : f32
    %88 = vector.broadcast %cst_46 : f32 to vector<8x128xf32>
    %89 = arith.mulf %88, %87 : vector<8x128xf32>
    %90 = math.tanh %89 : vector<8x128xf32>
    %cst_47 = arith.constant 5.000000e-01 : f32
    %91 = vector.broadcast %cst_47 : f32 to vector<8x128xf32>
    %92 = arith.mulf %91, %90 : vector<8x128xf32>
    %cst_48 = arith.constant 5.000000e-01 : f32
    %93 = vector.broadcast %cst_48 : f32 to vector<8x128xf32>
    %94 = arith.addf %92, %93 : vector<8x128xf32>
    %c0_49 = arith.constant 0 : index
    %c0_50 = arith.constant 0 : index
    %95 = vector.load %arg12[%c0_49, %c0_50] : memref<8x128xf32, #tpu.memory_space<vmem>>, vector<8x128xf32>
    %96 = arith.mulf %84, %95 : vector<8x128xf32>
    %97 = arith.mulf %76, %86 : vector<8x128xf32>
    %98 = arith.addf %96, %97 : vector<8x128xf32>
    %99 = math.tanh %98 : vector<8x128xf32>
    %100 = arith.mulf %94, %99 : vector<8x128xf32>
    %c0_51 = arith.constant 0 : index
    %c0_52 = arith.constant 0 : index
    %101 = vector.load %arg12[%c0_51, %c0_52] : memref<8x128xf32, #tpu.memory_space<vmem>>, vector<8x128xf32>
    tpu.vector_store %arg12[%c0_51, %c0_52], %98 {strides = array<i32>} : memref<8x128xf32, #tpu.memory_space<vmem>>, vector<8x128xf32>,
    %102 = arith.truncf %100 : vector<8x128xf32> to vector<8x128xbf16>
    %c0_53 = arith.constant 0 : index
    %c0_54 = arith.constant 0 : index
    %103 = vector.load %arg8[%c0_53, %c0_54] : memref<128x128xbf16, #tpu.memory_space<vmem>>, vector<128x128xbf16>
    %cst_55 = arith.constant dense<0.000000e+00> : vector<8x128xf32>
    %104 = tpu.matmul %102, %103, %cst_55 {dimension_numbers = #tpu.dot_dimension_numbers<[1], [0], [0], [1], [0, 0, 1, 1], [], []>} : vector<8x128xbf16>, vector<128x128xbf16>, vector<8x128xf32> -> vector<8x128xf32>
    %105 = arith.addf %104, %8 : vector<8x128xf32>
    %c1 = arith.constant 1 : index
    %c0_56 = arith.constant 0 : index
    %c0_57 = arith.constant 0 : index
    %106 = vector.load %arg10[%c1, %c0_56, %c0_57] : memref<4x8x128xf32, #tpu.memory_space<vmem>>, vector<1x8x128xf32>
    %107 = vector.shape_cast %106 : vector<1x8x128xf32> to vector<8x128xf32>
    %108 = vector.shape_cast %105 : vector<8x128xf32> to vector<1x8x128xf32>
    tpu.vector_store %arg10[%c1, %c0_56, %c0_57], %108 {strides = array<i32>} : memref<4x8x128xf32, #tpu.memory_space<vmem>>, vector<1x8x128xf32>,
    %c4_i32_58 = arith.constant 4 : i32
    %109 = arith.muli %arg1, %c4_i32_58 : i32
    %c1_i32 = arith.constant 1 : i32
    %110 = arith.addi %109, %c1_i32 : i32
    %111 = arith.index_cast %110 : i32 to index
    %112 = memref.load %arg2[%111] : memref<8xi32, #tpu.memory_space<smem>>
    %c0_i32_59 = arith.constant 0 : i32
    %113 = arith.cmpi sgt, %112, %c0_i32_59 : i32
    %c1_60 = arith.constant 1 : index
    %c0_61 = arith.constant 0 : index
    %c0_62 = arith.constant 0 : index
    %114 = vector.load %arg3[%c1_60, %c0_61, %c0_62] : memref<4x8x16xf32, #tpu.memory_space<vmem>>, vector<1x8x16xf32>
    %115 = vector.shape_cast %114 : vector<1x8x16xf32> to vector<8x16xf32>
    %116 = vector.extract_strided_slice %105 {offsets = [0, 0], sizes = [8, 16], strides = [1, 1]} : vector<8x128xf32> to vector<8x16xf32>
    %117 = arith.select %113, %115, %116 : vector<8x16xf32>
    %118 = arith.truncf %117 : vector<8x16xf32> to vector<8x16xbf16>
    %c0_63 = arith.constant 0 : index
    %c0_64 = arith.constant 0 : index
    %119 = vector.load %arg11[%c0_63, %c0_64] : memref<8x256xbf16, #tpu.memory_space<vmem>>, vector<8x16xbf16>
    tpu.vector_store %arg11[%c0_63, %c0_64], %118 {strides = array<i32>} : memref<8x256xbf16, #tpu.memory_space<vmem>>, vector<8x16xbf16>,
    %c0_65 = arith.constant 0 : index
    %c128_66 = arith.constant 128 : index
    %120 = vector.load %arg11[%c0_65, %c128_66] : memref<8x256xbf16, #tpu.memory_space<vmem>>, vector<8x128xbf16>
    tpu.vector_store %arg11[%c0_65, %c128_66], %102 {strides = array<i32>} : memref<8x256xbf16, #tpu.memory_space<vmem>>, vector<8x128xbf16>,
    %c0_67 = arith.constant 0 : index
    %c0_68 = arith.constant 0 : index
    %121 = vector.load %arg11[%c0_67, %c0_68] : memref<8x256xbf16, #tpu.memory_space<vmem>>, vector<8x256xbf16>
    %c0_69 = arith.constant 0 : index
    %c0_70 = arith.constant 0 : index
    %122 = vector.load %arg6[%c0_69, %c0_70] : memref<256x512xbf16, #tpu.memory_space<vmem>>, vector<256x512xbf16>
    %cst_71 = arith.constant dense<0.000000e+00> : vector<8x512xf32>
    %123 = tpu.matmul %121, %122, %cst_71 {dimension_numbers = #tpu.dot_dimension_numbers<[1], [0], [0], [1], [0, 0, 1, 1], [], []>} : vector<8x256xbf16>, vector<256x512xbf16>, vector<8x512xf32> -> vector<8x512xf32>
    %124 = arith.addf %123, %5 : vector<8x512xf32>
    %125 = vector.extract_strided_slice %124 {offsets = [0, 0], sizes = [8, 128], strides = [1, 1]} : vector<8x512xf32> to vector<8x128xf32>
    %cst_72 = arith.constant 5.000000e-01 : f32
    %126 = vector.broadcast %cst_72 : f32 to vector<8x128xf32>
    %127 = arith.mulf %126, %125 : vector<8x128xf32>
    %128 = math.tanh %127 : vector<8x128xf32>
    %cst_73 = arith.constant 5.000000e-01 : f32
    %129 = vector.broadcast %cst_73 : f32 to vector<8x128xf32>
    %130 = arith.mulf %129, %128 : vector<8x128xf32>
    %cst_74 = arith.constant 5.000000e-01 : f32
    %131 = vector.broadcast %cst_74 : f32 to vector<8x128xf32>
    %132 = arith.addf %130, %131 : vector<8x128xf32>
    %133 = vector.extract_strided_slice %124 {offsets = [0, 128], sizes = [8, 128], strides = [1, 1]} : vector<8x512xf32> to vector<8x128xf32>
    %cst_75 = arith.constant 5.000000e-01 : f32
    %134 = vector.broadcast %cst_75 : f32 to vector<8x128xf32>
    %135 = arith.mulf %134, %133 : vector<8x128xf32>
    %136 = math.tanh %135 : vector<8x128xf32>
    %cst_76 = arith.constant 5.000000e-01 : f32
    %137 = vector.broadcast %cst_76 : f32 to vector<8x128xf32>
    %138 = arith.mulf %137, %136 : vector<8x128xf32>
    %cst_77 = arith.constant 5.000000e-01 : f32
    %139 = vector.broadcast %cst_77 : f32 to vector<8x128xf32>
    %140 = arith.addf %138, %139 : vector<8x128xf32>
    %141 = vector.extract_strided_slice %124 {offsets = [0, 256], sizes = [8, 128], strides = [1, 1]} : vector<8x512xf32> to vector<8x128xf32>
    %142 = math.tanh %141 : vector<8x128xf32>
    %143 = vector.extract_strided_slice %124 {offsets = [0, 384], sizes = [8, 128], strides = [1, 1]} : vector<8x512xf32> to vector<8x128xf32>
    %cst_78 = arith.constant 5.000000e-01 : f32
    %144 = vector.broadcast %cst_78 : f32 to vector<8x128xf32>
    %145 = arith.mulf %144, %143 : vector<8x128xf32>
    %146 = math.tanh %145 : vector<8x128xf32>
    %cst_79 = arith.constant 5.000000e-01 : f32
    %147 = vector.broadcast %cst_79 : f32 to vector<8x128xf32>
    %148 = arith.mulf %147, %146 : vector<8x128xf32>
    %cst_80 = arith.constant 5.000000e-01 : f32
    %149 = vector.broadcast %cst_80 : f32 to vector<8x128xf32>
    %150 = arith.addf %148, %149 : vector<8x128xf32>
    %c0_81 = arith.constant 0 : index
    %c0_82 = arith.constant 0 : index
    %151 = vector.load %arg12[%c0_81, %c0_82] : memref<8x128xf32, #tpu.memory_space<vmem>>, vector<8x128xf32>
    %152 = arith.mulf %140, %151 : vector<8x128xf32>
    %153 = arith.mulf %132, %142 : vector<8x128xf32>
    %154 = arith.addf %152, %153 : vector<8x128xf32>
    %155 = math.tanh %154 : vector<8x128xf32>
    %156 = arith.mulf %150, %155 : vector<8x128xf32>
    %c0_83 = arith.constant 0 : index
    %c0_84 = arith.constant 0 : index
    %157 = vector.load %arg12[%c0_83, %c0_84] : memref<8x128xf32, #tpu.memory_space<vmem>>, vector<8x128xf32>
    tpu.vector_store %arg12[%c0_83, %c0_84], %154 {strides = array<i32>} : memref<8x128xf32, #tpu.memory_space<vmem>>, vector<8x128xf32>,
    %158 = arith.truncf %156 : vector<8x128xf32> to vector<8x128xbf16>
    %c0_85 = arith.constant 0 : index
    %c0_86 = arith.constant 0 : index
    %159 = vector.load %arg8[%c0_85, %c0_86] : memref<128x128xbf16, #tpu.memory_space<vmem>>, vector<128x128xbf16>
    %cst_87 = arith.constant dense<0.000000e+00> : vector<8x128xf32>
    %160 = tpu.matmul %158, %159, %cst_87 {dimension_numbers = #tpu.dot_dimension_numbers<[1], [0], [0], [1], [0, 0, 1, 1], [], []>} : vector<8x128xbf16>, vector<128x128xbf16>, vector<8x128xf32> -> vector<8x128xf32>
    %161 = arith.addf %160, %8 : vector<8x128xf32>
    %c2 = arith.constant 2 : index
    %c0_88 = arith.constant 0 : index
    %c0_89 = arith.constant 0 : index
    %162 = vector.load %arg10[%c2, %c0_88, %c0_89] : memref<4x8x128xf32, #tpu.memory_space<vmem>>, vector<1x8x128xf32>
    %163 = vector.shape_cast %162 : vector<1x8x128xf32> to vector<8x128xf32>
    %164 = vector.shape_cast %161 : vector<8x128xf32> to vector<1x8x128xf32>
    tpu.vector_store %arg10[%c2, %c0_88, %c0_89], %164 {strides = array<i32>} : memref<4x8x128xf32, #tpu.memory_space<vmem>>, vector<1x8x128xf32>,
    %c4_i32_90 = arith.constant 4 : i32
    %165 = arith.muli %arg1, %c4_i32_90 : i32
    %c2_i32 = arith.constant 2 : i32
    %166 = arith.addi %165, %c2_i32 : i32
    %167 = arith.index_cast %166 : i32 to index
    %168 = memref.load %arg2[%167] : memref<8xi32, #tpu.memory_space<smem>>
    %c0_i32_91 = arith.constant 0 : i32
    %169 = arith.cmpi sgt, %168, %c0_i32_91 : i32
    %c2_92 = arith.constant 2 : index
    %c0_93 = arith.constant 0 : index
    %c0_94 = arith.constant 0 : index
    %170 = vector.load %arg3[%c2_92, %c0_93, %c0_94] : memref<4x8x16xf32, #tpu.memory_space<vmem>>, vector<1x8x16xf32>
    %171 = vector.shape_cast %170 : vector<1x8x16xf32> to vector<8x16xf32>
    %172 = vector.extract_strided_slice %161 {offsets = [0, 0], sizes = [8, 16], strides = [1, 1]} : vector<8x128xf32> to vector<8x16xf32>
    %173 = arith.select %169, %171, %172 : vector<8x16xf32>
    %174 = arith.truncf %173 : vector<8x16xf32> to vector<8x16xbf16>
    %c0_95 = arith.constant 0 : index
    %c0_96 = arith.constant 0 : index
    %175 = vector.load %arg11[%c0_95, %c0_96] : memref<8x256xbf16, #tpu.memory_space<vmem>>, vector<8x16xbf16>
    tpu.vector_store %arg11[%c0_95, %c0_96], %174 {strides = array<i32>} : memref<8x256xbf16, #tpu.memory_space<vmem>>, vector<8x16xbf16>,
    %c0_97 = arith.constant 0 : index
    %c128_98 = arith.constant 128 : index
    %176 = vector.load %arg11[%c0_97, %c128_98] : memref<8x256xbf16, #tpu.memory_space<vmem>>, vector<8x128xbf16>
    tpu.vector_store %arg11[%c0_97, %c128_98], %158 {strides = array<i32>} : memref<8x256xbf16, #tpu.memory_space<vmem>>, vector<8x128xbf16>,
    %c0_99 = arith.constant 0 : index
    %c0_100 = arith.constant 0 : index
    %177 = vector.load %arg11[%c0_99, %c0_100] : memref<8x256xbf16, #tpu.memory_space<vmem>>, vector<8x256xbf16>
    %c0_101 = arith.constant 0 : index
    %c0_102 = arith.constant 0 : index
    %178 = vector.load %arg6[%c0_101, %c0_102] : memref<256x512xbf16, #tpu.memory_space<vmem>>, vector<256x512xbf16>
    %cst_103 = arith.constant dense<0.000000e+00> : vector<8x512xf32>
    %179 = tpu.matmul %177, %178, %cst_103 {dimension_numbers = #tpu.dot_dimension_numbers<[1], [0], [0], [1], [0, 0, 1, 1], [], []>} : vector<8x256xbf16>, vector<256x512xbf16>, vector<8x512xf32> -> vector<8x512xf32>
    %180 = arith.addf %179, %5 : vector<8x512xf32>
    %181 = vector.extract_strided_slice %180 {offsets = [0, 0], sizes = [8, 128], strides = [1, 1]} : vector<8x512xf32> to vector<8x128xf32>
    %cst_104 = arith.constant 5.000000e-01 : f32
    %182 = vector.broadcast %cst_104 : f32 to vector<8x128xf32>
    %183 = arith.mulf %182, %181 : vector<8x128xf32>
    %184 = math.tanh %183 : vector<8x128xf32>
    %cst_105 = arith.constant 5.000000e-01 : f32
    %185 = vector.broadcast %cst_105 : f32 to vector<8x128xf32>
    %186 = arith.mulf %185, %184 : vector<8x128xf32>
    %cst_106 = arith.constant 5.000000e-01 : f32
    %187 = vector.broadcast %cst_106 : f32 to vector<8x128xf32>
    %188 = arith.addf %186, %187 : vector<8x128xf32>
    %189 = vector.extract_strided_slice %180 {offsets = [0, 128], sizes = [8, 128], strides = [1, 1]} : vector<8x512xf32> to vector<8x128xf32>
    %cst_107 = arith.constant 5.000000e-01 : f32
    %190 = vector.broadcast %cst_107 : f32 to vector<8x128xf32>
    %191 = arith.mulf %190, %189 : vector<8x128xf32>
    %192 = math.tanh %191 : vector<8x128xf32>
    %cst_108 = arith.constant 5.000000e-01 : f32
    %193 = vector.broadcast %cst_108 : f32 to vector<8x128xf32>
    %194 = arith.mulf %193, %192 : vector<8x128xf32>
    %cst_109 = arith.constant 5.000000e-01 : f32
    %195 = vector.broadcast %cst_109 : f32 to vector<8x128xf32>
    %196 = arith.addf %194, %195 : vector<8x128xf32>
    %197 = vector.extract_strided_slice %180 {offsets = [0, 256], sizes = [8, 128], strides = [1, 1]} : vector<8x512xf32> to vector<8x128xf32>
    %198 = math.tanh %197 : vector<8x128xf32>
    %199 = vector.extract_strided_slice %180 {offsets = [0, 384], sizes = [8, 128], strides = [1, 1]} : vector<8x512xf32> to vector<8x128xf32>
    %cst_110 = arith.constant 5.000000e-01 : f32
    %200 = vector.broadcast %cst_110 : f32 to vector<8x128xf32>
    %201 = arith.mulf %200, %199 : vector<8x128xf32>
    %202 = math.tanh %201 : vector<8x128xf32>
    %cst_111 = arith.constant 5.000000e-01 : f32
    %203 = vector.broadcast %cst_111 : f32 to vector<8x128xf32>
    %204 = arith.mulf %203, %202 : vector<8x128xf32>
    %cst_112 = arith.constant 5.000000e-01 : f32
    %205 = vector.broadcast %cst_112 : f32 to vector<8x128xf32>
    %206 = arith.addf %204, %205 : vector<8x128xf32>
    %c0_113 = arith.constant 0 : index
    %c0_114 = arith.constant 0 : index
    %207 = vector.load %arg12[%c0_113, %c0_114] : memref<8x128xf32, #tpu.memory_space<vmem>>, vector<8x128xf32>
    %208 = arith.mulf %196, %207 : vector<8x128xf32>
    %209 = arith.mulf %188, %198 : vector<8x128xf32>
    %210 = arith.addf %208, %209 : vector<8x128xf32>
    %211 = math.tanh %210 : vector<8x128xf32>
    %212 = arith.mulf %206, %211 : vector<8x128xf32>
    %c0_115 = arith.constant 0 : index
    %c0_116 = arith.constant 0 : index
    %213 = vector.load %arg12[%c0_115, %c0_116] : memref<8x128xf32, #tpu.memory_space<vmem>>, vector<8x128xf32>
    tpu.vector_store %arg12[%c0_115, %c0_116], %210 {strides = array<i32>} : memref<8x128xf32, #tpu.memory_space<vmem>>, vector<8x128xf32>,
    %214 = arith.truncf %212 : vector<8x128xf32> to vector<8x128xbf16>
    %c0_117 = arith.constant 0 : index
    %c0_118 = arith.constant 0 : index
    %215 = vector.load %arg8[%c0_117, %c0_118] : memref<128x128xbf16, #tpu.memory_space<vmem>>, vector<128x128xbf16>
    %cst_119 = arith.constant dense<0.000000e+00> : vector<8x128xf32>
    %216 = tpu.matmul %214, %215, %cst_119 {dimension_numbers = #tpu.dot_dimension_numbers<[1], [0], [0], [1], [0, 0, 1, 1], [], []>} : vector<8x128xbf16>, vector<128x128xbf16>, vector<8x128xf32> -> vector<8x128xf32>
    %217 = arith.addf %216, %8 : vector<8x128xf32>
    %c3 = arith.constant 3 : index
    %c0_120 = arith.constant 0 : index
    %c0_121 = arith.constant 0 : index
    %218 = vector.load %arg10[%c3, %c0_120, %c0_121] : memref<4x8x128xf32, #tpu.memory_space<vmem>>, vector<1x8x128xf32>
    %219 = vector.shape_cast %218 : vector<1x8x128xf32> to vector<8x128xf32>
    %220 = vector.shape_cast %217 : vector<8x128xf32> to vector<1x8x128xf32>
    tpu.vector_store %arg10[%c3, %c0_120, %c0_121], %220 {strides = array<i32>} : memref<4x8x128xf32, #tpu.memory_space<vmem>>, vector<1x8x128xf32>,
    %c4_i32_122 = arith.constant 4 : i32
    %221 = arith.muli %arg1, %c4_i32_122 : i32
    %c3_i32 = arith.constant 3 : i32
    %222 = arith.addi %221, %c3_i32 : i32
    %223 = arith.index_cast %222 : i32 to index
    %224 = memref.load %arg2[%223] : memref<8xi32, #tpu.memory_space<smem>>
    %c0_i32_123 = arith.constant 0 : i32
    %225 = arith.cmpi sgt, %224, %c0_i32_123 : i32
    %c3_124 = arith.constant 3 : index
    %c0_125 = arith.constant 0 : index
    %c0_126 = arith.constant 0 : index
    %226 = vector.load %arg3[%c3_124, %c0_125, %c0_126] : memref<4x8x16xf32, #tpu.memory_space<vmem>>, vector<1x8x16xf32>
    %227 = vector.shape_cast %226 : vector<1x8x16xf32> to vector<8x16xf32>
    %228 = vector.extract_strided_slice %217 {offsets = [0, 0], sizes = [8, 16], strides = [1, 1]} : vector<8x128xf32> to vector<8x16xf32>
    %229 = arith.select %225, %227, %228 : vector<8x16xf32>
    %230 = arith.truncf %229 : vector<8x16xf32> to vector<8x16xbf16>
    %c0_127 = arith.constant 0 : index
    %c0_128 = arith.constant 0 : index
    %231 = vector.load %arg11[%c0_127, %c0_128] : memref<8x256xbf16, #tpu.memory_space<vmem>>, vector<8x16xbf16>
    tpu.vector_store %arg11[%c0_127, %c0_128], %230 {strides = array<i32>} : memref<8x256xbf16, #tpu.memory_space<vmem>>, vector<8x16xbf16>,
    %c0_129 = arith.constant 0 : index
    %c128_130 = arith.constant 128 : index
    %232 = vector.load %arg11[%c0_129, %c128_130] : memref<8x256xbf16, #tpu.memory_space<vmem>>, vector<8x128xbf16>
    tpu.vector_store %arg11[%c0_129, %c128_130], %214 {strides = array<i32>} : memref<8x256xbf16, #tpu.memory_space<vmem>>, vector<8x128xbf16>,
    return
  }
  func.func @transform_0(%arg0: i32, %arg1: i32, %arg2: memref<8xi32, #tpu.memory_space<smem>>) -> (i32, i32, i32) {
    %c0_i32 = arith.constant 0 : i32
    %c0_i32_0 = arith.constant 0 : i32
    return %arg1, %arg0, %c0_i32 : i32, i32, i32
  }
  func.func @transform_1(%arg0: i32, %arg1: i32, %arg2: memref<8xi32, #tpu.memory_space<smem>>) -> (i32, i32) {
    %c0_i32 = arith.constant 0 : i32
    %c0_i32_0 = arith.constant 0 : i32
    return %arg0, %c0_i32 : i32, i32
  }
  func.func @transform_2(%arg0: i32, %arg1: i32, %arg2: memref<8xi32, #tpu.memory_space<smem>>) -> (i32, i32) {
    %c0_i32 = arith.constant 0 : i32
    %c0_i32_0 = arith.constant 0 : i32
    return %arg0, %c0_i32 : i32, i32
  }
  func.func @transform_3(%arg0: i32, %arg1: i32, %arg2: memref<8xi32, #tpu.memory_space<smem>>) -> (i32, i32) {
    %c0_i32 = arith.constant 0 : i32
    %c0_i32_0 = arith.constant 0 : i32
    %c0_i32_1 = arith.constant 0 : i32
    return %c0_i32, %c0_i32_0 : i32, i32
  }
  func.func @transform_4(%arg0: i32, %arg1: i32, %arg2: memref<8xi32, #tpu.memory_space<smem>>) -> (i32, i32) {
    %c0_i32 = arith.constant 0 : i32
    %c0_i32_0 = arith.constant 0 : i32
    %c0_i32_1 = arith.constant 0 : i32
    return %c0_i32, %c0_i32_0 : i32, i32
  }
  func.func @transform_5(%arg0: i32, %arg1: i32, %arg2: memref<8xi32, #tpu.memory_space<smem>>) -> (i32, i32) {
    %c0_i32 = arith.constant 0 : i32
    %c0_i32_0 = arith.constant 0 : i32
    %c0_i32_1 = arith.constant 0 : i32
    return %c0_i32, %c0_i32_0 : i32, i32
  }
  func.func @transform_6(%arg0: i32, %arg1: i32, %arg2: memref<8xi32, #tpu.memory_space<smem>>) -> (i32, i32) {
    %c0_i32 = arith.constant 0 : i32
    %c0_i32_0 = arith.constant 0 : i32
    %c0_i32_1 = arith.constant 0 : i32
    return %c0_i32, %c0_i32_0 : i32, i32
  }
  func.func @transform_7(%arg0: i32, %arg1: i32, %arg2: memref<8xi32, #tpu.memory_space<smem>>) -> (i32, i32, i32) {
    %c0_i32 = arith.constant 0 : i32
    %c0_i32_0 = arith.constant 0 : i32
    return %arg1, %arg0, %c0_i32 : i32, i32, i32
  }
}

</mosaic_0001>

<bundles_post_ra>
// kernel: tpu_custom_call.1
= control target key start
LH: loop header
LB: loop body
LE: loop exit
PB: predicated region body
PF: predicated region fallthrough
CT: control target
= control target key end

     0   :  { %s4891_s30 = smov [#allocation5]   ;;  %s5238_s0 = inlined_call_operand.hbm [shape: s32[8], index: 0, kind: input, shape index: {}]   ;;  %s5239_s1 = inlined_call_operand.hbm [shape: f32[8,8,16], index: 1, kind: input, shape index: {}]   ;;  %s5240_s2 = inlined_call_operand.hbm [shape: f32[8,128], index: 2, kind: input, shape index: {}]   ;;  %s5241_s3 = inlined_call_operand.hbm [shape: f32[8,128], index: 3, kind: input, shape index: {}]   ;;  %s5242_s4 = inlined_call_operand.hbm [shape: bf16[256,512], index: 4, kind: input, shape index: {}]   ;;  %s5243_s5 = inlined_call_operand.vmem [shape: f32[1,512], index: 5, kind: input, shape index: {}]   ;;  %s5244_s6 = inlined_call_operand.hbm [shape: bf16[128,128], index: 6, kind: input, shape index: {}]   ;;  %s5245_s7 = inlined_call_operand.vmem [shape: f32[1,128], index: 7, kind: input, shape index: {}]   ;;  %s5246_s8 = inlined_call_operand.hbm [shape: f32[8,8,128], index: 8, kind: output, shape index: {}]  }
   0x1   :  { %5248 = sst [smem:[#allocation22_spill]] %s5240_s2  ;;  %s14_s29 = sshll.u32 %s5238_s0, 4  ;;  %s15_s29 = int_to_ptr.hbm [resolvable:$true] %s14_s29 }
   0x2   :  { %5249 = sst [smem:[#allocation23_spill]] %s5241_s3 }
   0x3   :  { %5250 = sst [smem:[#allocation24_spill]] %s5242_s4 }
   0x4   :  { %5251 = sst [smem:[#allocation25_spill]] %s5244_s6 }
   0x5   :  { %17 = dma.hbm_to_smem %s15_s29, 16, %s4891_s30, [#allocation4] }
   0x6   :  { %4849 = dma.done.wait [#allocation4], 16 }
   0x7   :  { %4850 = vsyncadd [#allocation4], 4294967280 }
   0x8   :  { %20 = sfence }
   0x9   :  { %21 = vsyncpa [#allocation7], 0 }
   0xa   :  { %23 = vsyncpa [#allocation7 + $0x1], 0 }
   0xb   :  { %24 = vsyncpa [#allocation10], 0 }
   0xc   :  { %25 = vsyncpa [#allocation13], 0 }
   0xd   :  { %26 = vsyncpa [#allocation8], 0 }
   0xe   :  { %28 = vsyncpa [#allocation8 + $0x1], 0  ;;  %s4953_s9 = smov 0   ;;  %s4955_s10 = smov 0  }
   0xf   :  { %s4957_s11 = smov 0   ;;  %s4959_s12 = smov 0  }
  0x10   :  { %s4961_s0 = smov 0   ;;  %s4963_s13 = smov 0  }
  0x11 LB: > { %s3007_s14 = sadd.s32 4294967295, %s4889_s13   ;;  %s3008_s15 = sadd.s32 4294967294, %s4889_s13   ;;  %s4889_s13 = sphi %s4963_s13, %s34_s13   ;;  %s4885_s0 = sphi %s4961_s0, %s5270_s0   ;;  %s4881_s12 = sphi %s4959_s12, %s5269_s12   ;;  %s4877_s11 = sphi %s4957_s11, %s5268_s11   ;;  %s4873_s10 = sphi %s4955_s10, %s5267_s10   ;;  %s4869_s9 = sphi %s4953_s9, %s5266_s9  }
  0x12   : > { %p68_p0 = scmp.ne.s32.totalorder %s4873_s10, %s4869_s9  ;;  %p4987_p1 = scmp.eq.s32.totalorder %s3007_s14, 0 }
  0x13   : > { %p4991_p2 = scmp.eq.s32.totalorder %s3007_s14, 1  ;;  %p236_p3 = scmp.eq.s32.totalorder %s3008_s15, 1 }
  0x14   : > { %p4997_p4 = por %p4987_p1, %p68_p0  ;;  %p3009_p5 = scmp.ge.s32.totalorder %s4889_s13, 1 }
  0x15   : > { %p5002_p6 = por %p236_p3, %p68_p0  ;;  %p243_p7 = scmp.lt.s32.totalorder %s4889_s13, 3 }
  0x16   : > { %s5256_s2 = sld [smem:[#allocation22_spill]]  ;;  %p3014_p9 = scmp.ge.s32.totalorder %s4889_s13, 2 }
  0x17   : > { %p5010_p8 = pnand %p3009_p5, %p243_p7  ;;  %s4892_s24 = smov [#allocation9]  }
  0x18   : > { %s259_s25 = sshll.u32 %s4892_s24, 4  ;;  %s5258_s4 = sld [smem:[#allocation24_spill]]  ;;  %s260_s25 = int_to_ptr.vmem [resolvable:$true] %s259_s25 }
  0x19   : > { %p4500_p10 = pneg %p5010_p8  ;;  %s4893_s30 = smov [#allocation12]  }
  0x1a   : > { %s284_s14 = sshll.u32 %s4893_s30, 4  ;;  %s4894_s15 = smov 256   ;;  %s285_s14 = int_to_ptr.vmem [resolvable:$true] %s284_s14 }
  0x1b   : > { %p5022_p11 = pnand %p4500_p10, %p4987_p1  ;;  %s4895_s20 = smov 16  }
  0x1c   : > { %s257_s22 = sshll.u32 %s5256_s2, 4  ;;  %s5260_s3 = sld [smem:[#allocation23_spill]]  ;;  %s258_s22 = int_to_ptr.hbm [resolvable:$true] %s257_s22 }
  0x1d   : > { %4503 = dma.hbm_to_vmem [thread:$0]  (!%p5022_p11), %s258_s22, 128, %s260_s25, [#allocation10]  }
  0x1e   : > { %s282_s28 = sshll.u32 %s5258_s4, 4  ;;  %s4896_s27 = smov [#allocation11]   ;;  %s283_s28 = int_to_ptr.hbm [resolvable:$true] %s282_s28 }
  0x1f   : > { %4509 = dma.hbm_to_vmem [thread:$0]  (!%p5022_p11), %s283_s28, 8192, %s285_s14, [#allocation13], %s4894_s15, %s4894_s15, %s4895_s20  }
  0x20   : > { %s273_s30 = sshll.u32 %s4896_s27, 4  ;;  %s5261_s6 = sld [smem:[#allocation25_spill]]  ;;  %s274_s30 = int_to_ptr.vmem [resolvable:$true] %s273_s30 }
  0x21   : > { %s4897_s28 = smov [#allocation14]   ;;  %s4898_s15 = smov 64  }
  0x22   : > { %s271_s26 = sshll.u32 %s5260_s3, 4  ;;  %s301_s14 = sshll.u32 %s4897_s28, 4  ;;  %s272_s26 = int_to_ptr.hbm [resolvable:$true] %s271_s26  ;;  %s302_s14 = int_to_ptr.vmem [resolvable:$true] %s301_s14 }
  0x23   : > { %4506 = dma.hbm_to_vmem [thread:$0]  (!%p5022_p11), %s272_s26, 128, %s274_s30, [#allocation10]  }
  0x24   : > { %s4899_s20 = smov 4   ;;  %s43_s21 = sadd.s32 1, %s4885_s0 }
  0x25   : > { %s55_s24 = sadd.s32 1, %s4877_s11  ;;  %p44_p12 = scmp.ge.s32.totalorder %s43_s21, 2 }
  0x26   : > { %s299_s2 = sshll.u32 %s5261_s6, 4  ;;  %p62_p13 = scmp.ne.s32.totalorder %s4877_s11, %s4873_s10  ;;  %s300_s2 = int_to_ptr.hbm [resolvable:$true] %s299_s2 }
  0x27   : > { %4512 = dma.hbm_to_vmem [thread:$0]  (!%p5022_p11), %s300_s2, 1024, %s302_s14, [#allocation13], %s4898_s15, %s4898_s15, %s4899_s20  }
  0x28   : > { %p63_p0 = scmp.eq.s32.totalorder %s4889_s13, 0  ;;  %p4525_p3 = scmp.lt.s32.totalorder %s4889_s13, 2 }
  0x29   : > { %s5272_s21 = smov (%p44_p12, %s43_s21), 0  ;;  %p5054_p7 = por %p4991_p2, %p62_p13 }
  0x2a   : > { %5262 = sst [smem:[#allocation21_spill]] %s5272_s21  ;;  %p5048_p5 = por %p63_p0, %p62_p13 }
  0x2b   : > { %s50_s2 = ssub.s32 %s4885_s0, %s5272_s21  ;;  %s318_s27 = sand.u32 1, %s4877_s11  }
  0x2c   : > { %p53_p10 = scmp.eq.s32.totalorder %s50_s2, 0  ;;  %s3015_s30 = sshll.u32 %s318_s27, 5 }
  0x2d   : > { %s4190_s22 = sshll.u32 %s4885_s0, 5  ;;  %s322_s3 = scalar_lea.vmem [#allocation6], %s3015_s30 }
  0x2e   : > { %s5063_s25 = scalar_select %p53_p10, %s4877_s11, %s55_s24  }
  0x2f   : > { %s328_s15 = scalar_lea.hbm %s5239_s1, %s4190_s22  ;;  %s331_s4 = sshll.u32 %s322_s3, 4  ;;  %s332_s4 = int_to_ptr.vmem [resolvable:$true] %s331_s4 }
  0x30   : > { %s329_s20 = sshll.u32 %s328_s15, 4  ;;  %p4514_p2 = pnand %p4525_p3, %p5048_p5  ;;  %s330_s20 = int_to_ptr.hbm [resolvable:$true] %s329_s20 }
  0x31   : > { %s319_s17 = scalar_lea.sflag [#allocation7], %s318_s27  ;;  %s4900_s6 = smov 128  }
  0x32   : > { %s4901_s21 = smov 8   ;;  %343 = sbr.rel (%p5010_p8) target bundleno = 1387 (0x56b), region = 48 }
  0x33   : > { %4516 = dma.hbm_to_vmem [thread:$0]  (!%p4514_p2), %s330_s20, 512, %s332_s4, %s319_s17, %s4900_s6, %s4900_s6, %s4901_s21  }
  0x34   : > { %s5075_s24 = sand.u32 (!%p5010_p8), 1, %s4873_s10  }
  0x35   : > { %s3019_s2 = sshll.u32 (!%p5010_p8), %s5075_s24, 5  ;;  %s346_s3 = scalar_lea.sflag (!%p5010_p8), [#allocation7], %s5075_s24 }
  0x36   : > { %s5079_s30 = scalar_lea.vmem (!%p5010_p8), [#allocation6], %s3019_s2 }
  0x37   : > { %4852 = dma.done.wait (%p4997_p4), %s346_s3, 512  }
  0x38   : > { %4854 = vsyncadd (%p4997_p4), %s346_s3, 4294966784 }
  0x39   : > { %4856 = dma.done.wait (%p4987_p1), [#allocation10], 256  }
  0x3a   : > { %4858 = vsyncadd (%p4987_p1), [#allocation10], 4294967040 }
  0x3b   : > { %4860 = dma.done.wait (%p4987_p1), [#allocation13], 9216  }
  0x3c   : > { %4862 = vsyncadd (%p4987_p1), [#allocation13], 4294958080  ;;  %s5093_s4 = scalar_lea.vmem [#allocation15], %s3019_s2  ;;  %p3025_p8 = scmp.ne.s32.totalorder %s4881_s12, 0 }
  0x3e   : > { %407 = sbr.rel (%p3025_p8) target bundleno = 72 (0x48), region = 72 }
  0x43   : > { %v408_v0 = vld [vmem:[#allocation11] sm:$0xff]  ;;  %v411_v1 = vld [vmem:[%s5079_s30] sm:$0xff]  ;;  %vm413_vm0 = vcmask 125952   ;;  %v4902_v3 = vmov 0  }
  0x44   : > { %v415_v2 = vld [vmem:[#allocation9] sm:$0xff]  ;;  %410 = vst [vmem:[#allocation2] sm:$0xff] %v4902_v3  ;;  %v412_v4 = vpack.c.bf16 %v411_v1, %v411_v1 }
  0x45   : > { %v416_v5 = vpack.c.bf16 %v415_v2, %v415_v2  ;;  %409 = vst [vmem:[#allocation3] sm:$0xff] %v408_v0 }
  0x46   : > { %414 = vst.msk [vmem:[#allocation2] sm:$0xf] %vm413_vm0, %v412_v4 }
  0x47   : > { %417 = vst [vmem:[#allocation2 + $0x4] sm:$0xf] %v416_v5 }
  0x48 PF: > { %v3140_v6 = vld [vmem:[#allocation12 + $0xe0] sm:$0xf]  ;;  %v4221_v7 = vld [vmem:[#allocation12 + $0xec] sm:$0xf0]  ;;  %v4219_v11 = vld [vmem:[#allocation12 + $0xe4] sm:$0xf] }
  0x49   : > { %v3268_v8 = vld [vmem:[#allocation12 + $0x1e0] sm:$0xf]  ;;  %v3141_v9 = vor.u32 %v4221_v7, %v3140_v6  ;;  %v4253_v10 = vld [vmem:[#allocation12 + $0x1ec] sm:$0xf0]  ;;  %v3142_v12 = vld [vmem:[#allocation12 + $0xf0] sm:$0xf0] }
  0x4a   : > { %v3269_v13 = vor.u32 %v4253_v10, %v3268_v8  ;;  %v3145_v14 = vor.u32 %v4219_v11, %v3142_v12  ;;  %v4251_v15 = vld [vmem:[#allocation12 + $0x1e4] sm:$0xf]  ;;  %v3270_v16 = vld [vmem:[#allocation12 + $0x1f0] sm:$0xf0]  ;;  %v3124_v17 = vld [vmem:[#allocation12 + $0xc0] sm:$0xf] }
  0x4b   : > { %824 = vmatpush.bf16.msra.mxu0 %v3141_v9  ;;  %v3273_v18 = vor.u32 %v4251_v15, %v3270_v16  ;;  %v4217_v19 = vld [vmem:[#allocation12 + $0xcc] sm:$0xf0]  ;;  %v3252_v20 = vld [vmem:[#allocation12 + $0x1c0] sm:$0xf]  ;;  %v4215_v24 = vld [vmem:[#allocation12 + $0xc4] sm:$0xf] }
  0x4c   : > { %v4249_v21 = vld [vmem:[#allocation12 + $0x1cc] sm:$0xf0]  ;;  %837 = vmatpush.bf16.msra.mxu1 %v3269_v13  ;;  %850 = vmatpush.bf16.msra.mxu2 %v3145_v14  ;;  %v3125_v22 = vor.u32 %v4217_v19, %v3124_v17  ;;  %v3126_v25 = vld [vmem:[#allocation12 + $0xd0] sm:$0xf0]  ;;  %v4247_v26 = vld [vmem:[#allocation12 + $0x1c4] sm:$0xf] }
  0x4d   : > { %v3253_v23 = vor.u32 %v4249_v21, %v3252_v20  ;;  %863 = vmatpush.bf16.msra.mxu3 %v3273_v18  ;;  %v3129_v27 = vor.u32 %v4215_v24, %v3126_v25  ;;  %v3254_v28 = vld [vmem:[#allocation12 + $0x1d0] sm:$0xf0]  ;;  %v3108_v29 = vld [vmem:[#allocation12 + $0xa0] sm:$0xf]  ;;  %v4213_v30 = vld [vmem:[#allocation12 + $0xac] sm:$0xf0] }
  0x4e   : > { %v3257_v31 = vor.u32 %v4247_v26, %v3254_v28  ;;  %v3236_v32 = vld [vmem:[#allocation12 + $0x1a0] sm:$0xf]  ;;  %v4245_v33 = vld [vmem:[#allocation12 + $0x1ac] sm:$0xf0]  ;;  %v4211_v34 = vld [vmem:[#allocation12 + $0xa4] sm:$0xf]  ;;  %v3109_v35 = vor.u32 %v4213_v30, %v3108_v29 }
  0x4f   : > { %825 = vmatpush.bf16.msra.mxu0 %v3125_v22  ;;  %v3110_v36 = vld [vmem:[#allocation12 + $0xb0] sm:$0xf0]  ;;  %v4243_v37 = vld [vmem:[#allocation12 + $0x1a4] sm:$0xf]  ;;  %v3237_v39 = vor.u32 %v4245_v33, %v3236_v32  ;;  %v3092_v41 = vld [vmem:[#allocation12 + $0x80] sm:$0xf] }
  0x50   : > { %v3238_v38 = vld [vmem:[#allocation12 + $0x1b0] sm:$0xf0]  ;;  %838 = vmatpush.bf16.msra.mxu1 %v3253_v23  ;;  %851 = vmatpush.bf16.msra.mxu2 %v3129_v27  ;;  %v3113_v40 = vor.u32 %v4211_v34, %v3110_v36  ;;  %v4209_v42 = vld [vmem:[#allocation12 + $0x8c] sm:$0xf0]  ;;  %v3220_v43 = vld [vmem:[#allocation12 + $0x180] sm:$0xf] }
  0x51   : > { %864 = vmatpush.bf16.msra.mxu3 %v3257_v31  ;;  %v3241_v44 = vor.u32 %v4243_v37, %v3238_v38  ;;  %v4241_v45 = vld [vmem:[#allocation12 + $0x18c] sm:$0xf0]  ;;  %v4207_v46 = vld [vmem:[#allocation12 + $0x84] sm:$0xf]  ;;  %v3094_v47 = vld [vmem:[#allocation12 + $0x90] sm:$0xf0]  ;;  %v3093_v50 = vor.u32 %v4209_v42, %v3092_v41 }
  0x52   : > { %v4239_v48 = vld [vmem:[#allocation12 + $0x184] sm:$0xf]  ;;  %v3222_v49 = vld [vmem:[#allocation12 + $0x190] sm:$0xf0]  ;;  %v3221_v51 = vor.u32 %v4241_v45, %v3220_v43  ;;  %v3097_v52 = vor.u32 %v4207_v46, %v3094_v47  ;;  %v3076_v53 = vld [vmem:[#allocation12 + $0x60] sm:$0xf] }
  0x53   : > { %826 = vmatpush.bf16.msra.mxu0 %v3109_v35  ;;  %v4205_v54 = vld [vmem:[#allocation12 + $0x6c] sm:$0xf0]  ;;  %v3204_v55 = vld [vmem:[#allocation12 + $0x160] sm:$0xf]  ;;  %v3225_v56 = vor.u32 %v4239_v48, %v3222_v49  ;;  %v4203_v58 = vld [vmem:[#allocation12 + $0x64] sm:$0xf] }
  0x54   : > { %839 = vmatpush.bf16.msra.mxu1 %v3237_v39  ;;  %852 = vmatpush.bf16.msra.mxu2 %v3113_v40  ;;  %v4237_v57 = vld [vmem:[#allocation12 + $0x16c] sm:$0xf0]  ;;  %v3078_v59 = vld [vmem:[#allocation12 + $0x70] sm:$0xf0]  ;;  %v4235_v60 = vld [vmem:[#allocation12 + $0x164] sm:$0xf]  ;;  %v3077_v62 = vor.u32 %v4205_v54, %v3076_v53 }
  0x55   : > { %865 = vmatpush.bf16.msra.mxu3 %v3241_v44  ;;  %v3206_v61 = vld [vmem:[#allocation12 + $0x170] sm:$0xf0]  ;;  %v3205_v63 = vor.u32 %v4237_v57, %v3204_v55  ;;  %v3081_v0 = vor.u32 %v4203_v58, %v3078_v59  ;;  %v3060_v1 = vld [vmem:[#allocation12 + $0x40] sm:$0xf]  ;;  %v4201_v2 = vld [vmem:[#allocation12 + $0x4c] sm:$0xf0] }
  0x56   : > { %v3188_v3 = vld [vmem:[#allocation12 + $0x140] sm:$0xf]  ;;  %v3209_v4 = vor.u32 %v4235_v60, %v3206_v61  ;;  %v4233_v5 = vld [vmem:[#allocation12 + $0x14c] sm:$0xf0]  ;;  %v4199_v6 = vld [vmem:[#allocation12 + $0x44] sm:$0xf]  ;;  %v3061_v10 = vor.u32 %v4201_v2, %v3060_v1 }
  0x57   : > { %827 = vmatpush.bf16.msra.mxu0 %v3093_v50  ;;  %v3062_v7 = vld [vmem:[#allocation12 + $0x50] sm:$0xf0]  ;;  %v4231_v8 = vld [vmem:[#allocation12 + $0x144] sm:$0xf]  ;;  %v3189_v11 = vor.u32 %v4233_v5, %v3188_v3  ;;  %v3044_v13 = vld [vmem:[#allocation12 + $0x20] sm:$0xf] }
  0x58   : > { %840 = vmatpush.bf16.msra.mxu1 %v3221_v51  ;;  %853 = vmatpush.bf16.msra.mxu2 %v3097_v52  ;;  %v3190_v9 = vld [vmem:[#allocation12 + $0x150] sm:$0xf0]  ;;  %v3065_v12 = vor.u32 %v4199_v6, %v3062_v7  ;;  %v4197_v14 = vld [vmem:[#allocation12 + $0x2c] sm:$0xf0]  ;;  %v3172_v15 = vld [vmem:[#allocation12 + $0x120] sm:$0xf] }
  0x59   : > { %866 = vmatpush.bf16.msra.mxu3 %v3225_v56  ;;  %v3193_v16 = vor.u32 %v4231_v8, %v3190_v9  ;;  %v4229_v17 = vld [vmem:[#allocation12 + $0x12c] sm:$0xf0]  ;;  %v4195_v18 = vld [vmem:[#allocation12 + $0x24] sm:$0xf]  ;;  %v3046_v19 = vld [vmem:[#allocation12 + $0x30] sm:$0xf0]  ;;  %v3045_v22 = vor.u32 %v4197_v14, %v3044_v13 }
  0x5a   : > { %v4227_v20 = vld [vmem:[#allocation12 + $0x124] sm:$0xf]  ;;  %v3174_v21 = vld [vmem:[#allocation12 + $0x130] sm:$0xf0]  ;;  %v3028_v23 = vld [vmem:[#allocation12] sm:$0xf]  ;;  %v3173_v26 = vor.u32 %v4229_v17, %v3172_v15  ;;  %v3049_v27 = vor.u32 %v4195_v18, %v3046_v19 }
  0x5b   : > { %828 = vmatpush.bf16.msra.mxu0 %v3077_v62  ;;  %v4193_v24 = vld [vmem:[#allocation12 + $0xc] sm:$0xf0]  ;;  %v3156_v25 = vld [vmem:[#allocation12 + $0x100] sm:$0xf]  ;;  %v4191_v29 = vld [vmem:[#allocation12 + $0x4] sm:$0xf]  ;;  %v3177_v31 = vor.u32 %v4227_v20, %v3174_v21 }
  0x5c   : > { %841 = vmatpush.bf16.msra.mxu1 %v3205_v63  ;;  %854 = vmatpush.bf16.msra.mxu2 %v3081_v0  ;;  %v4225_v28 = vld [vmem:[#allocation12 + $0x10c] sm:$0xf0]  ;;  %v3030_v30 = vld [vmem:[#allocation12 + $0x10] sm:$0xf0]  ;;  %v4223_v32 = vld [vmem:[#allocation12 + $0x104] sm:$0xf]  ;;  %v3029_v38 = vor.u32 %v4193_v24, %v3028_v23 }
  0x5d   : > { %867 = vmatpush.bf16.msra.mxu3 %v3209_v4  ;;  %v3158_v33 = vld [vmem:[#allocation12 + $0x110] sm:$0xf0]  ;;  %v3148_v34 = vld [vmem:[#allocation12 + $0xe8] sm:$0xf]  ;;  %v4222_v35 = vld [vmem:[#allocation12 + $0xf4] sm:$0xf0]  ;;  %v3157_v43 = vor.u32 %v4225_v28, %v3156_v25  ;;  %v3033_v44 = vor.u32 %v4191_v29, %v3030_v30 }
  0x5e   : > { %v3276_v36 = vld [vmem:[#allocation12 + $0x1e8] sm:$0xf]  ;;  %v432_v37 = vld [vmem:[#allocation2] sm:$0xff]  ;;  %v4254_v39 = vld [vmem:[#allocation12 + $0x1f4] sm:$0xf0]  ;;  %v3161_v48 = vor.u32 %v4223_v32, %v3158_v33  ;;  %v3149_v49 = vor.u32 %v4222_v35, %v3148_v34  ;;  %s5128_s18 = sshll.u32 %s4881_s12, 2 }
  0x5f   : > { %829 = vmatpush.bf16.msra.mxu0 %v3061_v10  ;;  %v4220_v40 = vld [vmem:[#allocation12 + $0xec] sm:$0xf]  ;;  %v3150_v41 = vld [vmem:[#allocation12 + $0xf8] sm:$0xf0]  ;;  %v498_v42 = vunpack.c.l.b16 %v432_v37  ;;  %v499_v47 = vunpack.c.h.b16 %v432_v37  ;;  %v3277_v50 = vor.u32 %v4254_v39, %v3276_v36  ;;  %v3132_v52 = vld [vmem:[#allocation12 + $0xc8] sm:$0xf] }
  0x60   : > { %842 = vmatpush.bf16.msra.mxu1 %v3189_v11  ;;  %855 = vmatpush.bf16.msra.mxu2 %v3065_v12  ;;  %v4252_v45 = vld [vmem:[#allocation12 + $0x1ec] sm:$0xf]  ;;  %v3278_v46 = vld [vmem:[#allocation12 + $0x1f8] sm:$0xf0]  ;;  %v3153_v51 = vor.u32 %v4220_v40, %v3150_v41  ;;  %v4218_v53 = vld [vmem:[#allocation12 + $0xd4] sm:$0xf0] }
  0x61   : > { %868 = vmatpush.bf16.msra.mxu3 %v3193_v16  ;;  %v3260_v54 = vld [vmem:[#allocation12 + $0x1c8] sm:$0xf]  ;;  %v3281_v55 = vor.u32 %v4252_v45, %v3278_v46  ;;  %v4250_v56 = vld [vmem:[#allocation12 + $0x1d4] sm:$0xf0]  ;;  %v4216_v57 = vld [vmem:[#allocation12 + $0xcc] sm:$0xf]  ;;  %v5097_v59 = vpack.c.b16 %v498_v42, %v498_v42  ;;  %v5099_v62 = vpack.c.b16 %v499_v47, %v499_v47  ;;  %v3133_v63 = vor.u32 %v4218_v53, %v3132_v52 }
  0x62   : > { %v3134_v58 = vld [vmem:[#allocation12 + $0xd8] sm:$0xf0]  ;;  %v4248_v60 = vld [vmem:[#allocation12 + $0x1cc] sm:$0xf]  ;;  %v3261_v0 = vor.u32 %v4250_v56, %v3260_v54  ;;  %v3116_v2 = vld [vmem:[#allocation12 + $0xa8] sm:$0xf] }
  0x63   : > { %830 = vmatpush.bf16.msra.mxu0 %v3045_v22  ;;  %v3262_v61 = vld [vmem:[#allocation12 + $0x1d8] sm:$0xf0]  ;;  %v3137_v1 = vor.u32 %v4216_v57, %v3134_v58  ;;  %v4214_v3 = vld [vmem:[#allocation12 + $0xb4] sm:$0xf0]  ;;  %v3244_v4 = vld [vmem:[#allocation12 + $0x1a8] sm:$0xf] }
  0x64   : > { %843 = vmatpush.bf16.msra.mxu1 %v3173_v26  ;;  %856 = vmatpush.bf16.msra.mxu2 %v3049_v27  ;;  %v3265_v5 = vor.u32 %v4248_v60, %v3262_v61  ;;  %v4246_v6 = vld [vmem:[#allocation12 + $0x1b4] sm:$0xf0]  ;;  %v4212_v7 = vld [vmem:[#allocation12 + $0xac] sm:$0xf]  ;;  %v3118_v8 = vld [vmem:[#allocation12 + $0xb8] sm:$0xf0]  ;;  %v3117_v11 = vor.u32 %v4214_v3, %v3116_v2 }
  0x65   : > { %869 = vmatpush.bf16.msra.mxu3 %v3177_v31  ;;  %v4244_v9 = vld [vmem:[#allocation12 + $0x1ac] sm:$0xf]  ;;  %v3246_v10 = vld [vmem:[#allocation12 + $0x1b8] sm:$0xf0]  ;;  %v3245_v12 = vor.u32 %v4246_v6, %v3244_v4  ;;  %v3121_v13 = vor.u32 %v4212_v7, %v3118_v8  ;;  %v3100_v14 = vld [vmem:[#allocation12 + $0x88] sm:$0xf] }
  0x66   : > { %v4210_v15 = vld [vmem:[#allocation12 + $0x94] sm:$0xf0]  ;;  %v3228_v16 = vld [vmem:[#allocation12 + $0x188] sm:$0xf]  ;;  %v3249_v17 = vor.u32 %v4244_v9, %v3246_v10  ;;  %v4208_v19 = vld [vmem:[#allocation12 + $0x8c] sm:$0xf] }
  0x67   : > { %831 = vmatpush.bf16.msra.mxu0 %v3029_v38  ;;  %v4242_v18 = vld [vmem:[#allocation12 + $0x194] sm:$0xf0]  ;;  %v3102_v20 = vld [vmem:[#allocation12 + $0x98] sm:$0xf0]  ;;  %v4240_v21 = vld [vmem:[#allocation12 + $0x18c] sm:$0xf]  ;;  %v3101_v23 = vor.u32 %v4210_v15, %v3100_v14 }
  0x68   : > { %844 = vmatpush.bf16.msra.mxu1 %v3157_v43  ;;  %857 = vmatpush.bf16.msra.mxu2 %v3033_v44  ;;  %v3230_v22 = vld [vmem:[#allocation12 + $0x198] sm:$0xf0]  ;;  %v3084_v24 = vld [vmem:[#allocation12 + $0x68] sm:$0xf]  ;;  %v3229_v25 = vor.u32 %v4242_v18, %v3228_v16  ;;  %v3105_v26 = vor.u32 %v4208_v19, %v3102_v20  ;;  %v4206_v27 = vld [vmem:[#allocation12 + $0x74] sm:$0xf0] }
  0x69   : > { %870 = vmatpush.bf16.msra.mxu3 %v3161_v48  ;;  %v3212_v28 = vld [vmem:[#allocation12 + $0x168] sm:$0xf]  ;;  %v4238_v29 = vld [vmem:[#allocation12 + $0x174] sm:$0xf0]  ;;  %v3233_v30 = vor.u32 %v4240_v21, %v3230_v22  ;;  %v4204_v31 = vld [vmem:[#allocation12 + $0x6c] sm:$0xf]  ;;  %v3085_v35 = vor.u32 %v4206_v27, %v3084_v24 }
  0x6a   : > { %832 = vmatmul.bf16.vlgmr.msra.gmra.mxu0 %v5097_v59  ;;  %v3086_v32 = vld [vmem:[#allocation12 + $0x78] sm:$0xf0]  ;;  %v4236_v33 = vld [vmem:[#allocation12 + $0x16c] sm:$0xf]  ;;  %v3213_v36 = vor.u32 %v4238_v29, %v3212_v28  ;;  %v3068_v38 = vld [vmem:[#allocation12 + $0x48] sm:$0xf] }
  0x6b   : > { %876 = vmatpush.bf16.msrb.mxu0 %v3149_v49  ;;  %858 = vmatmul.bf16.vlgmr.msra.gmra.mxu2 %v5097_v59  ;;  %v3214_v34 = vld [vmem:[#allocation12 + $0x178] sm:$0xf0]  ;;  %v3089_v37 = vor.u32 %v4204_v31, %v3086_v32  ;;  %v4202_v39 = vld [vmem:[#allocation12 + $0x54] sm:$0xf0]  ;;  %v3196_v40 = vld [vmem:[#allocation12 + $0x148] sm:$0xf] }
  0x6c   : > { %889 = vmatpush.bf16.msrb.mxu1 %v3277_v50  ;;  %902 = vmatpush.bf16.msrb.mxu2 %v3153_v51  ;;  %v3217_v41 = vor.u32 %v4236_v33, %v3214_v34  ;;  %v4234_v42 = vld [vmem:[#allocation12 + $0x154] sm:$0xf0]  ;;  %v4200_v43 = vld [vmem:[#allocation12 + $0x4c] sm:$0xf]  ;;  %v3070_v44 = vld [vmem:[#allocation12 + $0x58] sm:$0xf0]  ;;  %v3069_v47 = vor.u32 %v4202_v39, %v3068_v38 }
  0x6d   : > { %915 = vmatpush.bf16.msrb.mxu3 %v3281_v55  ;;  %845 = vmatmul.bf16.vlgmr.msra.gmra.mxu1 %v5099_v62  ;;  %v4232_v45 = vld [vmem:[#allocation12 + $0x14c] sm:$0xf]  ;;  %v3198_v46 = vld [vmem:[#allocation12 + $0x158] sm:$0xf0]  ;;  %v3197_v48 = vor.u32 %v4234_v42, %v3196_v40  ;;  %v3073_v49 = vor.u32 %v4200_v43, %v3070_v44  ;;  %v3052_v50 = vld [vmem:[#allocation12 + $0x28] sm:$0xf] }
  0x6e   : > { %871 = vmatmul.bf16.vlgmr.msra.gmra.mxu3 %v5099_v62  ;;  %v4198_v51 = vld [vmem:[#allocation12 + $0x34] sm:$0xf0]  ;;  %v3180_v52 = vld [vmem:[#allocation12 + $0x128] sm:$0xf]  ;;  %v3201_v53 = vor.u32 %v4232_v45, %v3198_v46  ;;  %v4196_v55 = vld [vmem:[#allocation12 + $0x2c] sm:$0xf] }
  0x6f   : > { %877 = vmatpush.bf16.msrb.mxu0 %v3133_v63  ;;  %v4230_v54 = vld [vmem:[#allocation12 + $0x134] sm:$0xf0]  ;;  %v3054_v56 = vld [vmem:[#allocation12 + $0x38] sm:$0xf0]  ;;  %v4228_v57 = vld [vmem:[#allocation12 + $0x12c] sm:$0xf]  ;;  %v3053_v60 = vor.u32 %v4198_v51, %v3052_v50 }
  0x70   : > { %890 = vmatpush.bf16.msrb.mxu1 %v3261_v0  ;;  %903 = vmatpush.bf16.msrb.mxu2 %v3137_v1  ;;  %v3182_v58 = vld [vmem:[#allocation12 + $0x138] sm:$0xf0]  ;;  %v3181_v61 = vor.u32 %v4230_v54, %v3180_v52  ;;  %v3057_v63 = vor.u32 %v4196_v55, %v3054_v56  ;;  %v3036_v0 = vld [vmem:[#allocation12 + $0x8] sm:$0xf]  ;;  %v4194_v1 = vld [vmem:[#allocation12 + $0x14] sm:$0xf0] }
  0x71   : > { %916 = vmatpush.bf16.msrb.mxu3 %v3265_v5  ;;  %v3164_v2 = vld [vmem:[#allocation12 + $0x108] sm:$0xf]  ;;  %v3185_v3 = vor.u32 %v4228_v57, %v3182_v58  ;;  %v4226_v4 = vld [vmem:[#allocation12 + $0x114] sm:$0xf0]  ;;  %v4192_v5 = vld [vmem:[#allocation12 + $0xc] sm:$0xf]  ;;  %v3037_v9 = vor.u32 %v4194_v1, %v3036_v0 }
  0x72   : > { %v3038_v6 = vld [vmem:[#allocation12 + $0x18] sm:$0xf0]  ;;  %v4224_v7 = vld [vmem:[#allocation12 + $0x10c] sm:$0xf]  ;;  %v3165_v10 = vor.u32 %v4226_v4, %v3164_v2  ;;  %v418_v14 = vld [vmem:[%s5243_s5] sm:$0xf] }
  0x73   : > { %878 = vmatpush.bf16.msrb.mxu0 %v3117_v11  ;;  %v3166_v8 = vld [vmem:[#allocation12 + $0x118] sm:$0xf0]  ;;  %v3041_v11 = vor.u32 %v4192_v5, %v3038_v6  ;;  %v4261_v15 = vld [vmem:[#allocation14 + $0x30] sm:$0xff]  ;;  %v5112_v16 = vperm.slane %v418_v14, 0  ;;  %v4260_v19 = vld [vmem:[#allocation14 + $0x28] sm:$0xff]  ;;  %v5115_v21 = vperm.slane %v418_v14, 1 }
  0x74   : > { %891 = vmatpush.bf16.msrb.mxu1 %v3245_v12  ;;  %904 = vmatpush.bf16.msrb.mxu2 %v3121_v13  ;;  %v3169_v12 = vor.u32 %v4224_v7, %v3166_v8  ;;  %v4262_v13 = vld [vmem:[#allocation14 + $0x38] sm:$0xff]  ;;  %v4257_v32 = vld [vmem:[#allocation14 + $0x10] sm:$0xff]  ;;  %v4256_v34 = vld [vmem:[#allocation14 + $0x8] sm:$0xff]  ;;  %v5118_v40 = vperm.slane %v418_v14, 2  ;;  %s5131_s23 = sld [smem:[#allocation5 + %s5128_s18]]  ;;  %vm1036_vm2 = vcmask 125952  }
  0x75   : > { %917 = vmatpush.bf16.msrb.mxu3 %v3249_v17  ;;  %v4258_v28 = vld [vmem:[#allocation14 + $0x18] sm:$0xff]  ;;  %v3429_v42 = vld [vmem:[#allocation12 + $0xe0] sm:$0xf]  ;;  %v4293_v43 = vld [vmem:[#allocation12 + $0xec] sm:$0xf0]  ;;  %s1635_s22 = sadd.s32 1, %s5128_s18 }
  0x76   : > { %v3557_v44 = vld [vmem:[#allocation12 + $0x1e0] sm:$0xf]  ;;  %v3430_v45 = vor.u32 %v4293_v43, %v3429_v42  ;;  %v4325_v46 = vld [vmem:[#allocation12 + $0x1ec] sm:$0xf0]  ;;  %v4323_v51 = vld [vmem:[#allocation12 + $0x1e4] sm:$0xf] }
  0x77   : > { %879 = vmatpush.bf16.msrb.mxu0 %v3101_v23  ;;  %v3559_v52 = vld [vmem:[#allocation12 + $0x1f0] sm:$0xf0]  ;;  %v4289_v56 = vld [vmem:[#allocation12 + $0xcc] sm:$0xf0]  ;;  %v3541_v57 = vld [vmem:[#allocation12 + $0x1c0] sm:$0xf] }
  0x78   : > { %892 = vmatpush.bf16.msrb.mxu1 %v3229_v25  ;;  %905 = vmatpush.bf16.msrb.mxu2 %v3105_v26  ;;  %v3562_v55 = vor.u32 %v4323_v51, %v3559_v52  ;;  %v4321_v58 = vld [vmem:[#allocation12 + $0x1cc] sm:$0xf0]  ;;  %v4287_v1 = vld [vmem:[#allocation12 + $0xc4] sm:$0xf]  ;;  %v3415_v2 = vld [vmem:[#allocation12 + $0xd0] sm:$0xf0] }
  0x79   : > { %918 = vmatpush.bf16.msrb.mxu3 %v3233_v30  ;;  %v3542_v0 = vor.u32 %v4321_v58, %v3541_v57  ;;  %v3418_v4 = vor.u32 %v4287_v1, %v3415_v2  ;;  %v3543_v5 = vld [vmem:[#allocation12 + $0x1d0] sm:$0xf0]  ;;  %v3397_v6 = vld [vmem:[#allocation12 + $0xa0] sm:$0xf]  ;;  %v4285_v7 = vld [vmem:[#allocation12 + $0xac] sm:$0xf0] }
  0x7a   : > { %v3365_v43 = vld [vmem:[#allocation12 + $0x60] sm:$0xf]  ;;  %v3495_v51 = vld [vmem:[#allocation12 + $0x170] sm:$0xf0]  ;;  %v4305_v1 = vld [vmem:[#allocation12 + $0x14c] sm:$0xf0] }
  0x7b   : > { %880 = vmatpush.bf16.msrb.mxu0 %v3085_v35  ;;  %v3349_v58 = vld [vmem:[#allocation12 + $0x40] sm:$0xf]  ;;  %v4271_v2 = vld [vmem:[#allocation12 + $0x44] sm:$0xf]  ;;  %p1029_p1 = scmp.gt.s32.totalorder %s5131_s23, 0  ;;  %s5157_s28 = sld [smem:[#allocation5 + %s1635_s22]] }
  0x7c   : > { %893 = vmatpush.bf16.msrb.mxu1 %v3213_v36  ;;  %906 = vmatpush.bf16.msrb.mxu2 %v3089_v37  ;;  %v4255_v37 = vld [vmem:[#allocation14] sm:$0xff]  ;;  %s2243_s15 = sadd.s32 2, %s5128_s18  ;;  %s2851_s6 = sadd.s32 3, %s5128_s18 }
  0x7d   : > { %919 = vmatpush.bf16.msrb.mxu3 %v3217_v41  ;;  %v5120_v41 = vperm.slane %v418_v14, 3  ;;  %v3399_v14 = vld [vmem:[#allocation12 + $0xb0] sm:$0xf0]  ;;  %s5136_s21 = scalar_select %p1029_p1, 1, 0 }
  0x7e   : > { %s5175_s20 = sld [smem:[#allocation5 + %s2243_s15]]  ;;  %s4479_s23 = sshll.u32 %s4881_s12, 5 }
  0x7f   : > { %881 = vmatpush.bf16.msrb.mxu0 %v3069_v47  ;;  %v4291_v47 = vld [vmem:[#allocation12 + $0xe4] sm:$0xf]  ;;  %s2852_s16 = sld [smem:[#allocation5 + %s2851_s6]]  ;;  %s2876_s22 = scalar_lea.hbm %s5246_s8, %s4479_s23 }
  0x80   : > { %894 = vmatpush.bf16.msrb.mxu1 %v3197_v48  ;;  %907 = vmatpush.bf16.msrb.mxu2 %v3073_v49  ;;  %v3431_v48 = vld [vmem:[#allocation12 + $0xf0] sm:$0xf0]  ;;  %v3558_v49 = vor.u32 %v4325_v46, %v3557_v44  ;;  %v4277_v44 = vld [vmem:[#allocation12 + $0x6c] sm:$0xf0]  ;;  %s2864_s12 = scalar_lea.sflag [#allocation8], %s5075_s24 }
  0x81   : > { %920 = vmatpush.bf16.msrb.mxu3 %v3201_v53  ;;  %v3434_v50 = vor.u32 %v4291_v47, %v3431_v48  ;;  %v3413_v53 = vld [vmem:[#allocation12 + $0xc0] sm:$0xf]  ;;  %v3367_v48 = vld [vmem:[#allocation12 + $0x70] sm:$0xf0]  ;;  %p1637_p4 = scmp.gt.s32.totalorder %s5157_s28, 0  ;;  %s2877_s28 = sshll.u32 %s5093_s4, 4  ;;  %s2878_s28 = int_to_ptr.vmem [resolvable:$true] %s2877_s28 }
  0x83   : > { %882 = vmatpush.bf16.msrb.mxu0 %v3053_v60  ;;  %s1640_s14 = scalar_select %p1637_p4, 1, 0 }
  0x84   : > { %895 = vmatpush.bf16.msrb.mxu1 %v3181_v61  ;;  %908 = vmatpush.bf16.msrb.mxu2 %v3057_v63  ;;  %v3414_v63 = vor.u32 %v4289_v56, %v3413_v53  ;;  %p2245_p11 = scmp.gt.s32.totalorder %s5175_s20, 0 }
  0x85   : > { %921 = vmatpush.bf16.msrb.mxu3 %v3185_v3  ;;  %v4319_v3 = vld [vmem:[#allocation12 + $0x1c4] sm:$0xf]  ;;  %p2853_p12 = scmp.gt.s32.totalorder %s2852_s16, 0 }
  0x86   : > { %s2248_s17 = scalar_select %p2245_p11, 1, 0 }
  0x87   : > { %883 = vmatpush.bf16.msrb.mxu0 %v3037_v9  ;;  %v3546_v9 = vor.u32 %v4319_v3, %v3543_v5  ;;  %v3351_v3 = vld [vmem:[#allocation12 + $0x50] sm:$0xf0]  ;;  %v4303_v5 = vld [vmem:[#allocation12 + $0x144] sm:$0xf] }
  0x88   : > { %896 = vmatpush.bf16.msrb.mxu1 %v3165_v10  ;;  %909 = vmatpush.bf16.msrb.mxu2 %v3041_v11  ;;  %v3525_v10 = vld [vmem:[#allocation12 + $0x1a0] sm:$0xf]  ;;  %v4317_v11 = vld [vmem:[#allocation12 + $0x1ac] sm:$0xf0] }
  0x89   : > { %922 = vmatpush.bf16.msrb.mxu3 %v3169_v12  ;;  %v4283_v12 = vld [vmem:[#allocation12 + $0xa4] sm:$0xf] }
  0x8a   : > { %884 = vmatmul.bf16.vlgmr.msrb.gmra.mxu0 %v5097_v59 }
  0x8b   : > { %897 = vmatmul.bf16.vlgmr.msrb.gmra.mxu1 %v5099_v62  ;;  %910 = vmatmul.bf16.vlgmr.msrb.gmra.mxu2 %v5097_v59 }
  0x8c   : > { %923 = vmatmul.bf16.vlgmr.msrb.gmra.mxu3 %v5099_v62  ;;  %1013 = vmatpush.bf16.msra.mxu0 %v4262_v13  ;;  %v4259_v62 = vld [vmem:[#allocation14 + $0x20] sm:$0xff]  ;;  %v3398_v13 = vor.u32 %v4285_v7, %v3397_v6  ;;  %v3479_v6 = vld [vmem:[#allocation12 + $0x150] sm:$0xf0] }
  0x8d   : > { %1431 = vmatpush.bf16.msra.mxu1 %v3430_v45  ;;  %1444 = vmatpush.bf16.msra.mxu2 %v3558_v49  ;;  %v3493_v45 = vld [vmem:[#allocation12 + $0x160] sm:$0xf] }
  0x8e   : > { %1457 = vmatpush.bf16.msra.mxu3 %v3434_v50  ;;  %v4307_v50 = vld [vmem:[#allocation12 + $0x164] sm:$0xf] }
  0x90   : > { %1014 = vmatpush.bf16.msra.mxu0 %v4261_v15  ;;  %v4315_v15 = vld [vmem:[#allocation12 + $0x1a4] sm:$0xf] }
  0x91   : > { %1432 = vmatpush.bf16.msra.mxu1 %v3414_v63  ;;  %1445 = vmatpush.bf16.msra.mxu2 %v3542_v0  ;;  %v3498_v0 = vor.u32 %v4307_v50, %v3495_v51  ;;  %v3439_v51 = vld [vmem:[#allocation12 + $0xf8] sm:$0xf0] }
  0x92   : > { %1458 = vmatpush.bf16.msra.mxu3 %v3418_v4 }
  0x94   : > { %1015 = vmatpush.bf16.msra.mxu0 %v4260_v19  ;;  %v3402_v19 = vor.u32 %v4283_v12, %v3399_v14  ;;  %v4269_v12 = vld [vmem:[#allocation12 + $0x2c] sm:$0xf0]  ;;  %v3482_v14 = vor.u32 %v4303_v5, %v3479_v6  ;;  %v3551_v5 = vld [vmem:[#allocation12 + $0x1d8] sm:$0xf0]  ;;  %v3405_v6 = vld [vmem:[#allocation12 + $0xa8] sm:$0xf] }
  0x95   : > { %1433 = vmatpush.bf16.msra.mxu1 %v3398_v13  ;;  %v3461_v13 = vld [vmem:[#allocation12 + $0x120] sm:$0xf] }
  0x96   : > { %1459 = vmatpush.bf16.msra.mxu3 %v3402_v19  ;;  %v4299_v19 = vld [vmem:[#allocation12 + $0x124] sm:$0xf] }
  0x98   : > { %1016 = vmatpush.bf16.msra.mxu0 %v4259_v62  ;;  %v3509_v62 = vld [vmem:[#allocation12 + $0x180] sm:$0xf] }
  0x9c   : > { %1017 = vmatpush.bf16.msra.mxu0 %v4258_v28  ;;  %v3511_v28 = vld [vmem:[#allocation12 + $0x190] sm:$0xf0] }
  0xa0   : > { %1018 = vmatpush.bf16.msra.mxu0 %v4257_v32 }
  0xa4   : > { %1019 = vmatpush.bf16.msra.mxu0 %v4256_v34 }
  0xa8   : > { %1020 = vmatpush.bf16.msra.mxu0 %v4255_v37 }
  0xac   : > { %1470 = vmatpush.bf16.msrb.mxu0 %v3562_v55  ;;  %v3366_v55 = vor.u32 %v4277_v44, %v3365_v43  ;;  %v4295_v43 = vld [vmem:[#allocation12 + $0x104] sm:$0xf]  ;;  %v3447_v44 = vld [vmem:[#allocation12 + $0x110] sm:$0xf0] }
  0xb0   : > { %1471 = vmatpush.bf16.msrb.mxu0 %v3546_v9 }
  0xe7   : > { %v833_v17 = vpop.f32.mrf.mxu0 }
  0xe8   : > { %v834_v20 = vadd.f32 %v833_v17, %v5112_v16  ;;  %v3527_v17 = vld [vmem:[#allocation12 + $0x1b0] sm:$0xf0] }
  0xea   : > { %v846_v18 = vpop.f32.mrf.mxu1 }
  0xeb   : > { %v847_v22 = vadd.f32 %v846_v18, %v834_v20  ;;  %v3526_v18 = vor.u32 %v4317_v11, %v3525_v10  ;;  %v3381_v20 = vld [vmem:[#allocation12 + $0x80] sm:$0xf]  ;;  %v3354_v10 = vor.u32 %v4271_v2, %v3351_v3 }
  0xec   : > { %v3333_v11 = vld [vmem:[#allocation12 + $0x20] sm:$0xf] }
  0xed   : > { %v928_v29 = vmul.f32 0.5, %v847_v22  ;;  %v3530_v22 = vor.u32 %v4315_v15, %v3527_v17  ;;  %1446 = vmatpush.bf16.msra.mxu2 %v3526_v18  ;;  %v4301_v15 = vld [vmem:[#allocation12 + $0x12c] sm:$0xf0]  ;;  %v4267_v17 = vld [vmem:[#allocation12 + $0x24] sm:$0xf] }
  0xee   : > { %v859_v59 = vpop.f32.mrf.mxu2  ;;  %v3335_v18 = vld [vmem:[#allocation12 + $0x30] sm:$0xf0] }
  0xef   : > { %v860_v23 = vadd.f32 %v859_v59, %v5115_v21  ;;  %v835_v26 = vpop.f32.mrf.mxu0  ;;  %4594 = vtanh.f32 %v928_v29  ;;  %v4281_v59 = vld [vmem:[#allocation12 + $0x8c] sm:$0xf0]  ;;  %1472 = vmatpush.bf16.msrb.mxu0 %v3530_v22 }
  0xf1   : > { %v872_v24 = vpop.f32.mrf.mxu3 }
  0xf2   : > { %v873_v25 = vadd.f32 %v872_v24, %v860_v23  ;;  %v848_v27 = vpop.f32.mrf.mxu1  ;;  %v4313_v23 = vld [vmem:[#allocation12 + $0x18c] sm:$0xf0]  ;;  %v4279_v24 = vld [vmem:[#allocation12 + $0x84] sm:$0xf] }
  0xf3   : > { %v4311_v27 = vld [vmem:[#allocation12 + $0x184] sm:$0xf]  ;;  %v3510_v37 = vor.u32 %v4313_v23, %v3509_v62  ;;  %v3334_v62 = vor.u32 %v4269_v12, %v3333_v11  ;;  %v3462_v23 = vor.u32 %v4301_v15, %v3461_v13  ;;  %v4284_v12 = vld [vmem:[#allocation12 + $0xac] sm:$0xf]  ;;  %v3407_v13 = vld [vmem:[#allocation12 + $0xb8] sm:$0xf0] }
  0xf4   : > { %v932_v30 = vmul.f32 0.5, %v873_v25  ;;  %v3383_v25 = vld [vmem:[#allocation12 + $0x90] sm:$0xf0]  ;;  %v3514_v47 = vor.u32 %v4311_v27, %v3511_v28 }
  0xf5   : > { %v4595_v35 = vpop.eup %4594  ;;  %v3386_v42 = vor.u32 %v4279_v24, %v3383_v25  ;;  %1447 = vmatpush.bf16.msra.mxu2 %v3510_v37  ;;  %v3338_v24 = vor.u32 %v4267_v17, %v3335_v18  ;;  %v3535_v17 = vld [vmem:[#allocation12 + $0x1b8] sm:$0xf0]  ;;  %v3389_v18 = vld [vmem:[#allocation12 + $0x88] sm:$0xf] }
  0xf6   : > { %v861_v31 = vpop.f32.mrf.mxu2  ;;  %4596 = vtanh.f32 %v932_v30  ;;  %v930_v38 = vmul.f32 0.5, %v4595_v35  ;;  %v3382_v35 = vor.u32 %v4281_v59, %v3381_v20  ;;  %1473 = vmatpush.bf16.msrb.mxu0 %v3514_v47  ;;  %v3463_v20 = vld [vmem:[#allocation12 + $0x130] sm:$0xf0]  ;;  %v4294_v47 = vld [vmem:[#allocation12 + $0xf4] sm:$0xf0] }
  0xf7   : > { %v941_v31 = vld [vmem:[#allocation3] sm:$0xff]  ;;  %1460 = vmatpush.bf16.msra.mxu3 %v3386_v42 }
  0xf8   : > { %v931_v29 = vadd.f32 0.5, %v930_v38  ;;  %v4309_v38 = vld [vmem:[#allocation12 + $0x16c] sm:$0xf0]  ;;  %1434 = vmatpush.bf16.msra.mxu1 %v3382_v35  ;;  %v4263_v35 = vld [vmem:[#allocation12 + $0x4] sm:$0xf] }
  0xf9   : > { %v874_v33 = vpop.f32.mrf.mxu3  ;;  %v3494_v56 = vor.u32 %v4309_v38, %v3493_v45  ;;  %v3437_v45 = vld [vmem:[#allocation12 + $0xe8] sm:$0xf] }
  0xfa   : > { %1474 = vmatpush.bf16.msrb.mxu0 %v3498_v0  ;;  %v3565_v38 = vld [vmem:[#allocation12 + $0x1e8] sm:$0xf]  ;;  %v4288_v0 = vld [vmem:[#allocation12 + $0xcc] sm:$0xf] }
  0xfb   : > { %1448 = vmatpush.bf16.msra.mxu2 %v3494_v56  ;;  %v3421_v56 = vld [vmem:[#allocation12 + $0xc8] sm:$0xf] }
  0xfc   : > { %v4597_v36 = vpop.eup %4596  ;;  %1435 = vmatpush.bf16.msra.mxu1 %v3366_v55 }
  0xfd   : > { %v934_v39 = vmul.f32 0.5, %v4597_v36 }
  0xfe   : > { %1475 = vmatpush.bf16.msrb.mxu0 %v3482_v14  ;;  %v4316_v14 = vld [vmem:[#allocation12 + $0x1ac] sm:$0xf] }
  0xff   : > { %v935_v30 = vadd.f32 0.5, %v934_v39  ;;  %v4275_v39 = vld [vmem:[#allocation12 + $0x64] sm:$0xf] }
 0x100   : > { %v3370_v57 = vor.u32 %v4275_v39, %v3367_v48  ;;  %v3438_v39 = vor.u32 %v4294_v47, %v3437_v45  ;;  %v4326_v48 = vld [vmem:[#allocation12 + $0x1f4] sm:$0xf0]  ;;  %v3357_v45 = vld [vmem:[#allocation12 + $0x48] sm:$0xf] }
 0x101   : > { %v942_v52 = vmul.f32 %v941_v31, %v935_v30  ;;  %v3317_v30 = vld [vmem:[#allocation12] sm:$0xf]  ;;  %v4265_v31 = vld [vmem:[#allocation12 + $0xc] sm:$0xf0]  ;;  %v3566_v50 = vor.u32 %v4326_v48, %v3565_v38  ;;  %v4274_v38 = vld [vmem:[#allocation12 + $0x54] sm:$0xf0] }
 0x102   : > { %1461 = vmatpush.bf16.msra.mxu3 %v3370_v57  ;;  %v4290_v57 = vld [vmem:[#allocation12 + $0xd4] sm:$0xf0] }
 0x103   : > { %v4306_v48 = vld [vmem:[#allocation12 + $0x154] sm:$0xf0] }
 0x106   : > { %1462 = vmatpush.bf16.msra.mxu3 %v3354_v10  ;;  %v4318_v10 = vld [vmem:[#allocation12 + $0x1b4] sm:$0xf0] }
 0x107   : > { %v885_v54 = vpop.f32.mrf.mxu0 }
 0x108   : > { %v886_v60 = vadd.f32 %v885_v54, %v5118_v40  ;;  %v898_v61 = vpop.f32.mrf.mxu1 }
 0x10a   : > { %v899_v8 = vadd.f32 %v898_v61, %v886_v60  ;;  %v4273_v60 = vld [vmem:[#allocation12 + $0x4c] sm:$0xf0]  ;;  %v3477_v61 = vld [vmem:[#allocation12 + $0x140] sm:$0xf]  ;;  %1463 = vmatpush.bf16.msra.mxu3 %v3338_v24  ;;  %v3391_v24 = vld [vmem:[#allocation12 + $0x98] sm:$0xf0] }
 0x10b   : > { %v3478_v9 = vor.u32 %v4305_v1, %v3477_v61  ;;  %v4322_v61 = vld [vmem:[#allocation12 + $0x1d4] sm:$0xf0]  ;;  %v3423_v1 = vld [vmem:[#allocation12 + $0xd8] sm:$0xf0] }
 0x10c   : > { %4598 = vtanh.f32 %v899_v8  ;;  %v3350_v8 = vor.u32 %v4273_v60, %v3349_v58  ;;  %v3549_v58 = vld [vmem:[#allocation12 + $0x1c8] sm:$0xf]  ;;  %v3422_v60 = vor.u32 %v4290_v57, %v3421_v56  ;;  %v3426_v3 = vor.u32 %v4288_v0, %v3423_v1  ;;  %v4270_v56 = vld [vmem:[#allocation12 + $0x34] sm:$0xf0]  ;;  %v4268_v0 = vld [vmem:[#allocation12 + $0x2c] sm:$0xf] }
 0x10d   : > { %1449 = vmatpush.bf16.msra.mxu2 %v3478_v9  ;;  %v3550_v2 = vor.u32 %v4322_v61, %v3549_v58  ;;  %v3533_v9 = vld [vmem:[#allocation12 + $0x1a8] sm:$0xf]  ;;  %v4302_v61 = vld [vmem:[#allocation12 + $0x134] sm:$0xf0]  ;;  %v3343_v1 = vld [vmem:[#allocation12 + $0x38] sm:$0xf0] }
 0x10e   : > { %v911_v26 = vpop.f32.mrf.mxu2  ;;  %1436 = vmatpush.bf16.msra.mxu1 %v3350_v8  ;;  %v4286_v8 = vld [vmem:[#allocation12 + $0xb4] sm:$0xf0]  ;;  %v3534_v15 = vor.u32 %v4318_v10, %v3533_v9  ;;  %v3346_v9 = vor.u32 %v4268_v0, %v3343_v1  ;;  %v4397_v1 = vld [vmem:[#allocation12 + $0x1ec] sm:$0xf0] }
 0x10f   : > { %v912_v32 = vadd.f32 %v911_v26, %v5120_v41  ;;  %v924_v33 = vpop.f32.mrf.mxu3  ;;  %v887_v34 = vpop.f32.mrf.mxu0  ;;  %v3466_v26 = vor.u32 %v4299_v19, %v3463_v20  ;;  %v3406_v11 = vor.u32 %v4286_v8, %v3405_v6  ;;  %v4282_v19 = vld [vmem:[#allocation12 + $0x94] sm:$0xf0]  ;;  %v3410_v20 = vor.u32 %v4284_v12, %v3407_v13  ;;  %v4264_v13 = vld [vmem:[#allocation12 + $0xc] sm:$0xf] }
 0x110   : > { %v900_v36 = vpop.f32.mrf.mxu1  ;;  %v4297_v34 = vld [vmem:[#allocation12 + $0x10c] sm:$0xf0]  ;;  %v4266_v8 = vld [vmem:[#allocation12 + $0x14] sm:$0xf0] }
 0x111   : > { %v925_v46 = vadd.f32 %v924_v33, %v912_v32  ;;  %1450 = vmatpush.bf16.msra.mxu2 %v3462_v23  ;;  %1476 = vmatpush.bf16.msrb.mxu0 %v3466_v26  ;;  %v3445_v32 = vld [vmem:[#allocation12 + $0x100] sm:$0xf]  ;;  %v3318_v33 = vor.u32 %v4265_v31, %v3317_v30  ;;  %v3319_v36 = vld [vmem:[#allocation12 + $0x10] sm:$0xf0]  ;;  %v4280_v23 = vld [vmem:[#allocation12 + $0x8c] sm:$0xf] }
 0x112   : > { %v4599_v49 = vpop.eup %4598  ;;  %1437 = vmatpush.bf16.msra.mxu1 %v3334_v62  ;;  %v3446_v37 = vor.u32 %v4297_v34, %v3445_v32  ;;  %v3322_v42 = vor.u32 %v4263_v35, %v3319_v36  ;;  %v3517_v62 = vld [vmem:[#allocation12 + $0x188] sm:$0xf]  ;;  %v3519_v26 = vld [vmem:[#allocation12 + $0x198] sm:$0xf0]  ;;  %v4278_v32 = vld [vmem:[#allocation12 + $0x74] sm:$0xf0] }
 0x113   : > { %v943_v53 = vmul.f32 %v4599_v49, %v931_v29  ;;  %v937_v54 = vmul.f32 0.5, %v925_v46  ;;  %v3450_v46 = vor.u32 %v4295_v43, %v3447_v44  ;;  %v4292_v49 = vld [vmem:[#allocation12 + $0xec] sm:$0xf]  ;;  %v3373_v31 = vld [vmem:[#allocation12 + $0x68] sm:$0xf] }
 0x114   : > { %1464 = vmatpush.bf16.msra.mxu3 %v3322_v42  ;;  %v3374_v34 = vor.u32 %v4278_v32, %v3373_v31  ;;  %v4310_v35 = vld [vmem:[#allocation12 + $0x174] sm:$0xf0]  ;;  %v4276_v36 = vld [vmem:[#allocation12 + $0x6c] sm:$0xf]  ;;  %v3503_v44 = vld [vmem:[#allocation12 + $0x178] sm:$0xf0] }
 0x115   : > { %v5124_v63 = vadd.f32 %v943_v53, %v942_v52  ;;  %4600 = vtanh.f32 %v937_v54  ;;  %1451 = vmatpush.bf16.msra.mxu2 %v3446_v37  ;;  %1477 = vmatpush.bf16.msrb.mxu0 %v3450_v46  ;;  %v4324_v52 = vld [vmem:[#allocation12 + $0x1ec] sm:$0xf]  ;;  %v3567_v53 = vld [vmem:[#allocation12 + $0x1f8] sm:$0xf0]  ;;  %v3442_v54 = vor.u32 %v4292_v49, %v3439_v51  ;;  %v4298_v12 = vld [vmem:[#allocation12 + $0x114] sm:$0xf0] }
 0x116   : > { %v913_v4 = vpop.f32.mrf.mxu2  ;;  %1438 = vmatpush.bf16.msra.mxu1 %v3318_v33  ;;  %v3570_v55 = vor.u32 %v4324_v52, %v3567_v53  ;;  %v3501_v33 = vld [vmem:[#allocation12 + $0x168] sm:$0xf]  ;;  %v3375_v37 = vld [vmem:[#allocation12 + $0x78] sm:$0xf0]  ;;  %v4308_v43 = vld [vmem:[#allocation12 + $0x16c] sm:$0xf]  ;;  %v3358_v52 = vor.u32 %v4274_v38, %v3357_v45 }
 0x117   : > { %4602 = vtanh.f32 %v5124_v63  ;;  %v926_v7 = vpop.f32.mrf.mxu3  ;;  %v4320_v4 = vld [vmem:[#allocation12 + $0x1cc] sm:$0xf]  ;;  %v3502_v42 = vor.u32 %v4310_v35, %v3501_v33  ;;  %v3378_v46 = vor.u32 %v4276_v36, %v3375_v37  ;;  %v3506_v47 = vor.u32 %v4308_v43, %v3503_v44  ;;  %v3487_v53 = vld [vmem:[#allocation12 + $0x158] sm:$0xf0]  ;;  %v4331_v36 = vld [vmem:[#allocation14 + $0x20] sm:$0xff] }
 0x118   : > { %1509 = vmatpush.bf16.msrb.mxu3 %v3442_v54  ;;  %v3554_v7 = vor.u32 %v4320_v4, %v3551_v5  ;;  %v4272_v49 = vld [vmem:[#allocation12 + $0x4c] sm:$0xf]  ;;  %v5141_v5 = vld [vmem:[%s5245_s7] ss:$0 sm:$0xff]  ;;  %v4329_v44 = vld [vmem:[#allocation14 + $0x10] sm:$0xff] }
 0x119   : > { %1496 = vmatpush.bf16.msrb.mxu2 %v3566_v50  ;;  %v3359_v50 = vld [vmem:[#allocation12 + $0x58] sm:$0xf0]  ;;  %v4304_v51 = vld [vmem:[#allocation12 + $0x14c] sm:$0xf] }
 0x11a   : > { %1483 = vmatpush.bf16.msrb.mxu1 %v3438_v39  ;;  %v3485_v39 = vld [vmem:[#allocation12 + $0x148] sm:$0xf]  ;;  %v3362_v57 = vor.u32 %v4272_v49, %v3359_v50  ;;  %v3490_v58 = vor.u32 %v4304_v51, %v3487_v53  ;;  %v4334_v33 = vld [vmem:[#allocation14 + $0x38] sm:$0xff]  ;;  %v4327_v53 = vld [vmem:[#allocation14] sm:$0xff] }
 0x11b   : > { %v4601_v59 = vpop.eup %4600  ;;  %v3486_v54 = vor.u32 %v4306_v48, %v3485_v39  ;;  %v4332_v35 = vld [vmem:[#allocation14 + $0x28] sm:$0xff]  ;;  %v4330_v37 = vld [vmem:[#allocation14 + $0x18] sm:$0xff] }
 0x11c   : > { %v939_v22 = vmul.f32 0.5, %v4601_v59  ;;  %1510 = vmatpush.bf16.msrb.mxu3 %v3426_v3  ;;  %v3538_v59 = vor.u32 %v4316_v14, %v3535_v17  ;;  %v3471_v3 = vld [vmem:[#allocation12 + $0x138] sm:$0xf0]  ;;  %v1032_v14 = vstv %s5136_s21  ;;  %v4296_v17 = vld [vmem:[#allocation12 + $0x10c] sm:$0xf] }
 0x11d   : > { %v4603_v25 = vpop.eup %4602  ;;  %1497 = vmatpush.bf16.msrb.mxu2 %v3550_v2  ;;  %v4300_v2 = vld [vmem:[#allocation12 + $0x12c] sm:$0xf]  ;;  %vm1033_vm1 = vcmp.eq.s32.totalorder %v1032_v14, 1  ;;  %s2856_s21 = scalar_select %p2853_p12, 1, 0 }
 0x11e   : > { %v940_v27 = vadd.f32 0.5, %v939_v22  ;;  %1484 = vmatpush.bf16.msrb.mxu1 %v3422_v60  ;;  %v4314_v22 = vld [vmem:[#allocation12 + $0x194] sm:$0xf0]  ;;  %v3469_v60 = vld [vmem:[#allocation12 + $0x128] sm:$0xf]  ;;  %v3474_v10 = vor.u32 %v4300_v2, %v3471_v3 }
 0x11f   : > { %v3470_v6 = vor.u32 %v4302_v61, %v3469_v60  ;;  %v4328_v39 = vld [vmem:[#allocation14 + $0x8] sm:$0xff]  ;;  %v3847_v60 = vld [vmem:[#allocation12 + $0x1e0] sm:$0xf]  ;;  %v4363_v2 = vld [vmem:[#allocation12 + $0xe4] sm:$0xf] }
 0x120   : > { %v946_v28 = vmul.f32 %v4603_v25, %v940_v27  ;;  %v4312_v25 = vld [vmem:[#allocation12 + $0x18c] sm:$0xf]  ;;  %v3390_v27 = vor.u32 %v4282_v19, %v3389_v18  ;;  %1511 = vmatpush.bf16.msrb.mxu3 %v3410_v20  ;;  %v3455_v18 = vld [vmem:[#allocation12 + $0x118] sm:$0xf0]  ;;  %v3721_v3 = vld [vmem:[#allocation12 + $0xf0] sm:$0xf0] }
 0x121   : > { %1498 = vmatpush.bf16.msrb.mxu2 %v3534_v15  ;;  %v3522_v30 = vor.u32 %v4312_v25, %v3519_v26  ;;  %v3327_v15 = vld [vmem:[#allocation12 + $0x18] sm:$0xf0] }
 0x122   : > { %v948_v29 = vpack.c.bf16 %v946_v28, %v946_v28  ;;  %1485 = vmatpush.bf16.msrb.mxu1 %v3406_v11  ;;  %v3518_v28 = vor.u32 %v4314_v22, %v3517_v62  ;;  %v3453_v11 = vld [vmem:[#allocation12 + $0x108] sm:$0xf]  ;;  %v1030_v62 = vld [vmem:[%s5079_s30] sm:$0xff]  ;;  %v3330_v22 = vor.u32 %v4264_v13, %v3327_v15  ;;  %v3831_v13 = vld [vmem:[#allocation12 + $0x1c0] sm:$0xf] }
 0x123   : > { %v3454_v20 = vor.u32 %v4298_v12, %v3453_v11  ;;  %v4361_v12 = vld [vmem:[#allocation12 + $0xcc] sm:$0xf0] }
 0x124   : > { %1038 = vst [vmem:[#allocation2 + $0x4] sm:$0xf] %v948_v29  ;;  %1021 = vmatmul.bf16.vlgmr.msra.gmra.mxu0 %v948_v29  ;;  %v3394_v29 = vor.u32 %v4280_v23, %v3391_v24  ;;  %v3458_v23 = vor.u32 %v4296_v17, %v3455_v18  ;;  %v4393_v17 = vld [vmem:[#allocation12 + $0x1cc] sm:$0xf0]  ;;  %v4359_v18 = vld [vmem:[#allocation12 + $0xc4] sm:$0xf] }
 0x125   : > { %1522 = vmatpush.bf16.msra.mxu0 %v3570_v55  ;;  %1499 = vmatpush.bf16.msrb.mxu2 %v3518_v28  ;;  %v3341_v55 = vld [vmem:[#allocation12 + $0x28] sm:$0xf] }
 0x126   : > { %1486 = vmatpush.bf16.msrb.mxu1 %v3390_v27  ;;  %1512 = vmatpush.bf16.msrb.mxu3 %v3394_v29  ;;  %v3342_v4 = vor.u32 %v4270_v56, %v3341_v55 }
 0x129   : > { %1523 = vmatpush.bf16.msra.mxu0 %v3554_v7  ;;  %1500 = vmatpush.bf16.msrb.mxu2 %v3502_v42  ;;  %v3325_v7 = vld [vmem:[#allocation12 + $0x8] sm:$0xf] }
 0x12a   : > { %1487 = vmatpush.bf16.msrb.mxu1 %v3374_v34  ;;  %1513 = vmatpush.bf16.msrb.mxu3 %v3378_v46  ;;  %v3326_v19 = vor.u32 %v4266_v8, %v3325_v7  ;;  %v4333_v34 = vld [vmem:[#allocation14 + $0x30] sm:$0xff]  ;;  %v3724_v7 = vor.u32 %v4363_v2, %v3721_v3  ;;  %v4395_v8 = vld [vmem:[#allocation12 + $0x1e4] sm:$0xf] }
 0x12d   : > { %1524 = vmatpush.bf16.msra.mxu0 %v3538_v59  ;;  %1501 = vmatpush.bf16.msrb.mxu2 %v3486_v54 }
 0x12e   : > { %1488 = vmatpush.bf16.msrb.mxu1 %v3358_v52  ;;  %1514 = vmatpush.bf16.msrb.mxu3 %v3362_v57  ;;  %v3719_v57 = vld [vmem:[#allocation12 + $0xe0] sm:$0xf] }
 0x131   : > { %1525 = vmatpush.bf16.msra.mxu0 %v3522_v30  ;;  %1502 = vmatpush.bf16.msrb.mxu2 %v3470_v6  ;;  %v3848_v6 = vor.u32 %v4397_v1, %v3847_v60  ;;  %v3783_v1 = vld [vmem:[#allocation12 + $0x160] sm:$0xf] }
 0x132   : > { %1489 = vmatpush.bf16.msrb.mxu1 %v3342_v4  ;;  %1515 = vmatpush.bf16.msrb.mxu3 %v3346_v9  ;;  %v3849_v9 = vld [vmem:[#allocation12 + $0x1f0] sm:$0xf0] }
 0x133   : > { %v3852_v11 = vor.u32 %v4395_v8, %v3849_v9  ;;  %v4347_v8 = vld [vmem:[#allocation12 + $0x64] sm:$0xf]  ;;  %v3657_v9 = vld [vmem:[#allocation12 + $0x70] sm:$0xf0] }
 0x135   : > { %1526 = vmatpush.bf16.msra.mxu0 %v3506_v47  ;;  %1503 = vmatpush.bf16.msrb.mxu2 %v3454_v20 }
 0x136   : > { %1490 = vmatpush.bf16.msrb.mxu1 %v3326_v19  ;;  %1516 = vmatpush.bf16.msrb.mxu3 %v3330_v22  ;;  %v3705_v19 = vld [vmem:[#allocation12 + $0xd0] sm:$0xf0]  ;;  %v4391_v22 = vld [vmem:[#allocation12 + $0x1c4] sm:$0xf] }
 0x139   : > { %1527 = vmatpush.bf16.msra.mxu0 %v3490_v58  ;;  %v4365_v58 = vld [vmem:[#allocation12 + $0xec] sm:$0xf0] }
 0x13a   : > { %v3720_v0 = vor.u32 %v4365_v58, %v3719_v57  ;;  %v3801_v57 = vld [vmem:[#allocation12 + $0x190] sm:$0xf0] }
 0x13d   : > { %1528 = vmatpush.bf16.msra.mxu0 %v3474_v10  ;;  %v3703_v10 = vld [vmem:[#allocation12 + $0xc0] sm:$0xf] }
 0x13e   : > { %v3704_v15 = vor.u32 %v4361_v12, %v3703_v10  ;;  %v3785_v10 = vld [vmem:[#allocation12 + $0x170] sm:$0xf0] }
 0x141   : > { %1529 = vmatpush.bf16.msra.mxu0 %v3458_v23  ;;  %v3833_v23 = vld [vmem:[#allocation12 + $0x1d0] sm:$0xf0] }
 0x1a1   : > { %v1022_v59 = vpop.f32.mrf.mxu0 }
 0x1a2   : > { %v1023_v24 = vadd.f32 %v5141_v5, %v1022_v59  ;;  %v3832_v59 = vor.u32 %v4393_v17, %v3831_v13 }
 0x1a4   : > { %1026 = vst [vmem:[%s5093_s4] sm:$0xff] %v1023_v24  ;;  %v1034_v25 = vsel %vm1033_vm1, %v1030_v62, %v1023_v24  ;;  %v3708_v62 = vor.u32 %v4359_v18, %v3705_v19  ;;  %v3660_v18 = vor.u32 %v4347_v8, %v3657_v9  ;;  %v3639_v19 = vld [vmem:[#allocation12 + $0x40] sm:$0xf]  ;;  %v3855_v8 = vld [vmem:[#allocation12 + $0x1e8] sm:$0xf] }
 0x1a5   : > { %v1035_v26 = vpack.c.bf16 %v1034_v25, %v1034_v25  ;;  %v3836_v25 = vor.u32 %v4391_v22, %v3833_v23 }
 0x1a7   : > { %1037 = vst.msk [vmem:[#allocation2] sm:$0xf] %vm1036_vm2, %v1035_v26  ;;  %v3687_v26 = vld [vmem:[#allocation12 + $0xa0] sm:$0xf] }
 0x1a9   : > { %v1024_v27 = vpop.f32.mrf.mxu0 }
 0x1aa   : > { %v4357_v27 = vld [vmem:[#allocation12 + $0xac] sm:$0xf0] }
 0x1ae   : > { %v1039_v28 = vld [vmem:[#allocation2] sm:$0xff] }
 0x1af   : > { %v1105_v29 = vunpack.c.l.b16 %v1039_v28  ;;  %v1106_v30 = vunpack.c.h.b16 %v1039_v28 }
 0x1b1   : > { %v1107_v31 = vpack.c.b16 %v1105_v29, %v1105_v29  ;;  %v1108_v32 = vpack.c.b16 %v1106_v30, %v1106_v30  ;;  %v3688_v29 = vor.u32 %v4357_v27, %v3687_v26  ;;  %v3815_v30 = vld [vmem:[#allocation12 + $0x1a0] sm:$0xf]  ;;  %v3641_v26 = vld [vmem:[#allocation12 + $0x50] sm:$0xf0]  ;;  %v4375_v27 = vld [vmem:[#allocation12 + $0x144] sm:$0xf] }
 0x1b3   : > { %1439 = vmatmul.bf16.vlgmr.msra.gmra.mxu1 %v1107_v31  ;;  %1452 = vmatmul.bf16.vlgmr.msra.gmra.mxu2 %v1108_v32 }
 0x1b4   : > { %1465 = vmatmul.bf16.vlgmr.msra.gmra.mxu3 %v1107_v31  ;;  %1478 = vmatmul.bf16.vlgmr.msrb.gmra.mxu0 %v1108_v32 }
 0x1b5   : > { %1620 = vmatpush.bf16.msra.mxu1 %v4334_v33  ;;  %2039 = vmatpush.bf16.msra.mxu2 %v3720_v0  ;;  %v4349_v0 = vld [vmem:[#allocation12 + $0x6c] sm:$0xf0] }
 0x1b6   : > { %2052 = vmatpush.bf16.msra.mxu3 %v3848_v6  ;;  %2065 = vmatpush.bf16.msrb.mxu0 %v3724_v7  ;;  %v4381_v7 = vld [vmem:[#allocation12 + $0x16c] sm:$0xf0] }
 0x1b7   : > { %v3784_v17 = vor.u32 %v4381_v7, %v3783_v1  ;;  %v4367_v1 = vld [vmem:[#allocation12 + $0x104] sm:$0xf]  ;;  %v4366_v7 = vld [vmem:[#allocation12 + $0xf4] sm:$0xf0] }
 0x1b9   : > { %1621 = vmatpush.bf16.msra.mxu1 %v4333_v34  ;;  %2040 = vmatpush.bf16.msra.mxu2 %v3704_v15 }
 0x1ba   : > { %2053 = vmatpush.bf16.msra.mxu3 %v3832_v59  ;;  %2066 = vmatpush.bf16.msrb.mxu0 %v3708_v62  ;;  %v3767_v59 = vld [vmem:[#allocation12 + $0x140] sm:$0xf] }
 0x1bd   : > { %1622 = vmatpush.bf16.msra.mxu1 %v4332_v35  ;;  %2041 = vmatpush.bf16.msra.mxu2 %v3688_v29 }
 0x1c1   : > { %1623 = vmatpush.bf16.msra.mxu1 %v4331_v36 }
 0x1c3   : > { %1491 = vmatmul.bf16.vlgmr.msrb.gmra.mxu1 %v1107_v31  ;;  %1504 = vmatmul.bf16.vlgmr.msrb.gmra.mxu2 %v1108_v32 }
 0x1c4   : > { %1517 = vmatmul.bf16.vlgmr.msrb.gmra.mxu3 %v1107_v31  ;;  %1530 = vmatmul.bf16.vlgmr.msra.gmra.mxu0 %v1108_v32  ;;  %v4389_v31 = vld [vmem:[#allocation12 + $0x1ac] sm:$0xf0]  ;;  %v4355_v32 = vld [vmem:[#allocation12 + $0xa4] sm:$0xf] }
 0x1c5   : > { %1624 = vmatpush.bf16.msra.mxu1 %v4330_v37  ;;  %v3816_v37 = vor.u32 %v4389_v31, %v3815_v30 }
 0x1c7   : > { %2054 = vmatpush.bf16.msra.mxu3 %v3816_v37  ;;  %v4373_v37 = vld [vmem:[#allocation12 + $0x12c] sm:$0xf0] }
 0x1c9   : > { %1625 = vmatpush.bf16.msra.mxu1 %v4329_v44 }
 0x1cd   : > { %1626 = vmatpush.bf16.msra.mxu1 %v4328_v39  ;;  %v4353_v39 = vld [vmem:[#allocation12 + $0x8c] sm:$0xf0] }
 0x1d1   : > { %1627 = vmatpush.bf16.msra.mxu1 %v4327_v53 }
 0x1d5   : > { %2078 = vmatpush.bf16.msrb.mxu1 %v3852_v11 }
 0x1d9   : > { %2079 = vmatpush.bf16.msrb.mxu1 %v3836_v25  ;;  %v4343_v25 = vld [vmem:[#allocation12 + $0x44] sm:$0xf] }
 0x230   : > { %v1440_v42 = vpop.f32.mrf.mxu1 }
 0x231   : > { %v1479_v43 = vpop.f32.mrf.mxu0  ;;  %v1441_v45 = vadd.f32 %v1440_v42, %v5112_v16  ;;  %v3689_v42 = vld [vmem:[#allocation12 + $0xb0] sm:$0xf0] }
 0x236   : > { %v1453_v46 = vpop.f32.mrf.mxu2 }
 0x237   : > { %v1454_v47 = vadd.f32 %v1453_v46, %v1441_v45  ;;  %v1466_v38 = vpop.f32.mrf.mxu3  ;;  %v3692_v46 = vor.u32 %v4355_v32, %v3689_v42  ;;  %v3644_v32 = vor.u32 %v4343_v25, %v3641_v26  ;;  %v4339_v42 = vld [vmem:[#allocation12 + $0x24] sm:$0xf]  ;;  %v4392_v25 = vld [vmem:[#allocation12 + $0x1cc] sm:$0xf] }
 0x238   : > { %v1467_v48 = vadd.f32 %v1466_v38, %v5115_v21  ;;  %v1442_v49 = vpop.f32.mrf.mxu1  ;;  %v3671_v38 = vld [vmem:[#allocation12 + $0x80] sm:$0xf] }
 0x239   : > { %v1535_v50 = vmul.f32 0.5, %v1454_v47  ;;  %v1481_v51 = vpop.f32.mrf.mxu0  ;;  %v3817_v47 = vld [vmem:[#allocation12 + $0x1b0] sm:$0xf0]  ;;  %2067 = vmatpush.bf16.msrb.mxu0 %v3692_v46 }
 0x23a   : > { %v1480_v52 = vadd.f32 %v1479_v43, %v1467_v48  ;;  %v4387_v43 = vld [vmem:[#allocation12 + $0x1a4] sm:$0xf]  ;;  %v4385_v51 = vld [vmem:[#allocation12 + $0x18c] sm:$0xf0]  ;;  %v3753_v46 = vld [vmem:[#allocation12 + $0x130] sm:$0xf0] }
 0x23b   : > { %4604 = vtanh.f32 %v1535_v50  ;;  %v3820_v49 = vor.u32 %v4387_v43, %v3817_v47  ;;  %v3799_v50 = vld [vmem:[#allocation12 + $0x180] sm:$0xf]  ;;  %v3625_v43 = vld [vmem:[#allocation12 + $0x30] sm:$0xf0] }
 0x23c   : > { %v1539_v54 = vmul.f32 0.5, %v1480_v52  ;;  %v4351_v52 = vld [vmem:[#allocation12 + $0x84] sm:$0xf]  ;;  %v3800_v58 = vor.u32 %v4385_v51, %v3799_v50 }
 0x23d   : > { %2080 = vmatpush.bf16.msrb.mxu1 %v3820_v49 }
 0x23e   : > { %4606 = vtanh.f32 %v1539_v54  ;;  %v1455_v55 = vpop.f32.mrf.mxu2  ;;  %v3672_v54 = vor.u32 %v4353_v39, %v3671_v38  ;;  %2055 = vmatpush.bf16.msra.mxu3 %v3800_v58  ;;  %v3628_v39 = vor.u32 %v4339_v42, %v3625_v43  ;;  %v4335_v58 = vld [vmem:[#allocation12 + $0x4] sm:$0xf] }
 0x23f   : > { %v1468_v56 = vpop.f32.mrf.mxu3  ;;  %v3673_v55 = vld [vmem:[#allocation12 + $0x90] sm:$0xf0] }
 0x240   : > { %v1492_v61 = vpop.f32.mrf.mxu1  ;;  %v4383_v56 = vld [vmem:[#allocation12 + $0x184] sm:$0xf]  ;;  %v3676_v60 = vor.u32 %v4351_v52, %v3673_v55  ;;  %2042 = vmatpush.bf16.msra.mxu2 %v3672_v54  ;;  %v4337_v54 = vld [vmem:[#allocation12 + $0xc] sm:$0xf0]  ;;  %v3735_v55 = vld [vmem:[#allocation12 + $0x100] sm:$0xf] }
 0x241   : > { %v1531_v4 = vpop.f32.mrf.mxu0  ;;  %v4605_v14 = vpop.eup %4604  ;;  %v1493_v24 = vadd.f32 %v1492_v61, %v5118_v40  ;;  %v3655_v61 = vld [vmem:[#allocation12 + $0x60] sm:$0xf]  ;;  %v3804_v6 = vor.u32 %v4383_v56, %v3801_v57  ;;  %v4369_v57 = vld [vmem:[#allocation12 + $0x10c] sm:$0xf0] }
 0x242   : > { %v1537_v33 = vmul.f32 0.5, %v4605_v14  ;;  %v3656_v13 = vor.u32 %v4349_v0, %v3655_v61  ;;  %2068 = vmatpush.bf16.msrb.mxu0 %v3676_v60  ;;  %2056 = vmatpush.bf16.msra.mxu3 %v3784_v17  ;;  %v3609_v60 = vld [vmem:[#allocation12 + $0x10] sm:$0xf0]  ;;  %v3736_v61 = vor.u32 %v4369_v57, %v3735_v55  ;;  %v3711_v17 = vld [vmem:[#allocation12 + $0xc8] sm:$0xf] }
 0x243   : > { %2081 = vmatpush.bf16.msrb.mxu1 %v3804_v6  ;;  %v3612_v0 = vor.u32 %v4335_v58, %v3609_v60  ;;  %v3663_v55 = vld [vmem:[#allocation12 + $0x68] sm:$0xf]  ;;  %v4382_v60 = vld [vmem:[#allocation12 + $0x174] sm:$0xf0] }
 0x244   : > { %v4607_v20 = vpop.eup %4606  ;;  %v1538_v11 = vadd.f32 0.5, %v1537_v33  ;;  %2043 = vmatpush.bf16.msra.mxu2 %v3656_v13  ;;  %v3623_v33 = vld [vmem:[#allocation12 + $0x20] sm:$0xf]  ;;  %v3791_v57 = vld [vmem:[#allocation12 + $0x168] sm:$0xf] }
 0x245   : > { %v1541_v34 = vmul.f32 0.5, %v4607_v20  ;;  %v4345_v20 = vld [vmem:[#allocation12 + $0x4c] sm:$0xf0] }
 0x246   : > { %v1505_v28 = vpop.f32.mrf.mxu2  ;;  %v3640_v30 = vor.u32 %v4345_v20, %v3639_v19  ;;  %2069 = vmatpush.bf16.msrb.mxu0 %v3660_v18  ;;  %v4362_v19 = vld [vmem:[#allocation12 + $0xd4] sm:$0xf0]  ;;  %v3839_v20 = vld [vmem:[#allocation12 + $0x1c8] sm:$0xf] }
 0x247   : > { %v1506_v35 = vadd.f32 %v1505_v28, %v1493_v24  ;;  %v1518_v36 = vpop.f32.mrf.mxu3  ;;  %v1542_v2 = vadd.f32 0.5, %v1541_v34  ;;  %v4377_v24 = vld [vmem:[#allocation12 + $0x14c] sm:$0xf0]  ;;  %v3769_v28 = vld [vmem:[#allocation12 + $0x150] sm:$0xf0] }
 0x248   : > { %v1519_v44 = vadd.f32 %v1518_v36, %v5120_v41  ;;  %v1494_v45 = vpop.f32.mrf.mxu1  ;;  %v3768_v31 = vor.u32 %v4377_v24, %v3767_v59  ;;  %v4341_v34 = vld [vmem:[#allocation12 + $0x2c] sm:$0xf0]  ;;  %v3772_v36 = vor.u32 %v4375_v27, %v3769_v28  ;;  %2044 = vmatpush.bf16.msra.mxu2 %v3640_v30  ;;  %v4394_v59 = vld [vmem:[#allocation12 + $0x1d4] sm:$0xf0]  ;;  %v3713_v24 = vld [vmem:[#allocation12 + $0xd8] sm:$0xf0] }
 0x249   : > { %4608 = vtanh.f32 %v1506_v35  ;;  %v1533_v48 = vpop.f32.mrf.mxu0  ;;  %v1549_v62 = vmul.f32 %v1542_v2, %v5124_v63  ;;  %v3751_v35 = vld [vmem:[#allocation12 + $0x120] sm:$0xf]  ;;  %v4371_v45 = vld [vmem:[#allocation12 + $0x124] sm:$0xf]  ;;  %v3624_v47 = vor.u32 %v4341_v34, %v3623_v33  ;;  %v3737_v2 = vld [vmem:[#allocation12 + $0x110] sm:$0xf0] }
 0x24a   : > { %v1532_v53 = vadd.f32 %v1531_v4, %v1519_v44  ;;  %v4379_v4 = vld [vmem:[#allocation12 + $0x164] sm:$0xf]  ;;  %2057 = vmatpush.bf16.msra.mxu3 %v3768_v31  ;;  %2070 = vmatpush.bf16.msrb.mxu0 %v3644_v32  ;;  %v3752_v38 = vor.u32 %v4373_v37, %v3751_v35  ;;  %v3756_v48 = vor.u32 %v4371_v45, %v3753_v46  ;;  %v3841_v27 = vld [vmem:[#allocation12 + $0x1d8] sm:$0xf0]  ;;  %v3695_v28 = vld [vmem:[#allocation12 + $0xa8] sm:$0xf] }
 0x24b   : > { %v3788_v23 = vor.u32 %v4379_v4, %v3785_v10  ;;  %v3740_v6 = vor.u32 %v4367_v1, %v3737_v2  ;;  %v4398_v4 = vld [vmem:[#allocation12 + $0x1f4] sm:$0xf0]  ;;  %v4364_v10 = vld [vmem:[#allocation12 + $0xec] sm:$0xf]  ;;  %v3844_v31 = vor.u32 %v4392_v25, %v3841_v27  ;;  %v3823_v32 = vld [vmem:[#allocation12 + $0x1a8] sm:$0xf]  ;;  %v3792_v1 = vor.u32 %v4382_v60, %v3791_v57 }
 0x24c   : > { %v1544_v3 = vmul.f32 0.5, %v1532_v53  ;;  %2045 = vmatpush.bf16.msra.mxu2 %v3624_v47  ;;  %v3607_v53 = vld [vmem:[#allocation12] sm:$0xf]  ;;  %v4358_v30 = vld [vmem:[#allocation12 + $0xb4] sm:$0xf0]  ;;  %v4405_v57 = vld [vmem:[#allocation14 + $0x30] sm:$0xff] }
 0x24d   : > { %2082 = vmatpush.bf16.msrb.mxu1 %v3788_v23  ;;  %v3608_v56 = vor.u32 %v4337_v54, %v3607_v53  ;;  %v4360_v23 = vld [vmem:[#allocation12 + $0xcc] sm:$0xf]  ;;  %v4390_v33 = vld [vmem:[#allocation12 + $0x1b4] sm:$0xf0]  ;;  %v3696_v35 = vor.u32 %v4358_v30, %v3695_v28  ;;  %v3825_v37 = vld [vmem:[#allocation12 + $0x1b8] sm:$0xf0] }
 0x24e   : > { %4610 = vtanh.f32 %v1544_v3  ;;  %v1507_v12 = vpop.f32.mrf.mxu2  ;;  %2058 = vmatpush.bf16.msra.mxu3 %v3752_v38  ;;  %2071 = vmatpush.bf16.msrb.mxu0 %v3628_v39  ;;  %v3727_v3 = vld [vmem:[#allocation12 + $0xe8] sm:$0xf]  ;;  %v3716_v26 = vor.u32 %v4360_v23, %v3713_v24  ;;  %v4356_v34 = vld [vmem:[#allocation12 + $0xac] sm:$0xf]  ;;  %v3824_v42 = vor.u32 %v4390_v33, %v3823_v32  ;;  %v4354_v45 = vld [vmem:[#allocation12 + $0x94] sm:$0xf0] }
 0x24f   : > { %v4609_v14 = vpop.eup %4608  ;;  %v1520_v15 = vpop.f32.mrf.mxu3  ;;  %v3728_v9 = vor.u32 %v4366_v7, %v3727_v3  ;;  %v3856_v12 = vor.u32 %v4398_v4, %v3855_v8  ;;  %v3807_v46 = vld [vmem:[#allocation12 + $0x188] sm:$0xf]  ;;  %v4386_v38 = vld [vmem:[#allocation12 + $0x194] sm:$0xf0]  ;;  %v4352_v39 = vld [vmem:[#allocation12 + $0x8c] sm:$0xf] }
 0x250   : > { %v1550_v22 = vmul.f32 %v4609_v14, %v1538_v11  ;;  %2046 = vmatpush.bf16.msra.mxu2 %v3608_v56  ;;  %v3729_v11 = vld [vmem:[#allocation12 + $0xf8] sm:$0xf0]  ;;  %v4396_v14 = vld [vmem:[#allocation12 + $0x1ec] sm:$0xf]  ;;  %v4350_v56 = vld [vmem:[#allocation12 + $0x74] sm:$0xf0] }
 0x251   : > { %2083 = vmatpush.bf16.msrb.mxu1 %v3772_v36  ;;  %v3732_v13 = vor.u32 %v4364_v10, %v3729_v11  ;;  %v3857_v15 = vld [vmem:[#allocation12 + $0x1f8] sm:$0xf0]  ;;  %v4388_v36 = vld [vmem:[#allocation12 + $0x1ac] sm:$0xf]  ;;  %v3664_v58 = vor.u32 %v4350_v56, %v3663_v55  ;;  %v3647_v7 = vld [vmem:[#allocation12 + $0x48] sm:$0xf] }
 0x252   : > { %v5153_v29 = vadd.f32 %v1550_v22, %v1549_v62  ;;  %2059 = vmatpush.bf16.msra.mxu3 %v3736_v61  ;;  %2072 = vmatpush.bf16.msrb.mxu0 %v3612_v0  ;;  %v3860_v18 = vor.u32 %v4396_v14, %v3857_v15  ;;  %v3712_v62 = vor.u32 %v4362_v19, %v3711_v17  ;;  %v4348_v61 = vld [vmem:[#allocation12 + $0x6c] sm:$0xf]  ;;  %v3665_v0 = vld [vmem:[#allocation12 + $0x78] sm:$0xf0]  ;;  %v3775_v4 = vld [vmem:[#allocation12 + $0x148] sm:$0xf] }
 0x253   : > { %v3840_v22 = vor.u32 %v4394_v59, %v3839_v20  ;;  %v3828_v47 = vor.u32 %v4388_v36, %v3825_v37  ;;  %v3668_v2 = vor.u32 %v4348_v61, %v3665_v0  ;;  %v4380_v3 = vld [vmem:[#allocation12 + $0x16c] sm:$0xf]  ;;  %v4378_v10 = vld [vmem:[#allocation12 + $0x154] sm:$0xf0]  ;;  %v3777_v15 = vld [vmem:[#allocation12 + $0x158] sm:$0xf0]  ;;  %v1641_v37 = vstv %s1640_s14 }
 0x254   : > { %v4611_v63 = vpop.eup %4610  ;;  %4612 = vtanh.f32 %v5153_v29  ;;  %2091 = vmatpush.bf16.msrb.mxu2 %v3728_v9  ;;  %v4346_v9 = vld [vmem:[#allocation12 + $0x54] sm:$0xf0]  ;;  %v4344_v11 = vld [vmem:[#allocation12 + $0x4c] sm:$0xf]  ;;  %v3776_v17 = vor.u32 %v4378_v10, %v3775_v4  ;;  %v3631_v19 = vld [vmem:[#allocation12 + $0x28] sm:$0xf] }
 0x255   : > { %v1546_v44 = vmul.f32 0.5, %v4611_v63  ;;  %2084 = vmatpush.bf16.msrb.mxu1 %v3756_v48  ;;  %v3697_v63 = vld [vmem:[#allocation12 + $0xb8] sm:$0xf0]  ;;  %v3648_v14 = vor.u32 %v4346_v9, %v3647_v7  ;;  %v4342_v20 = vld [vmem:[#allocation12 + $0x34] sm:$0xf0]  ;;  %vm1642_vm3 = vcmp.eq.s32.totalorder %v1641_v37, 1 }
 0x256   : > { %2104 = vmatpush.bf16.msrb.mxu3 %v3856_v12  ;;  %2117 = vmatpush.bf16.msra.mxu0 %v3732_v13  ;;  %v3700_v43 = vor.u32 %v4356_v34, %v3697_v63  ;;  %v3681_v48 = vld [vmem:[#allocation12 + $0x98] sm:$0xf0]  ;;  %v4376_v13 = vld [vmem:[#allocation12 + $0x14c] sm:$0xf]  ;;  %v3759_v59 = vld [vmem:[#allocation12 + $0x128] sm:$0xf]  ;;  %v3632_v27 = vor.u32 %v4342_v20, %v3631_v19 }
 0x257   : > { %v1547_v49 = vadd.f32 0.5, %v1546_v44  ;;  %v3679_v44 = vld [vmem:[#allocation12 + $0x88] sm:$0xf]  ;;  %v3684_v53 = vor.u32 %v4352_v39, %v3681_v48  ;;  %v3649_v12 = vld [vmem:[#allocation12 + $0x58] sm:$0xf0]  ;;  %v4403_v60 = vld [vmem:[#allocation14 + $0x20] sm:$0xff] }
 0x258   : > { %2092 = vmatpush.bf16.msrb.mxu2 %v3712_v62  ;;  %v3780_v62 = vor.u32 %v4376_v13, %v3777_v15  ;;  %v4340_v23 = vld [vmem:[#allocation12 + $0x2c] sm:$0xf]  ;;  %v3633_v24 = vld [vmem:[#allocation12 + $0x38] sm:$0xf0]  ;;  %v4338_v32 = vld [vmem:[#allocation12 + $0x14] sm:$0xf0] }
 0x259   : > { %2085 = vmatpush.bf16.msrb.mxu1 %v3740_v6  ;;  %v3793_v6 = vld [vmem:[#allocation12 + $0x178] sm:$0xf0]  ;;  %v4372_v25 = vld [vmem:[#allocation12 + $0x12c] sm:$0xf]  ;;  %v3636_v30 = vor.u32 %v4340_v23, %v3633_v24  ;;  %v3743_v33 = vld [vmem:[#allocation12 + $0x108] sm:$0xf] }
 0x25a   : > { %v4613_v50 = vpop.eup %4612  ;;  %2105 = vmatpush.bf16.msrb.mxu3 %v3840_v22  ;;  %2118 = vmatpush.bf16.msra.mxu0 %v3716_v26  ;;  %v3796_v8 = vor.u32 %v4380_v3, %v3793_v6  ;;  %v4374_v22 = vld [vmem:[#allocation12 + $0x134] sm:$0xf0]  ;;  %v3761_v26 = vld [vmem:[#allocation12 + $0x138] sm:$0xf0]  ;;  %v4336_v63 = vld [vmem:[#allocation12 + $0xc] sm:$0xf] }
 0x25b   : > { %v1553_v51 = vmul.f32 %v4613_v50, %v1547_v49  ;;  %v4384_v49 = vld [vmem:[#allocation12 + $0x18c] sm:$0xf]  ;;  %v3809_v50 = vld [vmem:[#allocation12 + $0x198] sm:$0xf0]  ;;  %v3760_v28 = vor.u32 %v4374_v22, %v3759_v59  ;;  %v3764_v34 = vor.u32 %v4372_v25, %v3761_v26  ;;  %v4401_v6 = vld [vmem:[#allocation14 + $0x10] sm:$0xff]  ;;  %s2879_s14 = sshll.u32 %s2876_s22, 4  ;;  %s2880_s14 = int_to_ptr.hbm [resolvable:$true] %s2879_s14 }
 0x25c   : > { %2093 = vmatpush.bf16.msrb.mxu2 %v3696_v35  ;;  %v3812_v54 = vor.u32 %v4384_v49, %v3809_v50  ;;  %v4370_v35 = vld [vmem:[#allocation12 + $0x114] sm:$0xf0]  ;;  %v3617_v36 = vld [vmem:[#allocation12 + $0x18] sm:$0xf0]  ;;  %v4400_v4 = vld [vmem:[#allocation14 + $0x8] sm:$0xff]  ;;  %s4811_s18 = sshra.s32 %s2880_s14, 4  ;;  %s4812_s18 = int_to_ptr.hbm [resolvable:$true] %s4811_s18 }
 0x25d   : > { %v1555_v52 = vpack.c.bf16 %v1553_v51, %v1553_v51  ;;  %v3680_v51 = vor.u32 %v4354_v45, %v3679_v44  ;;  %v3744_v45 = vor.u32 %v4370_v35, %v3743_v33  ;;  %v4009_v59 = vld [vmem:[#allocation12 + $0xe0] sm:$0xf]  ;;  %v4469_v25 = vld [vmem:[#allocation12 + $0x1ec] sm:$0xf0]  ;;  %v4435_v26 = vld [vmem:[#allocation12 + $0xe4] sm:$0xf]  ;;  %p4818_p5 = scmp.lt.s32.totalorder %s4812_s18, %s5246_s8 }
 0x25e   : > { %2106 = vmatpush.bf16.msrb.mxu3 %v3824_v42  ;;  %2119 = vmatpush.bf16.msra.mxu0 %v3700_v43  ;;  %v4368_v42 = vld [vmem:[#allocation12 + $0x10c] sm:$0xf]  ;;  %v3745_v43 = vld [vmem:[#allocation12 + $0x118] sm:$0xf0]  ;;  %v4137_v24 = vld [vmem:[#allocation12 + $0x1e0] sm:$0xf] }
 0x25f   : > { %1628 = vmatmul.bf16.vlgmr.msra.gmra.mxu1 %v1555_v52  ;;  %1646 = vst [vmem:[#allocation2 + $0x4] sm:$0xf] %v1555_v52  ;;  %v3808_v52 = vor.u32 %v4386_v38, %v3807_v46  ;;  %v3620_v46 = vor.u32 %v4336_v63, %v3617_v36  ;;  %v3604_v38 = vld [vmem:[%s5079_s30 + $0x8] sm:$0xff]  ;;  %v3748_v39 = vor.u32 %v4368_v42, %v3745_v43  ;;  %v3993_v63 = vld [vmem:[#allocation12 + $0xc0] sm:$0xf]  ;;  %s4813_s15 = scalar_lea.hbm %s4812_s18, 32 }
 0x260   : > { %2130 = vmatpush.bf16.msra.mxu1 %v3860_v18  ;;  %2094 = vmatpush.bf16.msrb.mxu2 %v3680_v51  ;;  %v3652_v18 = vor.u32 %v4344_v11, %v3649_v12  ;;  %v4433_v36 = vld [vmem:[#allocation12 + $0xcc] sm:$0xf0]  ;;  %v4121_v42 = vld [vmem:[#allocation12 + $0x1c0] sm:$0xf]  ;;  %p4814_p13 = scmp.ne.s32.totalorder %s4812_s18, %s4813_s15 }
 0x261   : > { %v3994_v37 = vor.u32 %v4433_v36, %v3993_v63  ;;  %v4465_v43 = vld [vmem:[#allocation12 + $0x1cc] sm:$0xf0] }
 0x262   : > { %2107 = vmatpush.bf16.msrb.mxu3 %v3808_v52  ;;  %2120 = vmatpush.bf16.msra.mxu0 %v3684_v53  ;;  %p4815_p0 = pnand %p4814_p13, %p5054_p7 }
 0x264   : > { %2131 = vmatpush.bf16.msra.mxu1 %v3844_v31  ;;  %2095 = vmatpush.bf16.msrb.mxu2 %v3664_v58  ;;  %v3615_v31 = vld [vmem:[#allocation12 + $0x8] sm:$0xf]  ;;  %p4816_p3 = pneg %p4815_p0 }
 0x265   : > { %v3616_v44 = vor.u32 %v4338_v32, %v3615_v31  ;;  %v4404_v58 = vld [vmem:[#allocation14 + $0x28] sm:$0xff]  ;;  %v4467_v31 = vld [vmem:[#allocation12 + $0x1e4] sm:$0xf]  ;;  %v4139_v32 = vld [vmem:[#allocation12 + $0x1f0] sm:$0xf0] }
 0x266   : > { %2108 = vmatpush.bf16.msrb.mxu3 %v3792_v1  ;;  %2121 = vmatpush.bf16.msra.mxu0 %v3668_v2  ;;  %v4402_v1 = vld [vmem:[#allocation14 + $0x18] sm:$0xff]  ;;  %v4142_v35 = vor.u32 %v4467_v31, %v4139_v32  ;;  %v3947_v31 = vld [vmem:[#allocation12 + $0x70] sm:$0xf0]  ;;  %v4451_v32 = vld [vmem:[#allocation12 + $0x164] sm:$0xf] }
 0x268   : > { %2132 = vmatpush.bf16.msra.mxu1 %v3828_v47  ;;  %2096 = vmatpush.bf16.msrb.mxu2 %v3648_v14  ;;  %v4399_v14 = vld [vmem:[#allocation14] sm:$0xff] }
 0x26a   : > { %2109 = vmatpush.bf16.msrb.mxu3 %v3776_v17  ;;  %2122 = vmatpush.bf16.msra.mxu0 %v3652_v18 }
 0x26c   : > { %2133 = vmatpush.bf16.msra.mxu1 %v3812_v54  ;;  %2097 = vmatpush.bf16.msrb.mxu2 %v3632_v27 }
 0x26e   : > { %2110 = vmatpush.bf16.msrb.mxu3 %v3760_v28  ;;  %2123 = vmatpush.bf16.msra.mxu0 %v3636_v30  ;;  %v4138_v28 = vor.u32 %v4469_v25, %v4137_v24  ;;  %v4011_v30 = vld [vmem:[#allocation12 + $0xf0] sm:$0xf0] }
 0x270   : > { %2134 = vmatpush.bf16.msra.mxu1 %v3796_v8  ;;  %2098 = vmatpush.bf16.msrb.mxu2 %v3616_v44  ;;  %v4431_v44 = vld [vmem:[#allocation12 + $0xc4] sm:$0xf] }
 0x272   : > { %2111 = vmatpush.bf16.msrb.mxu3 %v3744_v45  ;;  %2124 = vmatpush.bf16.msra.mxu0 %v3620_v46 }
 0x274   : > { %2135 = vmatpush.bf16.msra.mxu1 %v3780_v62  ;;  %v4437_v62 = vld [vmem:[#allocation12 + $0xec] sm:$0xf0] }
 0x275   : > { %v4010_v23 = vor.u32 %v4437_v62, %v4009_v59  ;;  %v3945_v62 = vld [vmem:[#allocation12 + $0x60] sm:$0xf] }
 0x278   : > { %2136 = vmatpush.bf16.msra.mxu1 %v3764_v34  ;;  %v4014_v34 = vor.u32 %v4435_v26, %v4011_v30  ;;  %v4419_v30 = vld [vmem:[#allocation12 + $0x64] sm:$0xf] }
 0x27c   : > { %2137 = vmatpush.bf16.msra.mxu1 %v3748_v39  ;;  %v4122_v39 = vor.u32 %v4465_v43, %v4121_v42  ;;  %v3929_v42 = vld [vmem:[#allocation12 + $0x40] sm:$0xf]  ;;  %v4417_v43 = vld [vmem:[#allocation12 + $0x4c] sm:$0xf0] }
 0x2dc   : > { %v1629_v47 = vpop.f32.mrf.mxu1 }
 0x2dd   : > { %v1630_v48 = vadd.f32 %v5141_v5, %v1629_v47  ;;  %v4406_v5 = vld [vmem:[#allocation14 + $0x38] sm:$0xff] }
 0x2df   : > { %3603 = vst [vmem:[%s5093_s4 + $0x8] sm:$0xff] %v1630_v48  ;;  %v1643_v49 = vsel %vm1642_vm3, %v3604_v38, %v1630_v48  ;;  %v3995_v48 = vld [vmem:[#allocation12 + $0xd0] sm:$0xf0] }
 0x2e0   : > { %v1644_v50 = vpack.c.bf16 %v1643_v49, %v1643_v49  ;;  %v4463_v49 = vld [vmem:[#allocation12 + $0x1c4] sm:$0xf] }
 0x2e2   : > { %1645 = vst.msk [vmem:[#allocation2] sm:$0xf] %vm1036_vm2, %v1644_v50 }
 0x2e4   : > { %v1631_v51 = vpop.f32.mrf.mxu1 }
 0x2e5   : > { %v3998_v51 = vor.u32 %v4431_v44, %v3995_v48  ;;  %v4415_v48 = vld [vmem:[#allocation12 + $0x44] sm:$0xf] }
 0x2e9   : > { %v1647_v52 = vld [vmem:[#allocation2] sm:$0xff] }
 0x2ea   : > { %v1713_v53 = vunpack.c.l.b16 %v1647_v52  ;;  %v1714_v54 = vunpack.c.h.b16 %v1647_v52  ;;  %v4123_v52 = vld [vmem:[#allocation12 + $0x1d0] sm:$0xf0] }
 0x2ec   : > { %v1715_v55 = vpack.c.b16 %v1713_v53, %v1713_v53  ;;  %v1716_v56 = vpack.c.b16 %v1714_v54, %v1714_v54  ;;  %v3977_v53 = vld [vmem:[#allocation12 + $0xa0] sm:$0xf]  ;;  %v4429_v54 = vld [vmem:[#allocation12 + $0xac] sm:$0xf0] }
 0x2ee   : > { %2047 = vmatmul.bf16.vlgmr.msra.gmra.mxu2 %v1715_v55  ;;  %2060 = vmatmul.bf16.vlgmr.msra.gmra.mxu3 %v1716_v56 }
 0x2ef   : > { %2073 = vmatmul.bf16.vlgmr.msrb.gmra.mxu0 %v1715_v55  ;;  %2086 = vmatmul.bf16.vlgmr.msrb.gmra.mxu1 %v1716_v56 }
 0x2f0   : > { %2228 = vmatpush.bf16.msra.mxu2 %v4406_v5  ;;  %2647 = vmatpush.bf16.msra.mxu3 %v4010_v23  ;;  %v4105_v5 = vld [vmem:[#allocation12 + $0x1a0] sm:$0xf] }
 0x2f1   : > { %2660 = vmatpush.bf16.msrb.mxu0 %v4138_v28  ;;  %2673 = vmatpush.bf16.msrb.mxu1 %v4014_v34  ;;  %v4453_v28 = vld [vmem:[#allocation12 + $0x16c] sm:$0xf0] }
 0x2f4   : > { %2229 = vmatpush.bf16.msra.mxu2 %v4405_v57  ;;  %2648 = vmatpush.bf16.msra.mxu3 %v3994_v37  ;;  %v4461_v57 = vld [vmem:[#allocation12 + $0x1ac] sm:$0xf0] }
 0x2f5   : > { %2661 = vmatpush.bf16.msrb.mxu0 %v4122_v39  ;;  %2674 = vmatpush.bf16.msrb.mxu1 %v3998_v51  ;;  %v4449_v39 = vld [vmem:[#allocation12 + $0x14c] sm:$0xf0]  ;;  %v4059_v51 = vld [vmem:[#allocation12 + $0x150] sm:$0xf0] }
 0x2f8   : > { %2230 = vmatpush.bf16.msra.mxu2 %v4404_v58  ;;  %v4427_v58 = vld [vmem:[#allocation12 + $0xa4] sm:$0xf] }
 0x2fc   : > { %2231 = vmatpush.bf16.msra.mxu2 %v4403_v60 }
 0x2fe   : > { %2099 = vmatmul.bf16.vlgmr.msrb.gmra.mxu2 %v1715_v55  ;;  %2112 = vmatmul.bf16.vlgmr.msrb.gmra.mxu3 %v1716_v56 }
 0x2ff   : > { %2125 = vmatmul.bf16.vlgmr.msra.gmra.mxu0 %v1715_v55  ;;  %2138 = vmatmul.bf16.vlgmr.msra.gmra.mxu1 %v1716_v56  ;;  %v4126_v55 = vor.u32 %v4463_v49, %v4123_v52  ;;  %v3978_v56 = vor.u32 %v4429_v54, %v3977_v53  ;;  %v3931_v49 = vld [vmem:[#allocation12 + $0x50] sm:$0xf0] }
 0x300   : > { %2232 = vmatpush.bf16.msra.mxu2 %v4402_v1 }
 0x301   : > { %2649 = vmatpush.bf16.msra.mxu3 %v3978_v56  ;;  %v4413_v56 = vld [vmem:[#allocation12 + $0x2c] sm:$0xf0] }
 0x304   : > { %2233 = vmatpush.bf16.msra.mxu2 %v4401_v6  ;;  %v4459_v6 = vld [vmem:[#allocation12 + $0x1a4] sm:$0xf] }
 0x308   : > { %2234 = vmatpush.bf16.msra.mxu2 %v4400_v4  ;;  %v3961_v4 = vld [vmem:[#allocation12 + $0x80] sm:$0xf] }
 0x30c   : > { %2235 = vmatpush.bf16.msra.mxu2 %v4399_v14  ;;  %v3963_v14 = vld [vmem:[#allocation12 + $0x90] sm:$0xf0] }
 0x310   : > { %2686 = vmatpush.bf16.msrb.mxu2 %v4142_v35 }
 0x314   : > { %2687 = vmatpush.bf16.msrb.mxu2 %v4126_v55  ;;  %v3913_v55 = vld [vmem:[#allocation12 + $0x20] sm:$0xf] }
 0x36c   : > { %v2074_v61 = vpop.f32.mrf.mxu0  ;;  %v2087_v0 = vpop.f32.mrf.mxu1 }
 0x36d   : > { %v2075_v2 = vadd.f32 %v2074_v61, %v5115_v21 }
 0x36f   : > { %v2088_v3 = vadd.f32 %v2087_v0, %v2075_v2  ;;  %v4106_v2 = vor.u32 %v4461_v57, %v4105_v5  ;;  %v3934_v5 = vor.u32 %v4415_v48, %v3931_v49  ;;  %v4131_v48 = vld [vmem:[#allocation12 + $0x1d8] sm:$0xf0]  ;;  %v3985_v49 = vld [vmem:[#allocation12 + $0xa8] sm:$0xf] }
 0x371   : > { %v2048_v7 = vpop.f32.mrf.mxu2  ;;  %v2061_v8 = vpop.f32.mrf.mxu3  ;;  %v2147_v10 = vmul.f32 0.5, %v2088_v3  ;;  %v3979_v3 = vld [vmem:[#allocation12 + $0xb0] sm:$0xf0]  ;;  %2662 = vmatpush.bf16.msrb.mxu0 %v4106_v2 }
 0x372   : > { %v2049_v9 = vadd.f32 %v2048_v7, %v5112_v16  ;;  %v4107_v7 = vld [vmem:[#allocation12 + $0x1b0] sm:$0xf0] }
 0x373   : > { %4614 = vtanh.f32 %v2147_v10  ;;  %v4425_v10 = vld [vmem:[#allocation12 + $0x8c] sm:$0xf0]  ;;  %v4043_v2 = vld [vmem:[#allocation12 + $0x130] sm:$0xf0] }
 0x374   : > { %v2076_v11 = vpop.f32.mrf.mxu0  ;;  %v2089_v12 = vpop.f32.mrf.mxu1  ;;  %v2062_v13 = vadd.f32 %v2061_v8, %v2049_v9  ;;  %v3982_v8 = vor.u32 %v4427_v58, %v3979_v3  ;;  %v4110_v9 = vor.u32 %v4459_v6, %v4107_v7  ;;  %v4041_v58 = vld [vmem:[#allocation12 + $0x120] sm:$0xf]  ;;  %v3914_v3 = vor.u32 %v4413_v56, %v3913_v55  ;;  %v3987_v56 = vld [vmem:[#allocation12 + $0xb8] sm:$0xf0] }
 0x375   : > { %v4089_v11 = vld [vmem:[#allocation12 + $0x180] sm:$0xf]  ;;  %v4457_v12 = vld [vmem:[#allocation12 + $0x18c] sm:$0xf0] }
 0x376   : > { %v2143_v18 = vmul.f32 0.5, %v2062_v13  ;;  %v4423_v13 = vld [vmem:[#allocation12 + $0x84] sm:$0xf]  ;;  %v4090_v59 = vor.u32 %v4457_v12, %v4089_v11  ;;  %2675 = vmatpush.bf16.msrb.mxu1 %v3982_v8  ;;  %2688 = vmatpush.bf16.msrb.mxu2 %v4110_v9  ;;  %v3897_v12 = vld [vmem:[#allocation12] sm:$0xf] }
 0x377   : > { %v3966_v25 = vor.u32 %v4423_v13, %v3963_v14  ;;  %v4409_v13 = vld [vmem:[#allocation12 + $0xc] sm:$0xf0]  ;;  %v4025_v14 = vld [vmem:[#allocation12 + $0x100] sm:$0xf] }
 0x378   : > { %4616 = vtanh.f32 %v2143_v18  ;;  %v4455_v18 = vld [vmem:[#allocation12 + $0x184] sm:$0xf]  ;;  %2663 = vmatpush.bf16.msrb.mxu0 %v4090_v59 }
 0x379   : > { %v2050_v15 = vpop.f32.mrf.mxu2  ;;  %v2063_v17 = vpop.f32.mrf.mxu3 }
 0x37a   : > { %v4615_v27 = vpop.eup %4614  ;;  %v3962_v17 = vor.u32 %v4425_v10, %v3961_v4  ;;  %2676 = vmatpush.bf16.msrb.mxu1 %v3966_v25  ;;  %v4438_v25 = vld [vmem:[#allocation12 + $0xf4] sm:$0xf0] }
 0x37b   : > { %v2149_v45 = vmul.f32 0.5, %v4615_v27  ;;  %v4073_v27 = vld [vmem:[#allocation12 + $0x160] sm:$0xf] }
 0x37c   : > { %v2126_v19 = vpop.f32.mrf.mxu0  ;;  %v2139_v20 = vpop.f32.mrf.mxu1  ;;  %2650 = vmatpush.bf16.msra.mxu3 %v3962_v17  ;;  %v4074_v37 = vor.u32 %v4453_v28, %v4073_v27  ;;  %v4441_v17 = vld [vmem:[#allocation12 + $0x10c] sm:$0xf0]  ;;  %v4470_v28 = vld [vmem:[#allocation12 + $0x1f4] sm:$0xf0] }
 0x37d   : > { %v2127_v22 = vadd.f32 %v2126_v19, %v5120_v41  ;;  %v4091_v19 = vld [vmem:[#allocation12 + $0x190] sm:$0xf0] }
 0x37e   : > { %v4617_v60 = vpop.eup %4616  ;;  %v4094_v26 = vor.u32 %v4455_v18, %v4091_v19  ;;  %2664 = vmatpush.bf16.msrb.mxu0 %v4074_v37  ;;  %v4407_v18 = vld [vmem:[#allocation12 + $0x4] sm:$0xf]  ;;  %v3899_v19 = vld [vmem:[#allocation12 + $0x10] sm:$0xf0]  ;;  %v4434_v37 = vld [vmem:[#allocation12 + $0xd4] sm:$0xf0] }
 0x37f   : > { %v2140_v33 = vadd.f32 %v2139_v20, %v2127_v22  ;;  %v2145_v15 = vmul.f32 0.5, %v4617_v60  ;;  %v2150_v20 = vadd.f32 0.5, %v2149_v45  ;;  %v4421_v22 = vld [vmem:[#allocation12 + $0x6c] sm:$0xf0]  ;;  %v3902_v59 = vor.u32 %v4407_v18, %v3899_v19  ;;  %v4454_v18 = vld [vmem:[#allocation12 + $0x174] sm:$0xf0] }
 0x380   : > { %v3946_v35 = vor.u32 %v4421_v22, %v3945_v62  ;;  %2689 = vmatpush.bf16.msrb.mxu2 %v4094_v26  ;;  %v4445_v60 = vld [vmem:[#allocation12 + $0x12c] sm:$0xf0]  ;;  %v4439_v62 = vld [vmem:[#allocation12 + $0x104] sm:$0xf]  ;;  %v4027_v22 = vld [vmem:[#allocation12 + $0x110] sm:$0xf0] }
 0x381   : > { %v2152_v46 = vmul.f32 0.5, %v2140_v33  ;;  %v2100_v47 = vpop.f32.mrf.mxu2  ;;  %v2113_v38 = vpop.f32.mrf.mxu3  ;;  %v4075_v33 = vld [vmem:[#allocation12 + $0x170] sm:$0xf0]  ;;  %v2146_v34 = vadd.f32 0.5, %v2145_v15  ;;  %v2157_v36 = vmul.f32 %v2150_v20, %v5153_v29  ;;  %v3930_v29 = vor.u32 %v4417_v43, %v3929_v42  ;;  %v4145_v26 = vld [vmem:[#allocation12 + $0x1e8] sm:$0xf] }
 0x382   : > { %v2101_v50 = vadd.f32 %v2100_v47, %v5118_v40  ;;  %v4078_v47 = vor.u32 %v4451_v32, %v4075_v33  ;;  %2651 = vmatpush.bf16.msra.mxu3 %v3946_v35  ;;  %v4042_v6 = vor.u32 %v4445_v60, %v4041_v58  ;;  %v3898_v15 = vor.u32 %v4409_v13, %v3897_v12  ;;  %v4147_v35 = vld [vmem:[#allocation12 + $0x1f8] sm:$0xf0]  ;;  %v4129_v42 = vld [vmem:[#allocation12 + $0x1c8] sm:$0xf]  ;;  %v4466_v43 = vld [vmem:[#allocation12 + $0x1d4] sm:$0xf0] }
 0x383   : > { %v4026_v20 = vor.u32 %v4441_v17, %v4025_v14  ;;  %v4146_v32 = vor.u32 %v4470_v28, %v4145_v26  ;;  %v3953_v13 = vld [vmem:[#allocation12 + $0x68] sm:$0xf]  ;;  %v4422_v14 = vld [vmem:[#allocation12 + $0x74] sm:$0xf0]  ;;  %v4420_v19 = vld [vmem:[#allocation12 + $0x6c] sm:$0xf] }
 0x384   : > { %v2114_v61 = vadd.f32 %v2113_v38, %v2101_v50  ;;  %v2128_v0 = vpop.f32.mrf.mxu0  ;;  %v2141_v1 = vpop.f32.mrf.mxu1  ;;  %v4057_v38 = vld [vmem:[#allocation12 + $0x140] sm:$0xf]  ;;  %v4447_v50 = vld [vmem:[#allocation12 + $0x144] sm:$0xf]  ;;  %2690 = vmatpush.bf16.msrb.mxu2 %v4078_v47  ;;  %v4003_v47 = vld [vmem:[#allocation12 + $0xd8] sm:$0xf0]  ;;  %v3954_v17 = vor.u32 %v4422_v14, %v3953_v13 }
 0x385   : > { %v4058_v54 = vor.u32 %v4449_v39, %v4057_v38  ;;  %v4062_v57 = vor.u32 %v4447_v50, %v4059_v51  ;;  %v3915_v0 = vld [vmem:[#allocation12 + $0x30] sm:$0xf0]  ;;  %v4443_v1 = vld [vmem:[#allocation12 + $0x124] sm:$0xf]  ;;  %v4464_v38 = vld [vmem:[#allocation12 + $0x1cc] sm:$0xf] }
 0x386   : > { %4618 = vtanh.f32 %v2114_v61  ;;  %v4411_v61 = vld [vmem:[#allocation12 + $0x24] sm:$0xf]  ;;  %2652 = vmatpush.bf16.msra.mxu3 %v3930_v29  ;;  %v4046_v8 = vor.u32 %v4443_v1, %v4043_v2  ;;  %v4430_v50 = vld [vmem:[#allocation12 + $0xb4] sm:$0xf0]  ;;  %v4134_v51 = vor.u32 %v4464_v38, %v4131_v48  ;;  %v4113_v29 = vld [vmem:[#allocation12 + $0x1a8] sm:$0xf] }
 0x387   : > { %4620 = vtanh.f32 %v2152_v46  ;;  %v3950_v46 = vor.u32 %v4419_v30, %v3947_v31  ;;  %2665 = vmatpush.bf16.msrb.mxu0 %v4058_v54  ;;  %v3918_v7 = vor.u32 %v4411_v61, %v3915_v0  ;;  %v4436_v30 = vld [vmem:[#allocation12 + $0xec] sm:$0xf]  ;;  %v4019_v31 = vld [vmem:[#allocation12 + $0xf8] sm:$0xf0]  ;;  %v3986_v55 = vor.u32 %v4430_v50, %v3985_v49  ;;  %v3969_v61 = vld [vmem:[#allocation12 + $0x88] sm:$0xf] }
 0x388   : > { %2691 = vmatpush.bf16.msrb.mxu2 %v4062_v57  ;;  %v4022_v33 = vor.u32 %v4436_v30, %v4019_v31  ;;  %v4428_v54 = vld [vmem:[#allocation12 + $0xac] sm:$0xf]  ;;  %v4115_v57 = vld [vmem:[#allocation12 + $0x1b8] sm:$0xf0]  ;;  %v4426_v0 = vld [vmem:[#allocation12 + $0x94] sm:$0xf0] }
 0x389   : > { %v2102_v23 = vpop.f32.mrf.mxu2  ;;  %v2115_v24 = vpop.f32.mrf.mxu3  ;;  %2677 = vmatpush.bf16.msrb.mxu1 %v3950_v46  ;;  %v4432_v46 = vld [vmem:[#allocation12 + $0xcc] sm:$0xf]  ;;  %v3990_v60 = vor.u32 %v4428_v54, %v3987_v56  ;;  %v4097_v1 = vld [vmem:[#allocation12 + $0x188] sm:$0xf]  ;;  %v4418_v26 = vld [vmem:[#allocation12 + $0x54] sm:$0xf0] }
 0x38a   : > { %2653 = vmatpush.bf16.msra.mxu3 %v3914_v3  ;;  %v4017_v23 = vld [vmem:[#allocation12 + $0xe8] sm:$0xf]  ;;  %v4030_v24 = vor.u32 %v4439_v62, %v4027_v22  ;;  %v4006_v39 = vor.u32 %v4432_v46, %v4003_v47  ;;  %v4458_v3 = vld [vmem:[#allocation12 + $0x194] sm:$0xf0]  ;;  %v4452_v22 = vld [vmem:[#allocation12 + $0x16c] sm:$0xf] }
 0x38b   : > { %2666 = vmatpush.bf16.msrb.mxu0 %v4042_v6  ;;  %v4018_v27 = vor.u32 %v4438_v25, %v4017_v23  ;;  %v4424_v6 = vld [vmem:[#allocation12 + $0x8c] sm:$0xf]  ;;  %v4083_v23 = vld [vmem:[#allocation12 + $0x178] sm:$0xf0]  ;;  %v4450_v28 = vld [vmem:[#allocation12 + $0x154] sm:$0xf0] }
 0x38c   : > { %v4619_v63 = vpop.eup %4618  ;;  %2692 = vmatpush.bf16.msrb.mxu2 %v4046_v8  ;;  %v4456_v8 = vld [vmem:[#allocation12 + $0x18c] sm:$0xf]  ;;  %v4086_v25 = vor.u32 %v4452_v22, %v4083_v23  ;;  %v3939_v31 = vld [vmem:[#allocation12 + $0x58] sm:$0xf0]  ;;  %v3905_v50 = vld [vmem:[#allocation12 + $0x8] sm:$0xf] }
 0x38d   : > { %v4621_v44 = vpop.eup %4620  ;;  %v2158_v45 = vmul.f32 %v4619_v63, %v2146_v34  ;;  %2678 = vmatpush.bf16.msrb.mxu1 %v3934_v5  ;;  %v4468_v34 = vld [vmem:[#allocation12 + $0x1ec] sm:$0xf]  ;;  %v4001_v63 = vld [vmem:[#allocation12 + $0xc8] sm:$0xf]  ;;  %v3923_v46 = vld [vmem:[#allocation12 + $0x38] sm:$0xf0] }
 0x38e   : > { %v2154_v53 = vmul.f32 0.5, %v4621_v44  ;;  %2654 = vmatpush.bf16.msra.mxu3 %v3898_v15  ;;  %v4002_v44 = vor.u32 %v4434_v37, %v4001_v63  ;;  %v4460_v5 = vld [vmem:[#allocation12 + $0x1ac] sm:$0xf]  ;;  %v4081_v15 = vld [vmem:[#allocation12 + $0x168] sm:$0xf]  ;;  %v4473_v22 = vld [vmem:[#allocation14 + $0x10] sm:$0xff] }
 0x38f   : > { %v5171_v52 = vadd.f32 %v2158_v45, %v2157_v36  ;;  %2667 = vmatpush.bf16.msrb.mxu0 %v4026_v20  ;;  %v4150_v36 = vor.u32 %v4468_v34, %v4147_v35  ;;  %v4130_v45 = vor.u32 %v4466_v43, %v4129_v42  ;;  %v4118_v2 = vor.u32 %v4460_v5, %v4115_v57  ;;  %v3955_v20 = vld [vmem:[#allocation12 + $0x78] sm:$0xf0]  ;;  %v4416_v30 = vld [vmem:[#allocation12 + $0x4c] sm:$0xf]  ;;  %v4414_v37 = vld [vmem:[#allocation12 + $0x34] sm:$0xf0] }
 0x390   : > { %v2155_v9 = vadd.f32 0.5, %v2154_v53  ;;  %2693 = vmatpush.bf16.msrb.mxu2 %v4030_v24  ;;  %v4462_v53 = vld [vmem:[#allocation12 + $0x1b4] sm:$0xf0]  ;;  %v3958_v62 = vor.u32 %v4420_v19, %v3955_v20  ;;  %v3937_v24 = vld [vmem:[#allocation12 + $0x48] sm:$0xf]  ;;  %v3942_v63 = vor.u32 %v4416_v30, %v3939_v31  ;;  %v2249_v5 = vstv %s2248_s17  ;;  %v4475_v19 = vld [vmem:[#allocation14 + $0x20] sm:$0xff] }
 0x391   : > { %4622 = vtanh.f32 %v5171_v52  ;;  %2679 = vmatpush.bf16.msrb.mxu1 %v3918_v7  ;;  %v4114_v58 = vor.u32 %v4462_v53, %v4113_v29  ;;  %v3971_v7 = vld [vmem:[#allocation12 + $0x98] sm:$0xf0]  ;;  %v4049_v42 = vld [vmem:[#allocation12 + $0x128] sm:$0xf]  ;;  %v4444_v47 = vld [vmem:[#allocation12 + $0x12c] sm:$0xf] }
 0x392   : > { %2699 = vmatpush.bf16.msrb.mxu3 %v4018_v27  ;;  %v4065_v27 = vld [vmem:[#allocation12 + $0x148] sm:$0xf]  ;;  %v4067_v34 = vld [vmem:[#allocation12 + $0x158] sm:$0xf0]  ;;  %v4442_v54 = vld [vmem:[#allocation12 + $0x114] sm:$0xf0] }
 0x393   : > { %2712 = vmatpush.bf16.msra.mxu0 %v4146_v32  ;;  %v4448_v32 = vld [vmem:[#allocation12 + $0x14c] sm:$0xf]  ;;  %v4066_v35 = vor.u32 %v4450_v28, %v4065_v27  ;;  %v4051_v38 = vld [vmem:[#allocation12 + $0x138] sm:$0xf0]  ;;  %v4033_v29 = vld [vmem:[#allocation12 + $0x108] sm:$0xf] }
 0x394   : > { %v4070_v43 = vor.u32 %v4448_v32, %v4067_v34  ;;  %v4054_v53 = vor.u32 %v4444_v47, %v4051_v38  ;;  %v3907_v56 = vld [vmem:[#allocation12 + $0x18] sm:$0xf0]  ;;  %v4440_v57 = vld [vmem:[#allocation12 + $0x10c] sm:$0xf]  ;;  %vm2250_vm4 = vcmp.eq.s32.totalorder %v2249_v5, 1  ;;  %v4471_v34 = vld [vmem:[#allocation14] sm:$0xff] }
 0x395   : > { %2680 = vmatpush.bf16.msrb.mxu1 %v3902_v59  ;;  %v4082_v59 = vor.u32 %v4454_v18, %v4081_v15  ;;  %v4478_v15 = vld [vmem:[#allocation14 + $0x38] sm:$0xff]  ;;  %v4476_v18 = vld [vmem:[#allocation14 + $0x28] sm:$0xff] }
 0x396   : > { %2700 = vmatpush.bf16.msrb.mxu3 %v4002_v44  ;;  %v4446_v44 = vld [vmem:[#allocation12 + $0x134] sm:$0xf0]  ;;  %v4472_v31 = vld [vmem:[#allocation14 + $0x8] sm:$0xff] }
 0x397   : > { %v4623_v4 = vpop.eup %4622  ;;  %2713 = vmatpush.bf16.msra.mxu0 %v4130_v45  ;;  %v4412_v45 = vld [vmem:[#allocation12 + $0x2c] sm:$0xf]  ;;  %v4050_v48 = vor.u32 %v4446_v44, %v4049_v42 }
 0x398   : > { %v2161_v10 = vmul.f32 %v4623_v4, %v2155_v9  ;;  %v4099_v9 = vld [vmem:[#allocation12 + $0x198] sm:$0xf0]  ;;  %v3970_v4 = vor.u32 %v4426_v0, %v3969_v61  ;;  %v3926_v49 = vor.u32 %v4412_v45, %v3923_v46  ;;  %v4034_v61 = vor.u32 %v4442_v54, %v4033_v29 }
 0x399   : > { %2725 = vmatpush.bf16.msra.mxu1 %v4022_v33  ;;  %v4102_v12 = vor.u32 %v4456_v8, %v4099_v9  ;;  %v3938_v33 = vor.u32 %v4418_v26, %v3937_v24 }
 0x39a   : > { %v2163_v11 = vpack.c.bf16 %v2161_v10, %v2161_v10  ;;  %2701 = vmatpush.bf16.msrb.mxu3 %v3986_v55  ;;  %v4098_v10 = vor.u32 %v4458_v3, %v4097_v1  ;;  %v4408_v55 = vld [vmem:[#allocation12 + $0xc] sm:$0xf] }
 0x39b   : > { %2714 = vmatpush.bf16.msra.mxu0 %v4114_v58  ;;  %v4035_v58 = vld [vmem:[#allocation12 + $0x118] sm:$0xf0]  ;;  %v3910_v0 = vor.u32 %v4408_v55, %v3907_v56 }
 0x39c   : > { %2236 = vmatmul.bf16.vlgmr.msra.gmra.mxu2 %v2163_v11  ;;  %2254 = vst [vmem:[#allocation2 + $0x4] sm:$0xf] %v2163_v11  ;;  %v3974_v11 = vor.u32 %v4424_v6, %v3971_v7  ;;  %v4038_v3 = vor.u32 %v4440_v57, %v4035_v58  ;;  %v5184_v6 = vld [vmem:[%s5245_s7] ss:$0 sm:$0xff] }
 0x39d   : > { %2738 = vmatpush.bf16.msra.mxu2 %v4150_v36  ;;  %2726 = vmatpush.bf16.msra.mxu1 %v4006_v39  ;;  %v3921_v36 = vld [vmem:[#allocation12 + $0x28] sm:$0xf] }
 0x39e   : > { %2702 = vmatpush.bf16.msrb.mxu3 %v3970_v4  ;;  %v3922_v39 = vor.u32 %v4414_v37, %v3921_v36 }
 0x39f   : > { %2715 = vmatpush.bf16.msra.mxu0 %v4098_v10 }
 0x3a1   : > { %2739 = vmatpush.bf16.msra.mxu2 %v4134_v51  ;;  %2727 = vmatpush.bf16.msra.mxu1 %v3990_v60  ;;  %v4410_v51 = vld [vmem:[#allocation12 + $0x14] sm:$0xf0] }
 0x3a2   : > { %2703 = vmatpush.bf16.msrb.mxu3 %v3954_v17  ;;  %v3906_v60 = vor.u32 %v4410_v51, %v3905_v50  ;;  %v4477_v17 = vld [vmem:[#allocation14 + $0x30] sm:$0xff] }
 0x3a3   : > { %2716 = vmatpush.bf16.msra.mxu0 %v4082_v59 }
 0x3a5   : > { %2740 = vmatpush.bf16.msra.mxu2 %v4118_v2  ;;  %2728 = vmatpush.bf16.msra.mxu1 %v3974_v11  ;;  %v3894_v2 = vld [vmem:[%s5079_s30 + $0x10] sm:$0xff] }
 0x3a6   : > { %2704 = vmatpush.bf16.msrb.mxu3 %v3938_v33 }
 0x3a7   : > { %2717 = vmatpush.bf16.msra.mxu0 %v4066_v35 }
 0x3a9   : > { %2741 = vmatpush.bf16.msra.mxu2 %v4102_v12  ;;  %2729 = vmatpush.bf16.msra.mxu1 %v3958_v62  ;;  %v4474_v62 = vld [vmem:[#allocation14 + $0x18] sm:$0xff] }
 0x3aa   : > { %2705 = vmatpush.bf16.msrb.mxu3 %v3922_v39 }
 0x3ab   : > { %2718 = vmatpush.bf16.msra.mxu0 %v4050_v48 }
 0x3ad   : > { %2742 = vmatpush.bf16.msra.mxu2 %v4086_v25  ;;  %2730 = vmatpush.bf16.msra.mxu1 %v3942_v63 }
 0x3ae   : > { %2706 = vmatpush.bf16.msrb.mxu3 %v3906_v60 }
 0x3af   : > { %2719 = vmatpush.bf16.msra.mxu0 %v4034_v61 }
 0x3b1   : > { %2743 = vmatpush.bf16.msra.mxu2 %v4070_v43  ;;  %2731 = vmatpush.bf16.msra.mxu1 %v3926_v49 }
 0x3b5   : > { %2744 = vmatpush.bf16.msra.mxu2 %v4054_v53  ;;  %2732 = vmatpush.bf16.msra.mxu1 %v3910_v0 }
 0x3b9   : > { %2745 = vmatpush.bf16.msra.mxu2 %v4038_v3  ;;  %v4184_v3 = vld [vmem:[%s5079_s30 + $0x18] sm:$0xff]  ;;  %s4817_s30 = scalar_lea.hbm %s5246_s8, 64 }
 0x3ba   : > { %p4819_p10 = scmp.lt.s32.totalorder %s4817_s30, %s4813_s15 }
 0x3bc   : > { %p4820_p2 = por %p4819_p10, %p4818_p5 }
 0x3be   : > { %p4821_p8 = pnand %p4820_p2, %p4816_p3 }
 0x41f   : > { %v2237_v1 = vpop.f32.mrf.mxu2 }
 0x420   : > { %v2238_v7 = vadd.f32 %v5184_v6, %v2237_v1 }
 0x422   : > { %3893 = vst [vmem:[%s5093_s4 + $0x10] sm:$0xff] %v2238_v7  ;;  %v2251_v8 = vsel %vm2250_vm4, %v3894_v2, %v2238_v7 }
 0x423   : > { %v2252_v9 = vpack.c.bf16 %v2251_v8, %v2251_v8 }
 0x425   : > { %2253 = vst.msk [vmem:[#allocation2] sm:$0xf] %vm1036_vm2, %v2252_v9 }
 0x427   : > { %v2239_v4 = vpop.f32.mrf.mxu2 }
 0x42c   : > { %v2255_v10 = vld [vmem:[#allocation2] sm:$0xff] }
 0x42d   : > { %v2321_v11 = vunpack.c.l.b16 %v2255_v10  ;;  %v2322_v12 = vunpack.c.h.b16 %v2255_v10 }
 0x42f   : > { %v2323_v13 = vpack.c.b16 %v2321_v11, %v2321_v11  ;;  %v2324_v14 = vpack.c.b16 %v2322_v12, %v2322_v12 }
 0x431   : > { %2655 = vmatmul.bf16.vlgmr.msra.gmra.mxu3 %v2323_v13  ;;  %2668 = vmatmul.bf16.vlgmr.msrb.gmra.mxu0 %v2324_v14 }
 0x432   : > { %2681 = vmatmul.bf16.vlgmr.msrb.gmra.mxu1 %v2323_v13  ;;  %2694 = vmatmul.bf16.vlgmr.msrb.gmra.mxu2 %v2324_v14 }
 0x433   : > { %2836 = vmatpush.bf16.msra.mxu3 %v4478_v15 }
 0x437   : > { %2837 = vmatpush.bf16.msra.mxu3 %v4477_v17 }
 0x43b   : > { %2838 = vmatpush.bf16.msra.mxu3 %v4476_v18 }
 0x43f   : > { %2839 = vmatpush.bf16.msra.mxu3 %v4475_v19 }
 0x441   : > { %2707 = vmatmul.bf16.vlgmr.msrb.gmra.mxu3 %v2323_v13  ;;  %2720 = vmatmul.bf16.vlgmr.msra.gmra.mxu0 %v2324_v14 }
 0x442   : > { %2733 = vmatmul.bf16.vlgmr.msra.gmra.mxu1 %v2323_v13  ;;  %2746 = vmatmul.bf16.vlgmr.msra.gmra.mxu2 %v2324_v14 }
 0x443   : > { %2840 = vmatpush.bf16.msra.mxu3 %v4474_v62 }
 0x447   : > { %2841 = vmatpush.bf16.msra.mxu3 %v4473_v22 }
 0x44b   : > { %2842 = vmatpush.bf16.msra.mxu3 %v4472_v31 }
 0x44f   : > { %2843 = vmatpush.bf16.msra.mxu3 %v4471_v34 }
 0x4ae   : > { %v2669_v20 = vpop.f32.mrf.mxu0 }
 0x4af   : > { %v2682_v59 = vpop.f32.mrf.mxu1 }
 0x4b0   : > { %v2683_v24 = vadd.f32 %v2682_v59, %v5115_v21 }
 0x4b4   : > { %v2656_v23 = vpop.f32.mrf.mxu3 }
 0x4b5   : > { %v2657_v25 = vadd.f32 %v2656_v23, %v5112_v16  ;;  %v2695_v26 = vpop.f32.mrf.mxu2 }
 0x4b6   : > { %v2671_v27 = vpop.f32.mrf.mxu0  ;;  %v2696_v28 = vadd.f32 %v2695_v26, %v2683_v24 }
 0x4b7   : > { %v2684_v30 = vpop.f32.mrf.mxu1  ;;  %v2670_v32 = vadd.f32 %v2669_v20, %v2657_v25 }
 0x4b8   : > { %v2755_v33 = vmul.f32 0.5, %v2696_v28 }
 0x4b9   : > { %v2751_v63 = vmul.f32 0.5, %v2670_v32 }
 0x4ba   : > { %4624 = vtanh.f32 %v2755_v33 }
 0x4bb   : > { %4626 = vtanh.f32 %v2751_v63 }
 0x4bc   : > { %v2658_v35 = vpop.f32.mrf.mxu3 }
 0x4bd   : > { %v2697_v36 = vpop.f32.mrf.mxu2 }
 0x4be   : > { %v2721_v37 = vpop.f32.mrf.mxu0 }
 0x4bf   : > { %v2734_v42 = vpop.f32.mrf.mxu1 }
 0x4c0   : > { %v2735_v16 = vadd.f32 %v2734_v42, %v5120_v41  ;;  %v4625_v43 = vpop.eup %4624 }
 0x4c1   : > { %v4627_v38 = vpop.eup %4626  ;;  %v2757_v49 = vmul.f32 0.5, %v4625_v43 }
 0x4c2   : > { %v2753_v51 = vmul.f32 0.5, %v4627_v38 }
 0x4c3   : > { %v2758_v29 = vadd.f32 0.5, %v2757_v49 }
 0x4c4   : > { %v2708_v21 = vpop.f32.mrf.mxu3  ;;  %v2754_v41 = vadd.f32 0.5, %v2753_v51 }
 0x4c5   : > { %v2709_v44 = vadd.f32 %v2708_v21, %v5118_v40  ;;  %v2747_v45 = vpop.f32.mrf.mxu2  ;;  %v2765_v56 = vmul.f32 %v2758_v29, %v5171_v52  ;;  %v2857_v52 = vstv %s2856_s21 }
 0x4c6   : > { %v2748_v46 = vadd.f32 %v2747_v45, %v2735_v16  ;;  %v2723_v47 = vpop.f32.mrf.mxu0  ;;  %vm2858_vm5 = vcmp.eq.s32.totalorder %v2857_v52, 1 }
 0x4c7   : > { %v2722_v39 = vadd.f32 %v2721_v37, %v2709_v44  ;;  %v2736_v48 = vpop.f32.mrf.mxu1 }
 0x4c8   : > { %v2760_v50 = vmul.f32 0.5, %v2748_v46 }
 0x4c9   : > { %4628 = vtanh.f32 %v2722_v39 }
 0x4ca   : > { %4630 = vtanh.f32 %v2760_v50 }
 0x4cc   : > { %v2710_v53 = vpop.f32.mrf.mxu3 }
 0x4cd   : > { %v2749_v54 = vpop.f32.mrf.mxu2 }
 0x4cf   : > { %v4629_v55 = vpop.eup %4628 }
 0x4d0   : > { %v2766_v40 = vmul.f32 %v4629_v55, %v2754_v41  ;;  %v4631_v5 = vpop.eup %4630 }
 0x4d1   : > { %v2762_v58 = vmul.f32 0.5, %v4631_v5 }
 0x4d2   : > { %v2767_v57 = vadd.f32 %v2766_v40, %v2765_v56 }
 0x4d3   : > { %v2763_v60 = vadd.f32 0.5, %v2762_v58 }
 0x4d4   : > { %2770 = vst [vmem:[#allocation3] sm:$0xff] %v2767_v57  ;;  %4632 = vtanh.f32 %v2767_v57 }
 0x4da   : > { %v4633_v61 = vpop.eup %4632 }
 0x4db   : > { %v2769_v0 = vmul.f32 %v4633_v61, %v2763_v60 }
 0x4dd   : > { %v2771_v1 = vpack.c.bf16 %v2769_v0, %v2769_v0 }
 0x4df   : > { %2862 = vst [vmem:[#allocation2 + $0x4] sm:$0xf] %v2771_v1  ;;  %2844 = vmatmul.bf16.vlgmr.msra.gmra.mxu3 %v2771_v1 }
 0x562   : > { %v2845_v2 = vpop.f32.mrf.mxu3 }
 0x563   : > { %v2846_v7 = vadd.f32 %v5184_v6, %v2845_v2 }
 0x565   : > { %4183 = vst [vmem:[%s5093_s4 + $0x18] sm:$0xff] %v2846_v7  ;;  %v2859_v8 = vsel %vm2858_vm5, %v4184_v3, %v2846_v7 }
 0x566   : > { %v2860_v9 = vpack.c.bf16 %v2859_v8, %v2859_v8 }
 0x567   : > { %4824 = shalt.err (!%p4821_p8)
}
 0x568   : > { %s4903_s24 = smov 128   ;;  %s4904_s4 = smov 8   ;;  %2861 = vst.msk [vmem:[#allocation2] sm:$0xf] %vm1036_vm2, %v2860_v9 }
 0x569   : > { %4498 = dma.vmem_to_hbm [thread:$0]  (%p5054_p7), %s2878_s28, 512, %s2880_s14, %s2864_s12, %s4903_s24, %s4903_s24, %s4904_s4  }
 0x56a   : > { %v2847_v6 = vpop.f32.mrf.mxu3 }
 0x56b PF: > { %s2894_s6 = sand.u32 1, %s4869_s9   ;;  %p4518_p1 = pnand %p3014_p9, %p5002_p6 }
 0x56c   : > { %s2895_s16 = scalar_lea.sflag [#allocation8], %s2894_s6 }
 0x56d   : > { %p4519_p4 = pneg %p4518_p1 }
 0x56f   : > { %4864 = dma.done.wait (%p4519_p4), %s2895_s16, 512  }
 0x570   : > { %4866 = vsyncadd (%p4519_p4), %s2895_s16, 4294966784  ;;  %s34_s13 = sadd.s32 1, %s4889_s13   ;;  %s5265_s29 = sld [smem:[#allocation21_spill]] }
 0x571   : > { %p31_p11 = scmp.ge.s32.totalorder %s34_s13, 4   ;;  %s5266_s9 = smov %s4873_s10 }
 0x572   : > { %s5267_s10 = smov %s4877_s11  ;;  %s5268_s11 = smov %s5063_s25 }
 0x573   : > { %s5269_s12 = smov %s4885_s0  ;;  %33 = sbr.rel (!%p31_p11) target bundleno = 17 (0x11), region = 121 }
 0x576   : > { %s5270_s0 = smov %s5265_s29 }
 0x578   :  { %2901 = vsyncpa [#allocation7], 1 }
 0x579   :  { %2903 = vsyncpa [#allocation7 + $0x1], 1 }
 0x57a   :  { %2904 = vsyncpa [#allocation10], 1 }
 0x57b   :  { %2905 = vsyncpa [#allocation13], 1 }
 0x57c   :  { %2906 = vsyncpa [#allocation8], 1 }
 0x57d   :  { %2908 = vsyncpa [#allocation8 + $0x1], 1 }

// kernel: tpu_custom_call.1
= control target key start
LH: loop header
LB: loop body
LE: loop exit
PB: predicated region body
PF: predicated region fallthrough
CT: control target
= control target key end

     0   :  { %s4891_s30 = smov [#allocation5]   ;;  %s5238_s0 = inlined_call_operand.hbm [shape: s32[8], index: 0, kind: input, shape index: {}]   ;;  %s5239_s1 = inlined_call_operand.hbm [shape: f32[8,8,16], index: 1, kind: input, shape index: {}]   ;;  %s5240_s2 = inlined_call_operand.hbm [shape: f32[8,128], index: 2, kind: input, shape index: {}]   ;;  %s5241_s3 = inlined_call_operand.hbm [shape: f32[8,128], index: 3, kind: input, shape index: {}]   ;;  %s5242_s4 = inlined_call_operand.hbm [shape: bf16[256,512], index: 4, kind: input, shape index: {}]   ;;  %s5243_s5 = inlined_call_operand.vmem [shape: f32[1,512], index: 5, kind: input, shape index: {}]   ;;  %s5244_s6 = inlined_call_operand.hbm [shape: bf16[128,128], index: 6, kind: input, shape index: {}]   ;;  %s5245_s7 = inlined_call_operand.vmem [shape: f32[1,128], index: 7, kind: input, shape index: {}]   ;;  %s5246_s8 = inlined_call_operand.hbm [shape: f32[8,8,128], index: 8, kind: output, shape index: {}]  }
   0x1   :  { %5248 = sst [smem:[#allocation22_spill]] %s5240_s2  ;;  %s14_s29 = sshll.u32 %s5238_s0, 4  ;;  %s15_s29 = int_to_ptr.hbm [resolvable:$true] %s14_s29 }
   0x2   :  { %5249 = sst [smem:[#allocation23_spill]] %s5241_s3 }
   0x3   :  { %5250 = sst [smem:[#allocation24_spill]] %s5242_s4 }
   0x4   :  { %5251 = sst [smem:[#allocation25_spill]] %s5244_s6 }
   0x5   :  { %17 = dma.hbm_to_smem %s15_s29, 16, %s4891_s30, [#allocation4] }
   0x6   :  { %4849 = dma.done.wait [#allocation4], 16 }
   0x7   :  { %4850 = vsyncadd [#allocation4], 4294967280 }
   0x8   :  { %20 = sfence }
   0x9   :  { %21 = vsyncpa [#allocation7], 0 }
   0xa   :  { %23 = vsyncpa [#allocation7 + $0x1], 0 }
   0xb   :  { %24 = vsyncpa [#allocation10], 0 }
   0xc   :  { %25 = vsyncpa [#allocation13], 0 }
   0xd   :  { %26 = vsyncpa [#allocation8], 0 }
   0xe   :  { %28 = vsyncpa [#allocation8 + $0x1], 0  ;;  %s4953_s9 = smov 0   ;;  %s4955_s10 = smov 0  }
   0xf   :  { %s4957_s11 = smov 0   ;;  %s4959_s12 = smov 0  }
  0x10   :  { %s4961_s0 = smov 0   ;;  %s4963_s13 = smov 0  }
  0x11 LB: > { %s3007_s14 = sadd.s32 4294967295, %s4889_s13   ;;  %s3008_s15 = sadd.s32 4294967294, %s4889_s13   ;;  %s4889_s13 = sphi %s4963_s13, %s34_s13   ;;  %s4885_s0 = sphi %s4961_s0, %s5270_s0   ;;  %s4881_s12 = sphi %s4959_s12, %s5269_s12   ;;  %s4877_s11 = sphi %s4957_s11, %s5268_s11   ;;  %s4873_s10 = sphi %s4955_s10, %s5267_s10   ;;  %s4869_s9 = sphi %s4953_s9, %s5266_s9  }
  0x12   : > { %p68_p0 = scmp.ne.s32.totalorder %s4873_s10, %s4869_s9  ;;  %p4987_p1 = scmp.eq.s32.totalorder %s3007_s14, 0 }
  0x13   : > { %p4991_p2 = scmp.eq.s32.totalorder %s3007_s14, 1  ;;  %p236_p3 = scmp.eq.s32.totalorder %s3008_s15, 1 }
  0x14   : > { %p4997_p4 = por %p4987_p1, %p68_p0  ;;  %p3009_p5 = scmp.ge.s32.totalorder %s4889_s13, 1 }
  0x15   : > { %p5002_p6 = por %p236_p3, %p68_p0  ;;  %p243_p7 = scmp.lt.s32.totalorder %s4889_s13, 3 }
  0x16   : > { %s5256_s2 = sld [smem:[#allocation22_spill]]  ;;  %p3014_p9 = scmp.ge.s32.totalorder %s4889_s13, 2 }
  0x17   : > { %p5010_p8 = pnand %p3009_p5, %p243_p7  ;;  %s4892_s24 = smov [#allocation9]  }
  0x18   : > { %s259_s25 = sshll.u32 %s4892_s24, 4  ;;  %s5258_s4 = sld [smem:[#allocation24_spill]]  ;;  %s260_s25 = int_to_ptr.vmem [resolvable:$true] %s259_s25 }
  0x19   : > { %p4500_p10 = pneg %p5010_p8  ;;  %s4893_s30 = smov [#allocation12]  }
  0x1a   : > { %s284_s14 = sshll.u32 %s4893_s30, 4  ;;  %s4894_s15 = smov 256   ;;  %s285_s14 = int_to_ptr.vmem [resolvable:$true] %s284_s14 }
  0x1b   : > { %p5022_p11 = pnand %p4500_p10, %p4987_p1  ;;  %s4895_s20 = smov 16  }
  0x1c   : > { %s257_s22 = sshll.u32 %s5256_s2, 4  ;;  %s5260_s3 = sld [smem:[#allocation23_spill]]  ;;  %s258_s22 = int_to_ptr.hbm [resolvable:$true] %s257_s22 }
  0x1d   : > { %4503 = dma.hbm_to_vmem [thread:$0]  (!%p5022_p11), %s258_s22, 128, %s260_s25, [#allocation10]  }
  0x1e   : > { %s282_s28 = sshll.u32 %s5258_s4, 4  ;;  %s4896_s27 = smov [#allocation11]   ;;  %s283_s28 = int_to_ptr.hbm [resolvable:$true] %s282_s28 }
  0x1f   : > { %4509 = dma.hbm_to_vmem [thread:$0]  (!%p5022_p11), %s283_s28, 8192, %s285_s14, [#allocation13], %s4894_s15, %s4894_s15, %s4895_s20  }
  0x20   : > { %s273_s30 = sshll.u32 %s4896_s27, 4  ;;  %s5261_s6 = sld [smem:[#allocation25_spill]]  ;;  %s274_s30 = int_to_ptr.vmem [resolvable:$true] %s273_s30 }
  0x21   : > { %s4897_s28 = smov [#allocation14]   ;;  %s4898_s15 = smov 64  }
  0x22   : > { %s271_s26 = sshll.u32 %s5260_s3, 4  ;;  %s301_s14 = sshll.u32 %s4897_s28, 4  ;;  %s272_s26 = int_to_ptr.hbm [resolvable:$true] %s271_s26  ;;  %s302_s14 = int_to_ptr.vmem [resolvable:$true] %s301_s14 }
  0x23   : > { %4506 = dma.hbm_to_vmem [thread:$0]  (!%p5022_p11), %s272_s26, 128, %s274_s30, [#allocation10]  }
  0x24   : > { %s4899_s20 = smov 4   ;;  %s43_s21 = sadd.s32 1, %s4885_s0 }
  0x25   : > { %s55_s24 = sadd.s32 1, %s4877_s11  ;;  %p44_p12 = scmp.ge.s32.totalorder %s43_s21, 2 }
  0x26   : > { %s299_s2 = sshll.u32 %s5261_s6, 4  ;;  %p62_p13 = scmp.ne.s32.totalorder %s4877_s11, %s4873_s10  ;;  %s300_s2 = int_to_ptr.hbm [resolvable:$true] %s299_s2 }
  0x27   : > { %4512 = dma.hbm_to_vmem [thread:$0]  (!%p5022_p11), %s300_s2, 1024, %s302_s14, [#allocation13], %s4898_s15, %s4898_s15, %s4899_s20  }
  0x28   : > { %p63_p0 = scmp.eq.s32.totalorder %s4889_s13, 0  ;;  %p4525_p3 = scmp.lt.s32.totalorder %s4889_s13, 2 }
  0x29   : > { %s5272_s21 = smov (%p44_p12, %s43_s21), 0  ;;  %p5054_p7 = por %p4991_p2, %p62_p13 }
  0x2a   : > { %5262 = sst [smem:[#allocation21_spill]] %s5272_s21  ;;  %p5048_p5 = por %p63_p0, %p62_p13 }
  0x2b   : > { %s50_s2 = ssub.s32 %s4885_s0, %s5272_s21  ;;  %s318_s27 = sand.u32 1, %s4877_s11  }
  0x2c   : > { %p53_p10 = scmp.eq.s32.totalorder %s50_s2, 0  ;;  %s3015_s30 = sshll.u32 %s318_s27, 5 }
  0x2d   : > { %s4190_s22 = sshll.u32 %s4885_s0, 5  ;;  %s322_s3 = scalar_lea.vmem [#allocation6], %s3015_s30 }
  0x2e   : > { %s5063_s25 = scalar_select %p53_p10, %s4877_s11, %s55_s24  }
  0x2f   : > { %s328_s15 = scalar_lea.hbm %s5239_s1, %s4190_s22  ;;  %s331_s4 = sshll.u32 %s322_s3, 4  ;;  %s332_s4 = int_to_ptr.vmem [resolvable:$true] %s331_s4 }
  0x30   : > { %s329_s20 = sshll.u32 %s328_s15, 4  ;;  %p4514_p2 = pnand %p4525_p3, %p5048_p5  ;;  %s330_s20 = int_to_ptr.hbm [resolvable:$true] %s329_s20 }
  0x31   : > { %s319_s17 = scalar_lea.sflag [#allocation7], %s318_s27  ;;  %s4900_s6 = smov 128  }
  0x32   : > { %s4901_s21 = smov 8   ;;  %343 = sbr.rel (%p5010_p8) target bundleno = 1387 (0x56b), region = 48 }
  0x33   : > { %4516 = dma.hbm_to_vmem [thread:$0]  (!%p4514_p2), %s330_s20, 512, %s332_s4, %s319_s17, %s4900_s6, %s4900_s6, %s4901_s21  }
  0x34   : > { %s5075_s24 = sand.u32 (!%p5010_p8), 1, %s4873_s10  }
  0x35   : > { %s3019_s2 = sshll.u32 (!%p5010_p8), %s5075_s24, 5  ;;  %s346_s3 = scalar_lea.sflag (!%p5010_p8), [#allocation7], %s5075_s24 }
  0x36   : > { %s5079_s30 = scalar_lea.vmem (!%p5010_p8), [#allocation6], %s3019_s2 }
  0x37   : > { %4852 = dma.done.wait (%p4997_p4), %s346_s3, 512  }
  0x38   : > { %4854 = vsyncadd (%p4997_p4), %s346_s3, 4294966784 }
  0x39   : > { %4856 = dma.done.wait (%p4987_p1), [#allocation10], 256  }
  0x3a   : > { %4858 = vsyncadd (%p4987_p1), [#allocation10], 4294967040 }
  0x3b   : > { %4860 = dma.done.wait (%p4987_p1), [#allocation13], 9216  }
  0x3c   : > { %4862 = vsyncadd (%p4987_p1), [#allocation13], 4294958080  ;;  %s5093_s4 = scalar_lea.vmem [#allocation15], %s3019_s2  ;;  %p3025_p8 = scmp.ne.s32.totalorder %s4881_s12, 0 }
  0x3e   : > { %407 = sbr.rel (%p3025_p8) target bundleno = 72 (0x48), region = 72 }
  0x43   : > { %v408_v0 = vld [vmem:[#allocation11] sm:$0xff]  ;;  %v411_v1 = vld [vmem:[%s5079_s30] sm:$0xff]  ;;  %vm413_vm0 = vcmask 125952   ;;  %v4902_v3 = vmov 0  }
  0x44   : > { %v415_v2 = vld [vmem:[#allocation9] sm:$0xff]  ;;  %410 = vst [vmem:[#allocation2] sm:$0xff] %v4902_v3  ;;  %v412_v4 = vpack.c.bf16 %v411_v1, %v411_v1 }
  0x45   : > { %v416_v5 = vpack.c.bf16 %v415_v2, %v415_v2  ;;  %409 = vst [vmem:[#allocation3] sm:$0xff] %v408_v0 }
  0x46   : > { %414 = vst.msk [vmem:[#allocation2] sm:$0xf] %vm413_vm0, %v412_v4 }
  0x47   : > { %417 = vst [vmem:[#allocation2 + $0x4] sm:$0xf] %v416_v5 }
  0x48 PF: > { %v3140_v6 = vld [vmem:[#allocation12 + $0xe0] sm:$0xf]  ;;  %v4221_v7 = vld [vmem:[#allocation12 + $0xec] sm:$0xf0]  ;;  %v4219_v11 = vld [vmem:[#allocation12 + $0xe4] sm:$0xf] }
  0x49   : > { %v3268_v8 = vld [vmem:[#allocation12 + $0x1e0] sm:$0xf]  ;;  %v3141_v9 = vor.u32 %v4221_v7, %v3140_v6  ;;  %v4253_v10 = vld [vmem:[#allocation12 + $0x1ec] sm:$0xf0]  ;;  %v3142_v12 = vld [vmem:[#allocation12 + $0xf0] sm:$0xf0] }
  0x4a   : > { %v3269_v13 = vor.u32 %v4253_v10, %v3268_v8  ;;  %v3145_v14 = vor.u32 %v4219_v11, %v3142_v12  ;;  %v4251_v15 = vld [vmem:[#allocation12 + $0x1e4] sm:$0xf]  ;;  %v3270_v16 = vld [vmem:[#allocation12 + $0x1f0] sm:$0xf0]  ;;  %v3124_v17 = vld [vmem:[#allocation12 + $0xc0] sm:$0xf] }
  0x4b   : > { %824 = vmatpush.bf16.msra.mxu0 %v3141_v9  ;;  %v3273_v18 = vor.u32 %v4251_v15, %v3270_v16  ;;  %v4217_v19 = vld [vmem:[#allocation12 + $0xcc] sm:$0xf0]  ;;  %v3252_v20 = vld [vmem:[#allocation12 + $0x1c0] sm:$0xf]  ;;  %v4215_v24 = vld [vmem:[#allocation12 + $0xc4] sm:$0xf] }
  0x4c   : > { %v4249_v21 = vld [vmem:[#allocation12 + $0x1cc] sm:$0xf0]  ;;  %837 = vmatpush.bf16.msra.mxu1 %v3269_v13  ;;  %850 = vmatpush.bf16.msra.mxu2 %v3145_v14  ;;  %v3125_v22 = vor.u32 %v4217_v19, %v3124_v17  ;;  %v3126_v25 = vld [vmem:[#allocation12 + $0xd0] sm:$0xf0]  ;;  %v4247_v26 = vld [vmem:[#allocation12 + $0x1c4] sm:$0xf] }
  0x4d   : > { %v3253_v23 = vor.u32 %v4249_v21, %v3252_v20  ;;  %863 = vmatpush.bf16.msra.mxu3 %v3273_v18  ;;  %v3129_v27 = vor.u32 %v4215_v24, %v3126_v25  ;;  %v3254_v28 = vld [vmem:[#allocation12 + $0x1d0] sm:$0xf0]  ;;  %v3108_v29 = vld [vmem:[#allocation12 + $0xa0] sm:$0xf]  ;;  %v4213_v30 = vld [vmem:[#allocation12 + $0xac] sm:$0xf0] }
  0x4e   : > { %v3257_v31 = vor.u32 %v4247_v26, %v3254_v28  ;;  %v3236_v32 = vld [vmem:[#allocation12 + $0x1a0] sm:$0xf]  ;;  %v4245_v33 = vld [vmem:[#allocation12 + $0x1ac] sm:$0xf0]  ;;  %v4211_v34 = vld [vmem:[#allocation12 + $0xa4] sm:$0xf]  ;;  %v3109_v35 = vor.u32 %v4213_v30, %v3108_v29 }
  0x4f   : > { %825 = vmatpush.bf16.msra.mxu0 %v3125_v22  ;;  %v3110_v36 = vld [vmem:[#allocation12 + $0xb0] sm:$0xf0]  ;;  %v4243_v37 = vld [vmem:[#allocation12 + $0x1a4] sm:$0xf]  ;;  %v3237_v39 = vor.u32 %v4245_v33, %v3236_v32  ;;  %v3092_v41 = vld [vmem:[#allocation12 + $0x80] sm:$0xf] }
  0x50   : > { %v3238_v38 = vld [vmem:[#allocation12 + $0x1b0] sm:$0xf0]  ;;  %838 = vmatpush.bf16.msra.mxu1 %v3253_v23  ;;  %851 = vmatpush.bf16.msra.mxu2 %v3129_v27  ;;  %v3113_v40 = vor.u32 %v4211_v34, %v3110_v36  ;;  %v4209_v42 = vld [vmem:[#allocation12 + $0x8c] sm:$0xf0]  ;;  %v3220_v43 = vld [vmem:[#allocation12 + $0x180] sm:$0xf] }
  0x51   : > { %864 = vmatpush.bf16.msra.mxu3 %v3257_v31  ;;  %v3241_v44 = vor.u32 %v4243_v37, %v3238_v38  ;;  %v4241_v45 = vld [vmem:[#allocation12 + $0x18c] sm:$0xf0]  ;;  %v4207_v46 = vld [vmem:[#allocation12 + $0x84] sm:$0xf]  ;;  %v3094_v47 = vld [vmem:[#allocation12 + $0x90] sm:$0xf0]  ;;  %v3093_v50 = vor.u32 %v4209_v42, %v3092_v41 }
  0x52   : > { %v4239_v48 = vld [vmem:[#allocation12 + $0x184] sm:$0xf]  ;;  %v3222_v49 = vld [vmem:[#allocation12 + $0x190] sm:$0xf0]  ;;  %v3221_v51 = vor.u32 %v4241_v45, %v3220_v43  ;;  %v3097_v52 = vor.u32 %v4207_v46, %v3094_v47  ;;  %v3076_v53 = vld [vmem:[#allocation12 + $0x60] sm:$0xf] }
  0x53   : > { %826 = vmatpush.bf16.msra.mxu0 %v3109_v35  ;;  %v4205_v54 = vld [vmem:[#allocation12 + $0x6c] sm:$0xf0]  ;;  %v3204_v55 = vld [vmem:[#allocation12 + $0x160] sm:$0xf]  ;;  %v3225_v56 = vor.u32 %v4239_v48, %v3222_v49  ;;  %v4203_v58 = vld [vmem:[#allocation12 + $0x64] sm:$0xf] }
  0x54   : > { %839 = vmatpush.bf16.msra.mxu1 %v3237_v39  ;;  %852 = vmatpush.bf16.msra.mxu2 %v3113_v40  ;;  %v4237_v57 = vld [vmem:[#allocation12 + $0x16c] sm:$0xf0]  ;;  %v3078_v59 = vld [vmem:[#allocation12 + $0x70] sm:$0xf0]  ;;  %v4235_v60 = vld [vmem:[#allocation12 + $0x164] sm:$0xf]  ;;  %v3077_v62 = vor.u32 %v4205_v54, %v3076_v53 }
  0x55   : > { %865 = vmatpush.bf16.msra.mxu3 %v3241_v44  ;;  %v3206_v61 = vld [vmem:[#allocation12 + $0x170] sm:$0xf0]  ;;  %v3205_v63 = vor.u32 %v4237_v57, %v3204_v55  ;;  %v3081_v0 = vor.u32 %v4203_v58, %v3078_v59  ;;  %v3060_v1 = vld [vmem:[#allocation12 + $0x40] sm:$0xf]  ;;  %v4201_v2 = vld [vmem:[#allocation12 + $0x4c] sm:$0xf0] }
  0x56   : > { %v3188_v3 = vld [vmem:[#allocation12 + $0x140] sm:$0xf]  ;;  %v3209_v4 = vor.u32 %v4235_v60, %v3206_v61  ;;  %v4233_v5 = vld [vmem:[#allocation12 + $0x14c] sm:$0xf0]  ;;  %v4199_v6 = vld [vmem:[#allocation12 + $0x44] sm:$0xf]  ;;  %v3061_v10 = vor.u32 %v4201_v2, %v3060_v1 }
  0x57   : > { %827 = vmatpush.bf16.msra.mxu0 %v3093_v50  ;;  %v3062_v7 = vld [vmem:[#allocation12 + $0x50] sm:$0xf0]  ;;  %v4231_v8 = vld [vmem:[#allocation12 + $0x144] sm:$0xf]  ;;  %v3189_v11 = vor.u32 %v4233_v5, %v3188_v3  ;;  %v3044_v13 = vld [vmem:[#allocation12 + $0x20] sm:$0xf] }
  0x58   : > { %840 = vmatpush.bf16.msra.mxu1 %v3221_v51  ;;  %853 = vmatpush.bf16.msra.mxu2 %v3097_v52  ;;  %v3190_v9 = vld [vmem:[#allocation12 + $0x150] sm:$0xf0]  ;;  %v3065_v12 = vor.u32 %v4199_v6, %v3062_v7  ;;  %v4197_v14 = vld [vmem:[#allocation12 + $0x2c] sm:$0xf0]  ;;  %v3172_v15 = vld [vmem:[#allocation12 + $0x120] sm:$0xf] }
  0x59   : > { %866 = vmatpush.bf16.msra.mxu3 %v3225_v56  ;;  %v3193_v16 = vor.u32 %v4231_v8, %v3190_v9  ;;  %v4229_v17 = vld [vmem:[#allocation12 + $0x12c] sm:$0xf0]  ;;  %v4195_v18 = vld [vmem:[#allocation12 + $0x24] sm:$0xf]  ;;  %v3046_v19 = vld [vmem:[#allocation12 + $0x30] sm:$0xf0]  ;;  %v3045_v22 = vor.u32 %v4197_v14, %v3044_v13 }
  0x5a   : > { %v4227_v20 = vld [vmem:[#allocation12 + $0x124] sm:$0xf]  ;;  %v3174_v21 = vld [vmem:[#allocation12 + $0x130] sm:$0xf0]  ;;  %v3028_v23 = vld [vmem:[#allocation12] sm:$0xf]  ;;  %v3173_v26 = vor.u32 %v4229_v17, %v3172_v15  ;;  %v3049_v27 = vor.u32 %v4195_v18, %v3046_v19 }
  0x5b   : > { %828 = vmatpush.bf16.msra.mxu0 %v3077_v62  ;;  %v4193_v24 = vld [vmem:[#allocation12 + $0xc] sm:$0xf0]  ;;  %v3156_v25 = vld [vmem:[#allocation12 + $0x100] sm:$0xf]  ;;  %v4191_v29 = vld [vmem:[#allocation12 + $0x4] sm:$0xf]  ;;  %v3177_v31 = vor.u32 %v4227_v20, %v3174_v21 }
  0x5c   : > { %841 = vmatpush.bf16.msra.mxu1 %v3205_v63  ;;  %854 = vmatpush.bf16.msra.mxu2 %v3081_v0  ;;  %v4225_v28 = vld [vmem:[#allocation12 + $0x10c] sm:$0xf0]  ;;  %v3030_v30 = vld [vmem:[#allocation12 + $0x10] sm:$0xf0]  ;;  %v4223_v32 = vld [vmem:[#allocation12 + $0x104] sm:$0xf]  ;;  %v3029_v38 = vor.u32 %v4193_v24, %v3028_v23 }
  0x5d   : > { %867 = vmatpush.bf16.msra.mxu3 %v3209_v4  ;;  %v3158_v33 = vld [vmem:[#allocation12 + $0x110] sm:$0xf0]  ;;  %v3148_v34 = vld [vmem:[#allocation12 + $0xe8] sm:$0xf]  ;;  %v4222_v35 = vld [vmem:[#allocation12 + $0xf4] sm:$0xf0]  ;;  %v3157_v43 = vor.u32 %v4225_v28, %v3156_v25  ;;  %v3033_v44 = vor.u32 %v4191_v29, %v3030_v30 }
  0x5e   : > { %v3276_v36 = vld [vmem:[#allocation12 + $0x1e8] sm:$0xf]  ;;  %v432_v37 = vld [vmem:[#allocation2] sm:$0xff]  ;;  %v4254_v39 = vld [vmem:[#allocation12 + $0x1f4] sm:$0xf0]  ;;  %v3161_v48 = vor.u32 %v4223_v32, %v3158_v33  ;;  %v3149_v49 = vor.u32 %v4222_v35, %v3148_v34  ;;  %s5128_s18 = sshll.u32 %s4881_s12, 2 }
  0x5f   : > { %829 = vmatpush.bf16.msra.mxu0 %v3061_v10  ;;  %v4220_v40 = vld [vmem:[#allocation12 + $0xec] sm:$0xf]  ;;  %v3150_v41 = vld [vmem:[#allocation12 + $0xf8] sm:$0xf0]  ;;  %v498_v42 = vunpack.c.l.b16 %v432_v37  ;;  %v499_v47 = vunpack.c.h.b16 %v432_v37  ;;  %v3277_v50 = vor.u32 %v4254_v39, %v3276_v36  ;;  %v3132_v52 = vld [vmem:[#allocation12 + $0xc8] sm:$0xf] }
  0x60   : > { %842 = vmatpush.bf16.msra.mxu1 %v3189_v11  ;;  %855 = vmatpush.bf16.msra.mxu2 %v3065_v12  ;;  %v4252_v45 = vld [vmem:[#allocation12 + $0x1ec] sm:$0xf]  ;;  %v3278_v46 = vld [vmem:[#allocation12 + $0x1f8] sm:$0xf0]  ;;  %v3153_v51 = vor.u32 %v4220_v40, %v3150_v41  ;;  %v4218_v53 = vld [vmem:[#allocation12 + $0xd4] sm:$0xf0] }
  0x61   : > { %868 = vmatpush.bf16.msra.mxu3 %v3193_v16  ;;  %v3260_v54 = vld [vmem:[#allocation12 + $0x1c8] sm:$0xf]  ;;  %v3281_v55 = vor.u32 %v4252_v45, %v3278_v46  ;;  %v4250_v56 = vld [vmem:[#allocation12 + $0x1d4] sm:$0xf0]  ;;  %v4216_v57 = vld [vmem:[#allocation12 + $0xcc] sm:$0xf]  ;;  %v5097_v59 = vpack.c.b16 %v498_v42, %v498_v42  ;;  %v5099_v62 = vpack.c.b16 %v499_v47, %v499_v47  ;;  %v3133_v63 = vor.u32 %v4218_v53, %v3132_v52 }
  0x62   : > { %v3134_v58 = vld [vmem:[#allocation12 + $0xd8] sm:$0xf0]  ;;  %v4248_v60 = vld [vmem:[#allocation12 + $0x1cc] sm:$0xf]  ;;  %v3261_v0 = vor.u32 %v4250_v56, %v3260_v54  ;;  %v3116_v2 = vld [vmem:[#allocation12 + $0xa8] sm:$0xf] }
  0x63   : > { %830 = vmatpush.bf16.msra.mxu0 %v3045_v22  ;;  %v3262_v61 = vld [vmem:[#allocation12 + $0x1d8] sm:$0xf0]  ;;  %v3137_v1 = vor.u32 %v4216_v57, %v3134_v58  ;;  %v4214_v3 = vld [vmem:[#allocation12 + $0xb4] sm:$0xf0]  ;;  %v3244_v4 = vld [vmem:[#allocation12 + $0x1a8] sm:$0xf] }
  0x64   : > { %843 = vmatpush.bf16.msra.mxu1 %v3173_v26  ;;  %856 = vmatpush.bf16.msra.mxu2 %v3049_v27  ;;  %v3265_v5 = vor.u32 %v4248_v60, %v3262_v61  ;;  %v4246_v6 = vld [vmem:[#allocation12 + $0x1b4] sm:$0xf0]  ;;  %v4212_v7 = vld [vmem:[#allocation12 + $0xac] sm:$0xf]  ;;  %v3118_v8 = vld [vmem:[#allocation12 + $0xb8] sm:$0xf0]  ;;  %v3117_v11 = vor.u32 %v4214_v3, %v3116_v2 }
  0x65   : > { %869 = vmatpush.bf16.msra.mxu3 %v3177_v31  ;;  %v4244_v9 = vld [vmem:[#allocation12 + $0x1ac] sm:$0xf]  ;;  %v3246_v10 = vld [vmem:[#allocation12 + $0x1b8] sm:$0xf0]  ;;  %v3245_v12 = vor.u32 %v4246_v6, %v3244_v4  ;;  %v3121_v13 = vor.u32 %v4212_v7, %v3118_v8  ;;  %v3100_v14 = vld [vmem:[#allocation12 + $0x88] sm:$0xf] }
  0x66   : > { %v4210_v15 = vld [vmem:[#allocation12 + $0x94] sm:$0xf0]  ;;  %v3228_v16 = vld [vmem:[#allocation12 + $0x188] sm:$0xf]  ;;  %v3249_v17 = vor.u32 %v4244_v9, %v3246_v10  ;;  %v4208_v19 = vld [vmem:[#allocation12 + $0x8c] sm:$0xf] }
  0x67   : > { %831 = vmatpush.bf16.msra.mxu0 %v3029_v38  ;;  %v4242_v18 = vld [vmem:[#allocation12 + $0x194] sm:$0xf0]  ;;  %v3102_v20 = vld [vmem:[#allocation12 + $0x98] sm:$0xf0]  ;;  %v4240_v21 = vld [vmem:[#allocation12 + $0x18c] sm:$0xf]  ;;  %v3101_v23 = vor.u32 %v4210_v15, %v3100_v14 }
  0x68   : > { %844 = vmatpush.bf16.msra.mxu1 %v3157_v43  ;;  %857 = vmatpush.bf16.msra.mxu2 %v3033_v44  ;;  %v3230_v22 = vld [vmem:[#allocation12 + $0x198] sm:$0xf0]  ;;  %v3084_v24 = vld [vmem:[#allocation12 + $0x68] sm:$0xf]  ;;  %v3229_v25 = vor.u32 %v4242_v18, %v3228_v16  ;;  %v3105_v26 = vor.u32 %v4208_v19, %v3102_v20  ;;  %v4206_v27 = vld [vmem:[#allocation12 + $0x74] sm:$0xf0] }
  0x69   : > { %870 = vmatpush.bf16.msra.mxu3 %v3161_v48  ;;  %v3212_v28 = vld [vmem:[#allocation12 + $0x168] sm:$0xf]  ;;  %v4238_v29 = vld [vmem:[#allocation12 + $0x174] sm:$0xf0]  ;;  %v3233_v30 = vor.u32 %v4240_v21, %v3230_v22  ;;  %v4204_v31 = vld [vmem:[#allocation12 + $0x6c] sm:$0xf]  ;;  %v3085_v35 = vor.u32 %v4206_v27, %v3084_v24 }
  0x6a   : > { %832 = vmatmul.bf16.vlgmr.msra.gmra.mxu0 %v5097_v59  ;;  %v3086_v32 = vld [vmem:[#allocation12 + $0x78] sm:$0xf0]  ;;  %v4236_v33 = vld [vmem:[#allocation12 + $0x16c] sm:$0xf]  ;;  %v3213_v36 = vor.u32 %v4238_v29, %v3212_v28  ;;  %v3068_v38 = vld [vmem:[#allocation12 + $0x48] sm:$0xf] }
  0x6b   : > { %876 = vmatpush.bf16.msrb.mxu0 %v3149_v49  ;;  %858 = vmatmul.bf16.vlgmr.msra.gmra.mxu2 %v5097_v59  ;;  %v3214_v34 = vld [vmem:[#allocation12 + $0x178] sm:$0xf0]  ;;  %v3089_v37 = vor.u32 %v4204_v31, %v3086_v32  ;;  %v4202_v39 = vld [vmem:[#allocation12 + $0x54] sm:$0xf0]  ;;  %v3196_v40 = vld [vmem:[#allocation12 + $0x148] sm:$0xf] }
  0x6c   : > { %889 = vmatpush.bf16.msrb.mxu1 %v3277_v50  ;;  %902 = vmatpush.bf16.msrb.mxu2 %v3153_v51  ;;  %v3217_v41 = vor.u32 %v4236_v33, %v3214_v34  ;;  %v4234_v42 = vld [vmem:[#allocation12 + $0x154] sm:$0xf0]  ;;  %v4200_v43 = vld [vmem:[#allocation12 + $0x4c] sm:$0xf]  ;;  %v3070_v44 = vld [vmem:[#allocation12 + $0x58] sm:$0xf0]  ;;  %v3069_v47 = vor.u32 %v4202_v39, %v3068_v38 }
  0x6d   : > { %915 = vmatpush.bf16.msrb.mxu3 %v3281_v55  ;;  %845 = vmatmul.bf16.vlgmr.msra.gmra.mxu1 %v5099_v62  ;;  %v4232_v45 = vld [vmem:[#allocation12 + $0x14c] sm:$0xf]  ;;  %v3198_v46 = vld [vmem:[#allocation12 + $0x158] sm:$0xf0]  ;;  %v3197_v48 = vor.u32 %v4234_v42, %v3196_v40  ;;  %v3073_v49 = vor.u32 %v4200_v43, %v3070_v44  ;;  %v3052_v50 = vld [vmem:[#allocation12 + $0x28] sm:$0xf] }
  0x6e   : > { %871 = vmatmul.bf16.vlgmr.msra.gmra.mxu3 %v5099_v62  ;;  %v4198_v51 = vld [vmem:[#allocation12 + $0x34] sm:$0xf0]  ;;  %v3180_v52 = vld [vmem:[#allocation12 + $0x128] sm:$0xf]  ;;  %v3201_v53 = vor.u32 %v4232_v45, %v3198_v46  ;;  %v4196_v55 = vld [vmem:[#allocation12 + $0x2c] sm:$0xf] }
  0x6f   : > { %877 = vmatpush.bf16.msrb.mxu0 %v3133_v63  ;;  %v4230_v54 = vld [vmem:[#allocation12 + $0x134] sm:$0xf0]  ;;  %v3054_v56 = vld [vmem:[#allocation12 + $0x38] sm:$0xf0]  ;;  %v4228_v57 = vld [vmem:[#allocation12 + $0x12c] sm:$0xf]  ;;  %v3053_v60 = vor.u32 %v4198_v51, %v3052_v50 }
  0x70   : > { %890 = vmatpush.bf16.msrb.mxu1 %v3261_v0  ;;  %903 = vmatpush.bf16.msrb.mxu2 %v3137_v1  ;;  %v3182_v58 = vld [vmem:[#allocation12 + $0x138] sm:$0xf0]  ;;  %v3181_v61 = vor.u32 %v4230_v54, %v3180_v52  ;;  %v3057_v63 = vor.u32 %v4196_v55, %v3054_v56  ;;  %v3036_v0 = vld [vmem:[#allocation12 + $0x8] sm:$0xf]  ;;  %v4194_v1 = vld [vmem:[#allocation12 + $0x14] sm:$0xf0] }
  0x71   : > { %916 = vmatpush.bf16.msrb.mxu3 %v3265_v5  ;;  %v3164_v2 = vld [vmem:[#allocation12 + $0x108] sm:$0xf]  ;;  %v3185_v3 = vor.u32 %v4228_v57, %v3182_v58  ;;  %v4226_v4 = vld [vmem:[#allocation12 + $0x114] sm:$0xf0]  ;;  %v4192_v5 = vld [vmem:[#allocation12 + $0xc] sm:$0xf]  ;;  %v3037_v9 = vor.u32 %v4194_v1, %v3036_v0 }
  0x72   : > { %v3038_v6 = vld [vmem:[#allocation12 + $0x18] sm:$0xf0]  ;;  %v4224_v7 = vld [vmem:[#allocation12 + $0x10c] sm:$0xf]  ;;  %v3165_v10 = vor.u32 %v4226_v4, %v3164_v2  ;;  %v418_v14 = vld [vmem:[%s5243_s5] sm:$0xf] }
  0x73   : > { %878 = vmatpush.bf16.msrb.mxu0 %v3117_v11  ;;  %v3166_v8 = vld [vmem:[#allocation12 + $0x118] sm:$0xf0]  ;;  %v3041_v11 = vor.u32 %v4192_v5, %v3038_v6  ;;  %v4261_v15 = vld [vmem:[#allocation14 + $0x30] sm:$0xff]  ;;  %v5112_v16 = vperm.slane %v418_v14, 0  ;;  %v4260_v19 = vld [vmem:[#allocation14 + $0x28] sm:$0xff]  ;;  %v5115_v21 = vperm.slane %v418_v14, 1 }
  0x74   : > { %891 = vmatpush.bf16.msrb.mxu1 %v3245_v12  ;;  %904 = vmatpush.bf16.msrb.mxu2 %v3121_v13  ;;  %v3169_v12 = vor.u32 %v4224_v7, %v3166_v8  ;;  %v4262_v13 = vld [vmem:[#allocation14 + $0x38] sm:$0xff]  ;;  %v4257_v32 = vld [vmem:[#allocation14 + $0x10] sm:$0xff]  ;;  %v4256_v34 = vld [vmem:[#allocation14 + $0x8] sm:$0xff]  ;;  %v5118_v40 = vperm.slane %v418_v14, 2  ;;  %s5131_s23 = sld [smem:[#allocation5 + %s5128_s18]]  ;;  %vm1036_vm2 = vcmask 125952  }
  0x75   : > { %917 = vmatpush.bf16.msrb.mxu3 %v3249_v17  ;;  %v4258_v28 = vld [vmem:[#allocation14 + $0x18] sm:$0xff]  ;;  %v3429_v42 = vld [vmem:[#allocation12 + $0xe0] sm:$0xf]  ;;  %v4293_v43 = vld [vmem:[#allocation12 + $0xec] sm:$0xf0]  ;;  %s1635_s22 = sadd.s32 1, %s5128_s18 }
  0x76   : > { %v3557_v44 = vld [vmem:[#allocation12 + $0x1e0] sm:$0xf]  ;;  %v3430_v45 = vor.u32 %v4293_v43, %v3429_v42  ;;  %v4325_v46 = vld [vmem:[#allocation12 + $0x1ec] sm:$0xf0]  ;;  %v4323_v51 = vld [vmem:[#allocation12 + $0x1e4] sm:$0xf] }
  0x77   : > { %879 = vmatpush.bf16.msrb.mxu0 %v3101_v23  ;;  %v3559_v52 = vld [vmem:[#allocation12 + $0x1f0] sm:$0xf0]  ;;  %v4289_v56 = vld [vmem:[#allocation12 + $0xcc] sm:$0xf0]  ;;  %v3541_v57 = vld [vmem:[#allocation12 + $0x1c0] sm:$0xf] }
  0x78   : > { %892 = vmatpush.bf16.msrb.mxu1 %v3229_v25  ;;  %905 = vmatpush.bf16.msrb.mxu2 %v3105_v26  ;;  %v3562_v55 = vor.u32 %v4323_v51, %v3559_v52  ;;  %v4321_v58 = vld [vmem:[#allocation12 + $0x1cc] sm:$0xf0]  ;;  %v4287_v1 = vld [vmem:[#allocation12 + $0xc4] sm:$0xf]  ;;  %v3415_v2 = vld [vmem:[#allocation12 + $0xd0] sm:$0xf0] }
  0x79   : > { %918 = vmatpush.bf16.msrb.mxu3 %v3233_v30  ;;  %v3542_v0 = vor.u32 %v4321_v58, %v3541_v57  ;;  %v3418_v4 = vor.u32 %v4287_v1, %v3415_v2  ;;  %v3543_v5 = vld [vmem:[#allocation12 + $0x1d0] sm:$0xf0]  ;;  %v3397_v6 = vld [vmem:[#allocation12 + $0xa0] sm:$0xf]  ;;  %v4285_v7 = vld [vmem:[#allocation12 + $0xac] sm:$0xf0] }
  0x7a   : > { %v3365_v43 = vld [vmem:[#allocation12 + $0x60] sm:$0xf]  ;;  %v3495_v51 = vld [vmem:[#allocation12 + $0x170] sm:$0xf0]  ;;  %v4305_v1 = vld [vmem:[#allocation12 + $0x14c] sm:$0xf0] }
  0x7b   : > { %880 = vmatpush.bf16.msrb.mxu0 %v3085_v35  ;;  %v3349_v58 = vld [vmem:[#allocation12 + $0x40] sm:$0xf]  ;;  %v4271_v2 = vld [vmem:[#allocation12 + $0x44] sm:$0xf]  ;;  %p1029_p1 = scmp.gt.s32.totalorder %s5131_s23, 0  ;;  %s5157_s28 = sld [smem:[#allocation5 + %s1635_s22]] }
  0x7c   : > { %893 = vmatpush.bf16.msrb.mxu1 %v3213_v36  ;;  %906 = vmatpush.bf16.msrb.mxu2 %v3089_v37  ;;  %v4255_v37 = vld [vmem:[#allocation14] sm:$0xff]  ;;  %s2243_s15 = sadd.s32 2, %s5128_s18  ;;  %s2851_s6 = sadd.s32 3, %s5128_s18 }
  0x7d   : > { %919 = vmatpush.bf16.msrb.mxu3 %v3217_v41  ;;  %v5120_v41 = vperm.slane %v418_v14, 3  ;;  %v3399_v14 = vld [vmem:[#allocation12 + $0xb0] sm:$0xf0]  ;;  %s5136_s21 = scalar_select %p1029_p1, 1, 0 }
  0x7e   : > { %s5175_s20 = sld [smem:[#allocation5 + %s2243_s15]]  ;;  %s4479_s23 = sshll.u32 %s4881_s12, 5 }
  0x7f   : > { %881 = vmatpush.bf16.msrb.mxu0 %v3069_v47  ;;  %v4291_v47 = vld [vmem:[#allocation12 + $0xe4] sm:$0xf]  ;;  %s2852_s16 = sld [smem:[#allocation5 + %s2851_s6]]  ;;  %s2876_s22 = scalar_lea.hbm %s5246_s8, %s4479_s23 }
  0x80   : > { %894 = vmatpush.bf16.msrb.mxu1 %v3197_v48  ;;  %907 = vmatpush.bf16.msrb.mxu2 %v3073_v49  ;;  %v3431_v48 = vld [vmem:[#allocation12 + $0xf0] sm:$0xf0]  ;;  %v3558_v49 = vor.u32 %v4325_v46, %v3557_v44  ;;  %v4277_v44 = vld [vmem:[#allocation12 + $0x6c] sm:$0xf0]  ;;  %s2864_s12 = scalar_lea.sflag [#allocation8], %s5075_s24 }
  0x81   : > { %920 = vmatpush.bf16.msrb.mxu3 %v3201_v53  ;;  %v3434_v50 = vor.u32 %v4291_v47, %v3431_v48  ;;  %v3413_v53 = vld [vmem:[#allocation12 + $0xc0] sm:$0xf]  ;;  %v3367_v48 = vld [vmem:[#allocation12 + $0x70] sm:$0xf0]  ;;  %p1637_p4 = scmp.gt.s32.totalorder %s5157_s28, 0  ;;  %s2877_s28 = sshll.u32 %s5093_s4, 4  ;;  %s2878_s28 = int_to_ptr.vmem [resolvable:$true] %s2877_s28 }
  0x83   : > { %882 = vmatpush.bf16.msrb.mxu0 %v3053_v60  ;;  %s1640_s14 = scalar_select %p1637_p4, 1, 0 }
  0x84   : > { %895 = vmatpush.bf16.msrb.mxu1 %v3181_v61  ;;  %908 = vmatpush.bf16.msrb.mxu2 %v3057_v63  ;;  %v3414_v63 = vor.u32 %v4289_v56, %v3413_v53  ;;  %p2245_p11 = scmp.gt.s32.totalorder %s5175_s20, 0 }
  0x85   : > { %921 = vmatpush.bf16.msrb.mxu3 %v3185_v3  ;;  %v4319_v3 = vld [vmem:[#allocation12 + $0x1c4] sm:$0xf]  ;;  %p2853_p12 = scmp.gt.s32.totalorder %s2852_s16, 0 }
  0x86   : > { %s2248_s17 = scalar_select %p2245_p11, 1, 0 }
  0x87   : > { %883 = vmatpush.bf16.msrb.mxu0 %v3037_v9  ;;  %v3546_v9 = vor.u32 %v4319_v3, %v3543_v5  ;;  %v3351_v3 = vld [vmem:[#allocation12 + $0x50] sm:$0xf0]  ;;  %v4303_v5 = vld [vmem:[#allocation12 + $0x144] sm:$0xf] }
  0x88   : > { %896 = vmatpush.bf16.msrb.mxu1 %v3165_v10  ;;  %909 = vmatpush.bf16.msrb.mxu2 %v3041_v11  ;;  %v3525_v10 = vld [vmem:[#allocation12 + $0x1a0] sm:$0xf]  ;;  %v4317_v11 = vld [vmem:[#allocation12 + $0x1ac] sm:$0xf0] }
  0x89   : > { %922 = vmatpush.bf16.msrb.mxu3 %v3169_v12  ;;  %v4283_v12 = vld [vmem:[#allocation12 + $0xa4] sm:$0xf] }
  0x8a   : > { %884 = vmatmul.bf16.vlgmr.msrb.gmra.mxu0 %v5097_v59 }
  0x8b   : > { %897 = vmatmul.bf16.vlgmr.msrb.gmra.mxu1 %v5099_v62  ;;  %910 = vmatmul.bf16.vlgmr.msrb.gmra.mxu2 %v5097_v59 }
  0x8c   : > { %923 = vmatmul.bf16.vlgmr.msrb.gmra.mxu3 %v5099_v62  ;;  %1013 = vmatpush.bf16.msra.mxu0 %v4262_v13  ;;  %v4259_v62 = vld [vmem:[#allocation14 + $0x20] sm:$0xff]  ;;  %v3398_v13 = vor.u32 %v4285_v7, %v3397_v6  ;;  %v3479_v6 = vld [vmem:[#allocation12 + $0x150] sm:$0xf0] }
  0x8d   : > { %1431 = vmatpush.bf16.msra.mxu1 %v3430_v45  ;;  %1444 = vmatpush.bf16.msra.mxu2 %v3558_v49  ;;  %v3493_v45 = vld [vmem:[#allocation12 + $0x160] sm:$0xf] }
  0x8e   : > { %1457 = vmatpush.bf16.msra.mxu3 %v3434_v50  ;;  %v4307_v50 = vld [vmem:[#allocation12 + $0x164] sm:$0xf] }
  0x90   : > { %1014 = vmatpush.bf16.msra.mxu0 %v4261_v15  ;;  %v4315_v15 = vld [vmem:[#allocation12 + $0x1a4] sm:$0xf] }
  0x91   : > { %1432 = vmatpush.bf16.msra.mxu1 %v3414_v63  ;;  %1445 = vmatpush.bf16.msra.mxu2 %v3542_v0  ;;  %v3498_v0 = vor.u32 %v4307_v50, %v3495_v51  ;;  %v3439_v51 = vld [vmem:[#allocation12 + $0xf8] sm:$0xf0] }
  0x92   : > { %1458 = vmatpush.bf16.msra.mxu3 %v3418_v4 }
  0x94   : > { %1015 = vmatpush.bf16.msra.mxu0 %v4260_v19  ;;  %v3402_v19 = vor.u32 %v4283_v12, %v3399_v14  ;;  %v4269_v12 = vld [vmem:[#allocation12 + $0x2c] sm:$0xf0]  ;;  %v3482_v14 = vor.u32 %v4303_v5, %v3479_v6  ;;  %v3551_v5 = vld [vmem:[#allocation12 + $0x1d8] sm:$0xf0]  ;;  %v3405_v6 = vld [vmem:[#allocation12 + $0xa8] sm:$0xf] }
  0x95   : > { %1433 = vmatpush.bf16.msra.mxu1 %v3398_v13  ;;  %v3461_v13 = vld [vmem:[#allocation12 + $0x120] sm:$0xf] }
  0x96   : > { %1459 = vmatpush.bf16.msra.mxu3 %v3402_v19  ;;  %v4299_v19 = vld [vmem:[#allocation12 + $0x124] sm:$0xf] }
  0x98   : > { %1016 = vmatpush.bf16.msra.mxu0 %v4259_v62  ;;  %v3509_v62 = vld [vmem:[#allocation12 + $0x180] sm:$0xf] }
  0x9c   : > { %1017 = vmatpush.bf16.msra.mxu0 %v4258_v28  ;;  %v3511_v28 = vld [vmem:[#allocation12 + $0x190] sm:$0xf0] }
  0xa0   : > { %1018 = vmatpush.bf16.msra.mxu0 %v4257_v32 }
  0xa4   : > { %1019 = vmatpush.bf16.msra.mxu0 %v4256_v34 }
  0xa8   : > { %1020 = vmatpush.bf16.msra.mxu0 %v4255_v37 }
  0xac   : > { %1470 = vmatpush.bf16.msrb.mxu0 %v3562_v55  ;;  %v3366_v55 = vor.u32 %v4277_v44, %v3365_v43  ;;  %v4295_v43 = vld [vmem:[#allocation12 + $0x104] sm:$0xf]  ;;  %v3447_v44 = vld [vmem:[#allocation12 + $0x110] sm:$0xf0] }
  0xb0   : > { %1471 = vmatpush.bf16.msrb.mxu0 %v3546_v9 }
  0xe7   : > { %v833_v17 = vpop.f32.mrf.mxu0 }
  0xe8   : > { %v834_v20 = vadd.f32 %v833_v17, %v5112_v16  ;;  %v3527_v17 = vld [vmem:[#allocation12 + $0x1b0] sm:$0xf0] }
  0xea   : > { %v846_v18 = vpop.f32.mrf.mxu1 }
  0xeb   : > { %v847_v22 = vadd.f32 %v846_v18, %v834_v20  ;;  %v3526_v18 = vor.u32 %v4317_v11, %v3525_v10  ;;  %v3381_v20 = vld [vmem:[#allocation12 + $0x80] sm:$0xf]  ;;  %v3354_v10 = vor.u32 %v4271_v2, %v3351_v3 }
  0xec   : > { %v3333_v11 = vld [vmem:[#allocation12 + $0x20] sm:$0xf] }
  0xed   : > { %v928_v29 = vmul.f32 0.5, %v847_v22  ;;  %v3530_v22 = vor.u32 %v4315_v15, %v3527_v17  ;;  %1446 = vmatpush.bf16.msra.mxu2 %v3526_v18  ;;  %v4301_v15 = vld [vmem:[#allocation12 + $0x12c] sm:$0xf0]  ;;  %v4267_v17 = vld [vmem:[#allocation12 + $0x24] sm:$0xf] }
  0xee   : > { %v859_v59 = vpop.f32.mrf.mxu2  ;;  %v3335_v18 = vld [vmem:[#allocation12 + $0x30] sm:$0xf0] }
  0xef   : > { %v860_v23 = vadd.f32 %v859_v59, %v5115_v21  ;;  %v835_v26 = vpop.f32.mrf.mxu0  ;;  %4594 = vtanh.f32 %v928_v29  ;;  %v4281_v59 = vld [vmem:[#allocation12 + $0x8c] sm:$0xf0]  ;;  %1472 = vmatpush.bf16.msrb.mxu0 %v3530_v22 }
  0xf1   : > { %v872_v24 = vpop.f32.mrf.mxu3 }
  0xf2   : > { %v873_v25 = vadd.f32 %v872_v24, %v860_v23  ;;  %v848_v27 = vpop.f32.mrf.mxu1  ;;  %v4313_v23 = vld [vmem:[#allocation12 + $0x18c] sm:$0xf0]  ;;  %v4279_v24 = vld [vmem:[#allocation12 + $0x84] sm:$0xf] }
  0xf3   : > { %v4311_v27 = vld [vmem:[#allocation12 + $0x184] sm:$0xf]  ;;  %v3510_v37 = vor.u32 %v4313_v23, %v3509_v62  ;;  %v3334_v62 = vor.u32 %v4269_v12, %v3333_v11  ;;  %v3462_v23 = vor.u32 %v4301_v15, %v3461_v13  ;;  %v4284_v12 = vld [vmem:[#allocation12 + $0xac] sm:$0xf]  ;;  %v3407_v13 = vld [vmem:[#allocation12 + $0xb8] sm:$0xf0] }
  0xf4   : > { %v932_v30 = vmul.f32 0.5, %v873_v25  ;;  %v3383_v25 = vld [vmem:[#allocation12 + $0x90] sm:$0xf0]  ;;  %v3514_v47 = vor.u32 %v4311_v27, %v3511_v28 }
  0xf5   : > { %v4595_v35 = vpop.eup %4594  ;;  %v3386_v42 = vor.u32 %v4279_v24, %v3383_v25  ;;  %1447 = vmatpush.bf16.msra.mxu2 %v3510_v37  ;;  %v3338_v24 = vor.u32 %v4267_v17, %v3335_v18  ;;  %v3535_v17 = vld [vmem:[#allocation12 + $0x1b8] sm:$0xf0]  ;;  %v3389_v18 = vld [vmem:[#allocation12 + $0x88] sm:$0xf] }
  0xf6   : > { %v861_v31 = vpop.f32.mrf.mxu2  ;;  %4596 = vtanh.f32 %v932_v30  ;;  %v930_v38 = vmul.f32 0.5, %v4595_v35  ;;  %v3382_v35 = vor.u32 %v4281_v59, %v3381_v20  ;;  %1473 = vmatpush.bf16.msrb.mxu0 %v3514_v47  ;;  %v3463_v20 = vld [vmem:[#allocation12 + $0x130] sm:$0xf0]  ;;  %v4294_v47 = vld [vmem:[#allocation12 + $0xf4] sm:$0xf0] }
  0xf7   : > { %v941_v31 = vld [vmem:[#allocation3] sm:$0xff]  ;;  %1460 = vmatpush.bf16.msra.mxu3 %v3386_v42 }
  0xf8   : > { %v931_v29 = vadd.f32 0.5, %v930_v38  ;;  %v4309_v38 = vld [vmem:[#allocation12 + $0x16c] sm:$0xf0]  ;;  %1434 = vmatpush.bf16.msra.mxu1 %v3382_v35  ;;  %v4263_v35 = vld [vmem:[#allocation12 + $0x4] sm:$0xf] }
  0xf9   : > { %v874_v33 = vpop.f32.mrf.mxu3  ;;  %v3494_v56 = vor.u32 %v4309_v38, %v3493_v45  ;;  %v3437_v45 = vld [vmem:[#allocation12 + $0xe8] sm:$0xf] }
  0xfa   : > { %1474 = vmatpush.bf16.msrb.mxu0 %v3498_v0  ;;  %v3565_v38 = vld [vmem:[#allocation12 + $0x1e8] sm:$0xf]  ;;  %v4288_v0 = vld [vmem:[#allocation12 + $0xcc] sm:$0xf] }
  0xfb   : > { %1448 = vmatpush.bf16.msra.mxu2 %v3494_v56  ;;  %v3421_v56 = vld [vmem:[#allocation12 + $0xc8] sm:$0xf] }
  0xfc   : > { %v4597_v36 = vpop.eup %4596  ;;  %1435 = vmatpush.bf16.msra.mxu1 %v3366_v55 }
  0xfd   : > { %v934_v39 = vmul.f32 0.5, %v4597_v36 }
  0xfe   : > { %1475 = vmatpush.bf16.msrb.mxu0 %v3482_v14  ;;  %v4316_v14 = vld [vmem:[#allocation12 + $0x1ac] sm:$0xf] }
  0xff   : > { %v935_v30 = vadd.f32 0.5, %v934_v39  ;;  %v4275_v39 = vld [vmem:[#allocation12 + $0x64] sm:$0xf] }
 0x100   : > { %v3370_v57 = vor.u32 %v4275_v39, %v3367_v48  ;;  %v3438_v39 = vor.u32 %v4294_v47, %v3437_v45  ;;  %v4326_v48 = vld [vmem:[#allocation12 + $0x1f4] sm:$0xf0]  ;;  %v3357_v45 = vld [vmem:[#allocation12 + $0x48] sm:$0xf] }
 0x101   : > { %v942_v52 = vmul.f32 %v941_v31, %v935_v30  ;;  %v3317_v30 = vld [vmem:[#allocation12] sm:$0xf]  ;;  %v4265_v31 = vld [vmem:[#allocation12 + $0xc] sm:$0xf0]  ;;  %v3566_v50 = vor.u32 %v4326_v48, %v3565_v38  ;;  %v4274_v38 = vld [vmem:[#allocation12 + $0x54] sm:$0xf0] }
 0x102   : > { %1461 = vmatpush.bf16.msra.mxu3 %v3370_v57  ;;  %v4290_v57 = vld [vmem:[#allocation12 + $0xd4] sm:$0xf0] }
 0x103   : > { %v4306_v48 = vld [vmem:[#allocation12 + $0x154] sm:$0xf0] }
 0x106   : > { %1462 = vmatpush.bf16.msra.mxu3 %v3354_v10  ;;  %v4318_v10 = vld [vmem:[#allocation12 + $0x1b4] sm:$0xf0] }
 0x107   : > { %v885_v54 = vpop.f32.mrf.mxu0 }
 0x108   : > { %v886_v60 = vadd.f32 %v885_v54, %v5118_v40  ;;  %v898_v61 = vpop.f32.mrf.mxu1 }
 0x10a   : > { %v899_v8 = vadd.f32 %v898_v61, %v886_v60  ;;  %v4273_v60 = vld [vmem:[#allocation12 + $0x4c] sm:$0xf0]  ;;  %v3477_v61 = vld [vmem:[#allocation12 + $0x140] sm:$0xf]  ;;  %1463 = vmatpush.bf16.msra.mxu3 %v3338_v24  ;;  %v3391_v24 = vld [vmem:[#allocation12 + $0x98] sm:$0xf0] }
 0x10b   : > { %v3478_v9 = vor.u32 %v4305_v1, %v3477_v61  ;;  %v4322_v61 = vld [vmem:[#allocation12 + $0x1d4] sm:$0xf0]  ;;  %v3423_v1 = vld [vmem:[#allocation12 + $0xd8] sm:$0xf0] }
 0x10c   : > { %4598 = vtanh.f32 %v899_v8  ;;  %v3350_v8 = vor.u32 %v4273_v60, %v3349_v58  ;;  %v3549_v58 = vld [vmem:[#allocation12 + $0x1c8] sm:$0xf]  ;;  %v3422_v60 = vor.u32 %v4290_v57, %v3421_v56  ;;  %v3426_v3 = vor.u32 %v4288_v0, %v3423_v1  ;;  %v4270_v56 = vld [vmem:[#allocation12 + $0x34] sm:$0xf0]  ;;  %v4268_v0 = vld [vmem:[#allocation12 + $0x2c] sm:$0xf] }
 0x10d   : > { %1449 = vmatpush.bf16.msra.mxu2 %v3478_v9  ;;  %v3550_v2 = vor.u32 %v4322_v61, %v3549_v58  ;;  %v3533_v9 = vld [vmem:[#allocation12 + $0x1a8] sm:$0xf]  ;;  %v4302_v61 = vld [vmem:[#allocation12 + $0x134] sm:$0xf0]  ;;  %v3343_v1 = vld [vmem:[#allocation12 + $0x38] sm:$0xf0] }
 0x10e   : > { %v911_v26 = vpop.f32.mrf.mxu2  ;;  %1436 = vmatpush.bf16.msra.mxu1 %v3350_v8  ;;  %v4286_v8 = vld [vmem:[#allocation12 + $0xb4] sm:$0xf0]  ;;  %v3534_v15 = vor.u32 %v4318_v10, %v3533_v9  ;;  %v3346_v9 = vor.u32 %v4268_v0, %v3343_v1  ;;  %v4397_v1 = vld [vmem:[#allocation12 + $0x1ec] sm:$0xf0] }
 0x10f   : > { %v912_v32 = vadd.f32 %v911_v26, %v5120_v41  ;;  %v924_v33 = vpop.f32.mrf.mxu3  ;;  %v887_v34 = vpop.f32.mrf.mxu0  ;;  %v3466_v26 = vor.u32 %v4299_v19, %v3463_v20  ;;  %v3406_v11 = vor.u32 %v4286_v8, %v3405_v6  ;;  %v4282_v19 = vld [vmem:[#allocation12 + $0x94] sm:$0xf0]  ;;  %v3410_v20 = vor.u32 %v4284_v12, %v3407_v13  ;;  %v4264_v13 = vld [vmem:[#allocation12 + $0xc] sm:$0xf] }
 0x110   : > { %v900_v36 = vpop.f32.mrf.mxu1  ;;  %v4297_v34 = vld [vmem:[#allocation12 + $0x10c] sm:$0xf0]  ;;  %v4266_v8 = vld [vmem:[#allocation12 + $0x14] sm:$0xf0] }
 0x111   : > { %v925_v46 = vadd.f32 %v924_v33, %v912_v32  ;;  %1450 = vmatpush.bf16.msra.mxu2 %v3462_v23  ;;  %1476 = vmatpush.bf16.msrb.mxu0 %v3466_v26  ;;  %v3445_v32 = vld [vmem:[#allocation12 + $0x100] sm:$0xf]  ;;  %v3318_v33 = vor.u32 %v4265_v31, %v3317_v30  ;;  %v3319_v36 = vld [vmem:[#allocation12 + $0x10] sm:$0xf0]  ;;  %v4280_v23 = vld [vmem:[#allocation12 + $0x8c] sm:$0xf] }
 0x112   : > { %v4599_v49 = vpop.eup %4598  ;;  %1437 = vmatpush.bf16.msra.mxu1 %v3334_v62  ;;  %v3446_v37 = vor.u32 %v4297_v34, %v3445_v32  ;;  %v3322_v42 = vor.u32 %v4263_v35, %v3319_v36  ;;  %v3517_v62 = vld [vmem:[#allocation12 + $0x188] sm:$0xf]  ;;  %v3519_v26 = vld [vmem:[#allocation12 + $0x198] sm:$0xf0]  ;;  %v4278_v32 = vld [vmem:[#allocation12 + $0x74] sm:$0xf0] }
 0x113   : > { %v943_v53 = vmul.f32 %v4599_v49, %v931_v29  ;;  %v937_v54 = vmul.f32 0.5, %v925_v46  ;;  %v3450_v46 = vor.u32 %v4295_v43, %v3447_v44  ;;  %v4292_v49 = vld [vmem:[#allocation12 + $0xec] sm:$0xf]  ;;  %v3373_v31 = vld [vmem:[#allocation12 + $0x68] sm:$0xf] }
 0x114   : > { %1464 = vmatpush.bf16.msra.mxu3 %v3322_v42  ;;  %v3374_v34 = vor.u32 %v4278_v32, %v3373_v31  ;;  %v4310_v35 = vld [vmem:[#allocation12 + $0x174] sm:$0xf0]  ;;  %v4276_v36 = vld [vmem:[#allocation12 + $0x6c] sm:$0xf]  ;;  %v3503_v44 = vld [vmem:[#allocation12 + $0x178] sm:$0xf0] }
 0x115   : > { %v5124_v63 = vadd.f32 %v943_v53, %v942_v52  ;;  %4600 = vtanh.f32 %v937_v54  ;;  %1451 = vmatpush.bf16.msra.mxu2 %v3446_v37  ;;  %1477 = vmatpush.bf16.msrb.mxu0 %v3450_v46  ;;  %v4324_v52 = vld [vmem:[#allocation12 + $0x1ec] sm:$0xf]  ;;  %v3567_v53 = vld [vmem:[#allocation12 + $0x1f8] sm:$0xf0]  ;;  %v3442_v54 = vor.u32 %v4292_v49, %v3439_v51  ;;  %v4298_v12 = vld [vmem:[#allocation12 + $0x114] sm:$0xf0] }
 0x116   : > { %v913_v4 = vpop.f32.mrf.mxu2  ;;  %1438 = vmatpush.bf16.msra.mxu1 %v3318_v33  ;;  %v3570_v55 = vor.u32 %v4324_v52, %v3567_v53  ;;  %v3501_v33 = vld [vmem:[#allocation12 + $0x168] sm:$0xf]  ;;  %v3375_v37 = vld [vmem:[#allocation12 + $0x78] sm:$0xf0]  ;;  %v4308_v43 = vld [vmem:[#allocation12 + $0x16c] sm:$0xf]  ;;  %v3358_v52 = vor.u32 %v4274_v38, %v3357_v45 }
 0x117   : > { %4602 = vtanh.f32 %v5124_v63  ;;  %v926_v7 = vpop.f32.mrf.mxu3  ;;  %v4320_v4 = vld [vmem:[#allocation12 + $0x1cc] sm:$0xf]  ;;  %v3502_v42 = vor.u32 %v4310_v35, %v3501_v33  ;;  %v3378_v46 = vor.u32 %v4276_v36, %v3375_v37  ;;  %v3506_v47 = vor.u32 %v4308_v43, %v3503_v44  ;;  %v3487_v53 = vld [vmem:[#allocation12 + $0x158] sm:$0xf0]  ;;  %v4331_v36 = vld [vmem:[#allocation14 + $0x20] sm:$0xff] }
 0x118   : > { %1509 = vmatpush.bf16.msrb.mxu3 %v3442_v54  ;;  %v3554_v7 = vor.u32 %v4320_v4, %v3551_v5  ;;  %v4272_v49 = vld [vmem:[#allocation12 + $0x4c] sm:$0xf]  ;;  %v5141_v5 = vld [vmem:[%s5245_s7] ss:$0 sm:$0xff]  ;;  %v4329_v44 = vld [vmem:[#allocation14 + $0x10] sm:$0xff] }
 0x119   : > { %1496 = vmatpush.bf16.msrb.mxu2 %v3566_v50  ;;  %v3359_v50 = vld [vmem:[#allocation12 + $0x58] sm:$0xf0]  ;;  %v4304_v51 = vld [vmem:[#allocation12 + $0x14c] sm:$0xf] }
 0x11a   : > { %1483 = vmatpush.bf16.msrb.mxu1 %v3438_v39  ;;  %v3485_v39 = vld [vmem:[#allocation12 + $0x148] sm:$0xf]  ;;  %v3362_v57 = vor.u32 %v4272_v49, %v3359_v50  ;;  %v3490_v58 = vor.u32 %v4304_v51, %v3487_v53  ;;  %v4334_v33 = vld [vmem:[#allocation14 + $0x38] sm:$0xff]  ;;  %v4327_v53 = vld [vmem:[#allocation14] sm:$0xff] }
 0x11b   : > { %v4601_v59 = vpop.eup %4600  ;;  %v3486_v54 = vor.u32 %v4306_v48, %v3485_v39  ;;  %v4332_v35 = vld [vmem:[#allocation14 + $0x28] sm:$0xff]  ;;  %v4330_v37 = vld [vmem:[#allocation14 + $0x18] sm:$0xff] }
 0x11c   : > { %v939_v22 = vmul.f32 0.5, %v4601_v59  ;;  %1510 = vmatpush.bf16.msrb.mxu3 %v3426_v3  ;;  %v3538_v59 = vor.u32 %v4316_v14, %v3535_v17  ;;  %v3471_v3 = vld [vmem:[#allocation12 + $0x138] sm:$0xf0]  ;;  %v1032_v14 = vstv %s5136_s21  ;;  %v4296_v17 = vld [vmem:[#allocation12 + $0x10c] sm:$0xf] }
 0x11d   : > { %v4603_v25 = vpop.eup %4602  ;;  %1497 = vmatpush.bf16.msrb.mxu2 %v3550_v2  ;;  %v4300_v2 = vld [vmem:[#allocation12 + $0x12c] sm:$0xf]  ;;  %vm1033_vm1 = vcmp.eq.s32.totalorder %v1032_v14, 1  ;;  %s2856_s21 = scalar_select %p2853_p12, 1, 0 }
 0x11e   : > { %v940_v27 = vadd.f32 0.5, %v939_v22  ;;  %1484 = vmatpush.bf16.msrb.mxu1 %v3422_v60  ;;  %v4314_v22 = vld [vmem:[#allocation12 + $0x194] sm:$0xf0]  ;;  %v3469_v60 = vld [vmem:[#allocation12 + $0x128] sm:$0xf]  ;;  %v3474_v10 = vor.u32 %v4300_v2, %v3471_v3 }
 0x11f   : > { %v3470_v6 = vor.u32 %v4302_v61, %v3469_v60  ;;  %v4328_v39 = vld [vmem:[#allocation14 + $0x8] sm:$0xff]  ;;  %v3847_v60 = vld [vmem:[#allocation12 + $0x1e0] sm:$0xf]  ;;  %v4363_v2 = vld [vmem:[#allocation12 + $0xe4] sm:$0xf] }
 0x120   : > { %v946_v28 = vmul.f32 %v4603_v25, %v940_v27  ;;  %v4312_v25 = vld [vmem:[#allocation12 + $0x18c] sm:$0xf]  ;;  %v3390_v27 = vor.u32 %v4282_v19, %v3389_v18  ;;  %1511 = vmatpush.bf16.msrb.mxu3 %v3410_v20  ;;  %v3455_v18 = vld [vmem:[#allocation12 + $0x118] sm:$0xf0]  ;;  %v3721_v3 = vld [vmem:[#allocation12 + $0xf0] sm:$0xf0] }
 0x121   : > { %1498 = vmatpush.bf16.msrb.mxu2 %v3534_v15  ;;  %v3522_v30 = vor.u32 %v4312_v25, %v3519_v26  ;;  %v3327_v15 = vld [vmem:[#allocation12 + $0x18] sm:$0xf0] }
 0x122   : > { %v948_v29 = vpack.c.bf16 %v946_v28, %v946_v28  ;;  %1485 = vmatpush.bf16.msrb.mxu1 %v3406_v11  ;;  %v3518_v28 = vor.u32 %v4314_v22, %v3517_v62  ;;  %v3453_v11 = vld [vmem:[#allocation12 + $0x108] sm:$0xf]  ;;  %v1030_v62 = vld [vmem:[%s5079_s30] sm:$0xff]  ;;  %v3330_v22 = vor.u32 %v4264_v13, %v3327_v15  ;;  %v3831_v13 = vld [vmem:[#allocation12 + $0x1c0] sm:$0xf] }
 0x123   : > { %v3454_v20 = vor.u32 %v4298_v12, %v3453_v11  ;;  %v4361_v12 = vld [vmem:[#allocation12 + $0xcc] sm:$0xf0] }
 0x124   : > { %1038 = vst [vmem:[#allocation2 + $0x4] sm:$0xf] %v948_v29  ;;  %1021 = vmatmul.bf16.vlgmr.msra.gmra.mxu0 %v948_v29  ;;  %v3394_v29 = vor.u32 %v4280_v23, %v3391_v24  ;;  %v3458_v23 = vor.u32 %v4296_v17, %v3455_v18  ;;  %v4393_v17 = vld [vmem:[#allocation12 + $0x1cc] sm:$0xf0]  ;;  %v4359_v18 = vld [vmem:[#allocation12 + $0xc4] sm:$0xf] }
 0x125   : > { %1522 = vmatpush.bf16.msra.mxu0 %v3570_v55  ;;  %1499 = vmatpush.bf16.msrb.mxu2 %v3518_v28  ;;  %v3341_v55 = vld [vmem:[#allocation12 + $0x28] sm:$0xf] }
 0x126   : > { %1486 = vmatpush.bf16.msrb.mxu1 %v3390_v27  ;;  %1512 = vmatpush.bf16.msrb.mxu3 %v3394_v29  ;;  %v3342_v4 = vor.u32 %v4270_v56, %v3341_v55 }
 0x129   : > { %1523 = vmatpush.bf16.msra.mxu0 %v3554_v7  ;;  %1500 = vmatpush.bf16.msrb.mxu2 %v3502_v42  ;;  %v3325_v7 = vld [vmem:[#allocation12 + $0x8] sm:$0xf] }
 0x12a   : > { %1487 = vmatpush.bf16.msrb.mxu1 %v3374_v34  ;;  %1513 = vmatpush.bf16.msrb.mxu3 %v3378_v46  ;;  %v3326_v19 = vor.u32 %v4266_v8, %v3325_v7  ;;  %v4333_v34 = vld [vmem:[#allocation14 + $0x30] sm:$0xff]  ;;  %v3724_v7 = vor.u32 %v4363_v2, %v3721_v3  ;;  %v4395_v8 = vld [vmem:[#allocation12 + $0x1e4] sm:$0xf] }
 0x12d   : > { %1524 = vmatpush.bf16.msra.mxu0 %v3538_v59  ;;  %1501 = vmatpush.bf16.msrb.mxu2 %v3486_v54 }
 0x12e   : > { %1488 = vmatpush.bf16.msrb.mxu1 %v3358_v52  ;;  %1514 = vmatpush.bf16.msrb.mxu3 %v3362_v57  ;;  %v3719_v57 = vld [vmem:[#allocation12 + $0xe0] sm:$0xf] }
 0x131   : > { %1525 = vmatpush.bf16.msra.mxu0 %v3522_v30  ;;  %1502 = vmatpush.bf16.msrb.mxu2 %v3470_v6  ;;  %v3848_v6 = vor.u32 %v4397_v1, %v3847_v60  ;;  %v3783_v1 = vld [vmem:[#allocation12 + $0x160] sm:$0xf] }
 0x132   : > { %1489 = vmatpush.bf16.msrb.mxu1 %v3342_v4  ;;  %1515 = vmatpush.bf16.msrb.mxu3 %v3346_v9  ;;  %v3849_v9 = vld [vmem:[#allocation12 + $0x1f0] sm:$0xf0] }
 0x133   : > { %v3852_v11 = vor.u32 %v4395_v8, %v3849_v9  ;;  %v4347_v8 = vld [vmem:[#allocation12 + $0x64] sm:$0xf]  ;;  %v3657_v9 = vld [vmem:[#allocation12 + $0x70] sm:$0xf0] }
 0x135   : > { %1526 = vmatpush.bf16.msra.mxu0 %v3506_v47  ;;  %1503 = vmatpush.bf16.msrb.mxu2 %v3454_v20 }
 0x136   : > { %1490 = vmatpush.bf16.msrb.mxu1 %v3326_v19  ;;  %1516 = vmatpush.bf16.msrb.mxu3 %v3330_v22  ;;  %v3705_v19 = vld [vmem:[#allocation12 + $0xd0] sm:$0xf0]  ;;  %v4391_v22 = vld [vmem:[#allocation12 + $0x1c4] sm:$0xf] }
 0x139   : > { %1527 = vmatpush.bf16.msra.mxu0 %v3490_v58  ;;  %v4365_v58 = vld [vmem:[#allocation12 + $0xec] sm:$0xf0] }
 0x13a   : > { %v3720_v0 = vor.u32 %v4365_v58, %v3719_v57  ;;  %v3801_v57 = vld [vmem:[#allocation12 + $0x190] sm:$0xf0] }
 0x13d   : > { %1528 = vmatpush.bf16.msra.mxu0 %v3474_v10  ;;  %v3703_v10 = vld [vmem:[#allocation12 + $0xc0] sm:$0xf] }
 0x13e   : > { %v3704_v15 = vor.u32 %v4361_v12, %v3703_v10  ;;  %v3785_v10 = vld [vmem:[#allocation12 + $0x170] sm:$0xf0] }
 0x141   : > { %1529 = vmatpush.bf16.msra.mxu0 %v3458_v23  ;;  %v3833_v23 = vld [vmem:[#allocation12 + $0x1d0] sm:$0xf0] }
 0x1a1   : > { %v1022_v59 = vpop.f32.mrf.mxu0 }
 0x1a2   : > { %v1023_v24 = vadd.f32 %v5141_v5, %v1022_v59  ;;  %v3832_v59 = vor.u32 %v4393_v17, %v3831_v13 }
 0x1a4   : > { %1026 = vst [vmem:[%s5093_s4] sm:$0xff] %v1023_v24  ;;  %v1034_v25 = vsel %vm1033_vm1, %v1030_v62, %v1023_v24  ;;  %v3708_v62 = vor.u32 %v4359_v18, %v3705_v19  ;;  %v3660_v18 = vor.u32 %v4347_v8, %v3657_v9  ;;  %v3639_v19 = vld [vmem:[#allocation12 + $0x40] sm:$0xf]  ;;  %v3855_v8 = vld [vmem:[#allocation12 + $0x1e8] sm:$0xf] }
 0x1a5   : > { %v1035_v26 = vpack.c.bf16 %v1034_v25, %v1034_v25  ;;  %v3836_v25 = vor.u32 %v4391_v22, %v3833_v23 }
 0x1a7   : > { %1037 = vst.msk [vmem:[#allocation2] sm:$0xf] %vm1036_vm2, %v1035_v26  ;;  %v3687_v26 = vld [vmem:[#allocation12 + $0xa0] sm:$0xf] }
 0x1a9   : > { %v1024_v27 = vpop.f32.mrf.mxu0 }
 0x1aa   : > { %v4357_v27 = vld [vmem:[#allocation12 + $0xac] sm:$0xf0] }
 0x1ae   : > { %v1039_v28 = vld [vmem:[#allocation2] sm:$0xff] }
 0x1af   : > { %v1105_v29 = vunpack.c.l.b16 %v1039_v28  ;;  %v1106_v30 = vunpack.c.h.b16 %v1039_v28 }
 0x1b1   : > { %v1107_v31 = vpack.c.b16 %v1105_v29, %v1105_v29  ;;  %v1108_v32 = vpack.c.b16 %v1106_v30, %v1106_v30  ;;  %v3688_v29 = vor.u32 %v4357_v27, %v3687_v26  ;;  %v3815_v30 = vld [vmem:[#allocation12 + $0x1a0] sm:$0xf]  ;;  %v3641_v26 = vld [vmem:[#allocation12 + $0x50] sm:$0xf0]  ;;  %v4375_v27 = vld [vmem:[#allocation12 + $0x144] sm:$0xf] }
 0x1b3   : > { %1439 = vmatmul.bf16.vlgmr.msra.gmra.mxu1 %v1107_v31  ;;  %1452 = vmatmul.bf16.vlgmr.msra.gmra.mxu2 %v1108_v32 }
 0x1b4   : > { %1465 = vmatmul.bf16.vlgmr.msra.gmra.mxu3 %v1107_v31  ;;  %1478 = vmatmul.bf16.vlgmr.msrb.gmra.mxu0 %v1108_v32 }
 0x1b5   : > { %1620 = vmatpush.bf16.msra.mxu1 %v4334_v33  ;;  %2039 = vmatpush.bf16.msra.mxu2 %v3720_v0  ;;  %v4349_v0 = vld [vmem:[#allocation12 + $0x6c] sm:$0xf0] }
 0x1b6   : > { %2052 = vmatpush.bf16.msra.mxu3 %v3848_v6  ;;  %2065 = vmatpush.bf16.msrb.mxu0 %v3724_v7  ;;  %v4381_v7 = vld [vmem:[#allocation12 + $0x16c] sm:$0xf0] }
 0x1b7   : > { %v3784_v17 = vor.u32 %v4381_v7, %v3783_v1  ;;  %v4367_v1 = vld [vmem:[#allocation12 + $0x104] sm:$0xf]  ;;  %v4366_v7 = vld [vmem:[#allocation12 + $0xf4] sm:$0xf0] }
 0x1b9   : > { %1621 = vmatpush.bf16.msra.mxu1 %v4333_v34  ;;  %2040 = vmatpush.bf16.msra.mxu2 %v3704_v15 }
 0x1ba   : > { %2053 = vmatpush.bf16.msra.mxu3 %v3832_v59  ;;  %2066 = vmatpush.bf16.msrb.mxu0 %v3708_v62  ;;  %v3767_v59 = vld [vmem:[#allocation12 + $0x140] sm:$0xf] }
 0x1bd   : > { %1622 = vmatpush.bf16.msra.mxu1 %v4332_v35  ;;  %2041 = vmatpush.bf16.msra.mxu2 %v3688_v29 }
 0x1c1   : > { %1623 = vmatpush.bf16.msra.mxu1 %v4331_v36 }
 0x1c3   : > { %1491 = vmatmul.bf16.vlgmr.msrb.gmra.mxu1 %v1107_v31  ;;  %1504 = vmatmul.bf16.vlgmr.msrb.gmra.mxu2 %v1108_v32 }
 0x1c4   : > { %1517 = vmatmul.bf16.vlgmr.msrb.gmra.mxu3 %v1107_v31  ;;  %1530 = vmatmul.bf16.vlgmr.msra.gmra.mxu0 %v1108_v32  ;;  %v4389_v31 = vld [vmem:[#allocation12 + $0x1ac] sm:$0xf0]  ;;  %v4355_v32 = vld [vmem:[#allocation12 + $0xa4] sm:$0xf] }
 0x1c5   : > { %1624 = vmatpush.bf16.msra.mxu1 %v4330_v37  ;;  %v3816_v37 = vor.u32 %v4389_v31, %v3815_v30 }
 0x1c7   : > { %2054 = vmatpush.bf16.msra.mxu3 %v3816_v37  ;;  %v4373_v37 = vld [vmem:[#allocation12 + $0x12c] sm:$0xf0] }
 0x1c9   : > { %1625 = vmatpush.bf16.msra.mxu1 %v4329_v44 }
 0x1cd   : > { %1626 = vmatpush.bf16.msra.mxu1 %v4328_v39  ;;  %v4353_v39 = vld [vmem:[#allocation12 + $0x8c] sm:$0xf0] }
 0x1d1   : > { %1627 = vmatpush.bf16.msra.mxu1 %v4327_v53 }
 0x1d5   : > { %2078 = vmatpush.bf16.msrb.mxu1 %v3852_v11 }
 0x1d9   : > { %2079 = vmatpush.bf16.msrb.mxu1 %v3836_v25  ;;  %v4343_v25 = vld [vmem:[#allocation12 + $0x44] sm:$0xf] }
 0x230   : > { %v1440_v42 = vpop.f32.mrf.mxu1 }
 0x231   : > { %v1479_v43 = vpop.f32.mrf.mxu0  ;;  %v1441_v45 = vadd.f32 %v1440_v42, %v5112_v16  ;;  %v3689_v42 = vld [vmem:[#allocation12 + $0xb0] sm:$0xf0] }
 0x236   : > { %v1453_v46 = vpop.f32.mrf.mxu2 }
 0x237   : > { %v1454_v47 = vadd.f32 %v1453_v46, %v1441_v45  ;;  %v1466_v38 = vpop.f32.mrf.mxu3  ;;  %v3692_v46 = vor.u32 %v4355_v32, %v3689_v42  ;;  %v3644_v32 = vor.u32 %v4343_v25, %v3641_v26  ;;  %v4339_v42 = vld [vmem:[#allocation12 + $0x24] sm:$0xf]  ;;  %v4392_v25 = vld [vmem:[#allocation12 + $0x1cc] sm:$0xf] }
 0x238   : > { %v1467_v48 = vadd.f32 %v1466_v38, %v5115_v21  ;;  %v1442_v49 = vpop.f32.mrf.mxu1  ;;  %v3671_v38 = vld [vmem:[#allocation12 + $0x80] sm:$0xf] }
 0x239   : > { %v1535_v50 = vmul.f32 0.5, %v1454_v47  ;;  %v1481_v51 = vpop.f32.mrf.mxu0  ;;  %v3817_v47 = vld [vmem:[#allocation12 + $0x1b0] sm:$0xf0]  ;;  %2067 = vmatpush.bf16.msrb.mxu0 %v3692_v46 }
 0x23a   : > { %v1480_v52 = vadd.f32 %v1479_v43, %v1467_v48  ;;  %v4387_v43 = vld [vmem:[#allocation12 + $0x1a4] sm:$0xf]  ;;  %v4385_v51 = vld [vmem:[#allocation12 + $0x18c] sm:$0xf0]  ;;  %v3753_v46 = vld [vmem:[#allocation12 + $0x130] sm:$0xf0] }
 0x23b   : > { %4604 = vtanh.f32 %v1535_v50  ;;  %v3820_v49 = vor.u32 %v4387_v43, %v3817_v47  ;;  %v3799_v50 = vld [vmem:[#allocation12 + $0x180] sm:$0xf]  ;;  %v3625_v43 = vld [vmem:[#allocation12 + $0x30] sm:$0xf0] }
 0x23c   : > { %v1539_v54 = vmul.f32 0.5, %v1480_v52  ;;  %v4351_v52 = vld [vmem:[#allocation12 + $0x84] sm:$0xf]  ;;  %v3800_v58 = vor.u32 %v4385_v51, %v3799_v50 }
 0x23d   : > { %2080 = vmatpush.bf16.msrb.mxu1 %v3820_v49 }
 0x23e   : > { %4606 = vtanh.f32 %v1539_v54  ;;  %v1455_v55 = vpop.f32.mrf.mxu2  ;;  %v3672_v54 = vor.u32 %v4353_v39, %v3671_v38  ;;  %2055 = vmatpush.bf16.msra.mxu3 %v3800_v58  ;;  %v3628_v39 = vor.u32 %v4339_v42, %v3625_v43  ;;  %v4335_v58 = vld [vmem:[#allocation12 + $0x4] sm:$0xf] }
 0x23f   : > { %v1468_v56 = vpop.f32.mrf.mxu3  ;;  %v3673_v55 = vld [vmem:[#allocation12 + $0x90] sm:$0xf0] }
 0x240   : > { %v1492_v61 = vpop.f32.mrf.mxu1  ;;  %v4383_v56 = vld [vmem:[#allocation12 + $0x184] sm:$0xf]  ;;  %v3676_v60 = vor.u32 %v4351_v52, %v3673_v55  ;;  %2042 = vmatpush.bf16.msra.mxu2 %v3672_v54  ;;  %v4337_v54 = vld [vmem:[#allocation12 + $0xc] sm:$0xf0]  ;;  %v3735_v55 = vld [vmem:[#allocation12 + $0x100] sm:$0xf] }
 0x241   : > { %v1531_v4 = vpop.f32.mrf.mxu0  ;;  %v4605_v14 = vpop.eup %4604  ;;  %v1493_v24 = vadd.f32 %v1492_v61, %v5118_v40  ;;  %v3655_v61 = vld [vmem:[#allocation12 + $0x60] sm:$0xf]  ;;  %v3804_v6 = vor.u32 %v4383_v56, %v3801_v57  ;;  %v4369_v57 = vld [vmem:[#allocation12 + $0x10c] sm:$0xf0] }
 0x242   : > { %v1537_v33 = vmul.f32 0.5, %v4605_v14  ;;  %v3656_v13 = vor.u32 %v4349_v0, %v3655_v61  ;;  %2068 = vmatpush.bf16.msrb.mxu0 %v3676_v60  ;;  %2056 = vmatpush.bf16.msra.mxu3 %v3784_v17  ;;  %v3609_v60 = vld [vmem:[#allocation12 + $0x10] sm:$0xf0]  ;;  %v3736_v61 = vor.u32 %v4369_v57, %v3735_v55  ;;  %v3711_v17 = vld [vmem:[#allocation12 + $0xc8] sm:$0xf] }
 0x243   : > { %2081 = vmatpush.bf16.msrb.mxu1 %v3804_v6  ;;  %v3612_v0 = vor.u32 %v4335_v58, %v3609_v60  ;;  %v3663_v55 = vld [vmem:[#allocation12 + $0x68] sm:$0xf]  ;;  %v4382_v60 = vld [vmem:[#allocation12 + $0x174] sm:$0xf0] }
 0x244   : > { %v4607_v20 = vpop.eup %4606  ;;  %v1538_v11 = vadd.f32 0.5, %v1537_v33  ;;  %2043 = vmatpush.bf16.msra.mxu2 %v3656_v13  ;;  %v3623_v33 = vld [vmem:[#allocation12 + $0x20] sm:$0xf]  ;;  %v3791_v57 = vld [vmem:[#allocation12 + $0x168] sm:$0xf] }
 0x245   : > { %v1541_v34 = vmul.f32 0.5, %v4607_v20  ;;  %v4345_v20 = vld [vmem:[#allocation12 + $0x4c] sm:$0xf0] }
 0x246   : > { %v1505_v28 = vpop.f32.mrf.mxu2  ;;  %v3640_v30 = vor.u32 %v4345_v20, %v3639_v19  ;;  %2069 = vmatpush.bf16.msrb.mxu0 %v3660_v18  ;;  %v4362_v19 = vld [vmem:[#allocation12 + $0xd4] sm:$0xf0]  ;;  %v3839_v20 = vld [vmem:[#allocation12 + $0x1c8] sm:$0xf] }
 0x247   : > { %v1506_v35 = vadd.f32 %v1505_v28, %v1493_v24  ;;  %v1518_v36 = vpop.f32.mrf.mxu3  ;;  %v1542_v2 = vadd.f32 0.5, %v1541_v34  ;;  %v4377_v24 = vld [vmem:[#allocation12 + $0x14c] sm:$0xf0]  ;;  %v3769_v28 = vld [vmem:[#allocation12 + $0x150] sm:$0xf0] }
 0x248   : > { %v1519_v44 = vadd.f32 %v1518_v36, %v5120_v41  ;;  %v1494_v45 = vpop.f32.mrf.mxu1  ;;  %v3768_v31 = vor.u32 %v4377_v24, %v3767_v59  ;;  %v4341_v34 = vld [vmem:[#allocation12 + $0x2c] sm:$0xf0]  ;;  %v3772_v36 = vor.u32 %v4375_v27, %v3769_v28  ;;  %2044 = vmatpush.bf16.msra.mxu2 %v3640_v30  ;;  %v4394_v59 = vld [vmem:[#allocation12 + $0x1d4] sm:$0xf0]  ;;  %v3713_v24 = vld [vmem:[#allocation12 + $0xd8] sm:$0xf0] }
 0x249   : > { %4608 = vtanh.f32 %v1506_v35  ;;  %v1533_v48 = vpop.f32.mrf.mxu0  ;;  %v1549_v62 = vmul.f32 %v1542_v2, %v5124_v63  ;;  %v3751_v35 = vld [vmem:[#allocation12 + $0x120] sm:$0xf]  ;;  %v4371_v45 = vld [vmem:[#allocation12 + $0x124] sm:$0xf]  ;;  %v3624_v47 = vor.u32 %v4341_v34, %v3623_v33  ;;  %v3737_v2 = vld [vmem:[#allocation12 + $0x110] sm:$0xf0] }
 0x24a   : > { %v1532_v53 = vadd.f32 %v1531_v4, %v1519_v44  ;;  %v4379_v4 = vld [vmem:[#allocation12 + $0x164] sm:$0xf]  ;;  %2057 = vmatpush.bf16.msra.mxu3 %v3768_v31  ;;  %2070 = vmatpush.bf16.msrb.mxu0 %v3644_v32  ;;  %v3752_v38 = vor.u32 %v4373_v37, %v3751_v35  ;;  %v3756_v48 = vor.u32 %v4371_v45, %v3753_v46  ;;  %v3841_v27 = vld [vmem:[#allocation12 + $0x1d8] sm:$0xf0]  ;;  %v3695_v28 = vld [vmem:[#allocation12 + $0xa8] sm:$0xf] }
 0x24b   : > { %v3788_v23 = vor.u32 %v4379_v4, %v3785_v10  ;;  %v3740_v6 = vor.u32 %v4367_v1, %v3737_v2  ;;  %v4398_v4 = vld [vmem:[#allocation12 + $0x1f4] sm:$0xf0]  ;;  %v4364_v10 = vld [vmem:[#allocation12 + $0xec] sm:$0xf]  ;;  %v3844_v31 = vor.u32 %v4392_v25, %v3841_v27  ;;  %v3823_v32 = vld [vmem:[#allocation12 + $0x1a8] sm:$0xf]  ;;  %v3792_v1 = vor.u32 %v4382_v60, %v3791_v57 }
 0x24c   : > { %v1544_v3 = vmul.f32 0.5, %v1532_v53  ;;  %2045 = vmatpush.bf16.msra.mxu2 %v3624_v47  ;;  %v3607_v53 = vld [vmem:[#allocation12] sm:$0xf]  ;;  %v4358_v30 = vld [vmem:[#allocation12 + $0xb4] sm:$0xf0]  ;;  %v4405_v57 = vld [vmem:[#allocation14 + $0x30] sm:$0xff] }
 0x24d   : > { %2082 = vmatpush.bf16.msrb.mxu1 %v3788_v23  ;;  %v3608_v56 = vor.u32 %v4337_v54, %v3607_v53  ;;  %v4360_v23 = vld [vmem:[#allocation12 + $0xcc] sm:$0xf]  ;;  %v4390_v33 = vld [vmem:[#allocation12 + $0x1b4] sm:$0xf0]  ;;  %v3696_v35 = vor.u32 %v4358_v30, %v3695_v28  ;;  %v3825_v37 = vld [vmem:[#allocation12 + $0x1b8] sm:$0xf0] }
 0x24e   : > { %4610 = vtanh.f32 %v1544_v3  ;;  %v1507_v12 = vpop.f32.mrf.mxu2  ;;  %2058 = vmatpush.bf16.msra.mxu3 %v3752_v38  ;;  %2071 = vmatpush.bf16.msrb.mxu0 %v3628_v39  ;;  %v3727_v3 = vld [vmem:[#allocation12 + $0xe8] sm:$0xf]  ;;  %v3716_v26 = vor.u32 %v4360_v23, %v3713_v24  ;;  %v4356_v34 = vld [vmem:[#allocation12 + $0xac] sm:$0xf]  ;;  %v3824_v42 = vor.u32 %v4390_v33, %v3823_v32  ;;  %v4354_v45 = vld [vmem:[#allocation12 + $0x94] sm:$0xf0] }
 0x24f   : > { %v4609_v14 = vpop.eup %4608  ;;  %v1520_v15 = vpop.f32.mrf.mxu3  ;;  %v3728_v9 = vor.u32 %v4366_v7, %v3727_v3  ;;  %v3856_v12 = vor.u32 %v4398_v4, %v3855_v8  ;;  %v3807_v46 = vld [vmem:[#allocation12 + $0x188] sm:$0xf]  ;;  %v4386_v38 = vld [vmem:[#allocation12 + $0x194] sm:$0xf0]  ;;  %v4352_v39 = vld [vmem:[#allocation12 + $0x8c] sm:$0xf] }
 0x250   : > { %v1550_v22 = vmul.f32 %v4609_v14, %v1538_v11  ;;  %2046 = vmatpush.bf16.msra.mxu2 %v3608_v56  ;;  %v3729_v11 = vld [vmem:[#allocation12 + $0xf8] sm:$0xf0]  ;;  %v4396_v14 = vld [vmem:[#allocation12 + $0x1ec] sm:$0xf]  ;;  %v4350_v56 = vld [vmem:[#allocation12 + $0x74] sm:$0xf0] }
 0x251   : > { %2083 = vmatpush.bf16.msrb.mxu1 %v3772_v36  ;;  %v3732_v13 = vor.u32 %v4364_v10, %v3729_v11  ;;  %v3857_v15 = vld [vmem:[#allocation12 + $0x1f8] sm:$0xf0]  ;;  %v4388_v36 = vld [vmem:[#allocation12 + $0x1ac] sm:$0xf]  ;;  %v3664_v58 = vor.u32 %v4350_v56, %v3663_v55  ;;  %v3647_v7 = vld [vmem:[#allocation12 + $0x48] sm:$0xf] }
 0x252   : > { %v5153_v29 = vadd.f32 %v1550_v22, %v1549_v62  ;;  %2059 = vmatpush.bf16.msra.mxu3 %v3736_v61  ;;  %2072 = vmatpush.bf16.msrb.mxu0 %v3612_v0  ;;  %v3860_v18 = vor.u32 %v4396_v14, %v3857_v15  ;;  %v3712_v62 = vor.u32 %v4362_v19, %v3711_v17  ;;  %v4348_v61 = vld [vmem:[#allocation12 + $0x6c] sm:$0xf]  ;;  %v3665_v0 = vld [vmem:[#allocation12 + $0x78] sm:$0xf0]  ;;  %v3775_v4 = vld [vmem:[#allocation12 + $0x148] sm:$0xf] }
 0x253   : > { %v3840_v22 = vor.u32 %v4394_v59, %v3839_v20  ;;  %v3828_v47 = vor.u32 %v4388_v36, %v3825_v37  ;;  %v3668_v2 = vor.u32 %v4348_v61, %v3665_v0  ;;  %v4380_v3 = vld [vmem:[#allocation12 + $0x16c] sm:$0xf]  ;;  %v4378_v10 = vld [vmem:[#allocation12 + $0x154] sm:$0xf0]  ;;  %v3777_v15 = vld [vmem:[#allocation12 + $0x158] sm:$0xf0]  ;;  %v1641_v37 = vstv %s1640_s14 }
 0x254   : > { %v4611_v63 = vpop.eup %4610  ;;  %4612 = vtanh.f32 %v5153_v29  ;;  %2091 = vmatpush.bf16.msrb.mxu2 %v3728_v9  ;;  %v4346_v9 = vld [vmem:[#allocation12 + $0x54] sm:$0xf0]  ;;  %v4344_v11 = vld [vmem:[#allocation12 + $0x4c] sm:$0xf]  ;;  %v3776_v17 = vor.u32 %v4378_v10, %v3775_v4  ;;  %v3631_v19 = vld [vmem:[#allocation12 + $0x28] sm:$0xf] }
 0x255   : > { %v1546_v44 = vmul.f32 0.5, %v4611_v63  ;;  %2084 = vmatpush.bf16.msrb.mxu1 %v3756_v48  ;;  %v3697_v63 = vld [vmem:[#allocation12 + $0xb8] sm:$0xf0]  ;;  %v3648_v14 = vor.u32 %v4346_v9, %v3647_v7  ;;  %v4342_v20 = vld [vmem:[#allocation12 + $0x34] sm:$0xf0]  ;;  %vm1642_vm3 = vcmp.eq.s32.totalorder %v1641_v37, 1 }
 0x256   : > { %2104 = vmatpush.bf16.msrb.mxu3 %v3856_v12  ;;  %2117 = vmatpush.bf16.msra.mxu0 %v3732_v13  ;;  %v3700_v43 = vor.u32 %v4356_v34, %v3697_v63  ;;  %v3681_v48 = vld [vmem:[#allocation12 + $0x98] sm:$0xf0]  ;;  %v4376_v13 = vld [vmem:[#allocation12 + $0x14c] sm:$0xf]  ;;  %v3759_v59 = vld [vmem:[#allocation12 + $0x128] sm:$0xf]  ;;  %v3632_v27 = vor.u32 %v4342_v20, %v3631_v19 }
 0x257   : > { %v1547_v49 = vadd.f32 0.5, %v1546_v44  ;;  %v3679_v44 = vld [vmem:[#allocation12 + $0x88] sm:$0xf]  ;;  %v3684_v53 = vor.u32 %v4352_v39, %v3681_v48  ;;  %v3649_v12 = vld [vmem:[#allocation12 + $0x58] sm:$0xf0]  ;;  %v4403_v60 = vld [vmem:[#allocation14 + $0x20] sm:$0xff] }
 0x258   : > { %2092 = vmatpush.bf16.msrb.mxu2 %v3712_v62  ;;  %v3780_v62 = vor.u32 %v4376_v13, %v3777_v15  ;;  %v4340_v23 = vld [vmem:[#allocation12 + $0x2c] sm:$0xf]  ;;  %v3633_v24 = vld [vmem:[#allocation12 + $0x38] sm:$0xf0]  ;;  %v4338_v32 = vld [vmem:[#allocation12 + $0x14] sm:$0xf0] }
 0x259   : > { %2085 = vmatpush.bf16.msrb.mxu1 %v3740_v6  ;;  %v3793_v6 = vld [vmem:[#allocation12 + $0x178] sm:$0xf0]  ;;  %v4372_v25 = vld [vmem:[#allocation12 + $0x12c] sm:$0xf]  ;;  %v3636_v30 = vor.u32 %v4340_v23, %v3633_v24  ;;  %v3743_v33 = vld [vmem:[#allocation12 + $0x108] sm:$0xf] }
 0x25a   : > { %v4613_v50 = vpop.eup %4612  ;;  %2105 = vmatpush.bf16.msrb.mxu3 %v3840_v22  ;;  %2118 = vmatpush.bf16.msra.mxu0 %v3716_v26  ;;  %v3796_v8 = vor.u32 %v4380_v3, %v3793_v6  ;;  %v4374_v22 = vld [vmem:[#allocation12 + $0x134] sm:$0xf0]  ;;  %v3761_v26 = vld [vmem:[#allocation12 + $0x138] sm:$0xf0]  ;;  %v4336_v63 = vld [vmem:[#allocation12 + $0xc] sm:$0xf] }
 0x25b   : > { %v1553_v51 = vmul.f32 %v4613_v50, %v1547_v49  ;;  %v4384_v49 = vld [vmem:[#allocation12 + $0x18c] sm:$0xf]  ;;  %v3809_v50 = vld [vmem:[#allocation12 + $0x198] sm:$0xf0]  ;;  %v3760_v28 = vor.u32 %v4374_v22, %v3759_v59  ;;  %v3764_v34 = vor.u32 %v4372_v25, %v3761_v26  ;;  %v4401_v6 = vld [vmem:[#allocation14 + $0x10] sm:$0xff]  ;;  %s2879_s14 = sshll.u32 %s2876_s22, 4  ;;  %s2880_s14 = int_to_ptr.hbm [resolvable:$true] %s2879_s14 }
 0x25c   : > { %2093 = vmatpush.bf16.msrb.mxu2 %v3696_v35  ;;  %v3812_v54 = vor.u32 %v4384_v49, %v3809_v50  ;;  %v4370_v35 = vld [vmem:[#allocation12 + $0x114] sm:$0xf0]  ;;  %v3617_v36 = vld [vmem:[#allocation12 + $0x18] sm:$0xf0]  ;;  %v4400_v4 = vld [vmem:[#allocation14 + $0x8] sm:$0xff]  ;;  %s4811_s18 = sshra.s32 %s2880_s14, 4  ;;  %s4812_s18 = int_to_ptr.hbm [resolvable:$true] %s4811_s18 }
 0x25d   : > { %v1555_v52 = vpack.c.bf16 %v1553_v51, %v1553_v51  ;;  %v3680_v51 = vor.u32 %v4354_v45, %v3679_v44  ;;  %v3744_v45 = vor.u32 %v4370_v35, %v3743_v33  ;;  %v4009_v59 = vld [vmem:[#allocation12 + $0xe0] sm:$0xf]  ;;  %v4469_v25 = vld [vmem:[#allocation12 + $0x1ec] sm:$0xf0]  ;;  %v4435_v26 = vld [vmem:[#allocation12 + $0xe4] sm:$0xf]  ;;  %p4818_p5 = scmp.lt.s32.totalorder %s4812_s18, %s5246_s8 }
 0x25e   : > { %2106 = vmatpush.bf16.msrb.mxu3 %v3824_v42  ;;  %2119 = vmatpush.bf16.msra.mxu0 %v3700_v43  ;;  %v4368_v42 = vld [vmem:[#allocation12 + $0x10c] sm:$0xf]  ;;  %v3745_v43 = vld [vmem:[#allocation12 + $0x118] sm:$0xf0]  ;;  %v4137_v24 = vld [vmem:[#allocation12 + $0x1e0] sm:$0xf] }
 0x25f   : > { %1628 = vmatmul.bf16.vlgmr.msra.gmra.mxu1 %v1555_v52  ;;  %1646 = vst [vmem:[#allocation2 + $0x4] sm:$0xf] %v1555_v52  ;;  %v3808_v52 = vor.u32 %v4386_v38, %v3807_v46  ;;  %v3620_v46 = vor.u32 %v4336_v63, %v3617_v36  ;;  %v3604_v38 = vld [vmem:[%s5079_s30 + $0x8] sm:$0xff]  ;;  %v3748_v39 = vor.u32 %v4368_v42, %v3745_v43  ;;  %v3993_v63 = vld [vmem:[#allocation12 + $0xc0] sm:$0xf]  ;;  %s4813_s15 = scalar_lea.hbm %s4812_s18, 32 }
 0x260   : > { %2130 = vmatpush.bf16.msra.mxu1 %v3860_v18  ;;  %2094 = vmatpush.bf16.msrb.mxu2 %v3680_v51  ;;  %v3652_v18 = vor.u32 %v4344_v11, %v3649_v12  ;;  %v4433_v36 = vld [vmem:[#allocation12 + $0xcc] sm:$0xf0]  ;;  %v4121_v42 = vld [vmem:[#allocation12 + $0x1c0] sm:$0xf]  ;;  %p4814_p13 = scmp.ne.s32.totalorder %s4812_s18, %s4813_s15 }
 0x261   : > { %v3994_v37 = vor.u32 %v4433_v36, %v3993_v63  ;;  %v4465_v43 = vld [vmem:[#allocation12 + $0x1cc] sm:$0xf0] }
 0x262   : > { %2107 = vmatpush.bf16.msrb.mxu3 %v3808_v52  ;;  %2120 = vmatpush.bf16.msra.mxu0 %v3684_v53  ;;  %p4815_p0 = pnand %p4814_p13, %p5054_p7 }
 0x264   : > { %2131 = vmatpush.bf16.msra.mxu1 %v3844_v31  ;;  %2095 = vmatpush.bf16.msrb.mxu2 %v3664_v58  ;;  %v3615_v31 = vld [vmem:[#allocation12 + $0x8] sm:$0xf]  ;;  %p4816_p3 = pneg %p4815_p0 }
 0x265   : > { %v3616_v44 = vor.u32 %v4338_v32, %v3615_v31  ;;  %v4404_v58 = vld [vmem:[#allocation14 + $0x28] sm:$0xff]  ;;  %v4467_v31 = vld [vmem:[#allocation12 + $0x1e4] sm:$0xf]  ;;  %v4139_v32 = vld [vmem:[#allocation12 + $0x1f0] sm:$0xf0] }
 0x266   : > { %2108 = vmatpush.bf16.msrb.mxu3 %v3792_v1  ;;  %2121 = vmatpush.bf16.msra.mxu0 %v3668_v2  ;;  %v4402_v1 = vld [vmem:[#allocation14 + $0x18] sm:$0xff]  ;;  %v4142_v35 = vor.u32 %v4467_v31, %v4139_v32  ;;  %v3947_v31 = vld [vmem:[#allocation12 + $0x70] sm:$0xf0]  ;;  %v4451_v32 = vld [vmem:[#allocation12 + $0x164] sm:$0xf] }
 0x268   : > { %2132 = vmatpush.bf16.msra.mxu1 %v3828_v47  ;;  %2096 = vmatpush.bf16.msrb.mxu2 %v3648_v14  ;;  %v4399_v14 = vld [vmem:[#allocation14] sm:$0xff] }
 0x26a   : > { %2109 = vmatpush.bf16.msrb.mxu3 %v3776_v17  ;;  %2122 = vmatpush.bf16.msra.mxu0 %v3652_v18 }
 0x26c   : > { %2133 = vmatpush.bf16.msra.mxu1 %v3812_v54  ;;  %2097 = vmatpush.bf16.msrb.mxu2 %v3632_v27 }
 0x26e   : > { %2110 = vmatpush.bf16.msrb.mxu3 %v3760_v28  ;;  %2123 = vmatpush.bf16.msra.mxu0 %v3636_v30  ;;  %v4138_v28 = vor.u32 %v4469_v25, %v4137_v24  ;;  %v4011_v30 = vld [vmem:[#allocation12 + $0xf0] sm:$0xf0] }
 0x270   : > { %2134 = vmatpush.bf16.msra.mxu1 %v3796_v8  ;;  %2098 = vmatpush.bf16.msrb.mxu2 %v3616_v44  ;;  %v4431_v44 = vld [vmem:[#allocation12 + $0xc4] sm:$0xf] }
 0x272   : > { %2111 = vmatpush.bf16.msrb.mxu3 %v3744_v45  ;;  %2124 = vmatpush.bf16.msra.mxu0 %v3620_v46 }
 0x274   : > { %2135 = vmatpush.bf16.msra.mxu1 %v3780_v62  ;;  %v4437_v62 = vld [vmem:[#allocation12 + $0xec] sm:$0xf0] }
 0x275   : > { %v4010_v23 = vor.u32 %v4437_v62, %v4009_v59  ;;  %v3945_v62 = vld [vmem:[#allocation12 + $0x60] sm:$0xf] }
 0x278   : > { %2136 = vmatpush.bf16.msra.mxu1 %v3764_v34  ;;  %v4014_v34 = vor.u32 %v4435_v26, %v4011_v30  ;;  %v4419_v30 = vld [vmem:[#allocation12 + $0x64] sm:$0xf] }
 0x27c   : > { %2137 = vmatpush.bf16.msra.mxu1 %v3748_v39  ;;  %v4122_v39 = vor.u32 %v4465_v43, %v4121_v42  ;;  %v3929_v42 = vld [vmem:[#allocation12 + $0x40] sm:$0xf]  ;;  %v4417_v43 = vld [vmem:[#allocation12 + $0x4c] sm:$0xf0] }
 0x2dc   : > { %v1629_v47 = vpop.f32.mrf.mxu1 }
 0x2dd   : > { %v1630_v48 = vadd.f32 %v5141_v5, %v1629_v47  ;;  %v4406_v5 = vld [vmem:[#allocation14 + $0x38] sm:$0xff] }
 0x2df   : > { %3603 = vst [vmem:[%s5093_s4 + $0x8] sm:$0xff] %v1630_v48  ;;  %v1643_v49 = vsel %vm1642_vm3, %v3604_v38, %v1630_v48  ;;  %v3995_v48 = vld [vmem:[#allocation12 + $0xd0] sm:$0xf0] }
 0x2e0   : > { %v1644_v50 = vpack.c.bf16 %v1643_v49, %v1643_v49  ;;  %v4463_v49 = vld [vmem:[#allocation12 + $0x1c4] sm:$0xf] }
 0x2e2   : > { %1645 = vst.msk [vmem:[#allocation2] sm:$0xf] %vm1036_vm2, %v1644_v50 }
 0x2e4   : > { %v1631_v51 = vpop.f32.mrf.mxu1 }
 0x2e5   : > { %v3998_v51 = vor.u32 %v4431_v44, %v3995_v48  ;;  %v4415_v48 = vld [vmem:[#allocation12 + $0x44] sm:$0xf] }
 0x2e9   : > { %v1647_v52 = vld [vmem:[#allocation2] sm:$0xff] }
 0x2ea   : > { %v1713_v53 = vunpack.c.l.b16 %v1647_v52  ;;  %v1714_v54 = vunpack.c.h.b16 %v1647_v52  ;;  %v4123_v52 = vld [vmem:[#allocation12 + $0x1d0] sm:$0xf0] }
 0x2ec   : > { %v1715_v55 = vpack.c.b16 %v1713_v53, %v1713_v53  ;;  %v1716_v56 = vpack.c.b16 %v1714_v54, %v1714_v54  ;;  %v3977_v53 = vld [vmem:[#allocation12 + $0xa0] sm:$0xf]  ;;  %v4429_v54 = vld [vmem:[#allocation12 + $0xac] sm:$0xf0] }
 0x2ee   : > { %2047 = vmatmul.bf16.vlgmr.msra.gmra.mxu2 %v1715_v55  ;;  %2060 = vmatmul.bf16.vlgmr.msra.gmra.mxu3 %v1716_v56 }
 0x2ef   : > { %2073 = vmatmul.bf16.vlgmr.msrb.gmra.mxu0 %v1715_v55  ;;  %2086 = vmatmul.bf16.vlgmr.msrb.gmra.mxu1 %v1716_v56 }
 0x2f0   : > { %2228 = vmatpush.bf16.msra.mxu2 %v4406_v5  ;;  %2647 = vmatpush.bf16.msra.mxu3 %v4010_v23  ;;  %v4105_v5 = vld [vmem:[#allocation12 + $0x1a0] sm:$0xf] }
 0x2f1   : > { %2660 = vmatpush.bf16.msrb.mxu0 %v4138_v28  ;;  %2673 = vmatpush.bf16.msrb.mxu1 %v4014_v34  ;;  %v4453_v28 = vld [vmem:[#allocation12 + $0x16c] sm:$0xf0] }
 0x2f4   : > { %2229 = vmatpush.bf16.msra.mxu2 %v4405_v57  ;;  %2648 = vmatpush.bf16.msra.mxu3 %v3994_v37  ;;  %v4461_v57 = vld [vmem:[#allocation12 + $0x1ac] sm:$0xf0] }
 0x2f5   : > { %2661 = vmatpush.bf16.msrb.mxu0 %v4122_v39  ;;  %2674 = vmatpush.bf16.msrb.mxu1 %v3998_v51  ;;  %v4449_v39 = vld [vmem:[#allocation12 + $0x14c] sm:$0xf0]  ;;  %v4059_v51 = vld [vmem:[#allocation12 + $0x150] sm:$0xf0] }
 0x2f8   : > { %2230 = vmatpush.bf16.msra.mxu2 %v4404_v58  ;;  %v4427_v58 = vld [vmem:[#allocation12 + $0xa4] sm:$0xf] }
 0x2fc   : > { %2231 = vmatpush.bf16.msra.mxu2 %v4403_v60 }
 0x2fe   : > { %2099 = vmatmul.bf16.vlgmr.msrb.gmra.mxu2 %v1715_v55  ;;  %2112 = vmatmul.bf16.vlgmr.msrb.gmra.mxu3 %v1716_v56 }
 0x2ff   : > { %2125 = vmatmul.bf16.vlgmr.msra.gmra.mxu0 %v1715_v55  ;;  %2138 = vmatmul.bf16.vlgmr.msra.gmra.mxu1 %v1716_v56  ;;  %v4126_v55 = vor.u32 %v4463_v49, %v4123_v52  ;;  %v3978_v56 = vor.u32 %v4429_v54, %v3977_v53  ;;  %v3931_v49 = vld [vmem:[#allocation12 + $0x50] sm:$0xf0] }
 0x300   : > { %2232 = vmatpush.bf16.msra.mxu2 %v4402_v1 }
 0x301   : > { %2649 = vmatpush.bf16.msra.mxu3 %v3978_v56  ;;  %v4413_v56 = vld [vmem:[#allocation12 + $0x2c] sm:$0xf0] }
 0x304   : > { %2233 = vmatpush.bf16.msra.mxu2 %v4401_v6  ;;  %v4459_v6 = vld [vmem:[#allocation12 + $0x1a4] sm:$0xf] }
 0x308   : > { %2234 = vmatpush.bf16.msra.mxu2 %v4400_v4  ;;  %v3961_v4 = vld [vmem:[#allocation12 + $0x80] sm:$0xf] }
 0x30c   : > { %2235 = vmatpush.bf16.msra.mxu2 %v4399_v14  ;;  %v3963_v14 = vld [vmem:[#allocation12 + $0x90] sm:$0xf0] }
 0x310   : > { %2686 = vmatpush.bf16.msrb.mxu2 %v4142_v35 }
 0x314   : > { %2687 = vmatpush.bf16.msrb.mxu2 %v4126_v55  ;;  %v3913_v55 = vld [vmem:[#allocation12 + $0x20] sm:$0xf] }
 0x36c   : > { %v2074_v61 = vpop.f32.mrf.mxu0  ;;  %v2087_v0 = vpop.f32.mrf.mxu1 }
 0x36d   : > { %v2075_v2 = vadd.f32 %v2074_v61, %v5115_v21 }
 0x36f   : > { %v2088_v3 = vadd.f32 %v2087_v0, %v2075_v2  ;;  %v4106_v2 = vor.u32 %v4461_v57, %v4105_v5  ;;  %v3934_v5 = vor.u32 %v4415_v48, %v3931_v49  ;;  %v4131_v48 = vld [vmem:[#allocation12 + $0x1d8] sm:$0xf0]  ;;  %v3985_v49 = vld [vmem:[#allocation12 + $0xa8] sm:$0xf] }
 0x371   : > { %v2048_v7 = vpop.f32.mrf.mxu2  ;;  %v2061_v8 = vpop.f32.mrf.mxu3  ;;  %v2147_v10 = vmul.f32 0.5, %v2088_v3  ;;  %v3979_v3 = vld [vmem:[#allocation12 + $0xb0] sm:$0xf0]  ;;  %2662 = vmatpush.bf16.msrb.mxu0 %v4106_v2 }
 0x372   : > { %v2049_v9 = vadd.f32 %v2048_v7, %v5112_v16  ;;  %v4107_v7 = vld [vmem:[#allocation12 + $0x1b0] sm:$0xf0] }
 0x373   : > { %4614 = vtanh.f32 %v2147_v10  ;;  %v4425_v10 = vld [vmem:[#allocation12 + $0x8c] sm:$0xf0]  ;;  %v4043_v2 = vld [vmem:[#allocation12 + $0x130] sm:$0xf0] }
 0x374   : > { %v2076_v11 = vpop.f32.mrf.mxu0  ;;  %v2089_v12 = vpop.f32.mrf.mxu1  ;;  %v2062_v13 = vadd.f32 %v2061_v8, %v2049_v9  ;;  %v3982_v8 = vor.u32 %v4427_v58, %v3979_v3  ;;  %v4110_v9 = vor.u32 %v4459_v6, %v4107_v7  ;;  %v4041_v58 = vld [vmem:[#allocation12 + $0x120] sm:$0xf]  ;;  %v3914_v3 = vor.u32 %v4413_v56, %v3913_v55  ;;  %v3987_v56 = vld [vmem:[#allocation12 + $0xb8] sm:$0xf0] }
 0x375   : > { %v4089_v11 = vld [vmem:[#allocation12 + $0x180] sm:$0xf]  ;;  %v4457_v12 = vld [vmem:[#allocation12 + $0x18c] sm:$0xf0] }
 0x376   : > { %v2143_v18 = vmul.f32 0.5, %v2062_v13  ;;  %v4423_v13 = vld [vmem:[#allocation12 + $0x84] sm:$0xf]  ;;  %v4090_v59 = vor.u32 %v4457_v12, %v4089_v11  ;;  %2675 = vmatpush.bf16.msrb.mxu1 %v3982_v8  ;;  %2688 = vmatpush.bf16.msrb.mxu2 %v4110_v9  ;;  %v3897_v12 = vld [vmem:[#allocation12] sm:$0xf] }
 0x377   : > { %v3966_v25 = vor.u32 %v4423_v13, %v3963_v14  ;;  %v4409_v13 = vld [vmem:[#allocation12 + $0xc] sm:$0xf0]  ;;  %v4025_v14 = vld [vmem:[#allocation12 + $0x100] sm:$0xf] }
 0x378   : > { %4616 = vtanh.f32 %v2143_v18  ;;  %v4455_v18 = vld [vmem:[#allocation12 + $0x184] sm:$0xf]  ;;  %2663 = vmatpush.bf16.msrb.mxu0 %v4090_v59 }
 0x379   : > { %v2050_v15 = vpop.f32.mrf.mxu2  ;;  %v2063_v17 = vpop.f32.mrf.mxu3 }
 0x37a   : > { %v4615_v27 = vpop.eup %4614  ;;  %v3962_v17 = vor.u32 %v4425_v10, %v3961_v4  ;;  %2676 = vmatpush.bf16.msrb.mxu1 %v3966_v25  ;;  %v4438_v25 = vld [vmem:[#allocation12 + $0xf4] sm:$0xf0] }
 0x37b   : > { %v2149_v45 = vmul.f32 0.5, %v4615_v27  ;;  %v4073_v27 = vld [vmem:[#allocation12 + $0x160] sm:$0xf] }
 0x37c   : > { %v2126_v19 = vpop.f32.mrf.mxu0  ;;  %v2139_v20 = vpop.f32.mrf.mxu1  ;;  %2650 = vmatpush.bf16.msra.mxu3 %v3962_v17  ;;  %v4074_v37 = vor.u32 %v4453_v28, %v4073_v27  ;;  %v4441_v17 = vld [vmem:[#allocation12 + $0x10c] sm:$0xf0]  ;;  %v4470_v28 = vld [vmem:[#allocation12 + $0x1f4] sm:$0xf0] }
 0x37d   : > { %v2127_v22 = vadd.f32 %v2126_v19, %v5120_v41  ;;  %v4091_v19 = vld [vmem:[#allocation12 + $0x190] sm:$0xf0] }
 0x37e   : > { %v4617_v60 = vpop.eup %4616  ;;  %v4094_v26 = vor.u32 %v4455_v18, %v4091_v19  ;;  %2664 = vmatpush.bf16.msrb.mxu0 %v4074_v37  ;;  %v4407_v18 = vld [vmem:[#allocation12 + $0x4] sm:$0xf]  ;;  %v3899_v19 = vld [vmem:[#allocation12 + $0x10] sm:$0xf0]  ;;  %v4434_v37 = vld [vmem:[#allocation12 + $0xd4] sm:$0xf0] }
 0x37f   : > { %v2140_v33 = vadd.f32 %v2139_v20, %v2127_v22  ;;  %v2145_v15 = vmul.f32 0.5, %v4617_v60  ;;  %v2150_v20 = vadd.f32 0.5, %v2149_v45  ;;  %v4421_v22 = vld [vmem:[#allocation12 + $0x6c] sm:$0xf0]  ;;  %v3902_v59 = vor.u32 %v4407_v18, %v3899_v19  ;;  %v4454_v18 = vld [vmem:[#allocation12 + $0x174] sm:$0xf0] }
 0x380   : > { %v3946_v35 = vor.u32 %v4421_v22, %v3945_v62  ;;  %2689 = vmatpush.bf16.msrb.mxu2 %v4094_v26  ;;  %v4445_v60 = vld [vmem:[#allocation12 + $0x12c] sm:$0xf0]  ;;  %v4439_v62 = vld [vmem:[#allocation12 + $0x104] sm:$0xf]  ;;  %v4027_v22 = vld [vmem:[#allocation12 + $0x110] sm:$0xf0] }
 0x381   : > { %v2152_v46 = vmul.f32 0.5, %v2140_v33  ;;  %v2100_v47 = vpop.f32.mrf.mxu2  ;;  %v2113_v38 = vpop.f32.mrf.mxu3  ;;  %v4075_v33 = vld [vmem:[#allocation12 + $0x170] sm:$0xf0]  ;;  %v2146_v34 = vadd.f32 0.5, %v2145_v15  ;;  %v2157_v36 = vmul.f32 %v2150_v20, %v5153_v29  ;;  %v3930_v29 = vor.u32 %v4417_v43, %v3929_v42  ;;  %v4145_v26 = vld [vmem:[#allocation12 + $0x1e8] sm:$0xf] }
 0x382   : > { %v2101_v50 = vadd.f32 %v2100_v47, %v5118_v40  ;;  %v4078_v47 = vor.u32 %v4451_v32, %v4075_v33  ;;  %2651 = vmatpush.bf16.msra.mxu3 %v3946_v35  ;;  %v4042_v6 = vor.u32 %v4445_v60, %v4041_v58  ;;  %v3898_v15 = vor.u32 %v4409_v13, %v3897_v12  ;;  %v4147_v35 = vld [vmem:[#allocation12 + $0x1f8] sm:$0xf0]  ;;  %v4129_v42 = vld [vmem:[#allocation12 + $0x1c8] sm:$0xf]  ;;  %v4466_v43 = vld [vmem:[#allocation12 + $0x1d4] sm:$0xf0] }
 0x383   : > { %v4026_v20 = vor.u32 %v4441_v17, %v4025_v14  ;;  %v4146_v32 = vor.u32 %v4470_v28, %v4145_v26  ;;  %v3953_v13 = vld [vmem:[#allocation12 + $0x68] sm:$0xf]  ;;  %v4422_v14 = vld [vmem:[#allocation12 + $0x74] sm:$0xf0]  ;;  %v4420_v19 = vld [vmem:[#allocation12 + $0x6c] sm:$0xf] }
 0x384   : > { %v2114_v61 = vadd.f32 %v2113_v38, %v2101_v50  ;;  %v2128_v0 = vpop.f32.mrf.mxu0  ;;  %v2141_v1 = vpop.f32.mrf.mxu1  ;;  %v4057_v38 = vld [vmem:[#allocation12 + $0x140] sm:$0xf]  ;;  %v4447_v50 = vld [vmem:[#allocation12 + $0x144] sm:$0xf]  ;;  %2690 = vmatpush.bf16.msrb.mxu2 %v4078_v47  ;;  %v4003_v47 = vld [vmem:[#allocation12 + $0xd8] sm:$0xf0]  ;;  %v3954_v17 = vor.u32 %v4422_v14, %v3953_v13 }
 0x385   : > { %v4058_v54 = vor.u32 %v4449_v39, %v4057_v38  ;;  %v4062_v57 = vor.u32 %v4447_v50, %v4059_v51  ;;  %v3915_v0 = vld [vmem:[#allocation12 + $0x30] sm:$0xf0]  ;;  %v4443_v1 = vld [vmem:[#allocation12 + $0x124] sm:$0xf]  ;;  %v4464_v38 = vld [vmem:[#allocation12 + $0x1cc] sm:$0xf] }
 0x386   : > { %4618 = vtanh.f32 %v2114_v61  ;;  %v4411_v61 = vld [vmem:[#allocation12 + $0x24] sm:$0xf]  ;;  %2652 = vmatpush.bf16.msra.mxu3 %v3930_v29  ;;  %v4046_v8 = vor.u32 %v4443_v1, %v4043_v2  ;;  %v4430_v50 = vld [vmem:[#allocation12 + $0xb4] sm:$0xf0]  ;;  %v4134_v51 = vor.u32 %v4464_v38, %v4131_v48  ;;  %v4113_v29 = vld [vmem:[#allocation12 + $0x1a8] sm:$0xf] }
 0x387   : > { %4620 = vtanh.f32 %v2152_v46  ;;  %v3950_v46 = vor.u32 %v4419_v30, %v3947_v31  ;;  %2665 = vmatpush.bf16.msrb.mxu0 %v4058_v54  ;;  %v3918_v7 = vor.u32 %v4411_v61, %v3915_v0  ;;  %v4436_v30 = vld [vmem:[#allocation12 + $0xec] sm:$0xf]  ;;  %v4019_v31 = vld [vmem:[#allocation12 + $0xf8] sm:$0xf0]  ;;  %v3986_v55 = vor.u32 %v4430_v50, %v3985_v49  ;;  %v3969_v61 = vld [vmem:[#allocation12 + $0x88] sm:$0xf] }
 0x388   : > { %2691 = vmatpush.bf16.msrb.mxu2 %v4062_v57  ;;  %v4022_v33 = vor.u32 %v4436_v30, %v4019_v31  ;;  %v4428_v54 = vld [vmem:[#allocation12 + $0xac] sm:$0xf]  ;;  %v4115_v57 = vld [vmem:[#allocation12 + $0x1b8] sm:$0xf0]  ;;  %v4426_v0 = vld [vmem:[#allocation12 + $0x94] sm:$0xf0] }
 0x389   : > { %v2102_v23 = vpop.f32.mrf.mxu2  ;;  %v2115_v24 = vpop.f32.mrf.mxu3  ;;  %2677 = vmatpush.bf16.msrb.mxu1 %v3950_v46  ;;  %v4432_v46 = vld [vmem:[#allocation12 + $0xcc] sm:$0xf]  ;;  %v3990_v60 = vor.u32 %v4428_v54, %v3987_v56  ;;  %v4097_v1 = vld [vmem:[#allocation12 + $0x188] sm:$0xf]  ;;  %v4418_v26 = vld [vmem:[#allocation12 + $0x54] sm:$0xf0] }
 0x38a   : > { %2653 = vmatpush.bf16.msra.mxu3 %v3914_v3  ;;  %v4017_v23 = vld [vmem:[#allocation12 + $0xe8] sm:$0xf]  ;;  %v4030_v24 = vor.u32 %v4439_v62, %v4027_v22  ;;  %v4006_v39 = vor.u32 %v4432_v46, %v4003_v47  ;;  %v4458_v3 = vld [vmem:[#allocation12 + $0x194] sm:$0xf0]  ;;  %v4452_v22 = vld [vmem:[#allocation12 + $0x16c] sm:$0xf] }
 0x38b   : > { %2666 = vmatpush.bf16.msrb.mxu0 %v4042_v6  ;;  %v4018_v27 = vor.u32 %v4438_v25, %v4017_v23  ;;  %v4424_v6 = vld [vmem:[#allocation12 + $0x8c] sm:$0xf]  ;;  %v4083_v23 = vld [vmem:[#allocation12 + $0x178] sm:$0xf0]  ;;  %v4450_v28 = vld [vmem:[#allocation12 + $0x154] sm:$0xf0] }
 0x38c   : > { %v4619_v63 = vpop.eup %4618  ;;  %2692 = vmatpush.bf16.msrb.mxu2 %v4046_v8  ;;  %v4456_v8 = vld [vmem:[#allocation12 + $0x18c] sm:$0xf]  ;;  %v4086_v25 = vor.u32 %v4452_v22, %v4083_v23  ;;  %v3939_v31 = vld [vmem:[#allocation12 + $0x58] sm:$0xf0]  ;;  %v3905_v50 = vld [vmem:[#allocation12 + $0x8] sm:$0xf] }
 0x38d   : > { %v4621_v44 = vpop.eup %4620  ;;  %v2158_v45 = vmul.f32 %v4619_v63, %v2146_v34  ;;  %2678 = vmatpush.bf16.msrb.mxu1 %v3934_v5  ;;  %v4468_v34 = vld [vmem:[#allocation12 + $0x1ec] sm:$0xf]  ;;  %v4001_v63 = vld [vmem:[#allocation12 + $0xc8] sm:$0xf]  ;;  %v3923_v46 = vld [vmem:[#allocation12 + $0x38] sm:$0xf0] }
 0x38e   : > { %v2154_v53 = vmul.f32 0.5, %v4621_v44  ;;  %2654 = vmatpush.bf16.msra.mxu3 %v3898_v15  ;;  %v4002_v44 = vor.u32 %v4434_v37, %v4001_v63  ;;  %v4460_v5 = vld [vmem:[#allocation12 + $0x1ac] sm:$0xf]  ;;  %v4081_v15 = vld [vmem:[#allocation12 + $0x168] sm:$0xf]  ;;  %v4473_v22 = vld [vmem:[#allocation14 + $0x10] sm:$0xff] }
 0x38f   : > { %v5171_v52 = vadd.f32 %v2158_v45, %v2157_v36  ;;  %2667 = vmatpush.bf16.msrb.mxu0 %v4026_v20  ;;  %v4150_v36 = vor.u32 %v4468_v34, %v4147_v35  ;;  %v4130_v45 = vor.u32 %v4466_v43, %v4129_v42  ;;  %v4118_v2 = vor.u32 %v4460_v5, %v4115_v57  ;;  %v3955_v20 = vld [vmem:[#allocation12 + $0x78] sm:$0xf0]  ;;  %v4416_v30 = vld [vmem:[#allocation12 + $0x4c] sm:$0xf]  ;;  %v4414_v37 = vld [vmem:[#allocation12 + $0x34] sm:$0xf0] }
 0x390   : > { %v2155_v9 = vadd.f32 0.5, %v2154_v53  ;;  %2693 = vmatpush.bf16.msrb.mxu2 %v4030_v24  ;;  %v4462_v53 = vld [vmem:[#allocation12 + $0x1b4] sm:$0xf0]  ;;  %v3958_v62 = vor.u32 %v4420_v19, %v3955_v20  ;;  %v3937_v24 = vld [vmem:[#allocation12 + $0x48] sm:$0xf]  ;;  %v3942_v63 = vor.u32 %v4416_v30, %v3939_v31  ;;  %v2249_v5 = vstv %s2248_s17  ;;  %v4475_v19 = vld [vmem:[#allocation14 + $0x20] sm:$0xff] }
 0x391   : > { %4622 = vtanh.f32 %v5171_v52  ;;  %2679 = vmatpush.bf16.msrb.mxu1 %v3918_v7  ;;  %v4114_v58 = vor.u32 %v4462_v53, %v4113_v29  ;;  %v3971_v7 = vld [vmem:[#allocation12 + $0x98] sm:$0xf0]  ;;  %v4049_v42 = vld [vmem:[#allocation12 + $0x128] sm:$0xf]  ;;  %v4444_v47 = vld [vmem:[#allocation12 + $0x12c] sm:$0xf] }
 0x392   : > { %2699 = vmatpush.bf16.msrb.mxu3 %v4018_v27  ;;  %v4065_v27 = vld [vmem:[#allocation12 + $0x148] sm:$0xf]  ;;  %v4067_v34 = vld [vmem:[#allocation12 + $0x158] sm:$0xf0]  ;;  %v4442_v54 = vld [vmem:[#allocation12 + $0x114] sm:$0xf0] }
 0x393   : > { %2712 = vmatpush.bf16.msra.mxu0 %v4146_v32  ;;  %v4448_v32 = vld [vmem:[#allocation12 + $0x14c] sm:$0xf]  ;;  %v4066_v35 = vor.u32 %v4450_v28, %v4065_v27  ;;  %v4051_v38 = vld [vmem:[#allocation12 + $0x138] sm:$0xf0]  ;;  %v4033_v29 = vld [vmem:[#allocation12 + $0x108] sm:$0xf] }
 0x394   : > { %v4070_v43 = vor.u32 %v4448_v32, %v4067_v34  ;;  %v4054_v53 = vor.u32 %v4444_v47, %v4051_v38  ;;  %v3907_v56 = vld [vmem:[#allocation12 + $0x18] sm:$0xf0]  ;;  %v4440_v57 = vld [vmem:[#allocation12 + $0x10c] sm:$0xf]  ;;  %vm2250_vm4 = vcmp.eq.s32.totalorder %v2249_v5, 1  ;;  %v4471_v34 = vld [vmem:[#allocation14] sm:$0xff] }
 0x395   : > { %2680 = vmatpush.bf16.msrb.mxu1 %v3902_v59  ;;  %v4082_v59 = vor.u32 %v4454_v18, %v4081_v15  ;;  %v4478_v15 = vld [vmem:[#allocation14 + $0x38] sm:$0xff]  ;;  %v4476_v18 = vld [vmem:[#allocation14 + $0x28] sm:$0xff] }
 0x396   : > { %2700 = vmatpush.bf16.msrb.mxu3 %v4002_v44  ;;  %v4446_v44 = vld [vmem:[#allocation12 + $0x134] sm:$0xf0]  ;;  %v4472_v31 = vld [vmem:[#allocation14 + $0x8] sm:$0xff] }
 0x397   : > { %v4623_v4 = vpop.eup %4622  ;;  %2713 = vmatpush.bf16.msra.mxu0 %v4130_v45  ;;  %v4412_v45 = vld [vmem:[#allocation12 + $0x2c] sm:$0xf]  ;;  %v4050_v48 = vor.u32 %v4446_v44, %v4049_v42 }
 0x398   : > { %v2161_v10 = vmul.f32 %v4623_v4, %v2155_v9  ;;  %v4099_v9 = vld [vmem:[#allocation12 + $0x198] sm:$0xf0]  ;;  %v3970_v4 = vor.u32 %v4426_v0, %v3969_v61  ;;  %v3926_v49 = vor.u32 %v4412_v45, %v3923_v46  ;;  %v4034_v61 = vor.u32 %v4442_v54, %v4033_v29 }
 0x399   : > { %2725 = vmatpush.bf16.msra.mxu1 %v4022_v33  ;;  %v4102_v12 = vor.u32 %v4456_v8, %v4099_v9  ;;  %v3938_v33 = vor.u32 %v4418_v26, %v3937_v24 }
 0x39a   : > { %v2163_v11 = vpack.c.bf16 %v2161_v10, %v2161_v10  ;;  %2701 = vmatpush.bf16.msrb.mxu3 %v3986_v55  ;;  %v4098_v10 = vor.u32 %v4458_v3, %v4097_v1  ;;  %v4408_v55 = vld [vmem:[#allocation12 + $0xc] sm:$0xf] }
 0x39b   : > { %2714 = vmatpush.bf16.msra.mxu0 %v4114_v58  ;;  %v4035_v58 = vld [vmem:[#allocation12 + $0x118] sm:$0xf0]  ;;  %v3910_v0 = vor.u32 %v4408_v55, %v3907_v56 }
 0x39c   : > { %2236 = vmatmul.bf16.vlgmr.msra.gmra.mxu2 %v2163_v11  ;;  %2254 = vst [vmem:[#allocation2 + $0x4] sm:$0xf] %v2163_v11  ;;  %v3974_v11 = vor.u32 %v4424_v6, %v3971_v7  ;;  %v4038_v3 = vor.u32 %v4440_v57, %v4035_v58  ;;  %v5184_v6 = vld [vmem:[%s5245_s7] ss:$0 sm:$0xff] }
 0x39d   : > { %2738 = vmatpush.bf16.msra.mxu2 %v4150_v36  ;;  %2726 = vmatpush.bf16.msra.mxu1 %v4006_v39  ;;  %v3921_v36 = vld [vmem:[#allocation12 + $0x28] sm:$0xf] }
 0x39e   : > { %2702 = vmatpush.bf16.msrb.mxu3 %v3970_v4  ;;  %v3922_v39 = vor.u32 %v4414_v37, %v3921_v36 }
 0x39f   : > { %2715 = vmatpush.bf16.msra.mxu0 %v4098_v10 }
 0x3a1   : > { %2739 = vmatpush.bf16.msra.mxu2 %v4134_v51  ;;  %2727 = vmatpush.bf16.msra.mxu1 %v3990_v60  ;;  %v4410_v51 = vld [vmem:[#allocation12 + $0x14] sm:$0xf0] }
 0x3a2   : > { %2703 = vmatpush.bf16.msrb.mxu3 %v3954_v17  ;;  %v3906_v60 = vor.u32 %v4410_v51, %v3905_v50  ;;  %v4477_v17 = vld [vmem:[#allocation14 + $0x30] sm:$0xff] }
 0x3a3   : > { %2716 = vmatpush.bf16.msra.mxu0 %v4082_v59 }
 0x3a5   : > { %2740 = vmatpush.bf16.msra.mxu2 %v4118_v2  ;;  %2728 = vmatpush.bf16.msra.mxu1 %v3974_v11  ;;  %v3894_v2 = vld [vmem:[%s5079_s30 + $0x10] sm:$0xff] }
 0x3a6   : > { %2704 = vmatpush.bf16.msrb.mxu3 %v3938_v33 }
 0x3a7   : > { %2717 = vmatpush.bf16.msra.mxu0 %v4066_v35 }
 0x3a9   : > { %2741 = vmatpush.bf16.msra.mxu2 %v4102_v12  ;;  %2729 = vmatpush.bf16.msra.mxu1 %v3958_v62  ;;  %v4474_v62 = vld [vmem:[#allocation14 + $0x18] sm:$0xff] }
 0x3aa   : > { %2705 = vmatpush.bf16.msrb.mxu3 %v3922_v39 }
 0x3ab   : > { %2718 = vmatpush.bf16.msra.mxu0 %v4050_v48 }
 0x3ad   : > { %2742 = vmatpush.bf16.msra.mxu2 %v4086_v25  ;;  %2730 = vmatpush.bf16.msra.mxu1 %v3942_v63 }
 0x3ae   : > { %2706 = vmatpush.bf16.msrb.mxu3 %v3906_v60 }
 0x3af   : > { %2719 = vmatpush.bf16.msra.mxu0 %v4034_v61 }
 0x3b1   : > { %2743 = vmatpush.bf16.msra.mxu2 %v4070_v43  ;;  %2731 = vmatpush.bf16.msra.mxu1 %v3926_v49 }
 0x3b5   : > { %2744 = vmatpush.bf16.msra.mxu2 %v4054_v53  ;;  %2732 = vmatpush.bf16.msra.mxu1 %v3910_v0 }
 0x3b9   : > { %2745 = vmatpush.bf16.msra.mxu2 %v4038_v3  ;;  %v4184_v3 = vld [vmem:[%s5079_s30 + $0x18] sm:$0xff]  ;;  %s4817_s30 = scalar_lea.hbm %s5246_s8, 64 }
 0x3ba   : > { %p4819_p10 = scmp.lt.s32.totalorder %s4817_s30, %s4813_s15 }
 0x3bc   : > { %p4820_p2 = por %p4819_p10, %p4818_p5 }
 0x3be   : > { %p4821_p8 = pnand %p4820_p2, %p4816_p3 }
 0x41f   : > { %v2237_v1 = vpop.f32.mrf.mxu2 }
 0x420   : > { %v2238_v7 = vadd.f32 %v5184_v6, %v2237_v1 }
 0x422   : > { %3893 = vst [vmem:[%s5093_s4 + $0x10] sm:$0xff] %v2238_v7  ;;  %v2251_v8 = vsel %vm2250_vm4, %v3894_v2, %v2238_v7 }
 0x423   : > { %v2252_v9 = vpack.c.bf16 %v2251_v8, %v2251_v8 }
 0x425   : > { %2253 = vst.msk [vmem:[#allocation2] sm:$0xf] %vm1036_vm2, %v2252_v9 }
 0x427   : > { %v2239_v4 = vpop.f32.mrf.mxu2 }
 0x42c   : > { %v2255_v10 = vld [vmem:[#allocation2] sm:$0xff] }
 0x42d   : > { %v2321_v11 = vunpack.c.l.b16 %v2255_v10  ;;  %v2322_v12 = vunpack.c.h.b16 %v2255_v10 }
 0x42f   : > { %v2323_v13 = vpack.c.b16 %v2321_v11, %v2321_v11  ;;  %v2324_v14 = vpack.c.b16 %v2322_v12, %v2322_v12 }
 0x431   : > { %2655 = vmatmul.bf16.vlgmr.msra.gmra.mxu3 %v2323_v13  ;;  %2668 = vmatmul.bf16.vlgmr.msrb.gmra.mxu0 %v2324_v14 }
 0x432   : > { %2681 = vmatmul.bf16.vlgmr.msrb.gmra.mxu1 %v2323_v13  ;;  %2694 = vmatmul.bf16.vlgmr.msrb.gmra.mxu2 %v2324_v14 }
 0x433   : > { %2836 = vmatpush.bf16.msra.mxu3 %v4478_v15 }
 0x437   : > { %2837 = vmatpush.bf16.msra.mxu3 %v4477_v17 }
 0x43b   : > { %2838 = vmatpush.bf16.msra.mxu3 %v4476_v18 }
 0x43f   : > { %2839 = vmatpush.bf16.msra.mxu3 %v4475_v19 }
 0x441   : > { %2707 = vmatmul.bf16.vlgmr.msrb.gmra.mxu3 %v2323_v13  ;;  %2720 = vmatmul.bf16.vlgmr.msra.gmra.mxu0 %v2324_v14 }
 0x442   : > { %2733 = vmatmul.bf16.vlgmr.msra.gmra.mxu1 %v2323_v13  ;;  %2746 = vmatmul.bf16.vlgmr.msra.gmra.mxu2 %v2324_v14 }
 0x443   : > { %2840 = vmatpush.bf16.msra.mxu3 %v4474_v62 }
 0x447   : > { %2841 = vmatpush.bf16.msra.mxu3 %v4473_v22 }
 0x44b   : > { %2842 = vmatpush.bf16.msra.mxu3 %v4472_v31 }
 0x44f   : > { %2843 = vmatpush.bf16.msra.mxu3 %v4471_v34 }
 0x4ae   : > { %v2669_v20 = vpop.f32.mrf.mxu0 }
 0x4af   : > { %v2682_v59 = vpop.f32.mrf.mxu1 }
 0x4b0   : > { %v2683_v24 = vadd.f32 %v2682_v59, %v5115_v21 }
 0x4b4   : > { %v2656_v23 = vpop.f32.mrf.mxu3 }
 0x4b5   : > { %v2657_v25 = vadd.f32 %v2656_v23, %v5112_v16  ;;  %v2695_v26 = vpop.f32.mrf.mxu2 }
 0x4b6   : > { %v2671_v27 = vpop.f32.mrf.mxu0  ;;  %v2696_v28 = vadd.f32 %v2695_v26, %v2683_v24 }
 0x4b7   : > { %v2684_v30 = vpop.f32.mrf.mxu1  ;;  %v2670_v32 = vadd.f32 %v2669_v20, %v2657_v25 }
 0x4b8   : > { %v2755_v33 = vmul.f32 0.5, %v2696_v28 }
 0x4b9   : > { %v2751_v63 = vmul.f32 0.5, %v2670_v32 }
 0x4ba   : > { %4624 = vtanh.f32 %v2755_v33 }
 0x4bb   : > { %4626 = vtanh.f32 %v2751_v63 }
 0x4bc   : > { %v2658_v35 = vpop.f32.mrf.mxu3 }
 0x4bd   : > { %v2697_v36 = vpop.f32.mrf.mxu2 }
 0x4be   : > { %v2721_v37 = vpop.f32.mrf.mxu0 }
 0x4bf   : > { %v2734_v42 = vpop.f32.mrf.mxu1 }
 0x4c0   : > { %v2735_v16 = vadd.f32 %v2734_v42, %v5120_v41  ;;  %v4625_v43 = vpop.eup %4624 }
 0x4c1   : > { %v4627_v38 = vpop.eup %4626  ;;  %v2757_v49 = vmul.f32 0.5, %v4625_v43 }
 0x4c2   : > { %v2753_v51 = vmul.f32 0.5, %v4627_v38 }
 0x4c3   : > { %v2758_v29 = vadd.f32 0.5, %v2757_v49 }
 0x4c4   : > { %v2708_v21 = vpop.f32.mrf.mxu3  ;;  %v2754_v41 = vadd.f32 0.5, %v2753_v51 }
 0x4c5   : > { %v2709_v44 = vadd.f32 %v2708_v21, %v5118_v40  ;;  %v2747_v45 = vpop.f32.mrf.mxu2  ;;  %v2765_v56 = vmul.f32 %v2758_v29, %v5171_v52  ;;  %v2857_v52 = vstv %s2856_s21 }
 0x4c6   : > { %v2748_v46 = vadd.f32 %v2747_v45, %v2735_v16  ;;  %v2723_v47 = vpop.f32.mrf.mxu0  ;;  %vm2858_vm5 = vcmp.eq.s32.totalorder %v2857_v52, 1 }
 0x4c7   : > { %v2722_v39 = vadd.f32 %v2721_v37, %v2709_v44  ;;  %v2736_v48 = vpop.f32.mrf.mxu1 }
 0x4c8   : > { %v2760_v50 = vmul.f32 0.5, %v2748_v46 }
 0x4c9   : > { %4628 = vtanh.f32 %v2722_v39 }
 0x4ca   : > { %4630 = vtanh.f32 %v2760_v50 }
 0x4cc   : > { %v2710_v53 = vpop.f32.mrf.mxu3 }
 0x4cd   : > { %v2749_v54 = vpop.f32.mrf.mxu2 }
 0x4cf   : > { %v4629_v55 = vpop.eup %4628 }
 0x4d0   : > { %v2766_v40 = vmul.f32 %v4629_v55, %v2754_v41  ;;  %v4631_v5 = vpop.eup %4630 }
 0x4d1   : > { %v2762_v58 = vmul.f32 0.5, %v4631_v5 }
 0x4d2   : > { %v2767_v57 = vadd.f32 %v2766_v40, %v2765_v56 }
 0x4d3   : > { %v2763_v60 = vadd.f32 0.5, %v2762_v58 }
 0x4d4   : > { %2770 = vst [vmem:[#allocation3] sm:$0xff] %v2767_v57  ;;  %4632 = vtanh.f32 %v2767_v57 }
 0x4da   : > { %v4633_v61 = vpop.eup %4632 }
 0x4db   : > { %v2769_v0 = vmul.f32 %v4633_v61, %v2763_v60 }
 0x4dd   : > { %v2771_v1 = vpack.c.bf16 %v2769_v0, %v2769_v0 }
 0x4df   : > { %2862 = vst [vmem:[#allocation2 + $0x4] sm:$0xf] %v2771_v1  ;;  %2844 = vmatmul.bf16.vlgmr.msra.gmra.mxu3 %v2771_v1 }
 0x562   : > { %v2845_v2 = vpop.f32.mrf.mxu3 }
 0x563   : > { %v2846_v7 = vadd.f32 %v5184_v6, %v2845_v2 }
 0x565   : > { %4183 = vst [vmem:[%s5093_s4 + $0x18] sm:$0xff] %v2846_v7  ;;  %v2859_v8 = vsel %vm2858_vm5, %v4184_v3, %v2846_v7 }
 0x566   : > { %v2860_v9 = vpack.c.bf16 %v2859_v8, %v2859_v8 }
 0x567   : > { %4824 = shalt.err (!%p4821_p8)
}
 0x568   : > { %s4903_s24 = smov 128   ;;  %s4904_s4 = smov 8   ;;  %2861 = vst.msk [vmem:[#allocation2] sm:$0xf] %vm1036_vm2, %v2860_v9 }
 0x569   : > { %4498 = dma.vmem_to_hbm [thread:$0]  (%p5054_p7), %s2878_s28, 512, %s2880_s14, %s2864_s12, %s4903_s24, %s4903_s24, %s4904_s4  }
 0x56a   : > { %v2847_v6 = vpop.f32.mrf.mxu3 }
 0x56b PF: > { %s2894_s6 = sand.u32 1, %s4869_s9   ;;  %p4518_p1 = pnand %p3014_p9, %p5002_p6 }
 0x56c   : > { %s2895_s16 = scalar_lea.sflag [#allocation8], %s2894_s6 }
 0x56d   : > { %p4519_p4 = pneg %p4518_p1 }
 0x56f   : > { %4864 = dma.done.wait (%p4519_p4), %s2895_s16, 512  }
 0x570   : > { %4866 = vsyncadd (%p4519_p4), %s2895_s16, 4294966784  ;;  %s34_s13 = sadd.s32 1, %s4889_s13   ;;  %s5265_s29 = sld [smem:[#allocation21_spill]] }
 0x571   : > { %p31_p11 = scmp.ge.s32.totalorder %s34_s13, 4   ;;  %s5266_s9 = smov %s4873_s10 }
 0x572   : > { %s5267_s10 = smov %s4877_s11  ;;  %s5268_s11 = smov %s5063_s25 }
 0x573   : > { %s5269_s12 = smov %s4885_s0  ;;  %33 = sbr.rel (!%p31_p11) target bundleno = 17 (0x11), region = 121 }
 0x576   : > { %s5270_s0 = smov %s5265_s29 }
 0x578   :  { %2901 = vsyncpa [#allocation7], 1 }
 0x579   :  { %2903 = vsyncpa [#allocation7 + $0x1], 1 }
 0x57a   :  { %2904 = vsyncpa [#allocation10], 1 }
 0x57b   :  { %2905 = vsyncpa [#allocation13], 1 }
 0x57c   :  { %2906 = vsyncpa [#allocation8], 1 }
 0x57d   :  { %2908 = vsyncpa [#allocation8 + $0x1], 1 }

</bundles_post_ra>
